<compile_context>
chip_gen: v7x
topology: tpu7x:2x2x1
jax: 0.10.0
libtpu: 0.0.40
codegen_flags: <defaults>
</compile_context>

<pallas_src>
import functools

import jax
import jax.numpy as jnp
from jax.experimental import pallas as pl
from jax.experimental.pallas import tpu as pltpu


# ----------------------------------------------------------------------------
# In-kernel helpers.
# ----------------------------------------------------------------------------
def _zero_border(pad_s):
    """Zero ONLY the 1-pixel halo border; the interior is rewritten each step."""
    Hp, Wp, C = pad_s.shape
    pad_s[0:1, :, :] = jnp.zeros((1, Wp, C), pad_s.dtype)
    pad_s[Hp - 1:Hp, :, :] = jnp.zeros((1, Wp, C), pad_s.dtype)
    pad_s[:, 0:1, :] = jnp.zeros((Hp, 1, C), pad_s.dtype)
    pad_s[:, Wp - 1:Wp, :] = jnp.zeros((Hp, 1, C), pad_s.dtype)


def _set_interior(pad_s, y_hwc):
    """Write an activation into the interior of its 1-pixel zero-halo scratch."""
    Hs, Ws = y_hwc.shape[0], y_hwc.shape[1]
    pad_s[1:Hs + 1, 1:Ws + 1, :] = y_hwc.astype(pad_s.dtype)


def _maxpool2x2(y, Hs, Ws):
    """(Hs*Ws, C) raster-order activation -> (Hs//2, Ws//2, C)."""
    C = y.shape[-1]
    Hs2, Ws2 = Hs // 2, Ws // 2
    yw = y.reshape(Hs * Ws2, 2, C)
    yw = jnp.maximum(yw[:, 0, :], yw[:, 1, :])          # pool along W
    yh = yw.reshape(Hs2, 2, Ws2, C)
    return jnp.maximum(yh[:, 0], yh[:, 1])              # pool along H


def _conv3x3_relu(pad_s, pat_s, w_ref, b_ref, Hs, Ws):
    """im2col into pat_s with 128-lane-aligned grouped stores, then ONE MXU
    matmul with K = 9*Cin (bf16 operands, f32 accumulation)."""
    Cin = pad_s.shape[-1]
    group = max(1, 128 // Cin)               # taps per aligned 128-lane chunk
    for t0 in range(0, 9, group):
        g = min(group, 9 - t0)
        slabs = []
        for tap in range(t0, t0 + g):
            dy, dx = divmod(tap, 3)
            slabs.append(pad_s[dy:dy + Hs, dx:dx + Ws, :])       # (Hs,Ws,Cin) f32
        chunk = slabs[0] if g == 1 else jnp.concatenate(slabs, axis=-1)
        pat_s[:, t0 * Cin:(t0 + g) * Cin] = (
            chunk.reshape(Hs * Ws, g * Cin).astype(pat_s.dtype))  # one aligned vst
    y = jnp.dot(pat_s[...], w_ref[...], preferred_element_type=jnp.float32)
    return jnp.maximum(y + b_ref[...], 0.0)              # (Hs*Ws, Cout) f32


# ----------------------------------------------------------------------------
# Fused kernel: one grid step == one batch element.
# ----------------------------------------------------------------------------
def _deepcnn_kernel(xp_ref,
                    w1_ref, b1_ref, w2_ref, b2_ref, w3_ref, b3_ref,
                    w4_ref, b4_ref, wf1_ref, bf1_ref, wf2_ref, bf2_ref,
                    o_ref,
                    pad2, pat2, pad3, pat3, pad4, pat4,
                    *, H, W):
    H2, W2 = H // 2, W // 2
    H4, W4 = H // 4, W // 4

    # Zero just the halo borders (cheap); interiors are fully overwritten below.
    _zero_border(pad2)
    _zero_border(pad3)
    _zero_border(pad4)

    # --- conv1: wrapper-built im2col patches -> single (H*W,27)x(27,32) matmul
    a1 = jnp.maximum(
        jnp.dot(xp_ref[0], w1_ref[...], preferred_element_type=jnp.float32)
        + b1_ref[...], 0.0)                                     # (H*W, 32) f32
    _set_interior(pad2, a1.reshape(H, W, 32))

    # --- conv2 -> maxpool ------------------------------------------------------
    a2 = _conv3x3_relu(pad2, pat2, w2_ref, b2_ref, H, W)        # (H*W, 64)
    p2 = _maxpool2x2(a2, H, W)                                  # (H2, W2, 64)
    _set_interior(pad3, p2)

    # --- conv3, conv4 -> maxpool ----------------------------------------------
    a3 = _conv3x3_relu(pad3, pat3, w3_ref, b3_ref, H2, W2)      # (H2*W2, 128)
    _set_interior(pad4, a3.reshape(H2, W2, 128))
    a4 = _conv3x3_relu(pad4, pat4, w4_ref, b4_ref, H2, W2)      # (H2*W2, 256)
    p4 = _maxpool2x2(a4, H2, W2).reshape(H4 * W4, 256)          # (H4*W4, 256) f32

    # --- flatten in NHWC order: assemble (1, H4*W4*256) lane-dense feature in
    # registers (aligned 256-wide pieces), no VMEM round trip, no per-row loop.
    feat = jnp.concatenate(
        [p4[k:k + 1, :] for k in range(H4 * W4)], axis=1).astype(jnp.bfloat16)

    # --- MLP head: Linear -> ReLU -> Dropout(eval=identity) -> Linear -> Sigmoid
    # TODO(synk): nn.Dropout(0.5) training-mode RNG masking (pltpu.prng_*) is
    # not implemented; eval mode (identity) matches the module's inference path.
    h = jnp.dot(feat, wf1_ref[...],
                preferred_element_type=jnp.float32) + bf1_ref[...]
    h = jnp.maximum(h, 0.0).astype(jnp.bfloat16)
    z = jnp.dot(h, wf2_ref[...],
                preferred_element_type=jnp.float32) + bf2_ref[...]
    o_ref[...] = (1.0 / (1.0 + jnp.exp(-z))).reshape(1, 1, 1)


# ----------------------------------------------------------------------------
# Wrapper: conv1 im2col + weight re-layout + single pallas_call.
# ----------------------------------------------------------------------------
def deep_cnn_forward(x_nchw, params):
    N, Cin, H, W = x_nchw.shape
    assert Cin == 3 and H % 4 == 0 and W % 4 == 0
    H2, W2, H4, W4 = H // 2, W // 2, H // 4, W // 4
    feat_dim = 256 * H4 * W4

    # conv1 im2col in the wrapper (layout plumbing only): (N,3,H,W) -> (N,H*W,27)
    x = jnp.transpose(x_nchw, (0, 2, 3, 1)).astype(jnp.float32)    # NCHW -> NHWC
    xpad = jnp.pad(x, ((0, 0), (1, 1), (1, 1), (0, 0)))
    taps = [xpad[:, dy:dy + H, dx:dx + W, :] for dy in range(3) for dx in range(3)]
    x_pat = jnp.concatenate(taps, axis=-1).reshape(N, H * W, 27)

    # Conv weights (3,3,Cin,Cout) -> (9*Cin, Cout); row = (dy*3+dx)*Cin + cin,
    # matching the in-kernel/wrapper im2col patch layout (tap-major order).
    w1 = params["w_c1"].reshape(9 * 3, 32).astype(jnp.float32)     # tiny K: f32
    w2 = params["w_c2"].reshape(9 * 32, 64).astype(jnp.bfloat16)
    w3 = params["w_c3"].reshape(9 * 64, 128).astype(jnp.bfloat16)
    w4 = params["w_c4"].reshape(9 * 128, 256).astype(jnp.bfloat16)
    b1 = params["b_c1"].reshape(1, 32).astype(jnp.float32)
    b2 = params["b_c2"].reshape(1, 64).astype(jnp.float32)
    b3 = params["b_c3"].reshape(1, 128).astype(jnp.float32)
    b4 = params["b_c4"].reshape(1, 256).astype(jnp.float32)
    # FC1 weight rows: NCHW flatten (PyTorch nn.Flatten) -> kernel's NHWC order.
    wf1 = (params["w_fc1"].reshape(256, H4, W4, 256)
           .transpose(1, 2, 0, 3).reshape(feat_dim, 256).astype(jnp.bfloat16))
    bf1 = params["b_fc1"].reshape(1, 256).astype(jnp.float32)
    wf2 = params["w_fc2"].reshape(256, 1).astype(jnp.bfloat16)
    bf2 = params["b_fc2"].reshape(1, 1).astype(jnp.float32)

    operands = (x_pat, w1, b1, w2, b2, w3, b3, w4, b4, wf1, bf1, wf2, bf2)

    conv_cfg = ((H, W, 3, 32), (H, W, 32, 64), (H2, W2, 64, 128), (H2, W2, 128, 256))
    flops = N * (sum(2 * hh * ww * 9 * ci * co for hh, ww, ci, co in conv_cfg)
                 + 2 * feat_dim * 256 + 2 * 256)
    bytes_accessed = sum(int(a.size) * a.dtype.itemsize for a in operands) + N * 4

    out3 = pl.pallas_call(
        functools.partial(_deepcnn_kernel, H=H, W=W),
        out_shape=jax.ShapeDtypeStruct((N, 1, 1), jnp.float32),
        grid=(N,),
        in_specs=[
            pl.BlockSpec((1, H * W, 27), lambda n: (n, 0, 0)),
            pl.BlockSpec((9 * 3, 32), lambda n: (0, 0)),
            pl.BlockSpec((1, 32), lambda n: (0, 0)),
            pl.BlockSpec((9 * 32, 64), lambda n: (0, 0)),
            pl.BlockSpec((1, 64), lambda n: (0, 0)),
            pl.BlockSpec((9 * 64, 128), lambda n: (0, 0)),
            pl.BlockSpec((1, 128), lambda n: (0, 0)),
            pl.BlockSpec((9 * 128, 256), lambda n: (0, 0)),
            pl.BlockSpec((1, 256), lambda n: (0, 0)),
            pl.BlockSpec((feat_dim, 256), lambda n: (0, 0)),
            pl.BlockSpec((1, 256), lambda n: (0, 0)),
            pl.BlockSpec((256, 1), lambda n: (0, 0)),
            pl.BlockSpec((1, 1), lambda n: (0, 0)),
        ],
        out_specs=pl.BlockSpec((1, 1, 1), lambda n: (n, 0, 0)),
        scratch_shapes=[
            pltpu.VMEM((H + 2, W + 2, 32), jnp.float32),       # pad2 halo
            pltpu.VMEM((H * W, 9 * 32), jnp.bfloat16),         # im2col patches 2
            pltpu.VMEM((H2 + 2, W2 + 2, 64), jnp.float32),     # pad3
            pltpu.VMEM((H2 * W2, 9 * 64), jnp.bfloat16),       # patches 3
            pltpu.VMEM((H2 + 2, W2 + 2, 128), jnp.float32),    # pad4
            pltpu.VMEM((H2 * W2, 9 * 128), jnp.bfloat16),      # patches 4
        ],
        compiler_params=pltpu.CompilerParams(
            dimension_semantics=("parallel",),
            vmem_limit_bytes=32 * 1024 * 1024),
        cost_estimate=pl.CostEstimate(
            flops=flops, transcendentals=N, bytes_accessed=bytes_accessed),
    )(*operands)
    return out3.reshape(N, 1)


# ----------------------------------------------------------------------------
# Pure-JAX reference (f32) for correctness checking.
# ----------------------------------------------------------------------------
def deep_cnn_reference(x_nchw, params):
    def conv(x, w, b):
        y = jax.lax.conv_general_dilated(
            x, w, window_strides=(1, 1), padding="SAME",
            dimension_numbers=("NCHW", "HWIO", "NCHW"))
        return jax.nn.relu(y + b[None, :, None, None])

    def pool(x):
        return jax.lax.reduce_window(x, -jnp.inf, jax.lax.max,
                                     (1, 1, 2, 2), (1, 1, 2, 2), "VALID")

    x = conv(x_nchw, params["w_c1"], params["b_c1"])
    x = conv(x, params["w_c2"], params["b_c2"])
    x = pool(x)
    x = conv(x, params["w_c3"], params["b_c3"])
    x = conv(x, params["w_c4"], params["b_c4"])
    x = pool(x)
    feat = x.reshape(x.shape[0], -1)                 # NCHW flatten (PyTorch order)
    h = jax.nn.relu(feat @ params["w_fc1"] + params["b_fc1"])
    z = h @ params["w_fc2"] + params["b_fc2"]
    return jax.nn.sigmoid(z)


def init_params(key, img_size):
    fmap = img_size // 4
    feat_dim = 256 * fmap * fmap
    ks = jax.random.split(key, 12)

    def conv_w(k, cin, cout):
        scale = 1.0 / jnp.sqrt(9.0 * cin)
        return jax.random.normal(k, (3, 3, cin, cout), jnp.float32) * scale

    def lin_w(k, fin, fout):
        scale = 1.0 / jnp.sqrt(float(fin))
        return jax.random.normal(k, (fin, fout), jnp.float32) * scale

    def bias(k, n, fan_in):
        return jax.random.normal(k, (n,), jnp.float32) * (0.5 / jnp.sqrt(float(fan_in)))

    return {
        "w_c1": conv_w(ks[0], 3, 32),    "b_c1": bias(ks[6], 32, 9 * 3),
        "w_c2": conv_w(ks[1], 32, 64),   "b_c2": bias(ks[7], 64, 9 * 32),
        "w_c3": conv_w(ks[2], 64, 128),  "b_c3": bias(ks[8], 128, 9 * 64),
        "w_c4": conv_w(ks[3], 128, 256), "b_c4": bias(ks[9], 256, 9 * 128),
        "w_fc1": lin_w(ks[4], feat_dim, 256), "b_fc1": bias(ks[10], 256, feat_dim),
        "w_fc2": lin_w(ks[5], 256, 1),        "b_fc2": bias(ks[11], 1, 256),
    }


if __name__ == "__main__":
    IMG = 16       # small img_size consistent with the module (divisible by 4)
    BATCH = 2

    key = jax.random.PRNGKey(0)
    k_x, k_p = jax.random.split(key)
    x = jax.random.normal(k_x, (BATCH, 3, IMG, IMG), jnp.float32)   # NCHW input
    params = init_params(k_p, IMG)

    fwd = jax.jit(deep_cnn_forward)
    out = jax.block_until_ready(fwd(x, params))

    assert out.shape == (BATCH, 1), out.shape
    assert bool(jnp.all((out > 0.0) & (out < 1.0))), "sigmoid output out of range"

    ref = deep_cnn_reference(x, params)
    err = float(jnp.max(jnp.abs(out - ref)))
    # conv2-4 / FC operands are bf16 (f32 MXU accumulation) vs the f32
    # reference: expected max-abs error on the sigmoid output is well under
    # 5e-2 at these shapes; the bound below documents that bf16 error band.
    assert err < 5e-2, f"kernel/reference mismatch: max abs err = {err}"
    print("KERNEL_OK")
</pallas_src>

<mosaic_0001>
module attributes {stable_mosaic.version = 11 : i64} {
  func.func @_deepcnn_kernel(%arg0: i32, %arg1: memref<1x256x27xf32, #tpu.memory_space<vmem>>, %arg2: memref<27x32xf32, #tpu.memory_space<vmem>>, %arg3: memref<1x32xf32, #tpu.memory_space<vmem>>, %arg4: memref<288x64xbf16, #tpu.memory_space<vmem>>, %arg5: memref<1x64xf32, #tpu.memory_space<vmem>>, %arg6: memref<576x128xbf16, #tpu.memory_space<vmem>>, %arg7: memref<1x128xf32, #tpu.memory_space<vmem>>, %arg8: memref<1152x256xbf16, #tpu.memory_space<vmem>>, %arg9: memref<1x256xf32, #tpu.memory_space<vmem>>, %arg10: memref<4096x256xbf16, #tpu.memory_space<vmem>>, %arg11: memref<1x256xf32, #tpu.memory_space<vmem>>, %arg12: memref<256x1xbf16, #tpu.memory_space<vmem>>, %arg13: memref<1x1xf32, #tpu.memory_space<vmem>>, %arg14: memref<1x1x1xf32, #tpu.memory_space<vmem>>, %arg15: memref<18x18x32xf32, #tpu.memory_space<vmem>>, %arg16: memref<256x288xbf16, #tpu.memory_space<vmem>>, %arg17: memref<10x10x64xf32, #tpu.memory_space<vmem>>, %arg18: memref<64x576xbf16, #tpu.memory_space<vmem>>, %arg19: memref<10x10x128xf32, #tpu.memory_space<vmem>>, %arg20: memref<64x1152xbf16, #tpu.memory_space<vmem>>) attributes {dimension_semantics = [#tpu.dimension_semantics<parallel>], iteration_bounds = array<i64: 2>, scalar_prefetch = 0 : i64, scratch_operands = 6 : i64, tpu.core_type = #tpu.core_type<tc>, window_params = [{transform_indices = @transform_0, window_bounds = array<i64: 1, 256, 27>}, {pipeline_mode = #tpu.pipeline_mode<synchronous>, transform_indices = @transform_1, window_bounds = array<i64: 27, 32>}, {pipeline_mode = #tpu.pipeline_mode<synchronous>, transform_indices = @transform_2, window_bounds = array<i64: 1, 32>}, {pipeline_mode = #tpu.pipeline_mode<synchronous>, transform_indices = @transform_3, window_bounds = array<i64: 288, 64>}, {pipeline_mode = #tpu.pipeline_mode<synchronous>, transform_indices = @transform_4, window_bounds = array<i64: 1, 64>}, {pipeline_mode = #tpu.pipeline_mode<synchronous>, transform_indices = @transform_5, window_bounds = array<i64: 576, 128>}, {pipeline_mode = #tpu.pipeline_mode<synchronous>, transform_indices = @transform_6, window_bounds = array<i64: 1, 128>}, {pipeline_mode = #tpu.pipeline_mode<synchronous>, transform_indices = @transform_7, window_bounds = array<i64: 1152, 256>}, {pipeline_mode = #tpu.pipeline_mode<synchronous>, transform_indices = @transform_8, window_bounds = array<i64: 1, 256>}, {pipeline_mode = #tpu.pipeline_mode<synchronous>, transform_indices = @transform_9, window_bounds = array<i64: 4096, 256>}, {pipeline_mode = #tpu.pipeline_mode<synchronous>, transform_indices = @transform_10, window_bounds = array<i64: 1, 256>}, {pipeline_mode = #tpu.pipeline_mode<synchronous>, transform_indices = @transform_11, window_bounds = array<i64: 256, 1>}, {pipeline_mode = #tpu.pipeline_mode<synchronous>, transform_indices = @transform_12, window_bounds = array<i64: 1, 1>}, {transform_indices = @transform_13, window_bounds = array<i64: 1, 1, 1>}]} {
    %cst = arith.constant 0.000000e+00 : f32
    %0 = vector.broadcast %cst : f32 to vector<1x18x32xf32>
    %c0 = arith.constant 0 : index
    %c0_0 = arith.constant 0 : index
    %c0_1 = arith.constant 0 : index
    %1 = vector.load %arg15[%c0, %c0_0, %c0_1] : memref<18x18x32xf32, #tpu.memory_space<vmem>>, vector<1x18x32xf32>
    tpu.vector_store %arg15[%c0, %c0_0, %c0_1], %0 {strides = array<i32>} : memref<18x18x32xf32, #tpu.memory_space<vmem>>, vector<1x18x32xf32>,
    %cst_2 = arith.constant 0.000000e+00 : f32
    %2 = vector.broadcast %cst_2 : f32 to vector<1x18x32xf32>
    %c17 = arith.constant 17 : index
    %c0_3 = arith.constant 0 : index
    %c0_4 = arith.constant 0 : index
    %3 = vector.load %arg15[%c17, %c0_3, %c0_4] : memref<18x18x32xf32, #tpu.memory_space<vmem>>, vector<1x18x32xf32>
    tpu.vector_store %arg15[%c17, %c0_3, %c0_4], %2 {strides = array<i32>} : memref<18x18x32xf32, #tpu.memory_space<vmem>>, vector<1x18x32xf32>,
    %cst_5 = arith.constant 0.000000e+00 : f32
    %4 = vector.broadcast %cst_5 : f32 to vector<18x1x32xf32>
    %c0_6 = arith.constant 0 : index
    %c0_7 = arith.constant 0 : index
    %c0_8 = arith.constant 0 : index
    %5 = vector.load %arg15[%c0_6, %c0_7, %c0_8] : memref<18x18x32xf32, #tpu.memory_space<vmem>>, vector<18x1x32xf32>
    tpu.vector_store %arg15[%c0_6, %c0_7, %c0_8], %4 {strides = array<i32>} : memref<18x18x32xf32, #tpu.memory_space<vmem>>, vector<18x1x32xf32>,
    %cst_9 = arith.constant 0.000000e+00 : f32
    %6 = vector.broadcast %cst_9 : f32 to vector<18x1x32xf32>
    %c0_10 = arith.constant 0 : index
    %c17_11 = arith.constant 17 : index
    %c0_12 = arith.constant 0 : index
    %7 = vector.load %arg15[%c0_10, %c17_11, %c0_12] : memref<18x18x32xf32, #tpu.memory_space<vmem>>, vector<18x1x32xf32>
    tpu.vector_store %arg15[%c0_10, %c17_11, %c0_12], %6 {strides = array<i32>} : memref<18x18x32xf32, #tpu.memory_space<vmem>>, vector<18x1x32xf32>,
    %cst_13 = arith.constant 0.000000e+00 : f32
    %8 = vector.broadcast %cst_13 : f32 to vector<1x10x64xf32>
    %c0_14 = arith.constant 0 : index
    %c0_15 = arith.constant 0 : index
    %c0_16 = arith.constant 0 : index
    %9 = vector.load %arg17[%c0_14, %c0_15, %c0_16] : memref<10x10x64xf32, #tpu.memory_space<vmem>>, vector<1x10x64xf32>
    tpu.vector_store %arg17[%c0_14, %c0_15, %c0_16], %8 {strides = array<i32>} : memref<10x10x64xf32, #tpu.memory_space<vmem>>, vector<1x10x64xf32>,
    %cst_17 = arith.constant 0.000000e+00 : f32
    %10 = vector.broadcast %cst_17 : f32 to vector<1x10x64xf32>
    %c9 = arith.constant 9 : index
    %c0_18 = arith.constant 0 : index
    %c0_19 = arith.constant 0 : index
    %11 = vector.load %arg17[%c9, %c0_18, %c0_19] : memref<10x10x64xf32, #tpu.memory_space<vmem>>, vector<1x10x64xf32>
    tpu.vector_store %arg17[%c9, %c0_18, %c0_19], %10 {strides = array<i32>} : memref<10x10x64xf32, #tpu.memory_space<vmem>>, vector<1x10x64xf32>,
    %cst_20 = arith.constant 0.000000e+00 : f32
    %12 = vector.broadcast %cst_20 : f32 to vector<10x1x64xf32>
    %c0_21 = arith.constant 0 : index
    %c0_22 = arith.constant 0 : index
    %c0_23 = arith.constant 0 : index
    %13 = vector.load %arg17[%c0_21, %c0_22, %c0_23] : memref<10x10x64xf32, #tpu.memory_space<vmem>>, vector<10x1x64xf32>
    tpu.vector_store %arg17[%c0_21, %c0_22, %c0_23], %12 {strides = array<i32>} : memref<10x10x64xf32, #tpu.memory_space<vmem>>, vector<10x1x64xf32>,
    %cst_24 = arith.constant 0.000000e+00 : f32
    %14 = vector.broadcast %cst_24 : f32 to vector<10x1x64xf32>
    %c0_25 = arith.constant 0 : index
    %c9_26 = arith.constant 9 : index
    %c0_27 = arith.constant 0 : index
    %15 = vector.load %arg17[%c0_25, %c9_26, %c0_27] : memref<10x10x64xf32, #tpu.memory_space<vmem>>, vector<10x1x64xf32>
    tpu.vector_store %arg17[%c0_25, %c9_26, %c0_27], %14 {strides = array<i32>} : memref<10x10x64xf32, #tpu.memory_space<vmem>>, vector<10x1x64xf32>,
    %cst_28 = arith.constant 0.000000e+00 : f32
    %16 = vector.broadcast %cst_28 : f32 to vector<1x10x128xf32>
    %c0_29 = arith.constant 0 : index
    %c0_30 = arith.constant 0 : index
    %c0_31 = arith.constant 0 : index
    %17 = vector.load %arg19[%c0_29, %c0_30, %c0_31] : memref<10x10x128xf32, #tpu.memory_space<vmem>>, vector<1x10x128xf32>
    tpu.vector_store %arg19[%c0_29, %c0_30, %c0_31], %16 {strides = array<i32>} : memref<10x10x128xf32, #tpu.memory_space<vmem>>, vector<1x10x128xf32>,
    %cst_32 = arith.constant 0.000000e+00 : f32
    %18 = vector.broadcast %cst_32 : f32 to vector<1x10x128xf32>
    %c9_33 = arith.constant 9 : index
    %c0_34 = arith.constant 0 : index
    %c0_35 = arith.constant 0 : index
    %19 = vector.load %arg19[%c9_33, %c0_34, %c0_35] : memref<10x10x128xf32, #tpu.memory_space<vmem>>, vector<1x10x128xf32>
    tpu.vector_store %arg19[%c9_33, %c0_34, %c0_35], %18 {strides = array<i32>} : memref<10x10x128xf32, #tpu.memory_space<vmem>>, vector<1x10x128xf32>,
    %cst_36 = arith.constant 0.000000e+00 : f32
    %20 = vector.broadcast %cst_36 : f32 to vector<10x1x128xf32>
    %c0_37 = arith.constant 0 : index
    %c0_38 = arith.constant 0 : index
    %c0_39 = arith.constant 0 : index
    %21 = vector.load %arg19[%c0_37, %c0_38, %c0_39] : memref<10x10x128xf32, #tpu.memory_space<vmem>>, vector<10x1x128xf32>
    tpu.vector_store %arg19[%c0_37, %c0_38, %c0_39], %20 {strides = array<i32>} : memref<10x10x128xf32, #tpu.memory_space<vmem>>, vector<10x1x128xf32>,
    %cst_40 = arith.constant 0.000000e+00 : f32
    %22 = vector.broadcast %cst_40 : f32 to vector<10x1x128xf32>
    %c0_41 = arith.constant 0 : index
    %c9_42 = arith.constant 9 : index
    %c0_43 = arith.constant 0 : index
    %23 = vector.load %arg19[%c0_41, %c9_42, %c0_43] : memref<10x10x128xf32, #tpu.memory_space<vmem>>, vector<10x1x128xf32>
    tpu.vector_store %arg19[%c0_41, %c9_42, %c0_43], %22 {strides = array<i32>} : memref<10x10x128xf32, #tpu.memory_space<vmem>>, vector<10x1x128xf32>,
    %c0_44 = arith.constant 0 : index
    %c0_45 = arith.constant 0 : index
    %c0_46 = arith.constant 0 : index
    %24 = vector.load %arg1[%c0_44, %c0_45, %c0_46] : memref<1x256x27xf32, #tpu.memory_space<vmem>>, vector<1x256x27xf32>
    %25 = vector.shape_cast %24 : vector<1x256x27xf32> to vector<256x27xf32>
    %c0_47 = arith.constant 0 : index
    %c0_48 = arith.constant 0 : index
    %26 = vector.load %arg2[%c0_47, %c0_48] : memref<27x32xf32, #tpu.memory_space<vmem>>, vector<27x32xf32>
    %cst_49 = arith.constant dense<0.000000e+00> : vector<256x32xf32>
    %27 = tpu.matmul %25, %26, %cst_49 {dimension_numbers = #tpu.dot_dimension_numbers<[1], [0], [0], [1], [0, 0, 1, 1], [], []>} : vector<256x27xf32>, vector<27x32xf32>, vector<256x32xf32> -> vector<256x32xf32>
    %c0_50 = arith.constant 0 : index
    %c0_51 = arith.constant 0 : index
    %28 = vector.load %arg3[%c0_50, %c0_51] : memref<1x32xf32, #tpu.memory_space<vmem>>, vector<1x32xf32>
    %29 = vector.broadcast %28 : vector<1x32xf32> to vector<256x32xf32>
    %30 = arith.addf %27, %29 : vector<256x32xf32>
    %cst_52 = arith.constant 0.000000e+00 : f32
    %31 = vector.broadcast %cst_52 : f32 to vector<256x32xf32>
    %32 = arith.maximumf %30, %31 : vector<256x32xf32>
    %33 = vector.shape_cast %32 : vector<256x32xf32> to vector<16x16x32xf32>
    %c1 = arith.constant 1 : index
    %c1_53 = arith.constant 1 : index
    %c0_54 = arith.constant 0 : index
    %34 = vector.load %arg15[%c1, %c1_53, %c0_54] : memref<18x18x32xf32, #tpu.memory_space<vmem>>, vector<16x16x32xf32>
    tpu.vector_store %arg15[%c1, %c1_53, %c0_54], %33 {strides = array<i32>} : memref<18x18x32xf32, #tpu.memory_space<vmem>>, vector<16x16x32xf32>,
    %c0_55 = arith.constant 0 : index
    %c0_56 = arith.constant 0 : index
    %c0_57 = arith.constant 0 : index
    %35 = vector.load %arg15[%c0_55, %c0_56, %c0_57] : memref<18x18x32xf32, #tpu.memory_space<vmem>>, vector<16x16x32xf32>
    %c0_58 = arith.constant 0 : index
    %c1_59 = arith.constant 1 : index
    %c0_60 = arith.constant 0 : index
    %36 = vector.load %arg15[%c0_58, %c1_59, %c0_60] : memref<18x18x32xf32, #tpu.memory_space<vmem>>, vector<16x16x32xf32>
    %c0_61 = arith.constant 0 : index
    %c2 = arith.constant 2 : index
    %c0_62 = arith.constant 0 : index
    %37 = vector.load %arg15[%c0_61, %c2, %c0_62] : memref<18x18x32xf32, #tpu.memory_space<vmem>>, vector<16x16x32xf32>
    %c1_63 = arith.constant 1 : index
    %c0_64 = arith.constant 0 : index
    %c0_65 = arith.constant 0 : index
    %38 = vector.load %arg15[%c1_63, %c0_64, %c0_65] : memref<18x18x32xf32, #tpu.memory_space<vmem>>, vector<16x16x32xf32>
    %39 = tpu.concatenate %35, %36, %37, %38 in 2 : vector<16x16x32xf32>, vector<16x16x32xf32>, vector<16x16x32xf32>, vector<16x16x32xf32> -> vector<16x16x128xf32>
    %40 = vector.shape_cast %39 : vector<16x16x128xf32> to vector<256x128xf32>
    %41 = arith.truncf %40 : vector<256x128xf32> to vector<256x128xbf16>
    %c0_66 = arith.constant 0 : index
    %c0_67 = arith.constant 0 : index
    %42 = vector.load %arg16[%c0_66, %c0_67] : memref<256x288xbf16, #tpu.memory_space<vmem>>, vector<256x128xbf16>
    tpu.vector_store %arg16[%c0_66, %c0_67], %41 {strides = array<i32>} : memref<256x288xbf16, #tpu.memory_space<vmem>>, vector<256x128xbf16>,
    %c1_68 = arith.constant 1 : index
    %c1_69 = arith.constant 1 : index
    %c0_70 = arith.constant 0 : index
    %43 = vector.load %arg15[%c1_68, %c1_69, %c0_70] : memref<18x18x32xf32, #tpu.memory_space<vmem>>, vector<16x16x32xf32>
    %c1_71 = arith.constant 1 : index
    %c2_72 = arith.constant 2 : index
    %c0_73 = arith.constant 0 : index
    %44 = vector.load %arg15[%c1_71, %c2_72, %c0_73] : memref<18x18x32xf32, #tpu.memory_space<vmem>>, vector<16x16x32xf32>
    %c2_74 = arith.constant 2 : index
    %c0_75 = arith.constant 0 : index
    %c0_76 = arith.constant 0 : index
    %45 = vector.load %arg15[%c2_74, %c0_75, %c0_76] : memref<18x18x32xf32, #tpu.memory_space<vmem>>, vector<16x16x32xf32>
    %c2_77 = arith.constant 2 : index
    %c1_78 = arith.constant 1 : index
    %c0_79 = arith.constant 0 : index
    %46 = vector.load %arg15[%c2_77, %c1_78, %c0_79] : memref<18x18x32xf32, #tpu.memory_space<vmem>>, vector<16x16x32xf32>
    %47 = tpu.concatenate %43, %44, %45, %46 in 2 : vector<16x16x32xf32>, vector<16x16x32xf32>, vector<16x16x32xf32>, vector<16x16x32xf32> -> vector<16x16x128xf32>
    %48 = vector.shape_cast %47 : vector<16x16x128xf32> to vector<256x128xf32>
    %49 = arith.truncf %48 : vector<256x128xf32> to vector<256x128xbf16>
    %c0_80 = arith.constant 0 : index
    %c128 = arith.constant 128 : index
    %50 = vector.load %arg16[%c0_80, %c128] : memref<256x288xbf16, #tpu.memory_space<vmem>>, vector<256x128xbf16>
    tpu.vector_store %arg16[%c0_80, %c128], %49 {strides = array<i32>} : memref<256x288xbf16, #tpu.memory_space<vmem>>, vector<256x128xbf16>,
    %c2_81 = arith.constant 2 : index
    %c2_82 = arith.constant 2 : index
    %c0_83 = arith.constant 0 : index
    %51 = vector.load %arg15[%c2_81, %c2_82, %c0_83] : memref<18x18x32xf32, #tpu.memory_space<vmem>>, vector<16x16x32xf32>
    %52 = vector.shape_cast %51 : vector<16x16x32xf32> to vector<256x32xf32>
    %53 = arith.truncf %52 : vector<256x32xf32> to vector<256x32xbf16>
    %c0_84 = arith.constant 0 : index
    %c256 = arith.constant 256 : index
    %54 = vector.load %arg16[%c0_84, %c256] : memref<256x288xbf16, #tpu.memory_space<vmem>>, vector<256x32xbf16>
    tpu.vector_store %arg16[%c0_84, %c256], %53 {strides = array<i32>} : memref<256x288xbf16, #tpu.memory_space<vmem>>, vector<256x32xbf16>,
    %c0_85 = arith.constant 0 : index
    %c0_86 = arith.constant 0 : index
    %55 = vector.load %arg16[%c0_85, %c0_86] : memref<256x288xbf16, #tpu.memory_space<vmem>>, vector<256x288xbf16>
    %c0_87 = arith.constant 0 : index
    %c0_88 = arith.constant 0 : index
    %56 = vector.load %arg4[%c0_87, %c0_88] : memref<288x64xbf16, #tpu.memory_space<vmem>>, vector<288x64xbf16>
    %cst_89 = arith.constant dense<0.000000e+00> : vector<256x64xf32>
    %57 = tpu.matmul %55, %56, %cst_89 {dimension_numbers = #tpu.dot_dimension_numbers<[1], [0], [0], [1], [0, 0, 1, 1], [], []>} : vector<256x288xbf16>, vector<288x64xbf16>, vector<256x64xf32> -> vector<256x64xf32>
    %c0_90 = arith.constant 0 : index
    %c0_91 = arith.constant 0 : index
    %58 = vector.load %arg5[%c0_90, %c0_91] : memref<1x64xf32, #tpu.memory_space<vmem>>, vector<1x64xf32>
    %59 = vector.broadcast %58 : vector<1x64xf32> to vector<256x64xf32>
    %60 = arith.addf %57, %59 : vector<256x64xf32>
    %cst_92 = arith.constant 0.000000e+00 : f32
    %61 = vector.broadcast %cst_92 : f32 to vector<256x64xf32>
    %62 = arith.maximumf %60, %61 : vector<256x64xf32>
    %63 = vector.shape_cast %62 : vector<256x64xf32> to vector<128x2x64xf32>
    %64 = vector.extract_strided_slice %63 {offsets = [0, 0, 0], sizes = [128, 1, 64], strides = [1, 1, 1]} : vector<128x2x64xf32> to vector<128x1x64xf32>
    %65 = vector.shape_cast %64 : vector<128x1x64xf32> to vector<128x64xf32>
    %66 = vector.extract_strided_slice %63 {offsets = [0, 1, 0], sizes = [128, 1, 64], strides = [1, 1, 1]} : vector<128x2x64xf32> to vector<128x1x64xf32>
    %67 = vector.shape_cast %66 : vector<128x1x64xf32> to vector<128x64xf32>
    %68 = arith.maximumf %65, %67 : vector<128x64xf32>
    %69 = vector.shape_cast %68 : vector<128x64xf32> to vector<8x2x8x64xf32>
    %70 = vector.extract_strided_slice %69 {offsets = [0, 0, 0, 0], sizes = [8, 1, 8, 64], strides = [1, 1, 1, 1]} : vector<8x2x8x64xf32> to vector<8x1x8x64xf32>
    %71 = vector.shape_cast %70 : vector<8x1x8x64xf32> to vector<8x8x64xf32>
    %72 = vector.extract_strided_slice %69 {offsets = [0, 1, 0, 0], sizes = [8, 1, 8, 64], strides = [1, 1, 1, 1]} : vector<8x2x8x64xf32> to vector<8x1x8x64xf32>
    %73 = vector.shape_cast %72 : vector<8x1x8x64xf32> to vector<8x8x64xf32>
    %74 = arith.maximumf %71, %73 : vector<8x8x64xf32>
    %c1_93 = arith.constant 1 : index
    %c1_94 = arith.constant 1 : index
    %c0_95 = arith.constant 0 : index
    %75 = vector.load %arg17[%c1_93, %c1_94, %c0_95] : memref<10x10x64xf32, #tpu.memory_space<vmem>>, vector<8x8x64xf32>
    tpu.vector_store %arg17[%c1_93, %c1_94, %c0_95], %74 {strides = array<i32>} : memref<10x10x64xf32, #tpu.memory_space<vmem>>, vector<8x8x64xf32>,
    %c0_96 = arith.constant 0 : index
    %c0_97 = arith.constant 0 : index
    %c0_98 = arith.constant 0 : index
    %76 = vector.load %arg17[%c0_96, %c0_97, %c0_98] : memref<10x10x64xf32, #tpu.memory_space<vmem>>, vector<8x8x64xf32>
    %c0_99 = arith.constant 0 : index
    %c1_100 = arith.constant 1 : index
    %c0_101 = arith.constant 0 : index
    %77 = vector.load %arg17[%c0_99, %c1_100, %c0_101] : memref<10x10x64xf32, #tpu.memory_space<vmem>>, vector<8x8x64xf32>
    %78 = tpu.concatenate %76, %77 in 2 : vector<8x8x64xf32>, vector<8x8x64xf32> -> vector<8x8x128xf32>
    %79 = vector.shape_cast %78 : vector<8x8x128xf32> to vector<64x128xf32>
    %80 = arith.truncf %79 : vector<64x128xf32> to vector<64x128xbf16>
    %c0_102 = arith.constant 0 : index
    %c0_103 = arith.constant 0 : index
    %81 = vector.load %arg18[%c0_102, %c0_103] : memref<64x576xbf16, #tpu.memory_space<vmem>>, vector<64x128xbf16>
    tpu.vector_store %arg18[%c0_102, %c0_103], %80 {strides = array<i32>} : memref<64x576xbf16, #tpu.memory_space<vmem>>, vector<64x128xbf16>,
    %c0_104 = arith.constant 0 : index
    %c2_105 = arith.constant 2 : index
    %c0_106 = arith.constant 0 : index
    %82 = vector.load %arg17[%c0_104, %c2_105, %c0_106] : memref<10x10x64xf32, #tpu.memory_space<vmem>>, vector<8x8x64xf32>
    %c1_107 = arith.constant 1 : index
    %c0_108 = arith.constant 0 : index
    %c0_109 = arith.constant 0 : index
    %83 = vector.load %arg17[%c1_107, %c0_108, %c0_109] : memref<10x10x64xf32, #tpu.memory_space<vmem>>, vector<8x8x64xf32>
    %84 = tpu.concatenate %82, %83 in 2 : vector<8x8x64xf32>, vector<8x8x64xf32> -> vector<8x8x128xf32>
    %85 = vector.shape_cast %84 : vector<8x8x128xf32> to vector<64x128xf32>
    %86 = arith.truncf %85 : vector<64x128xf32> to vector<64x128xbf16>
    %c0_110 = arith.constant 0 : index
    %c128_111 = arith.constant 128 : index
    %87 = vector.load %arg18[%c0_110, %c128_111] : memref<64x576xbf16, #tpu.memory_space<vmem>>, vector<64x128xbf16>
    tpu.vector_store %arg18[%c0_110, %c128_111], %86 {strides = array<i32>} : memref<64x576xbf16, #tpu.memory_space<vmem>>, vector<64x128xbf16>,
    %c1_112 = arith.constant 1 : index
    %c1_113 = arith.constant 1 : index
    %c0_114 = arith.constant 0 : index
    %88 = vector.load %arg17[%c1_112, %c1_113, %c0_114] : memref<10x10x64xf32, #tpu.memory_space<vmem>>, vector<8x8x64xf32>
    %c1_115 = arith.constant 1 : index
    %c2_116 = arith.constant 2 : index
    %c0_117 = arith.constant 0 : index
    %89 = vector.load %arg17[%c1_115, %c2_116, %c0_117] : memref<10x10x64xf32, #tpu.memory_space<vmem>>, vector<8x8x64xf32>
    %90 = tpu.concatenate %88, %89 in 2 : vector<8x8x64xf32>, vector<8x8x64xf32> -> vector<8x8x128xf32>
    %91 = vector.shape_cast %90 : vector<8x8x128xf32> to vector<64x128xf32>
    %92 = arith.truncf %91 : vector<64x128xf32> to vector<64x128xbf16>
    %c0_118 = arith.constant 0 : index
    %c256_119 = arith.constant 256 : index
    %93 = vector.load %arg18[%c0_118, %c256_119] : memref<64x576xbf16, #tpu.memory_space<vmem>>, vector<64x128xbf16>
    tpu.vector_store %arg18[%c0_118, %c256_119], %92 {strides = array<i32>} : memref<64x576xbf16, #tpu.memory_space<vmem>>, vector<64x128xbf16>,
    %c2_120 = arith.constant 2 : index
    %c0_121 = arith.constant 0 : index
    %c0_122 = arith.constant 0 : index
    %94 = vector.load %arg17[%c2_120, %c0_121, %c0_122] : memref<10x10x64xf32, #tpu.memory_space<vmem>>, vector<8x8x64xf32>
    %c2_123 = arith.constant 2 : index
    %c1_124 = arith.constant 1 : index
    %c0_125 = arith.constant 0 : index
    %95 = vector.load %arg17[%c2_123, %c1_124, %c0_125] : memref<10x10x64xf32, #tpu.memory_space<vmem>>, vector<8x8x64xf32>
    %96 = tpu.concatenate %94, %95 in 2 : vector<8x8x64xf32>, vector<8x8x64xf32> -> vector<8x8x128xf32>
    %97 = vector.shape_cast %96 : vector<8x8x128xf32> to vector<64x128xf32>
    %98 = arith.truncf %97 : vector<64x128xf32> to vector<64x128xbf16>
    %c0_126 = arith.constant 0 : index
    %c384 = arith.constant 384 : index
    %99 = vector.load %arg18[%c0_126, %c384] : memref<64x576xbf16, #tpu.memory_space<vmem>>, vector<64x128xbf16>
    tpu.vector_store %arg18[%c0_126, %c384], %98 {strides = array<i32>} : memref<64x576xbf16, #tpu.memory_space<vmem>>, vector<64x128xbf16>,
    %c2_127 = arith.constant 2 : index
    %c2_128 = arith.constant 2 : index
    %c0_129 = arith.constant 0 : index
    %100 = vector.load %arg17[%c2_127, %c2_128, %c0_129] : memref<10x10x64xf32, #tpu.memory_space<vmem>>, vector<8x8x64xf32>
    %101 = vector.shape_cast %100 : vector<8x8x64xf32> to vector<64x64xf32>
    %102 = arith.truncf %101 : vector<64x64xf32> to vector<64x64xbf16>
    %c0_130 = arith.constant 0 : index
    %c512 = arith.constant 512 : index
    %103 = vector.load %arg18[%c0_130, %c512] : memref<64x576xbf16, #tpu.memory_space<vmem>>, vector<64x64xbf16>
    tpu.vector_store %arg18[%c0_130, %c512], %102 {strides = array<i32>} : memref<64x576xbf16, #tpu.memory_space<vmem>>, vector<64x64xbf16>,
    %c0_131 = arith.constant 0 : index
    %c0_132 = arith.constant 0 : index
    %104 = vector.load %arg18[%c0_131, %c0_132] : memref<64x576xbf16, #tpu.memory_space<vmem>>, vector<64x576xbf16>
    %c0_133 = arith.constant 0 : index
    %c0_134 = arith.constant 0 : index
    %105 = vector.load %arg6[%c0_133, %c0_134] : memref<576x128xbf16, #tpu.memory_space<vmem>>, vector<576x128xbf16>
    %cst_135 = arith.constant dense<0.000000e+00> : vector<64x128xf32>
    %106 = tpu.matmul %104, %105, %cst_135 {dimension_numbers = #tpu.dot_dimension_numbers<[1], [0], [0], [1], [0, 0, 1, 1], [], []>} : vector<64x576xbf16>, vector<576x128xbf16>, vector<64x128xf32> -> vector<64x128xf32>
    %c0_136 = arith.constant 0 : index
    %c0_137 = arith.constant 0 : index
    %107 = vector.load %arg7[%c0_136, %c0_137] : memref<1x128xf32, #tpu.memory_space<vmem>>, vector<1x128xf32>
    %108 = vector.broadcast %107 : vector<1x128xf32> to vector<64x128xf32>
    %109 = arith.addf %106, %108 : vector<64x128xf32>
    %cst_138 = arith.constant 0.000000e+00 : f32
    %110 = vector.broadcast %cst_138 : f32 to vector<64x128xf32>
    %111 = arith.maximumf %109, %110 : vector<64x128xf32>
    %112 = vector.shape_cast %111 : vector<64x128xf32> to vector<8x8x128xf32>
    %c1_139 = arith.constant 1 : index
    %c1_140 = arith.constant 1 : index
    %c0_141 = arith.constant 0 : index
    %113 = vector.load %arg19[%c1_139, %c1_140, %c0_141] : memref<10x10x128xf32, #tpu.memory_space<vmem>>, vector<8x8x128xf32>
    tpu.vector_store %arg19[%c1_139, %c1_140, %c0_141], %112 {strides = array<i32>} : memref<10x10x128xf32, #tpu.memory_space<vmem>>, vector<8x8x128xf32>,
    %c0_142 = arith.constant 0 : index
    %c0_143 = arith.constant 0 : index
    %c0_144 = arith.constant 0 : index
    %114 = vector.load %arg19[%c0_142, %c0_143, %c0_144] : memref<10x10x128xf32, #tpu.memory_space<vmem>>, vector<8x8x128xf32>
    %115 = vector.shape_cast %114 : vector<8x8x128xf32> to vector<64x128xf32>
    %116 = arith.truncf %115 : vector<64x128xf32> to vector<64x128xbf16>
    %c0_145 = arith.constant 0 : index
    %c0_146 = arith.constant 0 : index
    %117 = vector.load %arg20[%c0_145, %c0_146] : memref<64x1152xbf16, #tpu.memory_space<vmem>>, vector<64x128xbf16>
    tpu.vector_store %arg20[%c0_145, %c0_146], %116 {strides = array<i32>} : memref<64x1152xbf16, #tpu.memory_space<vmem>>, vector<64x128xbf16>,
    %c0_147 = arith.constant 0 : index
    %c1_148 = arith.constant 1 : index
    %c0_149 = arith.constant 0 : index
    %118 = vector.load %arg19[%c0_147, %c1_148, %c0_149] : memref<10x10x128xf32, #tpu.memory_space<vmem>>, vector<8x8x128xf32>
    %119 = vector.shape_cast %118 : vector<8x8x128xf32> to vector<64x128xf32>
    %120 = arith.truncf %119 : vector<64x128xf32> to vector<64x128xbf16>
    %c0_150 = arith.constant 0 : index
    %c128_151 = arith.constant 128 : index
    %121 = vector.load %arg20[%c0_150, %c128_151] : memref<64x1152xbf16, #tpu.memory_space<vmem>>, vector<64x128xbf16>
    tpu.vector_store %arg20[%c0_150, %c128_151], %120 {strides = array<i32>} : memref<64x1152xbf16, #tpu.memory_space<vmem>>, vector<64x128xbf16>,
    %c0_152 = arith.constant 0 : index
    %c2_153 = arith.constant 2 : index
    %c0_154 = arith.constant 0 : index
    %122 = vector.load %arg19[%c0_152, %c2_153, %c0_154] : memref<10x10x128xf32, #tpu.memory_space<vmem>>, vector<8x8x128xf32>
    %123 = vector.shape_cast %122 : vector<8x8x128xf32> to vector<64x128xf32>
    %124 = arith.truncf %123 : vector<64x128xf32> to vector<64x128xbf16>
    %c0_155 = arith.constant 0 : index
    %c256_156 = arith.constant 256 : index
    %125 = vector.load %arg20[%c0_155, %c256_156] : memref<64x1152xbf16, #tpu.memory_space<vmem>>, vector<64x128xbf16>
    tpu.vector_store %arg20[%c0_155, %c256_156], %124 {strides = array<i32>} : memref<64x1152xbf16, #tpu.memory_space<vmem>>, vector<64x128xbf16>,
    %c1_157 = arith.constant 1 : index
    %c0_158 = arith.constant 0 : index
    %c0_159 = arith.constant 0 : index
    %126 = vector.load %arg19[%c1_157, %c0_158, %c0_159] : memref<10x10x128xf32, #tpu.memory_space<vmem>>, vector<8x8x128xf32>
    %127 = vector.shape_cast %126 : vector<8x8x128xf32> to vector<64x128xf32>
    %128 = arith.truncf %127 : vector<64x128xf32> to vector<64x128xbf16>
    %c0_160 = arith.constant 0 : index
    %c384_161 = arith.constant 384 : index
    %129 = vector.load %arg20[%c0_160, %c384_161] : memref<64x1152xbf16, #tpu.memory_space<vmem>>, vector<64x128xbf16>
    tpu.vector_store %arg20[%c0_160, %c384_161], %128 {strides = array<i32>} : memref<64x1152xbf16, #tpu.memory_space<vmem>>, vector<64x128xbf16>,
    %c1_162 = arith.constant 1 : index
    %c1_163 = arith.constant 1 : index
    %c0_164 = arith.constant 0 : index
    %130 = vector.load %arg19[%c1_162, %c1_163, %c0_164] : memref<10x10x128xf32, #tpu.memory_space<vmem>>, vector<8x8x128xf32>
    %131 = vector.shape_cast %130 : vector<8x8x128xf32> to vector<64x128xf32>
    %132 = arith.truncf %131 : vector<64x128xf32> to vector<64x128xbf16>
    %c0_165 = arith.constant 0 : index
    %c512_166 = arith.constant 512 : index
    %133 = vector.load %arg20[%c0_165, %c512_166] : memref<64x1152xbf16, #tpu.memory_space<vmem>>, vector<64x128xbf16>
    tpu.vector_store %arg20[%c0_165, %c512_166], %132 {strides = array<i32>} : memref<64x1152xbf16, #tpu.memory_space<vmem>>, vector<64x128xbf16>,
    %c1_167 = arith.constant 1 : index
    %c2_168 = arith.constant 2 : index
    %c0_169 = arith.constant 0 : index
    %134 = vector.load %arg19[%c1_167, %c2_168, %c0_169] : memref<10x10x128xf32, #tpu.memory_space<vmem>>, vector<8x8x128xf32>
    %135 = vector.shape_cast %134 : vector<8x8x128xf32> to vector<64x128xf32>
    %136 = arith.truncf %135 : vector<64x128xf32> to vector<64x128xbf16>
    %c0_170 = arith.constant 0 : index
    %c640 = arith.constant 640 : index
    %137 = vector.load %arg20[%c0_170, %c640] : memref<64x1152xbf16, #tpu.memory_space<vmem>>, vector<64x128xbf16>
    tpu.vector_store %arg20[%c0_170, %c640], %136 {strides = array<i32>} : memref<64x1152xbf16, #tpu.memory_space<vmem>>, vector<64x128xbf16>,
    %c2_171 = arith.constant 2 : index
    %c0_172 = arith.constant 0 : index
    %c0_173 = arith.constant 0 : index
    %138 = vector.load %arg19[%c2_171, %c0_172, %c0_173] : memref<10x10x128xf32, #tpu.memory_space<vmem>>, vector<8x8x128xf32>
    %139 = vector.shape_cast %138 : vector<8x8x128xf32> to vector<64x128xf32>
    %140 = arith.truncf %139 : vector<64x128xf32> to vector<64x128xbf16>
    %c0_174 = arith.constant 0 : index
    %c768 = arith.constant 768 : index
    %141 = vector.load %arg20[%c0_174, %c768] : memref<64x1152xbf16, #tpu.memory_space<vmem>>, vector<64x128xbf16>
    tpu.vector_store %arg20[%c0_174, %c768], %140 {strides = array<i32>} : memref<64x1152xbf16, #tpu.memory_space<vmem>>, vector<64x128xbf16>,
    %c2_175 = arith.constant 2 : index
    %c1_176 = arith.constant 1 : index
    %c0_177 = arith.constant 0 : index
    %142 = vector.load %arg19[%c2_175, %c1_176, %c0_177] : memref<10x10x128xf32, #tpu.memory_space<vmem>>, vector<8x8x128xf32>
    %143 = vector.shape_cast %142 : vector<8x8x128xf32> to vector<64x128xf32>
    %144 = arith.truncf %143 : vector<64x128xf32> to vector<64x128xbf16>
    %c0_178 = arith.constant 0 : index
    %c896 = arith.constant 896 : index
    %145 = vector.load %arg20[%c0_178, %c896] : memref<64x1152xbf16, #tpu.memory_space<vmem>>, vector<64x128xbf16>
    tpu.vector_store %arg20[%c0_178, %c896], %144 {strides = array<i32>} : memref<64x1152xbf16, #tpu.memory_space<vmem>>, vector<64x128xbf16>,
    %c2_179 = arith.constant 2 : index
    %c2_180 = arith.constant 2 : index
    %c0_181 = arith.constant 0 : index
    %146 = vector.load %arg19[%c2_179, %c2_180, %c0_181] : memref<10x10x128xf32, #tpu.memory_space<vmem>>, vector<8x8x128xf32>
    %147 = vector.shape_cast %146 : vector<8x8x128xf32> to vector<64x128xf32>
    %148 = arith.truncf %147 : vector<64x128xf32> to vector<64x128xbf16>
    %c0_182 = arith.constant 0 : index
    %c1024 = arith.constant 1024 : index
    %149 = vector.load %arg20[%c0_182, %c1024] : memref<64x1152xbf16, #tpu.memory_space<vmem>>, vector<64x128xbf16>
    tpu.vector_store %arg20[%c0_182, %c1024], %148 {strides = array<i32>} : memref<64x1152xbf16, #tpu.memory_space<vmem>>, vector<64x128xbf16>,
    %c0_183 = arith.constant 0 : index
    %c0_184 = arith.constant 0 : index
    %150 = vector.load %arg20[%c0_183, %c0_184] : memref<64x1152xbf16, #tpu.memory_space<vmem>>, vector<64x1152xbf16>
    %c0_185 = arith.constant 0 : index
    %c0_186 = arith.constant 0 : index
    %151 = vector.load %arg8[%c0_185, %c0_186] : memref<1152x256xbf16, #tpu.memory_space<vmem>>, vector<1152x256xbf16>
    %cst_187 = arith.constant dense<0.000000e+00> : vector<64x256xf32>
    %152 = tpu.matmul %150, %151, %cst_187 {dimension_numbers = #tpu.dot_dimension_numbers<[1], [0], [0], [1], [0, 0, 1, 1], [], []>} : vector<64x1152xbf16>, vector<1152x256xbf16>, vector<64x256xf32> -> vector<64x256xf32>
    %c0_188 = arith.constant 0 : index
    %c0_189 = arith.constant 0 : index
    %153 = vector.load %arg9[%c0_188, %c0_189] : memref<1x256xf32, #tpu.memory_space<vmem>>, vector<1x256xf32>
    %154 = vector.broadcast %153 : vector<1x256xf32> to vector<64x256xf32>
    %155 = arith.addf %152, %154 : vector<64x256xf32>
    %cst_190 = arith.constant 0.000000e+00 : f32
    %156 = vector.broadcast %cst_190 : f32 to vector<64x256xf32>
    %157 = arith.maximumf %155, %156 : vector<64x256xf32>
    %158 = vector.shape_cast %157 : vector<64x256xf32> to vector<32x2x256xf32>
    %159 = vector.extract_strided_slice %158 {offsets = [0, 0, 0], sizes = [32, 1, 256], strides = [1, 1, 1]} : vector<32x2x256xf32> to vector<32x1x256xf32>
    %160 = vector.shape_cast %159 : vector<32x1x256xf32> to vector<32x256xf32>
    %161 = vector.extract_strided_slice %158 {offsets = [0, 1, 0], sizes = [32, 1, 256], strides = [1, 1, 1]} : vector<32x2x256xf32> to vector<32x1x256xf32>
    %162 = vector.shape_cast %161 : vector<32x1x256xf32> to vector<32x256xf32>
    %163 = arith.maximumf %160, %162 : vector<32x256xf32>
    %164 = vector.shape_cast %163 : vector<32x256xf32> to vector<4x2x4x256xf32>
    %165 = vector.extract_strided_slice %164 {offsets = [0, 0, 0, 0], sizes = [4, 1, 4, 256], strides = [1, 1, 1, 1]} : vector<4x2x4x256xf32> to vector<4x1x4x256xf32>
    %166 = vector.shape_cast %165 : vector<4x1x4x256xf32> to vector<4x4x256xf32>
    %167 = vector.extract_strided_slice %164 {offsets = [0, 1, 0, 0], sizes = [4, 1, 4, 256], strides = [1, 1, 1, 1]} : vector<4x2x4x256xf32> to vector<4x1x4x256xf32>
    %168 = vector.shape_cast %167 : vector<4x1x4x256xf32> to vector<4x4x256xf32>
    %169 = arith.maximumf %166, %168 : vector<4x4x256xf32>
    %170 = vector.shape_cast %169 : vector<4x4x256xf32> to vector<16x256xf32>
    %171 = vector.extract_strided_slice %170 {offsets = [0, 0], sizes = [1, 256], strides = [1, 1]} : vector<16x256xf32> to vector<1x256xf32>
    %172 = vector.extract_strided_slice %170 {offsets = [1, 0], sizes = [1, 256], strides = [1, 1]} : vector<16x256xf32> to vector<1x256xf32>
    %173 = vector.extract_strided_slice %170 {offsets = [2, 0], sizes = [1, 256], strides = [1, 1]} : vector<16x256xf32> to vector<1x256xf32>
    %174 = vector.extract_strided_slice %170 {offsets = [3, 0], sizes = [1, 256], strides = [1, 1]} : vector<16x256xf32> to vector<1x256xf32>
    %175 = vector.extract_strided_slice %170 {offsets = [4, 0], sizes = [1, 256], strides = [1, 1]} : vector<16x256xf32> to vector<1x256xf32>
    %176 = vector.extract_strided_slice %170 {offsets = [5, 0], sizes = [1, 256], strides = [1, 1]} : vector<16x256xf32> to vector<1x256xf32>
    %177 = vector.extract_strided_slice %170 {offsets = [6, 0], sizes = [1, 256], strides = [1, 1]} : vector<16x256xf32> to vector<1x256xf32>
    %178 = vector.extract_strided_slice %170 {offsets = [7, 0], sizes = [1, 256], strides = [1, 1]} : vector<16x256xf32> to vector<1x256xf32>
    %179 = vector.extract_strided_slice %170 {offsets = [8, 0], sizes = [1, 256], strides = [1, 1]} : vector<16x256xf32> to vector<1x256xf32>
    %180 = vector.extract_strided_slice %170 {offsets = [9, 0], sizes = [1, 256], strides = [1, 1]} : vector<16x256xf32> to vector<1x256xf32>
    %181 = vector.extract_strided_slice %170 {offsets = [10, 0], sizes = [1, 256], strides = [1, 1]} : vector<16x256xf32> to vector<1x256xf32>
    %182 = vector.extract_strided_slice %170 {offsets = [11, 0], sizes = [1, 256], strides = [1, 1]} : vector<16x256xf32> to vector<1x256xf32>
    %183 = vector.extract_strided_slice %170 {offsets = [12, 0], sizes = [1, 256], strides = [1, 1]} : vector<16x256xf32> to vector<1x256xf32>
    %184 = vector.extract_strided_slice %170 {offsets = [13, 0], sizes = [1, 256], strides = [1, 1]} : vector<16x256xf32> to vector<1x256xf32>
    %185 = vector.extract_strided_slice %170 {offsets = [14, 0], sizes = [1, 256], strides = [1, 1]} : vector<16x256xf32> to vector<1x256xf32>
    %186 = vector.extract_strided_slice %170 {offsets = [15, 0], sizes = [1, 256], strides = [1, 1]} : vector<16x256xf32> to vector<1x256xf32>
    %187 = tpu.concatenate %171, %172, %173, %174, %175, %176, %177, %178, %179, %180, %181, %182, %183, %184, %185, %186 in 1 : vector<1x256xf32>, vector<1x256xf32>, vector<1x256xf32>, vector<1x256xf32>, vector<1x256xf32>, vector<1x256xf32>, vector<1x256xf32>, vector<1x256xf32>, vector<1x256xf32>, vector<1x256xf32>, vector<1x256xf32>, vector<1x256xf32>, vector<1x256xf32>, vector<1x256xf32>, vector<1x256xf32>, vector<1x256xf32> -> vector<1x4096xf32>
    %188 = arith.truncf %187 : vector<1x4096xf32> to vector<1x4096xbf16>
    %c0_191 = arith.constant 0 : index
    %c0_192 = arith.constant 0 : index
    %189 = vector.load %arg10[%c0_191, %c0_192] : memref<4096x256xbf16, #tpu.memory_space<vmem>>, vector<4096x256xbf16>
    %cst_193 = arith.constant dense<0.000000e+00> : vector<1x256xf32>
    %190 = tpu.matmul %188, %189, %cst_193 {dimension_numbers = #tpu.dot_dimension_numbers<[1], [0], [0], [1], [0, 0, 1, 1], [], []>} : vector<1x4096xbf16>, vector<4096x256xbf16>, vector<1x256xf32> -> vector<1x256xf32>
    %c0_194 = arith.constant 0 : index
    %c0_195 = arith.constant 0 : index
    %191 = vector.load %arg11[%c0_194, %c0_195] : memref<1x256xf32, #tpu.memory_space<vmem>>, vector<1x256xf32>
    %192 = arith.addf %190, %191 : vector<1x256xf32>
    %cst_196 = arith.constant 0.000000e+00 : f32
    %193 = vector.broadcast %cst_196 : f32 to vector<1x256xf32>
    %194 = arith.maximumf %192, %193 : vector<1x256xf32>
    %195 = arith.truncf %194 : vector<1x256xf32> to vector<1x256xbf16>
    %c0_197 = arith.constant 0 : index
    %c0_198 = arith.constant 0 : index
    %196 = vector.load %arg12[%c0_197, %c0_198] : memref<256x1xbf16, #tpu.memory_space<vmem>>, vector<256x1xbf16>
    %cst_199 = arith.constant dense<0.000000e+00> : vector<1x1xf32>
    %197 = tpu.matmul %195, %196, %cst_199 {dimension_numbers = #tpu.dot_dimension_numbers<[1], [0], [0], [1], [0, 0, 1, 1], [], []>} : vector<1x256xbf16>, vector<256x1xbf16>, vector<1x1xf32> -> vector<1x1xf32>
    %c0_200 = arith.constant 0 : index
    %c0_201 = arith.constant 0 : index
    %198 = vector.load %arg13[%c0_200, %c0_201] : memref<1x1xf32, #tpu.memory_space<vmem>>, vector<1x1xf32>
    %199 = arith.addf %197, %198 : vector<1x1xf32>
    %cst_202 = arith.constant 0.000000e+00 : f32
    %200 = vector.broadcast %cst_202 : f32 to vector<1x1xf32>
    %201 = arith.subf %200, %199 : vector<1x1xf32>
    %202 = math.exp %201 : vector<1x1xf32>
    %cst_203 = arith.constant 1.000000e+00 : f32
    %203 = vector.broadcast %cst_203 : f32 to vector<1x1xf32>
    %204 = arith.addf %203, %202 : vector<1x1xf32>
    %cst_204 = arith.constant 1.000000e+00 : f32
    %205 = vector.broadcast %cst_204 : f32 to vector<1x1xf32>
    %206 = arith.divf %205, %204 : vector<1x1xf32>
    %207 = vector.shape_cast %206 : vector<1x1xf32> to vector<1x1x1xf32>
    %c0_205 = arith.constant 0 : index
    %c0_206 = arith.constant 0 : index
    %c0_207 = arith.constant 0 : index
    %208 = vector.load %arg14[%c0_205, %c0_206, %c0_207] : memref<1x1x1xf32, #tpu.memory_space<vmem>>, vector<1x1x1xf32>
    tpu.vector_store %arg14[%c0_205, %c0_206, %c0_207], %207 {strides = array<i32>} : memref<1x1x1xf32, #tpu.memory_space<vmem>>, vector<1x1x1xf32>,
    return
  }
  func.func @transform_0(%arg0: i32) -> (i32, i32, i32) {
    %c0_i32 = arith.constant 0 : i32
    %c0_i32_0 = arith.constant 0 : i32
    %c0_i32_1 = arith.constant 0 : i32
    return %arg0, %c0_i32, %c0_i32_0 : i32, i32, i32
  }
  func.func @transform_1(%arg0: i32) -> (i32, i32) {
    %c0_i32 = arith.constant 0 : i32
    %c0_i32_0 = arith.constant 0 : i32
    %c0_i32_1 = arith.constant 0 : i32
    return %c0_i32, %c0_i32_0 : i32, i32
  }
  func.func @transform_2(%arg0: i32) -> (i32, i32) {
    %c0_i32 = arith.constant 0 : i32
    %c0_i32_0 = arith.constant 0 : i32
    %c0_i32_1 = arith.constant 0 : i32
    return %c0_i32, %c0_i32_0 : i32, i32
  }
  func.func @transform_3(%arg0: i32) -> (i32, i32) {
    %c0_i32 = arith.constant 0 : i32
    %c0_i32_0 = arith.constant 0 : i32
    %c0_i32_1 = arith.constant 0 : i32
    return %c0_i32, %c0_i32_0 : i32, i32
  }
  func.func @transform_4(%arg0: i32) -> (i32, i32) {
    %c0_i32 = arith.constant 0 : i32
    %c0_i32_0 = arith.constant 0 : i32
    %c0_i32_1 = arith.constant 0 : i32
    return %c0_i32, %c0_i32_0 : i32, i32
  }
  func.func @transform_5(%arg0: i32) -> (i32, i32) {
    %c0_i32 = arith.constant 0 : i32
    %c0_i32_0 = arith.constant 0 : i32
    %c0_i32_1 = arith.constant 0 : i32
    return %c0_i32, %c0_i32_0 : i32, i32
  }
  func.func @transform_6(%arg0: i32) -> (i32, i32) {
    %c0_i32 = arith.constant 0 : i32
    %c0_i32_0 = arith.constant 0 : i32
    %c0_i32_1 = arith.constant 0 : i32
    return %c0_i32, %c0_i32_0 : i32, i32
  }
  func.func @transform_7(%arg0: i32) -> (i32, i32) {
    %c0_i32 = arith.constant 0 : i32
    %c0_i32_0 = arith.constant 0 : i32
    %c0_i32_1 = arith.constant 0 : i32
    return %c0_i32, %c0_i32_0 : i32, i32
  }
  func.func @transform_8(%arg0: i32) -> (i32, i32) {
    %c0_i32 = arith.constant 0 : i32
    %c0_i32_0 = arith.constant 0 : i32
    %c0_i32_1 = arith.constant 0 : i32
    return %c0_i32, %c0_i32_0 : i32, i32
  }
  func.func @transform_9(%arg0: i32) -> (i32, i32) {
    %c0_i32 = arith.constant 0 : i32
    %c0_i32_0 = arith.constant 0 : i32
    %c0_i32_1 = arith.constant 0 : i32
    return %c0_i32, %c0_i32_0 : i32, i32
  }
  func.func @transform_10(%arg0: i32) -> (i32, i32) {
    %c0_i32 = arith.constant 0 : i32
    %c0_i32_0 = arith.constant 0 : i32
    %c0_i32_1 = arith.constant 0 : i32
    return %c0_i32, %c0_i32_0 : i32, i32
  }
  func.func @transform_11(%arg0: i32) -> (i32, i32) {
    %c0_i32 = arith.constant 0 : i32
    %c0_i32_0 = arith.constant 0 : i32
    %c0_i32_1 = arith.constant 0 : i32
    return %c0_i32, %c0_i32_0 : i32, i32
  }
  func.func @transform_12(%arg0: i32) -> (i32, i32) {
    %c0_i32 = arith.constant 0 : i32
    %c0_i32_0 = arith.constant 0 : i32
    %c0_i32_1 = arith.constant 0 : i32
    return %c0_i32, %c0_i32_0 : i32, i32
  }
  func.func @transform_13(%arg0: i32) -> (i32, i32, i32) {
    %c0_i32 = arith.constant 0 : i32
    %c0_i32_0 = arith.constant 0 : i32
    %c0_i32_1 = arith.constant 0 : i32
    return %arg0, %c0_i32, %c0_i32_0 : i32, i32, i32
  }
}

</mosaic_0001>

<bundles_post_ra>
// kernel: deep_cnn_forward.1
= control target key start
LH: loop header
LB: loop body
LE: loop exit
PB: predicated region body
PF: predicated region fallthrough
CT: control target
= control target key end

     0   :  { %s14573_s27 = smov 0   ;;  %s18632_s0 = inlined_call_operand.vmem [shape: f32[2,256,27], index: 0, kind: input, shape index: {}]   ;;  %s18633_s1 = inlined_call_operand.vmem [shape: f32[27,32], index: 1, kind: input, shape index: {}]   ;;  %s18634_s2 = inlined_call_operand.vmem [shape: f32[1,32], index: 2, kind: input, shape index: {}]   ;;  %s18635_s3 = inlined_call_operand.vmem [shape: bf16[288,64], index: 3, kind: input, shape index: {}]   ;;  %s18636_s4 = inlined_call_operand.vmem [shape: f32[1,64], index: 4, kind: input, shape index: {}]   ;;  %s18637_s5 = inlined_call_operand.vmem [shape: bf16[576,128], index: 5, kind: input, shape index: {}]   ;;  %s18638_s6 = inlined_call_operand.vmem [shape: f32[1,128], index: 6, kind: input, shape index: {}]   ;;  %s18639_s7 = inlined_call_operand.vmem [shape: bf16[1152,256], index: 7, kind: input, shape index: {}]   ;;  %s18640_s8 = inlined_call_operand.vmem [shape: f32[1,256], index: 8, kind: input, shape index: {}]   ;;  %s18641_s9 = inlined_call_operand.vmem [shape: bf16[4096,256], index: 9, kind: input, shape index: {}]   ;;  %s18642_s10 = inlined_call_operand.vmem [shape: f32[1,256], index: 10, kind: input, shape index: {}]   ;;  %s18643_s11 = inlined_call_operand.vmem [shape: bf16[256,1], index: 11, kind: input, shape index: {}]   ;;  %s18644_s12 = inlined_call_operand.<no memory space> [shape: f32[1,1], index: 12, kind: input, shape index: {}]   ;;  %s18645_s13 = inlined_call_operand.vmem [shape: f32[2,1,1], index: 13, kind: output, shape index: {}]  }
   0x1   :  { %v18_v0 = vstv %s18644_s12 }
   0x2   :  { %19 = vst [vmem:[#allocation8] sm:$0x1] %v18_v0 }
   0x3 LB: > { %s11362_s28 = sadd.s32 4294967295, %s14491_s27   ;;  %p11366_p0 = scmp.ge.s32.totalorder %s14491_s27, 1  ;;  %s14491_s27 = sphi %s14573_s27, %s25_s27  }
   0x4   : > { %p389_p1 = scmp.lt.s32.totalorder %s14491_s27, 3 }
   0x6   : > { %p390_p2 = pnand %p11366_p0, %p389_p1 }
   0x8   : > { %393 = sbr.rel (%p390_p2) target bundleno = 2959 (0xb8f), region = 72 }
   0xf   : > { %v571_v1 = vld [vmem:[%s18633_s1] sm:$0xff]  ;;  %v572_v2 = vld [vmem:[%s18633_s1 + $0x8] sm:$0xff]  ;;  %v573_v3 = vld [vmem:[%s18633_s1 + $0x10] sm:$0xff]  ;;  %vm679_vm0 = vcmask 1042432   ;;  %p431_p3 = scmp.lt.s32.totalorder %s11362_s28, 1  ;;  %vm14493_vm1 = vmmov 1  }
  0x10   : > { %v12698_v4 = vpack.c.bf16 %v572_v2, %v571_v1  ;;  %v574_v5 = vld [vmem:[%s18633_s1 + $0x18] sm:$0x7]  ;;  %vm12703_vm2 = vmpackc.low %vm679_vm0, %vm14493_vm1  ;;  %vm582_vm3 = vcmask 220160   ;;  %vm440_vm4 = vcmask 261120   ;;  %vm443_vm5 = vcmask 254976   ;;  %s14495_s23 = smov 32  }
  0x11   : > { %v12702_v6 = vpack.c.bf16 %v574_v5, %v573_v3  ;;  %s18665_s28 = smov (!%p431_p3, %s11362_s28), 1  ;;  %v14494_v39 = vmov 0.0   ;;  %vm449_vm6 = vcmask 253952   ;;  %s14496_s24 = smov 64   ;;  %v13423_v49 = vld [vmem:[%s18635_s3 + $0x40] sm:$0xff]   ;;  %v13425_v51 = vld [vmem:[%s18635_s3 + $0x48] sm:$0xff]  }
  0x12   : > { %12699 = vmatprep.subr.bf16.mxu1 %v12698_v4  ;;  %s12313_s19 = sshll.u32 %s18665_s28, 8  ;;  %441 = vst.msk [vmem:[#allocation2] sm:$0xff] %vm440_vm4, %v14494_v39  ;;  %442 = vst.msk [vmem:[#allocation2 + $0x8] sm:$0xff] %vm440_vm4, %v14494_v39  ;;  %v13424_v50 = vld [vmem:[%s18635_s3] sm:$0xff]   ;;  %v13426_v52 = vld [vmem:[%s18635_s3 + $0x8] sm:$0xff]   ;;  %vm486_vm7 = vcmask 523264  }
  0x13   : > { %12701 = vmatpush3.bf16.msra.mxu1 %v12698_v4  ;;  %s14599_s22 = scalar_lea.vmem %s18632_s0, %s12313_s19  ;;  %446 = vst.msk [vmem:[#allocation2 + $0x198] sm:$0xff] %vm440_vm4, %v14494_v39  ;;  %447 = vst.msk [vmem:[#allocation2 + $0x1a0] sm:$0xff] %vm440_vm4, %v14494_v39  ;;  %v14791_v53 = vld [vmem:[%s18634_s2] ss:$0 sm:$0xff]  ;;  %v13427_v54 = vld [vmem:[%s18635_s3 + $0x50] sm:$0xff]   ;;  %s14497_s29 = smov 96  }
  0x14   : > { %12704 = vmatprep.subr.msk.bf16.mxu1 %vm12703_vm2, %v12702_v6  ;;  %v539_v7 = vld [vmem:[%s14599_s22] sm:$0xff]  ;;  %v540_v8 = vld [vmem:[%s14599_s22 + $0x8] sm:$0xff]  ;;  %v541_v9 = vld [vmem:[%s14599_s22 + $0x10] sm:$0xff]  ;;  %514 = vst [vmem:[#allocation6] sm:$0xff] %v14494_v39  ;;  %vm1549_vm8 = vcmask 785408   ;;  %vm488_vm9 = vcmask 517120  }
  0x15   : > { %12598 = vmatprep.mubr.msk.f32.mxu1 %vm582_vm3, %v539_v7  ;;  %v542_v10 = vld [vmem:[%s14599_s22 + $0x18] sm:$0xff]  ;;  %v543_v11 = vld [vmem:[%s14599_s22 + $0x20] sm:$0xff]  ;;  %v544_v12 = vld [vmem:[%s14599_s22 + $0x28] sm:$0xff]  ;;  %515 = vst [vmem:[#allocation6 + $0x8] sm:$0x3] %v14494_v39  ;;  %vm493_vm10 = vcmask 516096  }
  0x16   : > { %v545_v13 = vld [vmem:[%s14599_s22 + $0x30] sm:$0xff]  ;;  %v546_v14 = vld [vmem:[%s14599_s22 + $0x38] sm:$0xff]  ;;  %v547_v15 = vld [vmem:[%s14599_s22 + $0x40] sm:$0xff]  ;;  %517 = vst [vmem:[#allocation6 + $0x90] sm:$0xff] %v14494_v39  ;;  %vm4520_vm11 = vcmask 1041409   ;;  %vm4522_vm12 = vcmask 1042434  }
  0x17   : > { %12707 = vmatpush3.bf16.msk.msra.mxu1 %vm12703_vm2, %v12702_v6  ;;  %v548_v16 = vld [vmem:[%s14599_s22 + $0x48] sm:$0xff]  ;;  %v549_v17 = vld [vmem:[%s14599_s22 + $0x50] sm:$0xff]  ;;  %v550_v18 = vld [vmem:[%s14599_s22 + $0x58] sm:$0xff]  ;;  %518 = vst [vmem:[#allocation6 + $0x98] sm:$0x3] %v14494_v39  ;;  %vm4524_vm13 = vcmask 1043459  }
  0x18   : > { %v551_v19 = vld [vmem:[%s14599_s22 + $0x60] sm:$0xff]  ;;  %v552_v20 = vld [vmem:[%s14599_s22 + $0x68] sm:$0xff]  ;;  %v553_v21 = vld [vmem:[%s14599_s22 + $0x70] sm:$0xff]  ;;  %520 = vst [vmem:[#allocation6 + $0x10] sm:$0x1] %v14494_v39  ;;  %12350 = vmatprep.subr.bf16.mxu1 %v13423_v49  ;;  %vm4526_vm14 = vcmask 1044484  }
  0x19   : > { %v554_v22 = vld [vmem:[%s14599_s22 + $0x78] sm:$0xff]  ;;  %v555_v23 = vld [vmem:[%s14599_s22 + $0x80] sm:$0xff]  ;;  %v556_v24 = vld [vmem:[%s14599_s22 + $0x88] sm:$0xff]  ;;  %521 = vst [vmem:[#allocation6 + $0x20] sm:$0x1] %v14494_v39  ;;  %vm4528_vm15 = vcmask 1045509  }
  0x1a   : > { %12599 = vmatmul.mubr.msk.f32.vlgmr.msra.gmra.mrb[0].mxu1 %vm582_vm3, %v540_v8  ;;  %v557_v25 = vld [vmem:[%s14599_s22 + $0x90] sm:$0xff]  ;;  %v558_v26 = vld [vmem:[%s14599_s22 + $0x98] sm:$0xff]  ;;  %v559_v27 = vld [vmem:[%s14599_s22 + $0xa0] sm:$0xff]  ;;  %522 = vst [vmem:[#allocation6 + $0x30] sm:$0x1] %v14494_v39  ;;  %vm4530_vm0 = vcmask 1046534  }
  0x1b   : > { %12601 = vmatprep.mubr.msk.f32.mxu1 %vm582_vm3, %v541_v9  ;;  %v560_v28 = vld [vmem:[%s14599_s22 + $0xa8] sm:$0xff]  ;;  %v561_v29 = vld [vmem:[%s14599_s22 + $0xb0] sm:$0xff]  ;;  %v562_v30 = vld [vmem:[%s14599_s22 + $0xb8] sm:$0xff]  ;;  %523 = vst [vmem:[#allocation6 + $0x40] sm:$0x1] %v14494_v39  ;;  %12351 = vmatpush3.bf16.msra.mxu1 %v13424_v50  ;;  %vm4532_vm1 = vcmask 1047559  }
  0x1c   : > { %v563_v31 = vld [vmem:[%s14599_s22 + $0xc0] sm:$0xff]  ;;  %v564_v32 = vld [vmem:[%s14599_s22 + $0xc8] sm:$0xff]  ;;  %v565_v33 = vld [vmem:[%s14599_s22 + $0xd0] sm:$0xff]  ;;  %524 = vst [vmem:[#allocation6 + $0x50] sm:$0x1] %v14494_v39  ;;  %12352 = vmatprep.subr.bf16.mxu1 %v13425_v51  ;;  %vm11313_vm2 = vcmask 0  }
  0x1d   : > { %v566_v34 = vld [vmem:[%s14599_s22 + $0xd8] sm:$0xff]  ;;  %v567_v35 = vld [vmem:[%s14599_s22 + $0xe0] sm:$0xff]  ;;  %v568_v36 = vld [vmem:[%s14599_s22 + $0xe8] sm:$0xff]  ;;  %525 = vst [vmem:[#allocation6 + $0x60] sm:$0x1] %v14494_v39 }
  0x1e   : > { %12602 = vmatmul.mubr.msk.f32.gmra.mrb[2].mxu1 %vm582_vm3, %v542_v10  ;;  %v569_v37 = vld [vmem:[%s14599_s22 + $0xf0] sm:$0xff]  ;;  %v570_v38 = vld [vmem:[%s14599_s22 + $0xf8] sm:$0xff]  ;;  %526 = vst [vmem:[#allocation6 + $0x70] sm:$0x1] %v14494_v39  ;;  %527 = vst [vmem:[#allocation6 + $0x80] sm:$0x1] %v14494_v39 }
  0x1f   : > { %12604 = vmatprep.mubr.msk.f32.mxu1 %vm582_vm3, %v543_v11  ;;  %530 = vst [vmem:[#allocation6 + $0x19] sm:$0x1] %v14494_v39  ;;  %531 = vst [vmem:[#allocation6 + $0x29] sm:$0x1] %v14494_v39  ;;  %v1005_v40 = vld [vmem:[#allocation2 + $0x1] sm:$0xff]  ;;  %12353 = vmatpush3.bf16.msra.mxu1 %v13426_v52  ;;  %v13428_v55 = vld [vmem:[%s18635_s3 + $0x10] sm:$0xff]  }
  0x20   : > { %532 = vst [vmem:[#allocation6 + $0x39] sm:$0x1] %v14494_v39  ;;  %533 = vst [vmem:[#allocation6 + $0x49] sm:$0x1] %v14494_v39  ;;  %v1037_v43 = vld [vmem:[#allocation2 + $0x2] sm:$0xff]  ;;  %12354 = vmatprep.subr.bf16.mxu1 %v13427_v54  ;;  %v13429_v59 = vld [vmem:[%s18635_s3 + $0x58] sm:$0xff]  }
  0x21   : > { %534 = vst [vmem:[#allocation6 + $0x59] sm:$0x1] %v14494_v39  ;;  %535 = vst [vmem:[#allocation6 + $0x69] sm:$0x1] %v14494_v39  ;;  %v1710_v47 = vld [vmem:[#allocation2 + $0x1a0] sm:$0xff]  ;;  %v13430_v61 = vld [vmem:[%s18635_s3 + $0x18] sm:$0xff]  }
  0x22   : > { %12605 = vmatmul.mubr.msk.f32.gmra.mrb[4].mxu1 %vm582_vm3, %v544_v12  ;;  %536 = vst [vmem:[#allocation6 + $0x79] sm:$0x1] %v14494_v39  ;;  %537 = vst [vmem:[#allocation6 + $0x89] sm:$0x1] %v14494_v39  ;;  %v13431_v3 = vld [vmem:[%s18635_s3 + $0x60] sm:$0xff]   ;;  %v13433_v11 = vld [vmem:[%s18635_s3 + $0x68] sm:$0xff]  }
  0x23   : > { %12607 = vmatprep.mubr.msk.f32.mxu1 %vm582_vm3, %v545_v13  ;;  %444 = vst.msk [vmem:[#allocation2 + $0x10] sm:$0x3] %vm443_vm5, %v14494_v39  ;;  %448 = vst.msk [vmem:[#allocation2 + $0x1a8] sm:$0x3] %vm443_vm5, %v14494_v39  ;;  %12355 = vmatpush3.bf16.msra.mxu1 %v13428_v55  ;;  %v13432_v5 = vld [vmem:[%s18635_s3 + $0x20] sm:$0xff]   ;;  %v13434_v13 = vld [vmem:[%s18635_s3 + $0x28] sm:$0xff]  }
  0x24   : > { %519 = vst [vmem:[#allocation6] sm:$0x1] %v14494_v39  ;;  %528 = vst [vmem:[#allocation6 + $0x90] sm:$0x1] %v14494_v39  ;;  %12356 = vmatprep.subr.bf16.mxu1 %v13429_v59 }
  0x25   : > { %529 = vst [vmem:[#allocation6 + $0x9] sm:$0x1] %v14494_v39  ;;  %538 = vst [vmem:[#allocation6 + $0x99] sm:$0x1] %v14494_v39 }
  0x26   : > { %12608 = vmatmul.mubr.msk.f32.gmra.mrb[6].mxu1 %vm582_vm3, %v546_v14  ;;  %470 = vst.msk [vmem:[#allocation2 + $0x41] sm:$0x1] %vm449_vm6, %v14494_v39  ;;  %451 = vst.msk [vmem:[#allocation2 + $0x18] sm:$0x1] %vm449_vm6, %v14494_v39 }
  0x27   : > { %12610 = vmatprep.mubr.msk.f32.mxu1 %vm582_vm3, %v547_v15  ;;  %452 = vst.msk [vmem:[#allocation2 + $0x30] sm:$0x1] %vm449_vm6, %v14494_v39  ;;  %453 = vst.msk [vmem:[#allocation2 + $0x48] sm:$0x1] %vm449_vm6, %v14494_v39  ;;  %12357 = vmatpush3.bf16.msra.mxu1 %v13430_v61 }
  0x28   : > { %454 = vst.msk [vmem:[#allocation2 + $0x60] sm:$0x1] %vm449_vm6, %v14494_v39  ;;  %455 = vst.msk [vmem:[#allocation2 + $0x78] sm:$0x1] %vm449_vm6, %v14494_v39  ;;  %12358 = vmatprep.subr.bf16.mxu1 %v13431_v3 }
  0x29   : > { %456 = vst.msk [vmem:[#allocation2 + $0x90] sm:$0x1] %vm449_vm6, %v14494_v39  ;;  %457 = vst.msk [vmem:[#allocation2 + $0xa8] sm:$0x1] %vm449_vm6, %v14494_v39 }
  0x2a   : > { %12611 = vmatmul.mubr.msk.f32.gmra.mrb[8].mxu1 %vm582_vm3, %v548_v16  ;;  %458 = vst.msk [vmem:[#allocation2 + $0xc0] sm:$0x1] %vm449_vm6, %v14494_v39  ;;  %459 = vst.msk [vmem:[#allocation2 + $0xd8] sm:$0x1] %vm449_vm6, %v14494_v39  ;;  %v1006_v41 = vld [vmem:[#allocation2 + $0x9] sm:$0xff] }
  0x2b   : > { %12613 = vmatprep.mubr.msk.f32.mxu1 %vm582_vm3, %v549_v17  ;;  %460 = vst.msk [vmem:[#allocation2 + $0xf0] sm:$0x1] %vm449_vm6, %v14494_v39  ;;  %461 = vst.msk [vmem:[#allocation2 + $0x108] sm:$0x1] %vm449_vm6, %v14494_v39  ;;  %v12863_v42 = vpack.i.bf16 %v1006_v41, %v1005_v40  ;;  %12359 = vmatpush3.bf16.msra.mxu1 %v13432_v5 }
  0x2c   : > { %462 = vst.msk [vmem:[#allocation2 + $0x120] sm:$0x1] %vm449_vm6, %v14494_v39  ;;  %463 = vst.msk [vmem:[#allocation2 + $0x138] sm:$0x1] %vm449_vm6, %v14494_v39  ;;  %12360 = vmatprep.subr.bf16.mxu1 %v13433_v11 }
  0x2d   : > { %464 = vst.msk [vmem:[#allocation2 + $0x150] sm:$0x1] %vm449_vm6, %v14494_v39  ;;  %465 = vst.msk [vmem:[#allocation2 + $0x168] sm:$0x1] %vm449_vm6, %v14494_v39  ;;  %12864 = vrot.lane.b32.xlu0 %v12863_v42, %s14495_s23 }
  0x2e   : > { %12614 = vmatmul.mubr.msk.f32.gmra.mrb[10].mxu1 %vm582_vm3, %v550_v18  ;;  %466 = vst.msk [vmem:[#allocation2 + $0x180] sm:$0x1] %vm449_vm6, %v14494_v39  ;;  %469 = vst.msk [vmem:[#allocation2 + $0x29] sm:$0x1] %vm449_vm6, %v14494_v39 }
  0x2f   : > { %12616 = vmatprep.mubr.msk.f32.mxu1 %vm582_vm3, %v551_v19  ;;  %471 = vst.msk [vmem:[#allocation2 + $0x59] sm:$0x1] %vm449_vm6, %v14494_v39  ;;  %472 = vst.msk [vmem:[#allocation2 + $0x71] sm:$0x1] %vm449_vm6, %v14494_v39  ;;  %12361 = vmatpush3.bf16.msra.mxu1 %v13434_v13 }
  0x30   : > { %473 = vst.msk [vmem:[#allocation2 + $0x89] sm:$0x1] %vm449_vm6, %v14494_v39  ;;  %474 = vst.msk [vmem:[#allocation2 + $0xa1] sm:$0x1] %vm449_vm6, %v14494_v39 }
  0x31   : > { %475 = vst.msk [vmem:[#allocation2 + $0xb9] sm:$0x1] %vm449_vm6, %v14494_v39  ;;  %476 = vst.msk [vmem:[#allocation2 + $0xd1] sm:$0x1] %vm449_vm6, %v14494_v39 }
  0x32   : > { %12617 = vmatmul.mubr.msk.f32.gmra.mrb[12].mxu1 %vm582_vm3, %v552_v20  ;;  %477 = vst.msk [vmem:[#allocation2 + $0xe9] sm:$0x1] %vm449_vm6, %v14494_v39  ;;  %478 = vst.msk [vmem:[#allocation2 + $0x101] sm:$0x1] %vm449_vm6, %v14494_v39 }
  0x33   : > { %12619 = vmatprep.mubr.msk.f32.mxu1 %vm582_vm3, %v553_v21  ;;  %479 = vst.msk [vmem:[#allocation2 + $0x119] sm:$0x1] %vm449_vm6, %v14494_v39  ;;  %480 = vst.msk [vmem:[#allocation2 + $0x131] sm:$0x1] %vm449_vm6, %v14494_v39 }
  0x34   : > { %481 = vst.msk [vmem:[#allocation2 + $0x149] sm:$0x1] %vm449_vm6, %v14494_v39  ;;  %482 = vst.msk [vmem:[#allocation2 + $0x161] sm:$0x1] %vm449_vm6, %v14494_v39 }
  0x35   : > { %483 = vst.msk [vmem:[#allocation2 + $0x179] sm:$0x1] %vm449_vm6, %v14494_v39  ;;  %484 = vst.msk [vmem:[#allocation2 + $0x191] sm:$0x1] %vm449_vm6, %v14494_v39 }
  0x36   : > { %12620 = vmatmul.mubr.msk.f32.gmra.mrb[14].mxu1 %vm582_vm3, %v554_v22  ;;  %450 = vst.msk [vmem:[#allocation2] sm:$0x1] %vm449_vm6, %v14494_v39  ;;  %467 = vst.msk [vmem:[#allocation2 + $0x198] sm:$0x1] %vm449_vm6, %v14494_v39 }
  0x37   : > { %12622 = vmatprep.mubr.msk.f32.mxu1 %vm582_vm3, %v555_v23  ;;  %485 = vst.msk [vmem:[#allocation2 + $0x1a9] sm:$0x1] %vm449_vm6, %v14494_v39  ;;  %468 = vst.msk [vmem:[#allocation2 + $0x11] sm:$0x1] %vm449_vm6, %v14494_v39 }
  0x38   : > { %487 = vst.msk [vmem:[#allocation4] sm:$0xff] %vm486_vm7, %v14494_v39  ;;  %491 = vst.msk [vmem:[#allocation4 + $0x90] sm:$0xff] %vm486_vm7, %v14494_v39 }
  0x39   : > { %489 = vst.msk [vmem:[#allocation4 + $0x8] sm:$0x3] %vm488_vm9, %v14494_v39  ;;  %492 = vst.msk [vmem:[#allocation4 + $0x98] sm:$0x3] %vm488_vm9, %v14494_v39 }
  0x3a   : > { %12623 = vmatmul.mubr.msk.f32.gmra.mrb[16].mxu1 %vm582_vm3, %v556_v24  ;;  %494 = vst.msk [vmem:[#allocation4] sm:$0x1] %vm493_vm10, %v14494_v39  ;;  %495 = vst.msk [vmem:[#allocation4 + $0x10] sm:$0x1] %vm493_vm10, %v14494_v39 }
  0x3b   : > { %12625 = vmatprep.mubr.msk.f32.mxu1 %vm582_vm3, %v557_v25  ;;  %496 = vst.msk [vmem:[#allocation4 + $0x20] sm:$0x1] %vm493_vm10, %v14494_v39  ;;  %497 = vst.msk [vmem:[#allocation4 + $0x30] sm:$0x1] %vm493_vm10, %v14494_v39 }
  0x3c   : > { %498 = vst.msk [vmem:[#allocation4 + $0x40] sm:$0x1] %vm493_vm10, %v14494_v39  ;;  %499 = vst.msk [vmem:[#allocation4 + $0x50] sm:$0x1] %vm493_vm10, %v14494_v39 }
  0x3d   : > { %v1709_v45 = vld [vmem:[#allocation2 + $0x198] sm:$0xff]  ;;  %500 = vst.msk [vmem:[#allocation4 + $0x60] sm:$0x1] %vm493_vm10, %v14494_v39  ;;  %501 = vst.msk [vmem:[#allocation4 + $0x70] sm:$0x1] %vm493_vm10, %v14494_v39 }
  0x3e   : > { %12626 = vmatmul.mubr.msk.f32.gmra.mrb[18].mxu1 %vm582_vm3, %v558_v26  ;;  %v1038_v44 = vld [vmem:[#allocation2 + $0xa] sm:$0xff]  ;;  %v12873_v48 = vpack.i.bf16 %v1710_v47, %v1709_v45  ;;  %v13438_v45 = vld [vmem:[%s18635_s3 + $0x38] sm:$0xff]   ;;  %502 = vst.msk [vmem:[#allocation4 + $0x80] sm:$0x1] %vm493_vm10, %v14494_v39  ;;  %503 = vst.msk [vmem:[#allocation4 + $0x90] sm:$0x1] %vm493_vm10, %v14494_v39 }
  0x3f   : > { %12628 = vmatprep.mubr.msk.f32.mxu1 %vm582_vm3, %v559_v27  ;;  %v12868_v46 = vpack.i.bf16 %v1038_v44, %v1037_v43  ;;  %v13437_v44 = vld [vmem:[%s18635_s3 + $0x78] sm:$0xff]   ;;  %505 = vst.msk [vmem:[#allocation4 + $0x19] sm:$0x1] %vm493_vm10, %v14494_v39  ;;  %506 = vst.msk [vmem:[#allocation4 + $0x29] sm:$0x1] %vm493_vm10, %v14494_v39 }
  0x40   : > { %12874 = vrot.lane.b32.xlu0 %v12873_v48, %s14496_s24  ;;  %507 = vst.msk [vmem:[#allocation4 + $0x39] sm:$0x1] %vm493_vm10, %v14494_v39  ;;  %508 = vst.msk [vmem:[#allocation4 + $0x49] sm:$0x1] %vm493_vm10, %v14494_v39 }
  0x41   : > { %12869 = vrot.lane.b32.xlu1 %v12868_v46, %s14496_s24  ;;  %509 = vst.msk [vmem:[#allocation4 + $0x59] sm:$0x1] %vm493_vm10, %v14494_v39  ;;  %510 = vst.msk [vmem:[#allocation4 + $0x69] sm:$0x1] %vm493_vm10, %v14494_v39 }
  0x42   : > { %12629 = vmatmul.mubr.msk.f32.gmra.mrb[20].mxu1 %vm582_vm3, %v560_v28  ;;  %v13435_v28 = vld [vmem:[%s18635_s3 + $0x70] sm:$0xff]   ;;  %511 = vst.msk [vmem:[#allocation4 + $0x79] sm:$0x1] %vm493_vm10, %v14494_v39  ;;  %512 = vst.msk [vmem:[#allocation4 + $0x89] sm:$0x1] %vm493_vm10, %v14494_v39 }
  0x43   : > { %12631 = vmatprep.mubr.msk.f32.mxu1 %vm582_vm3, %v561_v29  ;;  %v13436_v29 = vld [vmem:[%s18635_s3 + $0x30] sm:$0xff]   ;;  %12362 = vmatprep.subr.bf16.mxu1 %v13435_v28  ;;  %504 = vst.msk [vmem:[#allocation4 + $0x9] sm:$0x1] %vm493_vm10, %v14494_v39  ;;  %513 = vst.msk [vmem:[#allocation4 + $0x99] sm:$0x1] %vm493_vm10, %v14494_v39 }
  0x44   : > { %12363 = vmatpush3.bf16.msra.mxu1 %v13436_v29 }
  0x45   : > { %12364 = vmatprep.subr.bf16.mxu1 %v13437_v44 }
  0x46   : > { %12632 = vmatmul.mubr.msk.f32.gmra.mrb[22].mxu1 %vm582_vm3, %v562_v30 }
  0x47   : > { %12634 = vmatprep.mubr.msk.f32.mxu1 %vm582_vm3, %v563_v31 }
  0x48   : > { %12365 = vmatpush3.bf16.msra.mxu1 %v13438_v45 }
  0x4a   : > { %12635 = vmatmul.mubr.msk.f32.gmra.mrb[24].mxu1 %vm582_vm3, %v564_v32 }
  0x4b   : > { %12637 = vmatprep.mubr.msk.f32.mxu1 %vm582_vm3, %v565_v33 }
  0x4e   : > { %12638 = vmatmul.mubr.msk.f32.gmra.mrb[26].mxu1 %vm582_vm3, %v566_v34 }
  0x4f   : > { %12640 = vmatprep.mubr.msk.f32.mxu1 %vm582_vm3, %v567_v35 }
  0x52   : > { %12641 = vmatmul.mubr.msk.f32.gmra.mrb[28].mxu1 %vm582_vm3, %v568_v36 }
  0x53   : > { %12643 = vmatprep.mubr.msk.f32.mxu1 %vm582_vm3, %v569_v37 }
  0x56   : > { %12644 = vmatmul.mubr.msk.f32.gmra.mrb[30].mxu1 %vm582_vm3, %v570_v38 }
  0xed   : > { %v12600_v56 = vpop.f32.mrb[0].mxu1 }
  0xee   : > { %v755_v57 = vadd.f32 %v12600_v56, %v14791_v53  ;;  %v749_v58 = vpop.f32.mrb[1].mxu1 }
  0xef   : > { %v750_v60 = vadd.f32 %v14791_v53, %v749_v58 }
  0xf0   : > { %v909_v62 = vmax.f32 %v755_v57, 0.0 }
  0xf1   : > { %v908_v63 = vmax.f32 %v750_v60, 0.0  ;;  %v12603_v0 = vpop.f32.mrb[2].mxu1 }
  0xf2   : > { %942 = vst.msk [vmem:[#allocation2 + $0x21] sm:$0xff] %vm440_vm4, %v909_v62  ;;  %v765_v1 = vadd.f32 %v12603_v0, %v14791_v53  ;;  %v759_v2 = vpop.f32.mrb[3].mxu1 }
  0xf3   : > { %941 = vst.msk [vmem:[#allocation2 + $0x19] sm:$0xff] %vm440_vm4, %v908_v63  ;;  %v760_v4 = vadd.f32 %v14791_v53, %v759_v2 }
  0xf4   : > { %v911_v6 = vmax.f32 %v765_v1, 0.0 }
  0xf5   : > { %v910_v7 = vmax.f32 %v760_v4, 0.0  ;;  %v12606_v8 = vpop.f32.mrb[4].mxu1 }
  0xf6   : > { %944 = vst.msk [vmem:[#allocation2 + $0x39] sm:$0xff] %vm440_vm4, %v911_v6  ;;  %v775_v9 = vadd.f32 %v12606_v8, %v14791_v53  ;;  %v769_v10 = vpop.f32.mrb[5].mxu1 }
  0xf7   : > { %943 = vst.msk [vmem:[#allocation2 + $0x31] sm:$0xff] %vm440_vm4, %v910_v7  ;;  %v770_v12 = vadd.f32 %v14791_v53, %v769_v10 }
  0xf8   : > { %v913_v14 = vmax.f32 %v775_v9, 0.0 }
  0xf9   : > { %v912_v15 = vmax.f32 %v770_v12, 0.0  ;;  %v1647_v16 = vld [vmem:[#allocation2 + $0x22] sm:$0xff]  ;;  %v12609_v17 = vpop.f32.mrb[6].mxu1 }
  0xfa   : > { %946 = vst.msk [vmem:[#allocation2 + $0x51] sm:$0xff] %vm440_vm4, %v913_v14  ;;  %v1646_v18 = vld [vmem:[#allocation2 + $0x1a] sm:$0xff]  ;;  %v785_v22 = vadd.f32 %v12609_v17, %v14791_v53  ;;  %v779_v23 = vpop.f32.mrb[7].mxu1 }
  0xfb   : > { %v1069_v19 = vld [vmem:[#allocation2 + $0x18] sm:$0xff]  ;;  %v1070_v20 = vld [vmem:[#allocation2 + $0x20] sm:$0xff]  ;;  %945 = vst.msk [vmem:[#allocation2 + $0x49] sm:$0xff] %vm440_vm4, %v912_v15  ;;  %v12878_v24 = vpack.i.bf16 %v1647_v16, %v1646_v18  ;;  %v780_v27 = vadd.f32 %v14791_v53, %v779_v23 }
  0xfc   : > { %v14832_v21 = vld [vmem:[#allocation2 + $0x21] sm:$0xff]  ;;  %v12883_v25 = vpack.i.bf16 %v1070_v20, %v1069_v19  ;;  %v14836_v26 = vld [vmem:[#allocation2 + $0x19] sm:$0xff]  ;;  %v915_v30 = vmax.f32 %v785_v22, 0.0 }
  0xfd   : > { %v2256_v31 = vld [vmem:[#allocation2 + $0x3a] sm:$0xff]  ;;  %12879 = vrot.lane.b32.xlu0 %v12878_v24, %s14495_s23  ;;  %v914_v33 = vmax.f32 %v780_v27, 0.0  ;;  %v12612_v34 = vpop.f32.mrb[8].mxu1  ;;  %v12888_v42 = vpack.i.bf16 %v14832_v21, %v14836_v26 }
  0xfe   : > { %12884 = vrot.lane.b32.xlu1 %v12883_v25, %s14497_s29  ;;  %v14847_v32 = vld [vmem:[#allocation2 + $0x39] sm:$0xff]  ;;  %v14849_v36 = vld [vmem:[#allocation2 + $0x31] sm:$0xff]  ;;  %948 = vst.msk [vmem:[#allocation2 + $0x69] sm:$0xff] %vm440_vm4, %v915_v30  ;;  %v795_v37 = vadd.f32 %v12612_v34, %v14791_v53  ;;  %v789_v38 = vpop.f32.mrb[9].mxu1 }
  0xff   : > { %v2255_v35 = vld [vmem:[#allocation2 + $0x32] sm:$0xff]  ;;  %v14855_v41 = vpack.i.bf16 %v14847_v32, %v14849_v36  ;;  %947 = vst.msk [vmem:[#allocation2 + $0x61] sm:$0xff] %vm440_vm4, %v914_v33  ;;  %v790_v43 = vadd.f32 %v14791_v53, %v789_v38 }
 0x100   : > { %v2287_v40 = vpack.c.bf16 %v2256_v31, %v2255_v35  ;;  %v917_v46 = vmax.f32 %v795_v37, 0.0  ;;  %v14876_v57 = vpack.i.bf16 %v2256_v31, %v2255_v35  ;;  %v1679_v58 = vld [vmem:[#allocation2 + $0x30] sm:$0xff]  ;;  %v1680_v59 = vld [vmem:[#allocation2 + $0x38] sm:$0xff] }
 0x101   : > { %v14868_v47 = vld [vmem:[#allocation2 + $0x52] sm:$0xff]  ;;  %12904 = vrot.lane.b32.xlu0 %v14855_v41, %s14497_s29  ;;  %v916_v48 = vmax.f32 %v790_v43, 0.0  ;;  %v12615_v49 = vpop.f32.mrb[10].mxu1  ;;  %v12898_v6 = vpack.i.bf16 %v1680_v59, %v1679_v58 }
 0x102   : > { %2303 = vst.msk [vmem:[#allocation3 + $0x10] sm:$0xff] %vm440_vm4, %v2287_v40  ;;  %12889 = vrot.lane.b32.xlu1 %v12888_v42, %s14495_s23  ;;  %v2257_v50 = vld [vmem:[#allocation2 + $0x4a] sm:$0xff]  ;;  %950 = vst.msk [vmem:[#allocation2 + $0x81] sm:$0xff] %vm440_vm4, %v917_v46  ;;  %v805_v54 = vadd.f32 %v12615_v49, %v14791_v53  ;;  %v799_v55 = vpop.f32.mrb[11].mxu1 }
 0x103   : > { %v1681_v51 = vld [vmem:[#allocation2 + $0x48] sm:$0xff]  ;;  %v1682_v52 = vld [vmem:[#allocation2 + $0x50] sm:$0xff]  ;;  %v2288_v56 = vpack.c.bf16 %v14868_v47, %v2257_v50  ;;  %949 = vst.msk [vmem:[#allocation2 + $0x79] sm:$0xff] %vm440_vm4, %v916_v48  ;;  %v800_v60 = vadd.f32 %v14791_v53, %v799_v55  ;;  %v14929_v31 = vpack.i.bf16 %v14868_v47, %v2257_v50 }
 0x104   : > { %v919_v61 = vmax.f32 %v805_v54, 0.0  ;;  %v14886_v63 = vpack.i.bf16 %v1682_v52, %v1681_v51  ;;  %v14896_v8 = vld [vmem:[#allocation2 + $0x49] sm:$0xff]  ;;  %v14898_v9 = vld [vmem:[#allocation2 + $0x51] sm:$0xff] }
 0x105   : > { %2304 = vst.msk [vmem:[#allocation3 + $0x28] sm:$0xff] %vm440_vm4, %v2288_v56  ;;  %v14881_v62 = vld [vmem:[#allocation2 + $0x6a] sm:$0xff]  ;;  %12909 = vrot.lane.b32.xlu0 %v14876_v57, %s14495_s23  ;;  %v918_v0 = vmax.f32 %v800_v60, 0.0  ;;  %v12618_v1 = vpop.f32.mrb[12].mxu1  ;;  %v14912_v17 = vpack.i.bf16 %v14898_v9, %v14896_v8 }
 0x106   : > { %12894 = vrot.lane.b32.xlu1 %v12878_v24, %s14496_s24  ;;  %v14888_v2 = vld [vmem:[#allocation2 + $0x62] sm:$0xff]  ;;  %952 = vst.msk [vmem:[#allocation2 + $0x99] sm:$0xff] %vm440_vm4, %v919_v61  ;;  %v815_v3 = vadd.f32 %v12618_v1, %v14791_v53  ;;  %v809_v4 = vpop.f32.mrb[13].mxu1 }
 0x107   : > { %v2289_v5 = vpack.c.bf16 %v14881_v62, %v14888_v2  ;;  %951 = vst.msk [vmem:[#allocation2 + $0x91] sm:$0xff] %vm440_vm4, %v918_v0  ;;  %v810_v7 = vadd.f32 %v14791_v53, %v809_v4  ;;  %v1683_v25 = vld [vmem:[#allocation2 + $0x60] sm:$0xff]  ;;  %v1684_v27 = vld [vmem:[#allocation2 + $0x68] sm:$0xff] }
 0x108   : > { %v921_v10 = vmax.f32 %v815_v3, 0.0  ;;  %v14939_v37 = vpack.i.bf16 %v1684_v27, %v1683_v25  ;;  %v1715_v47 = vld [vmem:[#allocation2 + $0x61] sm:$0xff]  ;;  %v1716_v48 = vld [vmem:[#allocation2 + $0x69] sm:$0xff] }
 0x109   : > { %2305 = vst.msk [vmem:[#allocation3 + $0x40] sm:$0xff] %vm440_vm4, %v2289_v5  ;;  %12929 = vrot.lane.b32.xlu0 %v14886_v63, %s14496_s24  ;;  %v14904_v11 = vld [vmem:[#allocation2 + $0x82] sm:$0xff]  ;;  %v920_v12 = vmax.f32 %v810_v7, 0.0  ;;  %v12621_v13 = vpop.f32.mrb[14].mxu1  ;;  %v14963_v58 = vpack.i.bf16 %v1716_v48, %v1715_v47 }
 0x10a   : > { %12899 = vrot.lane.b32.xlu1 %v12898_v6, %s14496_s24  ;;  %v14906_v14 = vld [vmem:[#allocation2 + $0x7a] sm:$0xff]  ;;  %954 = vst.msk [vmem:[#allocation2 + $0xb1] sm:$0xff] %vm440_vm4, %v921_v10  ;;  %v825_v15 = vadd.f32 %v12621_v13, %v14791_v53  ;;  %v819_v16 = vpop.f32.mrb[15].mxu1  ;;  %v14982_v10 = vpack.i.bf16 %v14881_v62, %v14888_v2 }
 0x10b   : > { %v2290_v18 = vpack.c.bf16 %v14904_v11, %v14906_v14  ;;  %953 = vst.msk [vmem:[#allocation2 + $0xa9] sm:$0xff] %vm440_vm4, %v920_v12  ;;  %v820_v19 = vadd.f32 %v14791_v53, %v819_v16  ;;  %v1685_v3 = vld [vmem:[#allocation2 + $0x78] sm:$0xff]  ;;  %v1686_v4 = vld [vmem:[#allocation2 + $0x80] sm:$0xff] }
 0x10c   : > { %v923_v20 = vmax.f32 %v825_v15, 0.0  ;;  %v14992_v15 = vpack.i.bf16 %v1686_v4, %v1685_v3  ;;  %v1717_v25 = vld [vmem:[#allocation2 + $0x79] sm:$0xff]  ;;  %v1718_v27 = vld [vmem:[#allocation2 + $0x81] sm:$0xff] }
 0x10d   : > { %12934 = vrot.lane.b32.xlu0 %v14912_v17, %s14497_s29  ;;  %2306 = vst.msk [vmem:[#allocation3 + $0x58] sm:$0xff] %vm440_vm4, %v2290_v18  ;;  %v14922_v22 = vld [vmem:[#allocation2 + $0x9a] sm:$0xff]  ;;  %v922_v23 = vmax.f32 %v820_v19, 0.0  ;;  %v12624_v24 = vpop.f32.mrb[16].mxu1 }
 0x10e   : > { %12914 = vrot.lane.b32.xlu1 %v12898_v6, %s14497_s29  ;;  %v14924_v28 = vld [vmem:[#allocation2 + $0x92] sm:$0xff]  ;;  %956 = vst.msk [vmem:[#allocation2 + $0xc9] sm:$0xff] %vm440_vm4, %v923_v20  ;;  %v835_v29 = vadd.f32 %v12624_v24, %v14791_v53  ;;  %v829_v30 = vpop.f32.mrb[17].mxu1 }
 0x10f   : > { %v2291_v33 = vpack.c.bf16 %v14922_v22, %v14924_v28  ;;  %955 = vst.msk [vmem:[#allocation2 + $0xc1] sm:$0xff] %vm440_vm4, %v922_v23  ;;  %v830_v34 = vadd.f32 %v14791_v53, %v829_v30 }
 0x110   : > { %v925_v35 = vmax.f32 %v835_v29, 0.0 }
 0x111   : > { %12939 = vrot.lane.b32.xlu0 %v14929_v31, %s14495_s23  ;;  %2307 = vst.msk [vmem:[#allocation3 + $0x70] sm:$0xff] %vm440_vm4, %v2291_v33  ;;  %v14942_v38 = vld [vmem:[#allocation2 + $0xb2] sm:$0xff]  ;;  %v924_v40 = vmax.f32 %v830_v34, 0.0  ;;  %v12627_v42 = vpop.f32.mrb[18].mxu1 }
 0x112   : > { %12919 = vrot.lane.b32.xlu1 %v14855_v41, %s14495_s23  ;;  %v14944_v43 = vld [vmem:[#allocation2 + $0xaa] sm:$0xff]  ;;  %958 = vst.msk [vmem:[#allocation2 + $0xe1] sm:$0xff] %vm440_vm4, %v925_v35  ;;  %v845_v44 = vadd.f32 %v12627_v42, %v14791_v53  ;;  %v839_v45 = vpop.f32.mrb[19].mxu1 }
 0x113   : > { %v2292_v46 = vpack.c.bf16 %v14942_v38, %v14944_v43  ;;  %957 = vst.msk [vmem:[#allocation2 + $0xd9] sm:$0xff] %vm440_vm4, %v924_v40  ;;  %v840_v41 = vadd.f32 %v14791_v53, %v839_v45 }
 0x114   : > { %v927_v49 = vmax.f32 %v845_v44, 0.0  ;;  %v15008_v44 = vpack.i.bf16 %v1718_v27, %v1717_v25  ;;  %v1690_v27 = vld [vmem:[#allocation2 + $0xb0] sm:$0xff] }
 0x115   : > { %12959 = vrot.lane.b32.xlu0 %v14939_v37, %s14496_s24  ;;  %2308 = vst.msk [vmem:[#allocation3 + $0x88] sm:$0xff] %vm440_vm4, %v2292_v46  ;;  %v14957_v50 = vld [vmem:[#allocation2 + $0xca] sm:$0xff]  ;;  %v926_v51 = vmax.f32 %v840_v41, 0.0  ;;  %v12630_v52 = vpop.f32.mrb[20].mxu1 }
 0x116   : > { %12924 = vrot.lane.b32.xlu1 %v14876_v57, %s14496_s24  ;;  %v14959_v54 = vld [vmem:[#allocation2 + $0xc2] sm:$0xff]  ;;  %960 = vst.msk [vmem:[#allocation2 + $0xf9] sm:$0xff] %vm440_vm4, %v927_v49  ;;  %v855_v55 = vadd.f32 %v12630_v52, %v14791_v53  ;;  %v849_v56 = vpop.f32.mrb[21].mxu1  ;;  %v1688_v52 = vld [vmem:[#allocation2 + $0x98] sm:$0xff] }
 0x117   : > { %v2293_v59 = vpack.c.bf16 %v14957_v50, %v14959_v54  ;;  %959 = vst.msk [vmem:[#allocation2 + $0xf1] sm:$0xff] %vm440_vm4, %v926_v51  ;;  %v850_v57 = vadd.f32 %v14791_v53, %v849_v56  ;;  %v1687_v51 = vld [vmem:[#allocation2 + $0x90] sm:$0xff] }
 0x118   : > { %v929_v60 = vmax.f32 %v855_v55, 0.0  ;;  %v13018_v3 = vpack.i.bf16 %v1688_v52, %v1687_v51  ;;  %v1723_v51 = vld [vmem:[#allocation2 + $0xc1] sm:$0xff]  ;;  %v1724_v52 = vld [vmem:[#allocation2 + $0xc9] sm:$0xff] }
 0x119   : > { %12964 = vrot.lane.b32.xlu0 %v14963_v58, %s14497_s29  ;;  %2309 = vst.msk [vmem:[#allocation3 + $0xa0] sm:$0xff] %vm440_vm4, %v2293_v59  ;;  %v14974_v61 = vld [vmem:[#allocation2 + $0xe2] sm:$0xff]  ;;  %v928_v0 = vmax.f32 %v850_v57, 0.0  ;;  %v12633_v1 = vpop.f32.mrb[22].mxu1  ;;  %v12998_v57 = vpack.i.bf16 %v14904_v11, %v14906_v14 }
 0x11a   : > { %12944 = vrot.lane.b32.xlu1 %v14886_v63, %s14497_s29  ;;  %v14976_v5 = vld [vmem:[#allocation2 + $0xda] sm:$0xff]  ;;  %962 = vst.msk [vmem:[#allocation2 + $0x111] sm:$0xff] %vm440_vm4, %v929_v60  ;;  %v865_v6 = vadd.f32 %v12633_v1, %v14791_v53  ;;  %v859_v7 = vpop.f32.mrb[23].mxu1 }
 0x11b   : > { %v2294_v63 = vpack.c.bf16 %v14974_v61, %v14976_v5  ;;  %961 = vst.msk [vmem:[#allocation2 + $0x109] sm:$0xff] %vm440_vm4, %v928_v0  ;;  %v860_v12 = vadd.f32 %v14791_v53, %v859_v7 }
 0x11c   : > { %v931_v13 = vmax.f32 %v865_v6, 0.0 }
 0x11d   : > { %12969 = vrot.lane.b32.xlu0 %v14982_v10, %s14495_s23  ;;  %2310 = vst.msk [vmem:[#allocation3 + $0xb8] sm:$0xff] %vm440_vm4, %v2294_v63  ;;  %v2272_v62 = vld [vmem:[#allocation2 + $0xfa] sm:$0xff]  ;;  %v930_v2 = vmax.f32 %v860_v12, 0.0  ;;  %v12636_v16 = vpop.f32.mrb[24].mxu1 }
 0x11e   : > { %12949 = vrot.lane.b32.xlu1 %v14912_v17, %s14495_s23  ;;  %v2271_v18 = vld [vmem:[#allocation2 + $0xf2] sm:$0xff]  ;;  %964 = vst.msk [vmem:[#allocation2 + $0x129] sm:$0xff] %vm440_vm4, %v931_v13  ;;  %v875_v19 = vadd.f32 %v12636_v16, %v14791_v53  ;;  %v869_v20 = vpop.f32.mrb[25].mxu1 }
 0x11f   : > { %v2295_v23 = vpack.c.bf16 %v2272_v62, %v2271_v18  ;;  %v14997_v24 = vpack.i.bf16 %v2272_v62, %v2271_v18  ;;  %963 = vst.msk [vmem:[#allocation2 + $0x121] sm:$0xff] %vm440_vm4, %v930_v2  ;;  %v870_v17 = vadd.f32 %v14791_v53, %v869_v20  ;;  %v1720_v2 = vld [vmem:[#allocation2 + $0x99] sm:$0xff] }
 0x120   : > { %v933_v29 = vmax.f32 %v875_v19, 0.0 }
 0x121   : > { %12989 = vrot.lane.b32.xlu0 %v14992_v15, %s14496_s24  ;;  %2311 = vst.msk [vmem:[#allocation3 + $0xd0] sm:$0xff] %vm440_vm4, %v2295_v23  ;;  %v2274_v30 = vld [vmem:[#allocation2 + $0x112] sm:$0xff]  ;;  %v932_v33 = vmax.f32 %v870_v17, 0.0  ;;  %v12639_v34 = vpop.f32.mrb[26].mxu1 }
 0x122   : > { %12954 = vrot.lane.b32.xlu1 %v14929_v31, %s14496_s24  ;;  %v2273_v35 = vld [vmem:[#allocation2 + $0x10a] sm:$0xff]  ;;  %966 = vst.msk [vmem:[#allocation2 + $0x141] sm:$0xff] %vm440_vm4, %v933_v29  ;;  %v885_v40 = vadd.f32 %v12639_v34, %v14791_v53  ;;  %v879_v42 = vpop.f32.mrb[27].mxu1 }
 0x123   : > { %v2296_v45 = vpack.c.bf16 %v2274_v30, %v2273_v35  ;;  %v15010_v46 = vpack.i.bf16 %v2274_v30, %v2273_v35  ;;  %965 = vst.msk [vmem:[#allocation2 + $0x139] sm:$0xff] %vm440_vm4, %v932_v33  ;;  %v880_v31 = vadd.f32 %v14791_v53, %v879_v42  ;;  %v13028_v30 = vpack.i.bf16 %v14922_v22, %v14924_v28  ;;  %v1722_v42 = vld [vmem:[#allocation2 + $0xb1] sm:$0xff]  ;;  %v1721_v28 = vld [vmem:[#allocation2 + $0xa9] sm:$0xff] }
 0x124   : > { %v935_v41 = vmax.f32 %v885_v40, 0.0 }
 0x125   : > { %12994 = vrot.lane.b32.xlu0 %v15008_v44, %s14497_s29  ;;  %2312 = vst.msk [vmem:[#allocation3 + $0xe8] sm:$0xff] %vm440_vm4, %v2296_v45  ;;  %v2276_v47 = vld [vmem:[#allocation2 + $0x12a] sm:$0xff]  ;;  %v934_v48 = vmax.f32 %v880_v31, 0.0  ;;  %v12642_v49 = vpop.f32.mrb[28].mxu1  ;;  %v1691_v31 = vld [vmem:[#allocation2 + $0xc0] sm:$0xff] }
 0x126   : > { %12974 = vrot.lane.b32.xlu1 %v14939_v37, %s14497_s29  ;;  %v2275_v55 = vld [vmem:[#allocation2 + $0x122] sm:$0xff]  ;;  %968 = vst.msk [vmem:[#allocation2 + $0x159] sm:$0xff] %vm440_vm4, %v935_v41  ;;  %v895_v56 = vadd.f32 %v12642_v49, %v14791_v53  ;;  %v889_v59 = vpop.f32.mrb[29].mxu1 }
 0x127   : > { %v2297_v60 = vpack.c.bf16 %v2276_v47, %v2275_v55  ;;  %v15023_v0 = vpack.i.bf16 %v2276_v47, %v2275_v55  ;;  %967 = vst.msk [vmem:[#allocation2 + $0x151] sm:$0xff] %vm440_vm4, %v934_v48  ;;  %v890_v37 = vadd.f32 %v14791_v53, %v889_v59  ;;  %v1692_v41 = vld [vmem:[#allocation2 + $0xc8] sm:$0xff]  ;;  %v13058_v47 = vpack.i.bf16 %v14942_v38, %v14944_v43  ;;  %v15077_v49 = vld [vmem:[%s18635_s3 + $0x80] sm:$0xff]   ;;  %v1693_v38 = vld [vmem:[#allocation2 + $0xd8] sm:$0xff] }
 0x128   : > { %v937_v1 = vmax.f32 %v895_v56, 0.0  ;;  %v13078_v48 = vpack.i.bf16 %v1692_v41, %v1691_v31  ;;  %12646 = vmatprep.subr.bf16.mxu1 %v15077_v49  ;;  %v13083_v55 = vpack.i.bf16 %v1724_v52, %v1723_v51  ;;  %v1694_v43 = vld [vmem:[#allocation2 + $0xe0] sm:$0xff]  ;;  %v13088_v56 = vpack.i.bf16 %v14957_v50, %v14959_v54 }
 0x129   : > { %12999 = vrot.lane.b32.xlu0 %v12998_v57, %s14495_s23  ;;  %2313 = vst.msk [vmem:[#allocation3 + $0x100] sm:$0xff] %vm440_vm4, %v2297_v60  ;;  %v2278_v4 = vld [vmem:[#allocation2 + $0x142] sm:$0xff]  ;;  %v936_v6 = vmax.f32 %v890_v37, 0.0  ;;  %v12645_v7 = vpop.f32.mrb[30].mxu1  ;;  %v13108_v59 = vpack.i.bf16 %v1694_v43, %v1693_v38  ;;  %v13118_v50 = vpack.i.bf16 %v14974_v61, %v14976_v5 }
 0x12a   : > { %12979 = vrot.lane.b32.xlu1 %v14963_v58, %s14495_s23  ;;  %v2277_v11 = vld [vmem:[#allocation2 + $0x13a] sm:$0xff]  ;;  %970 = vst.msk [vmem:[#allocation2 + $0x171] sm:$0xff] %vm440_vm4, %v937_v1  ;;  %v905_v14 = vadd.f32 %v12645_v7, %v14791_v53  ;;  %v899_v63 = vpop.f32.mrb[31].mxu1  ;;  %v1719_v58 = vld [vmem:[#allocation2 + $0x91] sm:$0xff]  ;;  %v1729_v5 = vld [vmem:[#allocation2 + $0x109] sm:$0xff] }
 0x12b   : > { %v2298_v12 = vpack.c.bf16 %v2278_v4, %v2277_v11  ;;  %v15033_v13 = vpack.i.bf16 %v2278_v4, %v2277_v11  ;;  %969 = vst.msk [vmem:[#allocation2 + $0x169] sm:$0xff] %vm440_vm4, %v936_v6  ;;  %v900_v62 = vadd.f32 %v14791_v53, %v899_v63  ;;  %v13023_v23 = vpack.i.bf16 %v1720_v2, %v1719_v58  ;;  %v1726_v60 = vld [vmem:[#allocation2 + $0xe1] sm:$0xff]  ;;  %v1695_v1 = vld [vmem:[#allocation2 + $0xf0] sm:$0xff]  ;;  %v1728_v6 = vld [vmem:[#allocation2 + $0xf9] sm:$0xff]  ;;  %v12865_v63 = vpop.permute.xlu0 %12864 }
 0x12c   : > { %v939_v16 = vmax.f32 %v905_v14, 0.0  ;;  %v1727_v4 = vld [vmem:[#allocation2 + $0xf1] sm:$0xff]  ;;  %v1697_v11 = vld [vmem:[#allocation2 + $0x108] sm:$0xff]  ;;  %v12867_v2 = vunpack.i.h.bf16 %v12865_v63 }
 0x12d   : > { %13019 = vrot.lane.b32.xlu0 %v13018_v3, %s14496_s24  ;;  %2314 = vst.msk [vmem:[#allocation3 + $0x118] sm:$0xff] %vm440_vm4, %v2298_v12  ;;  %v2280_v18 = vld [vmem:[#allocation2 + $0x15a] sm:$0xff]  ;;  %v938_v19 = vmax.f32 %v900_v62, 0.0  ;;  %v13143_v7 = vpack.i.bf16 %v1728_v6, %v1727_v4  ;;  %v1698_v14 = vld [vmem:[#allocation2 + $0x110] sm:$0xff]  ;;  %v12870_v62 = vpop.permute.xlu1 %12869 }
 0x12e   : > { %12984 = vrot.lane.b32.xlu1 %v14982_v10, %s14496_s24  ;;  %v2279_v20 = vld [vmem:[#allocation2 + $0x152] sm:$0xff]  ;;  %972 = vst.msk [vmem:[#allocation2 + $0x189] sm:$0xff] %vm440_vm4, %v939_v16  ;;  %v1689_v10 = vld [vmem:[#allocation2 + $0xa8] sm:$0xff]  ;;  %v13168_v61 = vpack.i.bf16 %v1698_v14, %v1697_v11  ;;  %v12866_v16 = vunpack.i.l.bf16 %v12865_v63 }
 0x12f   : > { %v2299_v17 = vpack.c.bf16 %v2280_v18, %v2279_v20  ;;  %v15042_v25 = vpack.i.bf16 %v2280_v18, %v2279_v20  ;;  %971 = vst.msk [vmem:[#allocation2 + $0x181] sm:$0xff] %vm440_vm4, %v938_v19  ;;  %v13048_v35 = vpack.i.bf16 %v1690_v27, %v1689_v10  ;;  %v1730_v12 = vld [vmem:[#allocation2 + $0x111] sm:$0xff]  ;;  %v15105_v58 = vpop.permute.xlu0 %12874  ;;  %v974_v18 = vld [vmem:[#allocation2 + $0x8] sm:$0xff]  ;;  %v973_v19 = vld [vmem:[#allocation2] sm:$0xff] }
 0x130   : > { %v13173_v20 = vpack.i.bf16 %v1730_v12, %v1729_v5  ;;  %v1485_v10 = vsel %vm440_vm4, %v973_v19, %v12866_v16  ;;  %v1699_v27 = vld [vmem:[#allocation2 + $0x120] sm:$0xff] }
 0x131   : > { %13024 = vrot.lane.b32.xlu0 %v13023_v23, %s14497_s29  ;;  %2315 = vst.msk [vmem:[#allocation3 + $0x130] sm:$0xff] %vm440_vm4, %v2299_v17  ;;  %v2282_v53 = vld [vmem:[#allocation2 + $0x172] sm:$0xff]  ;;  %v12871_v17 = vunpack.i.l.bf16 %v12870_v62  ;;  %v1731_v52 = vld [vmem:[#allocation2 + $0x121] sm:$0xff] }
 0x132   : > { %13004 = vrot.lane.b32.xlu1 %v14992_v15, %s14497_s29  ;;  %v2281_v29 = vld [vmem:[#allocation2 + $0x16a] sm:$0xff] }
 0x133   : > { %v2300_v33 = vpack.c.bf16 %v2282_v53, %v2281_v29  ;;  %v15051_v34 = vpack.i.bf16 %v2282_v53, %v2281_v29  ;;  %v1486_v53 = vsel %vm440_vm4, %v974_v18, %v12867_v2  ;;  %v1700_v29 = vld [vmem:[#allocation2 + $0x128] sm:$0xff] }
 0x135   : > { %13029 = vrot.lane.b32.xlu0 %v13028_v30, %s14495_s23  ;;  %2316 = vst.msk [vmem:[#allocation3 + $0x148] sm:$0xff] %vm440_vm4, %v2300_v33  ;;  %v15057_v15 = vld [vmem:[#allocation2 + $0x18a] sm:$0xff] }
 0x136   : > { %13009 = vrot.lane.b32.xlu1 %v15008_v44, %s14495_s23  ;;  %v15059_v40 = vld [vmem:[#allocation2 + $0x182] sm:$0xff]  ;;  %v13053_v44 = vpack.i.bf16 %v1722_v42, %v1721_v28 }
 0x137   : > { %v2301_v45 = vpack.c.bf16 %v15057_v15, %v15059_v40  ;;  %v13328_v22 = vpack.i.bf16 %v15057_v15, %v15059_v40 }
 0x139   : > { %13049 = vrot.lane.b32.xlu0 %v13048_v35, %s14496_s24  ;;  %2317 = vst.msk [vmem:[#allocation3 + $0x160] sm:$0xff] %vm440_vm4, %v2301_v45  ;;  %v1517_v45 = vsel %vm486_vm7, %v1485_v10, %v12871_v17 }
 0x13a   : > { %13014 = vrot.lane.b32.xlu1 %v12998_v57, %s14496_s24  ;;  %v1725_v57 = vld [vmem:[#allocation2 + $0xd9] sm:$0xff] }
 0x13b   : > { %v13113_v37 = vpack.i.bf16 %v1726_v60, %v1725_v57  ;;  %v1701_v60 = vld [vmem:[#allocation2 + $0x138] sm:$0xff] }
 0x13d   : > { %13054 = vrot.lane.b32.xlu0 %v13053_v44, %s14497_s29 }
 0x13e   : > { %13034 = vrot.lane.b32.xlu1 %v13018_v3, %s14497_s29  ;;  %v1696_v3 = vld [vmem:[#allocation2 + $0xf8] sm:$0xff] }
 0x13f   : > { %v13138_v54 = vpack.i.bf16 %v1696_v3, %v1695_v1 }
 0x141   : > { %13059 = vrot.lane.b32.xlu0 %v13058_v47, %s14495_s23 }
 0x142   : > { %13039 = vrot.lane.b32.xlu1 %v13023_v23, %s14495_s23  ;;  %v12872_v23 = vunpack.i.h.bf16 %v12870_v62  ;;  %v14481_v62 = vld [vmem:[#allocation2 + $0x18] sm:$0xff] }
 0x144   : > { %v1518_v28 = vsel %vm486_vm7, %v1486_v53, %v12872_v23 }
 0x145   : > { %13079 = vrot.lane.b32.xlu0 %v13078_v48, %s14496_s24 }
 0x146   : > { %13044 = vrot.lane.b32.xlu1 %v13028_v30, %s14496_s24 }
 0x149   : > { %13084 = vrot.lane.b32.xlu0 %v13083_v55, %s14497_s29 }
 0x14a   : > { %13064 = vrot.lane.b32.xlu1 %v13048_v35, %s14497_s29 }
 0x14d   : > { %13089 = vrot.lane.b32.xlu0 %v13088_v56, %s14495_s23 }
 0x14e   : > { %13069 = vrot.lane.b32.xlu1 %v13053_v44, %s14495_s23  ;;  %v15116_v44 = vpack.i.bf16 %v1700_v29, %v1699_v27 }
 0x151   : > { %13109 = vrot.lane.b32.xlu0 %v13108_v59, %s14496_s24 }
 0x152   : > { %13074 = vrot.lane.b32.xlu1 %v13058_v47, %s14496_s24 }
 0x155   : > { %13114 = vrot.lane.b32.xlu0 %v13113_v37, %s14497_s29 }
 0x156   : > { %13094 = vrot.lane.b32.xlu1 %v13078_v48, %s14497_s29 }
 0x159   : > { %13119 = vrot.lane.b32.xlu0 %v13118_v50, %s14495_s23 }
 0x15a   : > { %13099 = vrot.lane.b32.xlu1 %v13083_v55, %s14495_s23  ;;  %v1732_v55 = vld [vmem:[#allocation2 + $0x129] sm:$0xff] }
 0x15b   : > { %v15130_v57 = vpack.i.bf16 %v1732_v55, %v1731_v52 }
 0x15d   : > { %13139 = vrot.lane.b32.xlu0 %v13138_v54, %s14496_s24 }
 0x15e   : > { %13104 = vrot.lane.b32.xlu1 %v13088_v56, %s14496_s24 }
 0x161   : > { %13144 = vrot.lane.b32.xlu0 %v13143_v7, %s14497_s29 }
 0x162   : > { %13124 = vrot.lane.b32.xlu1 %v13108_v59, %s14497_s29 }
 0x165   : > { %13149 = vrot.lane.b32.xlu0 %v14997_v24, %s14495_s23 }
 0x166   : > { %13129 = vrot.lane.b32.xlu1 %v13113_v37, %s14495_s23  ;;  %v1702_v37 = vld [vmem:[#allocation2 + $0x140] sm:$0xff] }
 0x169   : > { %13169 = vrot.lane.b32.xlu0 %v13168_v61, %s14496_s24 }
 0x16a   : > { %13134 = vrot.lane.b32.xlu1 %v13118_v50, %s14496_s24  ;;  %v15135_v50 = vpack.i.bf16 %v1702_v37, %v1701_v60 }
 0x16d   : > { %13174 = vrot.lane.b32.xlu0 %v13173_v20, %s14497_s29 }
 0x16e   : > { %13154 = vrot.lane.b32.xlu1 %v13138_v54, %s14497_s29 }
 0x16f   : > { %v12880_v30 = vpop.permute.xlu0 %12879 }
 0x170   : > { %v12885_v33 = vpop.permute.xlu1 %12884  ;;  %v12882_v38 = vunpack.i.h.bf16 %v12880_v30  ;;  %v12881_v43 = vunpack.i.l.bf16 %v12880_v30 }
 0x171   : > { %v12887_v35 = vunpack.i.h.bf16 %v12885_v33  ;;  %v12886_v42 = vunpack.i.l.bf16 %v12885_v33  ;;  %13179 = vrot.lane.b32.xlu0 %v15010_v46, %s14495_s23 }
 0x172   : > { %13159 = vrot.lane.b32.xlu1 %v13143_v7, %s14495_s23  ;;  %v2127_v54 = vsel %vm440_vm4, %v14836_v26, %v12881_v43 }
 0x173   : > { %v15119_v31 = vsel %vm1549_vm8, %v1518_v28, %v12887_v35  ;;  %v15122_v41 = vsel %vm1549_vm8, %v1517_v45, %v12886_v42  ;;  %v12905_v48 = vpop.permute.xlu0 %12904  ;;  %v1733_v28 = vld [vmem:[#allocation2 + $0x139] sm:$0xff] }
 0x174   : > { %v1582_v47 = vpack.c.bf16 %v15119_v31, %v15122_v41  ;;  %v12890_v51 = vpop.permute.xlu1 %12889  ;;  %v12907_v14 = vunpack.i.h.bf16 %v12905_v48  ;;  %v12906_v63 = vunpack.i.l.bf16 %v12905_v48  ;;  %v1734_v48 = vld [vmem:[#allocation2 + $0x141] sm:$0xff] }
 0x175   : > { %13199 = vrot.lane.b32.xlu0 %v15116_v44, %s14496_s24  ;;  %v12891_v1 = vunpack.i.l.bf16 %v12890_v51  ;;  %v12892_v3 = vunpack.i.h.bf16 %v12890_v51 }
 0x176   : > { %13164 = vrot.lane.b32.xlu1 %v14997_v24, %s14496_s24  ;;  %v2128_v24 = vsel %vm440_vm4, %v14832_v21, %v12882_v38  ;;  %v14482_v21 = vld [vmem:[#allocation2 + $0x20] sm:$0xff] }
 0x177   : > { %v12910_v56 = vpop.permute.xlu0 %12909  ;;  %v1488_v26 = vsel %vm440_vm4, %v14482_v21, %v12892_v3 }
 0x178   : > { %v12895_v59 = vpop.permute.xlu1 %12894  ;;  %v12912_v4 = vunpack.i.h.bf16 %v12910_v56  ;;  %v12911_v6 = vunpack.i.l.bf16 %v12910_v56 }
 0x179   : > { %13204 = vrot.lane.b32.xlu0 %v15130_v57, %s14497_s29  ;;  %v12897_v2 = vunpack.i.h.bf16 %v12895_v59  ;;  %v12896_v19 = vunpack.i.l.bf16 %v12895_v59  ;;  %v13440_v59 = vld [vmem:[%s18635_s3 + $0x88] sm:$0xff]  }
 0x17a   : > { %13184 = vrot.lane.b32.xlu1 %v13168_v61, %s14497_s29  ;;  %v1487_v61 = vsel %vm440_vm4, %v14481_v62, %v12891_v1  ;;  %v2130_v53 = vsel %vm440_vm4, %v14847_v32, %v12912_v4  ;;  %v2129_v10 = vsel %vm440_vm4, %v14849_v36, %v12911_v6  ;;  %v1703_v4 = vld [vmem:[#allocation2 + $0x150] sm:$0xff]  ;;  %v1704_v6 = vld [vmem:[#allocation2 + $0x158] sm:$0xff] }
 0x17b   : > { %v12930_v7 = vpop.permute.xlu0 %12929  ;;  %v1520_v51 = vsel %vm486_vm7, %v1488_v26, %v12897_v2  ;;  %v1519_v36 = vsel %vm486_vm7, %v1487_v61, %v12896_v19  ;;  %v14483_v61 = vld [vmem:[#allocation2 + $0x38] sm:$0xff] }
 0x17c   : > { %v12900_v11 = vpop.permute.xlu1 %12899  ;;  %v12932_v16 = vunpack.i.h.bf16 %v12930_v7  ;;  %v12931_v18 = vunpack.i.l.bf16 %v12930_v7 }
 0x17d   : > { %v12902_v5 = vunpack.i.h.bf16 %v12900_v11  ;;  %v12901_v12 = vunpack.i.l.bf16 %v12900_v11  ;;  %13209 = vrot.lane.b32.xlu0 %v15023_v0, %s14495_s23 }
 0x17e   : > { %13189 = vrot.lane.b32.xlu1 %v13173_v20, %s14495_s23  ;;  %v2161_v52 = vsel %vm486_vm7, %v2129_v10, %v12931_v18  ;;  %v2162_v32 = vsel %vm486_vm7, %v2130_v53, %v12932_v16  ;;  %v14484_v16 = vld [vmem:[#allocation2 + $0x30] sm:$0xff] }
 0x17f   : > { %v2160_v23 = vsel %vm486_vm7, %v2128_v24, %v12902_v5  ;;  %v2159_v17 = vsel %vm486_vm7, %v2127_v54, %v12901_v12  ;;  %v12935_v30 = vpop.permute.xlu0 %12934  ;;  %v15169_v24 = vpack.i.bf16 %v1734_v48, %v1733_v28  ;;  %v15192_v10 = vld [vmem:[#allocation2 + $0x151] sm:$0xff] }
 0x180   : > { %v2192_v27 = vsel %vm1549_vm8, %v2160_v23, %v12907_v14  ;;  %v2191_v29 = vsel %vm1549_vm8, %v2159_v17, %v12906_v63  ;;  %v12915_v20 = vpop.permute.xlu1 %12914  ;;  %v12937_v35 = vunpack.i.h.bf16 %v12935_v30  ;;  %v12936_v42 = vunpack.i.l.bf16 %v12935_v30 }
 0x181   : > { %v2223_v33 = vpack.c.bf16 %v2192_v27, %v2191_v29  ;;  %v12917_v45 = vunpack.i.h.bf16 %v12915_v20  ;;  %v12916_v55 = vunpack.i.l.bf16 %v12915_v20  ;;  %13229 = vrot.lane.b32.xlu0 %v15135_v50, %s14496_s24 }
 0x182   : > { %13194 = vrot.lane.b32.xlu1 %v15010_v46, %s14496_s24  ;;  %v2193_v38 = vsel %vm1549_vm8, %v2161_v52, %v12936_v42  ;;  %v2194_v43 = vsel %vm1549_vm8, %v2162_v32, %v12937_v35  ;;  %v1705_v52 = vld [vmem:[#allocation2 + $0x168] sm:$0xff]  ;;  %v1706_v32 = vld [vmem:[#allocation2 + $0x170] sm:$0xff] }
 0x183   : > { %v1553_v56 = vsel %vm1549_vm8, %v1520_v51, %v12917_v45  ;;  %2598 = vmatprep.mubr.bf16.mxu1 %v2223_v33  ;;  %v2224_v60 = vpack.c.bf16 %v2194_v43, %v2193_v38  ;;  %v1552_v37 = vsel %vm1549_vm8, %v1519_v36, %v12916_v55  ;;  %v12940_v1 = vpop.permute.xlu0 %12939 }
 0x184   : > { %v12920_v3 = vpop.permute.xlu1 %12919  ;;  %2599 = vmatmul.mubr.bf16.vlgmr.msra.gmra.mrb[32].mxu1 %v1582_v47  ;;  %v1583_v46 = vpack.c.bf16 %v1553_v56, %v1552_v37  ;;  %v12941_v54 = vunpack.i.l.bf16 %v12940_v1  ;;  %v12942_v7 = vunpack.i.h.bf16 %v12940_v1 }
 0x185   : > { %12647 = vmatpush3.bf16.msra.mxu1 %v15077_v49  ;;  %13234 = vrot.lane.b32.xlu0 %v15169_v24, %s14497_s29  ;;  %v12922_v11 = vunpack.i.h.bf16 %v12920_v3  ;;  %v12921_v14 = vunpack.i.l.bf16 %v12920_v3 }
 0x186   : > { %13214 = vrot.lane.b32.xlu1 %v15116_v44, %s14497_s29  ;;  %2606 = vmatprep.mubr.bf16.mxu1 %v2224_v60  ;;  %v15183_v44 = vpack.i.bf16 %v1704_v6, %v1703_v4  ;;  %v2131_v12 = vsel %vm440_vm4, %v14896_v8, %v12941_v54  ;;  %v2132_v62 = vsel %vm440_vm4, %v14898_v9, %v12942_v7  ;;  %v15194_v8 = vld [vmem:[#allocation2 + $0x159] sm:$0xff]  ;;  %v1620_v60 = vld [vmem:[#allocation2 + $0x61] sm:$0xff]  ;;  %v980_v6 = vld [vmem:[#allocation2 + $0x50] sm:$0xff] }
 0x187   : > { %12648 = vmatprep.subr.bf16.mxu1 %v13440_v59  ;;  %v12960_v63 = vpop.permute.xlu0 %12959  ;;  %v1490_v2 = vsel %vm440_vm4, %v14483_v61, %v12922_v11  ;;  %v1489_v18 = vsel %vm440_vm4, %v14484_v16, %v12921_v14  ;;  %v15209_v51 = vpack.i.bf16 %v15194_v8, %v15192_v10  ;;  %v979_v4 = vld [vmem:[#allocation2 + $0x48] sm:$0xff] }
 0x188   : > { %v12925_v31 = vpop.permute.xlu1 %12924  ;;  %v12961_v41 = vunpack.i.l.bf16 %v12960_v63  ;;  %v12962_v47 = vunpack.i.h.bf16 %v12960_v63 }
 0x189   : > { %12649 = vmatpush3.bf16.msra.mxu1 %v13440_v59  ;;  %v12927_v49 = vunpack.i.h.bf16 %v12925_v31  ;;  %v12926_v5 = vunpack.i.l.bf16 %v12925_v31  ;;  %13239 = vrot.lane.b32.xlu0 %v15033_v13, %s14495_s23 }
 0x18a   : > { %13219 = vrot.lane.b32.xlu1 %v15130_v57, %s14495_s23  ;;  %v2163_v21 = vsel %vm486_vm7, %v2131_v12, %v12961_v41  ;;  %v2164_v9 = vsel %vm486_vm7, %v2132_v62, %v12962_v47  ;;  %v15226_v12 = vld [vmem:[#allocation2 + $0x169] sm:$0xff]  ;;  %v15228_v62 = vld [vmem:[#allocation2 + $0x171] sm:$0xff] }
 0x18b   : > { %v12965_v26 = vpop.permute.xlu0 %12964  ;;  %v1521_v27 = vsel %vm486_vm7, %v1489_v18, %v12926_v5  ;;  %v1522_v29 = vsel %vm486_vm7, %v1490_v2, %v12927_v49 }
 0x18c   : > { %v12945_v19 = vpop.permute.xlu1 %12944  ;;  %2607 = vmatmul.mubr.bf16.gmra.mrb[36].mxu1 %v1583_v46  ;;  %v12967_v57 = vunpack.i.h.bf16 %v12965_v26  ;;  %v12966_v23 = vunpack.i.l.bf16 %v12965_v26  ;;  %v1621_v46 = vld [vmem:[#allocation2 + $0x69] sm:$0xff] }
 0x18d   : > { %v12947_v17 = vunpack.i.h.bf16 %v12945_v19  ;;  %v12946_v53 = vunpack.i.l.bf16 %v12945_v19  ;;  %13259 = vrot.lane.b32.xlu0 %v15183_v44, %s14496_s24 }
 0x18e   : > { %13224 = vrot.lane.b32.xlu1 %v15023_v0, %s14496_s24  ;;  %v2195_v30 = vsel %vm1549_vm8, %v2163_v21, %v12966_v23  ;;  %v2196_v20 = vsel %vm1549_vm8, %v2164_v9, %v12967_v57  ;;  %v15243_v9 = vpack.i.bf16 %v15228_v62, %v15226_v12 }
 0x18f   : > { %v1554_v33 = vsel %vm1549_vm8, %v1521_v27, %v12946_v53  ;;  %v1555_v35 = vsel %vm1549_vm8, %v1522_v29, %v12947_v17  ;;  %v2225_v42 = vpack.c.bf16 %v2196_v20, %v2195_v30  ;;  %v12970_v28 = vpop.permute.xlu0 %12969  ;;  %v1707_v27 = vld [vmem:[#allocation2 + $0x180] sm:$0xff]  ;;  %v1708_v29 = vld [vmem:[#allocation2 + $0x188] sm:$0xff] }
 0x190   : > { %v1584_v45 = vpack.c.bf16 %v1555_v35, %v1554_v33  ;;  %v12950_v48 = vpop.permute.xlu1 %12949  ;;  %v12971_v0 = vunpack.i.l.bf16 %v12970_v28  ;;  %v12972_v55 = vunpack.i.h.bf16 %v12970_v28  ;;  %v1622_v28 = vld [vmem:[#allocation2 + $0x79] sm:$0xff] }
 0x191   : > { %13264 = vrot.lane.b32.xlu0 %v15209_v51, %s14497_s29  ;;  %2614 = vmatprep.mubr.bf16.mxu1 %v2225_v42  ;;  %v12952_v36 = vunpack.i.h.bf16 %v12950_v48  ;;  %v12951_v38 = vunpack.i.l.bf16 %v12950_v48 }
 0x192   : > { %13244 = vrot.lane.b32.xlu1 %v15135_v50, %s14497_s29  ;;  %v15219_v50 = vpack.i.bf16 %v1706_v32, %v1705_v52  ;;  %v2133_v54 = vsel %vm440_vm4, %v1620_v60, %v12971_v0  ;;  %v2134_v7 = vsel %vm440_vm4, %v1621_v46, %v12972_v55  ;;  %v1623_v32 = vld [vmem:[#allocation2 + $0x81] sm:$0xff] }
 0x193   : > { %v12990_v43 = vpop.permute.xlu0 %12989  ;;  %v1492_v11 = vsel %vm440_vm4, %v980_v6, %v12952_v36  ;;  %v1491_v14 = vsel %vm440_vm4, %v979_v4, %v12951_v38  ;;  %v981_v36 = vld [vmem:[#allocation2 + $0x60] sm:$0xff]  ;;  %v982_v38 = vld [vmem:[#allocation2 + $0x68] sm:$0xff] }
 0x194   : > { %v12955_v56 = vpop.permute.xlu1 %12954  ;;  %2615 = vmatmul.mubr.bf16.gmra.mrb[40].mxu1 %v1584_v45  ;;  %v12991_v59 = vunpack.i.l.bf16 %v12990_v43  ;;  %v12992_v37 = vunpack.i.h.bf16 %v12990_v43  ;;  %v15260_v4 = vld [vmem:[#allocation2 + $0x181] sm:$0xff]  ;;  %v15262_v6 = vld [vmem:[#allocation2 + $0x189] sm:$0xff] }
 0x195   : > { %v12957_v1 = vunpack.i.h.bf16 %v12955_v56  ;;  %v12956_v3 = vunpack.i.l.bf16 %v12955_v56  ;;  %13269 = vrot.lane.b32.xlu0 %v15042_v25, %s14495_s23 }
 0x196   : > { %13249 = vrot.lane.b32.xlu1 %v15169_v24, %s14495_s23  ;;  %v2165_v63 = vsel %vm486_vm7, %v2133_v54, %v12991_v59  ;;  %v2166_v61 = vsel %vm486_vm7, %v2134_v7, %v12992_v37 }
 0x197   : > { %v12995_v31 = vpop.permute.xlu0 %12994  ;;  %v1523_v2 = vsel %vm486_vm7, %v1491_v14, %v12956_v3  ;;  %v1524_v16 = vsel %vm486_vm7, %v1492_v11, %v12957_v1 }
 0x198   : > { %v12975_v41 = vpop.permute.xlu1 %12974  ;;  %v12997_v47 = vunpack.i.h.bf16 %v12995_v31  ;;  %v12996_v49 = vunpack.i.l.bf16 %v12995_v31 }
 0x199   : > { %v12977_v24 = vunpack.i.h.bf16 %v12975_v41  ;;  %v12976_v5 = vunpack.i.l.bf16 %v12975_v41  ;;  %13289 = vrot.lane.b32.xlu0 %v15219_v50, %s14496_s24 }
 0x19a   : > { %13254 = vrot.lane.b32.xlu1 %v15033_v13, %s14496_s24  ;;  %v2197_v18 = vsel %vm1549_vm8, %v2165_v63, %v12996_v49  ;;  %v2198_v21 = vsel %vm1549_vm8, %v2166_v61, %v12997_v47 }
 0x19b   : > { %v1556_v26 = vsel %vm1549_vm8, %v1523_v2, %v12976_v5  ;;  %v1557_v19 = vsel %vm1549_vm8, %v1524_v16, %v12977_v24  ;;  %v2226_v57 = vpack.c.bf16 %v2198_v21, %v2197_v18  ;;  %v13000_v17 = vpop.permute.xlu0 %12999  ;;  %v13323_v2 = vpack.i.bf16 %v15262_v6, %v15260_v4  ;;  %v1741_v16 = vld [vmem:[#allocation2 + $0x199] sm:$0xff]  ;;  %v1742_v18 = vld [vmem:[#allocation2 + $0x1a1] sm:$0xff] }
 0x19c   : > { %v1585_v23 = vpack.c.bf16 %v1557_v19, %v1556_v26  ;;  %v12980_v53 = vpop.permute.xlu1 %12979  ;;  %v13001_v13 = vunpack.i.l.bf16 %v13000_v17  ;;  %v13002_v30 = vunpack.i.h.bf16 %v13000_v17 }
 0x19d   : > { %13294 = vrot.lane.b32.xlu0 %v15243_v9, %s14497_s29  ;;  %2622 = vmatprep.mubr.bf16.mxu1 %v2226_v57  ;;  %v12982_v20 = vunpack.i.h.bf16 %v12980_v53  ;;  %v12981_v33 = vunpack.i.l.bf16 %v12980_v53  ;;  %v1624_v53 = vld [vmem:[#allocation2 + $0x91] sm:$0xff] }
 0x19e   : > { %13274 = vrot.lane.b32.xlu1 %v15183_v44, %s14497_s29  ;;  %2623 = vmatmul.mubr.bf16.gmra.mrb[44].mxu1 %v1585_v23  ;;  %v15253_v44 = vpack.i.bf16 %v1708_v29, %v1707_v27  ;;  %v2135_v55 = vsel %vm440_vm4, %v1622_v28, %v13001_v13  ;;  %v2136_v43 = vsel %vm440_vm4, %v1623_v32, %v13002_v30  ;;  %v1625_v30 = vld [vmem:[#allocation2 + $0x99] sm:$0xff] }
 0x19f   : > { %v13020_v35 = vpop.permute.xlu0 %13019  ;;  %v1494_v56 = vsel %vm440_vm4, %v982_v38, %v12982_v20  ;;  %v1493_v59 = vsel %vm440_vm4, %v981_v36, %v12981_v33  ;;  %v983_v33 = vld [vmem:[#allocation2 + $0x78] sm:$0xff] }
 0x1a0   : > { %v12985_v42 = vpop.permute.xlu1 %12984  ;;  %v13021_v45 = vunpack.i.l.bf16 %v13020_v35  ;;  %v13022_v48 = vunpack.i.h.bf16 %v13020_v35  ;;  %v984_v35 = vld [vmem:[#allocation2 + $0x80] sm:$0xff] }
 0x1a1   : > { %v12987_v0 = vunpack.i.h.bf16 %v12985_v42  ;;  %v12986_v52 = vunpack.i.l.bf16 %v12985_v42  ;;  %13299 = vrot.lane.b32.xlu0 %v15051_v34, %s14495_s23 }
 0x1a2   : > { %13279 = vrot.lane.b32.xlu1 %v15209_v51, %s14495_s23  ;;  %v2167_v60 = vsel %vm486_vm7, %v2135_v55, %v13021_v45  ;;  %v2168_v7 = vsel %vm486_vm7, %v2136_v43, %v13022_v48 }
 0x1a3   : > { %v13025_v37 = vpop.permute.xlu0 %13024  ;;  %v1525_v11 = vsel %vm486_vm7, %v1493_v59, %v12986_v52  ;;  %v1526_v14 = vsel %vm486_vm7, %v1494_v56, %v12987_v0 }
 0x1a4   : > { %v13005_v1 = vpop.permute.xlu1 %13004  ;;  %v13027_v3 = vunpack.i.h.bf16 %v13025_v37  ;;  %v13026_v46 = vunpack.i.l.bf16 %v13025_v37 }
 0x1a5   : > { %v13007_v51 = vunpack.i.h.bf16 %v13005_v1  ;;  %v13006_v54 = vunpack.i.l.bf16 %v13005_v1  ;;  %13319 = vrot.lane.b32.xlu0 %v15253_v44, %s14496_s24 }
 0x1a6   : > { %13284 = vrot.lane.b32.xlu1 %v15042_v25, %s14496_s24  ;;  %v2199_v63 = vsel %vm1549_vm8, %v2167_v60, %v13026_v46  ;;  %v2200_v31 = vsel %vm1549_vm8, %v2168_v7, %v13027_v3 }
 0x1a7   : > { %v1558_v41 = vsel %vm1549_vm8, %v1525_v11, %v13006_v54  ;;  %v1559_v47 = vsel %vm1549_vm8, %v1526_v14, %v13007_v51  ;;  %v2227_v49 = vpack.c.bf16 %v2200_v31, %v2199_v63  ;;  %v13030_v5 = vpop.permute.xlu0 %13029  ;;  %v985_v14 = vld [vmem:[#allocation2 + $0x90] sm:$0xff] }
 0x1a8   : > { %v1586_v24 = vpack.c.bf16 %v1559_v47, %v1558_v41  ;;  %v13010_v61 = vpop.permute.xlu1 %13009  ;;  %v13031_v25 = vunpack.i.l.bf16 %v13030_v5  ;;  %v13032_v21 = vunpack.i.h.bf16 %v13030_v5  ;;  %v986_v5 = vld [vmem:[#allocation2 + $0x98] sm:$0xff] }
 0x1a9   : > { %13324 = vrot.lane.b32.xlu0 %v13323_v2, %s14497_s29  ;;  %2630 = vmatprep.mubr.bf16.mxu1 %v2227_v49  ;;  %v13012_v26 = vunpack.i.h.bf16 %v13010_v61  ;;  %v13011_v19 = vunpack.i.l.bf16 %v13010_v61  ;;  %v1626_v49 = vld [vmem:[#allocation2 + $0xa9] sm:$0xff] }
 0x1aa   : > { %13304 = vrot.lane.b32.xlu1 %v15219_v50, %s14497_s29  ;;  %2631 = vmatmul.mubr.bf16.gmra.mrb[48].mxu1 %v1586_v24  ;;  %v13333_v50 = vpack.i.bf16 %v1742_v18, %v1741_v16  ;;  %v2137_v20 = vsel %vm440_vm4, %v1624_v53, %v13031_v25  ;;  %v2138_v42 = vsel %vm440_vm4, %v1625_v30, %v13032_v21  ;;  %v1627_v24 = vld [vmem:[#allocation2 + $0xb1] sm:$0xff] }
 0x1ab   : > { %v13050_v57 = vpop.permute.xlu0 %13049  ;;  %v1496_v45 = vsel %vm440_vm4, %v984_v35, %v13012_v26  ;;  %v1495_v28 = vsel %vm440_vm4, %v983_v33, %v13011_v19 }
 0x1ac   : > { %v13015_v23 = vpop.permute.xlu1 %13014  ;;  %v13051_v17 = vunpack.i.l.bf16 %v13050_v57  ;;  %v13052_v13 = vunpack.i.h.bf16 %v13050_v57 }
 0x1ad   : > { %v13017_v27 = vunpack.i.h.bf16 %v13015_v23  ;;  %v13016_v29 = vunpack.i.l.bf16 %v13015_v23  ;;  %13329 = vrot.lane.b32.xlu0 %v13328_v22, %s14495_s23 }
 0x1ae   : > { %13309 = vrot.lane.b32.xlu1 %v15243_v9, %s14495_s23  ;;  %v2169_v48 = vsel %vm486_vm7, %v2137_v20, %v13051_v17  ;;  %v2170_v32 = vsel %vm486_vm7, %v2138_v42, %v13052_v13 }
 0x1af   : > { %v13055_v0 = vpop.permute.xlu0 %13054  ;;  %v1527_v55 = vsel %vm486_vm7, %v1495_v28, %v13016_v29  ;;  %v1528_v36 = vsel %vm486_vm7, %v1496_v45, %v13017_v27 }
 0x1b0   : > { %v13035_v15 = vpop.permute.xlu1 %13034  ;;  %v13057_v40 = vunpack.i.h.bf16 %v13055_v0  ;;  %v13056_v22 = vunpack.i.l.bf16 %v13055_v0 }
 0x1b1   : > { %v13037_v52 = vunpack.i.h.bf16 %v13035_v15  ;;  %v13036_v9 = vunpack.i.l.bf16 %v13035_v15  ;;  %13334 = vrot.lane.b32.xlu0 %v13333_v50, %s14497_s29 }
 0x1b2   : > { %13314 = vrot.lane.b32.xlu1 %v15051_v34, %s14496_s24  ;;  %v2201_v38 = vsel %vm1549_vm8, %v2169_v48, %v13056_v22  ;;  %v2202_v43 = vsel %vm1549_vm8, %v2170_v32, %v13057_v40  ;;  %v987_v22 = vld [vmem:[#allocation2 + $0xa8] sm:$0xff] }
 0x1b3   : > { %v1560_v56 = vsel %vm1549_vm8, %v1527_v55, %v13036_v9  ;;  %v1561_v59 = vsel %vm1549_vm8, %v1528_v36, %v13037_v52  ;;  %v2228_v60 = vpack.c.bf16 %v2202_v43, %v2201_v38  ;;  %v13060_v1 = vpop.permute.xlu0 %13059  ;;  %v1628_v36 = vld [vmem:[#allocation2 + $0xc1] sm:$0xff]  ;;  %v1629_v38 = vld [vmem:[#allocation2 + $0xc9] sm:$0xff] }
 0x1b4   : > { %v1587_v37 = vpack.c.bf16 %v1561_v59, %v1560_v56  ;;  %v13040_v3 = vpop.permute.xlu1 %13039  ;;  %v13062_v46 = vunpack.i.h.bf16 %v13060_v1  ;;  %v13061_v51 = vunpack.i.l.bf16 %v13060_v1  ;;  %v988_v43 = vld [vmem:[#allocation2 + $0xb0] sm:$0xff] }
 0x1b5   : > { %2638 = vmatprep.mubr.bf16.mxu1 %v2228_v60  ;;  %v13042_v34 = vunpack.i.h.bf16 %v13040_v3  ;;  %v13041_v54 = vunpack.i.l.bf16 %v13040_v3 }
 0x1b6   : > { %13339 = vrot.lane.b32.xlu1 %v15253_v44, %s14497_s29  ;;  %2639 = vmatmul.mubr.bf16.gmra.mrb[52].mxu1 %v1587_v37  ;;  %v2140_v61 = vsel %vm440_vm4, %v1627_v24, %v13062_v46  ;;  %v2139_v44 = vsel %vm440_vm4, %v1626_v49, %v13061_v51  ;;  %s438_s29 = scalar_lea.vmem %s18645_s13, %s18665_s28 }
 0x1b7   : > { %v13080_v7 = vpop.permute.xlu0 %13079  ;;  %v1498_v2 = vsel %vm440_vm4, %v986_v5, %v13042_v34  ;;  %v1497_v25 = vsel %vm440_vm4, %v985_v14, %v13041_v54 }
 0x1b8   : > { %v13045_v11 = vpop.permute.xlu1 %13044  ;;  %v13082_v63 = vunpack.i.h.bf16 %v13080_v7  ;;  %v13081_v31 = vunpack.i.l.bf16 %v13080_v7 }
 0x1b9   : > { %v13047_v41 = vunpack.i.h.bf16 %v13045_v11  ;;  %v13046_v47 = vunpack.i.l.bf16 %v13045_v11 }
 0x1ba   : > { %v2171_v23 = vsel %vm486_vm7, %v2139_v44, %v13081_v31  ;;  %v2172_v17 = vsel %vm486_vm7, %v2140_v61, %v13082_v63 }
 0x1bb   : > { %v13085_v16 = vpop.permute.xlu0 %13084  ;;  %v1529_v53 = vsel %vm486_vm7, %v1497_v25, %v13046_v47  ;;  %v1530_v13 = vsel %vm486_vm7, %v1498_v2, %v13047_v41 }
 0x1bc   : > { %v13065_v18 = vpop.permute.xlu1 %13064  ;;  %v13087_v21 = vunpack.i.h.bf16 %v13085_v16  ;;  %v13086_v26 = vunpack.i.l.bf16 %v13085_v16 }
 0x1bd   : > { %v13067_v19 = vunpack.i.h.bf16 %v13065_v18  ;;  %v13066_v57 = vunpack.i.l.bf16 %v13065_v18 }
 0x1be   : > { %v2203_v27 = vsel %vm1549_vm8, %v2171_v23, %v13086_v26  ;;  %v2204_v29 = vsel %vm1549_vm8, %v2172_v17, %v13087_v21 }
 0x1bf   : > { %v1562_v50 = vsel %vm1549_vm8, %v1529_v53, %v13066_v57  ;;  %v1563_v30 = vsel %vm1549_vm8, %v1530_v13, %v13067_v19  ;;  %v2229_v20 = vpack.c.bf16 %v2204_v29, %v2203_v27  ;;  %v13090_v35 = vpop.permute.xlu0 %13089  ;;  %v989_v19 = vld [vmem:[#allocation2 + $0xc0] sm:$0xff]  ;;  %v990_v29 = vld [vmem:[#allocation2 + $0xc8] sm:$0xff] }
 0x1c0   : > { %v1588_v33 = vpack.c.bf16 %v1563_v30, %v1562_v50  ;;  %v13070_v42 = vpop.permute.xlu1 %13069  ;;  %v13092_v45 = vunpack.i.h.bf16 %v13090_v35  ;;  %v13091_v28 = vunpack.i.l.bf16 %v13090_v35  ;;  %v1630_v13 = vld [vmem:[#allocation2 + $0xd9] sm:$0xff]  ;;  %v1631_v27 = vld [vmem:[#allocation2 + $0xe1] sm:$0xff] }
 0x1c1   : > { %2646 = vmatprep.mubr.bf16.mxu1 %v2229_v20  ;;  %v13072_v48 = vunpack.i.h.bf16 %v13070_v42  ;;  %v13071_v0 = vunpack.i.l.bf16 %v13070_v42 }
 0x1c2   : > { %2647 = vmatmul.mubr.bf16.gmra.mrb[56].mxu1 %v1588_v33  ;;  %v2142_v56 = vsel %vm440_vm4, %v1629_v38, %v13092_v45  ;;  %v2141_v59 = vsel %vm440_vm4, %v1628_v36, %v13091_v28 }
 0x1c3   : > { %v13110_v15 = vpop.permute.xlu0 %13109  ;;  %v1500_v60 = vsel %vm440_vm4, %v988_v43, %v13072_v48  ;;  %v1499_v37 = vsel %vm440_vm4, %v987_v22, %v13071_v0 }
 0x1c4   : > { %v13075_v40 = vpop.permute.xlu1 %13074  ;;  %v13112_v52 = vunpack.i.h.bf16 %v13110_v15  ;;  %v13111_v9 = vunpack.i.l.bf16 %v13110_v15 }
 0x1c5   : > { %v13077_v32 = vunpack.i.h.bf16 %v13075_v40  ;;  %v13076_v55 = vunpack.i.l.bf16 %v13075_v40 }
 0x1c6   : > { %v2173_v7 = vsel %vm486_vm7, %v2141_v59, %v13111_v9  ;;  %v2174_v11 = vsel %vm486_vm7, %v2142_v56, %v13112_v52 }
 0x1c7   : > { %v13115_v1 = vpop.permute.xlu0 %13114  ;;  %v1531_v14 = vsel %vm486_vm7, %v1499_v37, %v13076_v55  ;;  %v1532_v63 = vsel %vm486_vm7, %v1500_v60, %v13077_v32 }
 0x1c8   : > { %v13095_v3 = vpop.permute.xlu1 %13094  ;;  %v13117_v46 = vunpack.i.h.bf16 %v13115_v1  ;;  %v13116_v51 = vunpack.i.l.bf16 %v13115_v1 }
 0x1c9   : > { %v13097_v34 = vunpack.i.h.bf16 %v13095_v3  ;;  %v13096_v54 = vunpack.i.l.bf16 %v13095_v3 }
 0x1ca   : > { %v2205_v31 = vsel %vm1549_vm8, %v2173_v7, %v13116_v51  ;;  %v2206_v41 = vsel %vm1549_vm8, %v2174_v11, %v13117_v46 }
 0x1cb   : > { %v1564_v47 = vsel %vm1549_vm8, %v1531_v14, %v13096_v54  ;;  %v1565_v49 = vsel %vm1549_vm8, %v1532_v63, %v13097_v34  ;;  %v2230_v24 = vpack.c.bf16 %v2206_v41, %v2205_v31  ;;  %v13120_v61 = vpop.permute.xlu0 %13119  ;;  %v991_v34 = vld [vmem:[#allocation2 + $0xd8] sm:$0xff]  ;;  %v992_v41 = vld [vmem:[#allocation2 + $0xe0] sm:$0xff] }
 0x1cc   : > { %v1589_v5 = vpack.c.bf16 %v1565_v49, %v1564_v47  ;;  %v13100_v44 = vpop.permute.xlu1 %13099  ;;  %v13122_v2 = vunpack.i.h.bf16 %v13120_v61  ;;  %v13121_v25 = vunpack.i.l.bf16 %v13120_v61  ;;  %v1632_v63 = vld [vmem:[#allocation2 + $0xf1] sm:$0xff]  ;;  %v1633_v31 = vld [vmem:[#allocation2 + $0xf9] sm:$0xff] }
 0x1cd   : > { %2654 = vmatprep.mubr.bf16.mxu1 %v2230_v24  ;;  %v13102_v16 = vunpack.i.h.bf16 %v13100_v44  ;;  %v13101_v18 = vunpack.i.l.bf16 %v13100_v44 }
 0x1ce   : > { %2655 = vmatmul.mubr.bf16.gmra.mrb[60].mxu1 %v1589_v5  ;;  %v2144_v50 = vsel %vm440_vm4, %v1631_v27, %v13122_v2  ;;  %v2143_v30 = vsel %vm440_vm4, %v1630_v13, %v13121_v25 }
 0x1cf   : > { %v13140_v21 = vpop.permute.xlu0 %13139  ;;  %v1502_v20 = vsel %vm440_vm4, %v990_v29, %v13102_v16  ;;  %v1501_v33 = vsel %vm440_vm4, %v989_v19, %v13101_v18 }
 0x1d0   : > { %v13105_v26 = vpop.permute.xlu1 %13104  ;;  %v13142_v57 = vunpack.i.h.bf16 %v13140_v21  ;;  %v13141_v23 = vunpack.i.l.bf16 %v13140_v21 }
 0x1d1   : > { %v13107_v17 = vunpack.i.h.bf16 %v13105_v26  ;;  %v13106_v53 = vunpack.i.l.bf16 %v13105_v26 }
 0x1d2   : > { %v2175_v15 = vsel %vm486_vm7, %v2143_v30, %v13141_v23  ;;  %v2176_v40 = vsel %vm486_vm7, %v2144_v50, %v13142_v57 }
 0x1d3   : > { %v13145_v35 = vpop.permute.xlu0 %13144  ;;  %v1533_v22 = vsel %vm486_vm7, %v1501_v33, %v13106_v53  ;;  %v1534_v52 = vsel %vm486_vm7, %v1502_v20, %v13107_v17  ;;  %v2285_v20 = vld [vmem:[#allocation2 + $0x19a] sm:$0xff]  ;;  %v2286_v33 = vld [vmem:[#allocation2 + $0x1a2] sm:$0xff] }
 0x1d4   : > { %v13125_v42 = vpop.permute.xlu1 %13124  ;;  %v13147_v45 = vunpack.i.h.bf16 %v13145_v35  ;;  %v13146_v28 = vunpack.i.l.bf16 %v13145_v35  ;;  %v2302_v35 = vpack.c.bf16 %v2286_v33, %v2285_v20 }
 0x1d5   : > { %v13127_v48 = vunpack.i.h.bf16 %v13125_v42  ;;  %v13126_v0 = vunpack.i.l.bf16 %v13125_v42 }
 0x1d6   : > { %v2207_v9 = vsel %vm1549_vm8, %v2175_v15, %v13146_v28  ;;  %v2208_v32 = vsel %vm1549_vm8, %v2176_v40, %v13147_v45  ;;  %2318 = vst.msk [vmem:[#allocation3 + $0x178] sm:$0xff] %vm440_vm4, %v2302_v35  ;;  %v993_v40 = vld [vmem:[#allocation2 + $0xf0] sm:$0xff] }
 0x1d7   : > { %v1566_v55 = vsel %vm1549_vm8, %v1533_v22, %v13126_v0  ;;  %v1567_v36 = vsel %vm1549_vm8, %v1534_v52, %v13127_v48  ;;  %v2231_v38 = vpack.c.bf16 %v2208_v32, %v2207_v9  ;;  %v13150_v56 = vpop.permute.xlu0 %13149 }
 0x1d8   : > { %v1590_v43 = vpack.c.bf16 %v1567_v36, %v1566_v55  ;;  %v13130_v59 = vpop.permute.xlu1 %13129  ;;  %v13152_v60 = vunpack.i.h.bf16 %v13150_v56  ;;  %v13151_v37 = vunpack.i.l.bf16 %v13150_v56  ;;  %v1634_v55 = vld [vmem:[#allocation2 + $0x109] sm:$0xff]  ;;  %v1635_v36 = vld [vmem:[#allocation2 + $0x111] sm:$0xff] }
 0x1d9   : > { %2662 = vmatprep.mubr.bf16.mxu1 %v2231_v38  ;;  %v13132_v1 = vunpack.i.h.bf16 %v13130_v59  ;;  %v13131_v3 = vunpack.i.l.bf16 %v13130_v59  ;;  %v994_v38 = vld [vmem:[#allocation2 + $0xf8] sm:$0xff] }
 0x1da   : > { %2663 = vmatmul.mubr.bf16.gmra.mrb[64].mxu1 %v1590_v43  ;;  %v2146_v47 = vsel %vm440_vm4, %v1633_v31, %v13152_v60  ;;  %v2145_v49 = vsel %vm440_vm4, %v1632_v63, %v13151_v37 }
 0x1db   : > { %v13170_v46 = vpop.permute.xlu0 %13169  ;;  %v1504_v24 = vsel %vm440_vm4, %v992_v41, %v13132_v1  ;;  %v1503_v5 = vsel %vm440_vm4, %v991_v34, %v13131_v3 }
 0x1dc   : > { %v13135_v51 = vpop.permute.xlu1 %13134  ;;  %v13172_v54 = vunpack.i.h.bf16 %v13170_v46  ;;  %v13171_v7 = vunpack.i.l.bf16 %v13170_v46 }
 0x1dd   : > { %v13137_v11 = vunpack.i.h.bf16 %v13135_v51  ;;  %v13136_v14 = vunpack.i.l.bf16 %v13135_v51 }
 0x1de   : > { %v2177_v21 = vsel %vm486_vm7, %v2145_v49, %v13171_v7  ;;  %v2178_v26 = vsel %vm486_vm7, %v2146_v47, %v13172_v54 }
 0x1df   : > { %v13175_v61 = vpop.permute.xlu0 %13174  ;;  %v1535_v19 = vsel %vm486_vm7, %v1503_v5, %v13136_v14  ;;  %v1536_v57 = vsel %vm486_vm7, %v1504_v24, %v13137_v11 }
 0x1e0   : > { %v13155_v44 = vpop.permute.xlu1 %13154  ;;  %v13177_v2 = vunpack.i.h.bf16 %v13175_v61  ;;  %v13176_v25 = vunpack.i.l.bf16 %v13175_v61 }
 0x1e1   : > { %v13157_v16 = vunpack.i.h.bf16 %v13155_v44  ;;  %v13156_v18 = vunpack.i.l.bf16 %v13155_v44 }
 0x1e2   : > { %v2209_v23 = vsel %vm1549_vm8, %v2177_v21, %v13176_v25  ;;  %v2210_v17 = vsel %vm1549_vm8, %v2178_v26, %v13177_v2  ;;  %v995_v26 = vld [vmem:[#allocation2 + $0x108] sm:$0xff] }
 0x1e3   : > { %v1568_v53 = vsel %vm1549_vm8, %v1535_v19, %v13156_v18  ;;  %v1569_v13 = vsel %vm1549_vm8, %v1536_v57, %v13157_v16  ;;  %v2232_v27 = vpack.c.bf16 %v2210_v17, %v2209_v23  ;;  %v13180_v50 = vpop.permute.xlu0 %13179 }
 0x1e4   : > { %v1591_v29 = vpack.c.bf16 %v1569_v13, %v1568_v53  ;;  %v13160_v30 = vpop.permute.xlu1 %13159  ;;  %v13182_v42 = vunpack.i.h.bf16 %v13180_v50  ;;  %v13181_v45 = vunpack.i.l.bf16 %v13180_v50  ;;  %v1636_v53 = vld [vmem:[#allocation2 + $0x121] sm:$0xff]  ;;  %v1637_v13 = vld [vmem:[#allocation2 + $0x129] sm:$0xff] }
 0x1e5   : > { %2670 = vmatprep.mubr.bf16.mxu1 %v2232_v27  ;;  %v13162_v28 = vunpack.i.h.bf16 %v13160_v30  ;;  %v13161_v48 = vunpack.i.l.bf16 %v13160_v30  ;;  %v996_v27 = vld [vmem:[#allocation2 + $0x110] sm:$0xff] }
 0x1e6   : > { %2671 = vmatmul.mubr.bf16.gmra.mrb[68].mxu1 %v1591_v29  ;;  %v2148_v43 = vsel %vm440_vm4, %v1635_v36, %v13182_v42  ;;  %v2147_v56 = vsel %vm440_vm4, %v1634_v55, %v13181_v45 }
 0x1e7   : > { %v13200_v0 = vpop.permute.xlu0 %13199  ;;  %v1506_v59 = vsel %vm440_vm4, %v994_v38, %v13162_v28  ;;  %v1505_v60 = vsel %vm440_vm4, %v993_v40, %v13161_v48 }
 0x1e8   : > { %v13165_v15 = vpop.permute.xlu1 %13164  ;;  %v13202_v22 = vunpack.i.h.bf16 %v13200_v0  ;;  %v13201_v52 = vunpack.i.l.bf16 %v13200_v0 }
 0x1e9   : > { %v13167_v9 = vunpack.i.h.bf16 %v13165_v15  ;;  %v13166_v32 = vunpack.i.l.bf16 %v13165_v15 }
 0x1ea   : > { %v2179_v54 = vsel %vm486_vm7, %v2147_v56, %v13201_v52  ;;  %v2180_v7 = vsel %vm486_vm7, %v2148_v43, %v13202_v22 }
 0x1eb   : > { %v13205_v37 = vpop.permute.xlu0 %13204  ;;  %v1537_v11 = vsel %vm486_vm7, %v1505_v60, %v13166_v32  ;;  %v1538_v14 = vsel %vm486_vm7, %v1506_v59, %v13167_v9 }
 0x1ec   : > { %v13185_v1 = vpop.permute.xlu1 %13184  ;;  %v13207_v3 = vunpack.i.h.bf16 %v13205_v37  ;;  %v13206_v46 = vunpack.i.l.bf16 %v13205_v37 }
 0x1ed   : > { %v13187_v51 = vunpack.i.h.bf16 %v13185_v1  ;;  %v13186_v34 = vunpack.i.l.bf16 %v13185_v1 }
 0x1ee   : > { %v2211_v63 = vsel %vm1549_vm8, %v2179_v54, %v13206_v46  ;;  %v2212_v31 = vsel %vm1549_vm8, %v2180_v7, %v13207_v3 }
 0x1ef   : > { %v1570_v41 = vsel %vm1549_vm8, %v1537_v11, %v13186_v34  ;;  %v1571_v47 = vsel %vm1549_vm8, %v1538_v14, %v13187_v51  ;;  %v2233_v49 = vpack.c.bf16 %v2212_v31, %v2211_v63  ;;  %v13210_v5 = vpop.permute.xlu0 %13209  ;;  %v997_v51 = vld [vmem:[#allocation2 + $0x120] sm:$0xff]  ;;  %v998_v31 = vld [vmem:[#allocation2 + $0x128] sm:$0xff] }
 0x1f0   : > { %v1592_v24 = vpack.c.bf16 %v1571_v47, %v1570_v41  ;;  %v13190_v61 = vpop.permute.xlu1 %13189  ;;  %v13212_v44 = vunpack.i.h.bf16 %v13210_v5  ;;  %v13211_v2 = vunpack.i.l.bf16 %v13210_v5  ;;  %v1638_v14 = vld [vmem:[#allocation2 + $0x139] sm:$0xff]  ;;  %v1639_v63 = vld [vmem:[#allocation2 + $0x141] sm:$0xff] }
 0x1f1   : > { %2678 = vmatprep.mubr.bf16.mxu1 %v2233_v49  ;;  %v13192_v25 = vunpack.i.h.bf16 %v13190_v61  ;;  %v13191_v16 = vunpack.i.l.bf16 %v13190_v61 }
 0x1f2   : > { %2679 = vmatmul.mubr.bf16.gmra.mrb[72].mxu1 %v1592_v24  ;;  %v2150_v29 = vsel %vm440_vm4, %v1637_v13, %v13212_v44  ;;  %v2149_v50 = vsel %vm440_vm4, %v1636_v53, %v13211_v2 }
 0x1f3   : > { %v13230_v18 = vpop.permute.xlu0 %13229  ;;  %v1508_v30 = vsel %vm440_vm4, %v996_v27, %v13192_v25  ;;  %v1507_v20 = vsel %vm440_vm4, %v995_v26, %v13191_v16 }
 0x1f4   : > { %v13195_v21 = vpop.permute.xlu1 %13194  ;;  %v13232_v19 = vunpack.i.h.bf16 %v13230_v18  ;;  %v13231_v57 = vunpack.i.l.bf16 %v13230_v18 }
 0x1f5   : > { %v13197_v23 = vunpack.i.h.bf16 %v13195_v21  ;;  %v13196_v17 = vunpack.i.l.bf16 %v13195_v21 }
 0x1f6   : > { %v2181_v0 = vsel %vm486_vm7, %v2149_v50, %v13231_v57  ;;  %v2182_v15 = vsel %vm486_vm7, %v2150_v29, %v13232_v19 }
 0x1f7   : > { %v13235_v33 = vpop.permute.xlu0 %13234  ;;  %v1539_v40 = vsel %vm486_vm7, %v1507_v20, %v13196_v17  ;;  %v1540_v22 = vsel %vm486_vm7, %v1508_v30, %v13197_v23 }
 0x1f8   : > { %v13215_v35 = vpop.permute.xlu1 %13214  ;;  %v13237_v42 = vunpack.i.h.bf16 %v13235_v33  ;;  %v13236_v45 = vunpack.i.l.bf16 %v13235_v33 }
 0x1f9   : > { %v13217_v28 = vunpack.i.h.bf16 %v13215_v35  ;;  %v13216_v48 = vunpack.i.l.bf16 %v13215_v35 }
 0x1fa   : > { %v2213_v52 = vsel %vm1549_vm8, %v2181_v0, %v13236_v45  ;;  %v2214_v9 = vsel %vm1549_vm8, %v2182_v15, %v13237_v42 }
 0x1fb   : > { %v1572_v32 = vsel %vm1549_vm8, %v1539_v40, %v13216_v48  ;;  %v1573_v55 = vsel %vm1549_vm8, %v1540_v22, %v13217_v28  ;;  %v2234_v36 = vpack.c.bf16 %v2214_v9, %v2213_v52  ;;  %v13240_v43 = vpop.permute.xlu0 %13239  ;;  %v999_v40 = vld [vmem:[#allocation2 + $0x138] sm:$0xff]  ;;  %v1000_v22 = vld [vmem:[#allocation2 + $0x140] sm:$0xff] }
 0x1fc   : > { %v1593_v38 = vpack.c.bf16 %v1573_v55, %v1572_v32  ;;  %v13220_v56 = vpop.permute.xlu1 %13219  ;;  %v13242_v59 = vunpack.i.h.bf16 %v13240_v43  ;;  %v13241_v60 = vunpack.i.l.bf16 %v13240_v43 }
 0x1fd   : > { %2686 = vmatprep.mubr.bf16.mxu1 %v2234_v36  ;;  %v13222_v37 = vunpack.i.h.bf16 %v13220_v56  ;;  %v13221_v1 = vunpack.i.l.bf16 %v13220_v56 }
 0x1fe   : > { %2687 = vmatmul.mubr.bf16.gmra.mrb[76].mxu1 %v1593_v38  ;;  %v2152_v41 = vsel %vm440_vm4, %v1639_v63, %v13242_v59  ;;  %v2151_v47 = vsel %vm440_vm4, %v1638_v14, %v13241_v60 }
 0x1ff   : > { %v13260_v3 = vpop.permute.xlu0 %13259  ;;  %v1510_v49 = vsel %vm440_vm4, %v998_v31, %v13222_v37  ;;  %v1509_v24 = vsel %vm440_vm4, %v997_v51, %v13221_v1 }
 0x200   : > { %v13225_v46 = vpop.permute.xlu1 %13224  ;;  %v13262_v34 = vunpack.i.h.bf16 %v13260_v3  ;;  %v13261_v54 = vunpack.i.l.bf16 %v13260_v3 }
 0x201   : > { %v13227_v7 = vunpack.i.h.bf16 %v13225_v46  ;;  %v13226_v11 = vunpack.i.l.bf16 %v13225_v46 }
 0x202   : > { %v2183_v18 = vsel %vm486_vm7, %v2151_v47, %v13261_v54  ;;  %v2184_v21 = vsel %vm486_vm7, %v2152_v41, %v13262_v34 }
 0x203   : > { %v13265_v5 = vpop.permute.xlu0 %13264  ;;  %v1541_v26 = vsel %vm486_vm7, %v1509_v24, %v13226_v11  ;;  %v1542_v19 = vsel %vm486_vm7, %v1510_v49, %v13227_v7 }
 0x204   : > { %v13245_v61 = vpop.permute.xlu1 %13244  ;;  %v13267_v44 = vunpack.i.h.bf16 %v13265_v5  ;;  %v13266_v2 = vunpack.i.l.bf16 %v13265_v5 }
 0x205   : > { %v13247_v25 = vunpack.i.h.bf16 %v13245_v61  ;;  %v13246_v16 = vunpack.i.l.bf16 %v13245_v61 }
 0x206   : > { %v2215_v57 = vsel %vm1549_vm8, %v2183_v18, %v13266_v2  ;;  %v2216_v23 = vsel %vm1549_vm8, %v2184_v21, %v13267_v44 }
 0x207   : > { %v1574_v17 = vsel %vm1549_vm8, %v1541_v26, %v13246_v16  ;;  %v1575_v53 = vsel %vm1549_vm8, %v1542_v19, %v13247_v25  ;;  %v2235_v13 = vpack.c.bf16 %v2216_v23, %v2215_v57  ;;  %v13270_v29 = vpop.permute.xlu0 %13269  ;;  %v1001_v25 = vld [vmem:[#allocation2 + $0x150] sm:$0xff]  ;;  %v1002_v16 = vld [vmem:[#allocation2 + $0x158] sm:$0xff] }
 0x208   : > { %v1594_v27 = vpack.c.bf16 %v1575_v53, %v1574_v17  ;;  %v13250_v50 = vpop.permute.xlu1 %13249  ;;  %v13272_v30 = vunpack.i.h.bf16 %v13270_v29  ;;  %v13271_v20 = vunpack.i.l.bf16 %v13270_v29 }
 0x209   : > { %2694 = vmatprep.mubr.bf16.mxu1 %v2235_v13  ;;  %v13252_v33 = vunpack.i.h.bf16 %v13250_v50  ;;  %v13251_v35 = vunpack.i.l.bf16 %v13250_v50 }
 0x20a   : > { %2695 = vmatmul.mubr.bf16.gmra.mrb[80].mxu1 %v1594_v27  ;;  %v2154_v52 = vsel %vm440_vm4, %v15194_v8, %v13272_v30  ;;  %v2153_v9 = vsel %vm440_vm4, %v15192_v10, %v13271_v20 }
 0x20b   : > { %v13290_v42 = vpop.permute.xlu0 %13289  ;;  %v1512_v32 = vsel %vm440_vm4, %v1000_v22, %v13252_v33  ;;  %v1511_v55 = vsel %vm440_vm4, %v999_v40, %v13251_v35 }
 0x20c   : > { %v13255_v45 = vpop.permute.xlu1 %13254  ;;  %v13292_v28 = vunpack.i.h.bf16 %v13290_v42  ;;  %v13291_v48 = vunpack.i.l.bf16 %v13290_v42 }
 0x20d   : > { %v13257_v0 = vunpack.i.h.bf16 %v13255_v45  ;;  %v13256_v15 = vunpack.i.l.bf16 %v13255_v45 }
 0x20e   : > { %v2185_v37 = vsel %vm486_vm7, %v2153_v9, %v13291_v48  ;;  %v2186_v1 = vsel %vm486_vm7, %v2154_v52, %v13292_v28  ;;  %v12877_v52 = vunpack.i.h.bf16 %v15105_v58  ;;  %v12876_v9 = vunpack.i.l.bf16 %v15105_v58 }
 0x20f   : > { %v13295_v36 = vpop.permute.xlu0 %13294  ;;  %v1543_v3 = vsel %vm486_vm7, %v1511_v55, %v13256_v15  ;;  %v1544_v8 = vsel %vm486_vm7, %v1512_v32, %v13257_v0 }
 0x210   : > { %v13275_v38 = vpop.permute.xlu1 %13274  ;;  %v13297_v43 = vunpack.i.h.bf16 %v13295_v36  ;;  %v13296_v56 = vunpack.i.l.bf16 %v13295_v36 }
 0x211   : > { %v13277_v59 = vunpack.i.h.bf16 %v13275_v38  ;;  %v13276_v60 = vunpack.i.l.bf16 %v13275_v38 }
 0x212   : > { %v2217_v10 = vsel %vm1549_vm8, %v2185_v37, %v13296_v56  ;;  %v2218_v46 = vsel %vm1549_vm8, %v2186_v1, %v13297_v43 }
 0x213   : > { %v1576_v51 = vsel %vm1549_vm8, %v1543_v3, %v13276_v60  ;;  %v1577_v34 = vsel %vm1549_vm8, %v1544_v8, %v13277_v59  ;;  %v2236_v54 = vpack.c.bf16 %v2218_v46, %v2217_v10  ;;  %v13300_v11 = vpop.permute.xlu0 %13299  ;;  %v1003_v3 = vld [vmem:[#allocation2 + $0x168] sm:$0xff]  ;;  %v1004_v8 = vld [vmem:[#allocation2 + $0x170] sm:$0xff] }
 0x214   : > { %v1595_v7 = vpack.c.bf16 %v1577_v34, %v1576_v51  ;;  %v13280_v14 = vpop.permute.xlu1 %13279  ;;  %v13302_v63 = vunpack.i.h.bf16 %v13300_v11  ;;  %v13301_v31 = vunpack.i.l.bf16 %v13300_v11 }
 0x215   : > { %2702 = vmatprep.mubr.bf16.mxu1 %v2236_v54  ;;  %v13282_v41 = vunpack.i.h.bf16 %v13280_v14  ;;  %v13281_v47 = vunpack.i.l.bf16 %v13280_v14 }
 0x216   : > { %2703 = vmatmul.mubr.bf16.gmra.mrb[84].mxu1 %v1595_v7  ;;  %v2156_v18 = vsel %vm440_vm4, %v15228_v62, %v13302_v63  ;;  %v2155_v21 = vsel %vm440_vm4, %v15226_v12, %v13301_v31 }
 0x217   : > { %v13320_v49 = vpop.permute.xlu0 %13319  ;;  %v1514_v26 = vsel %vm440_vm4, %v1002_v16, %v13282_v41  ;;  %v1513_v19 = vsel %vm440_vm4, %v1001_v25, %v13281_v47  ;;  %v2321_v41 = vld [vmem:[#allocation3 + $0x10] sm:$0xff]  ;;  %v2324_v47 = vld [vmem:[#allocation3 + $0x28] sm:$0xff] }
 0x218   : > { %v13285_v24 = vpop.permute.xlu1 %13284  ;;  %v13322_v5 = vunpack.i.h.bf16 %v13320_v49  ;;  %v13321_v61 = vunpack.i.l.bf16 %v13320_v49  ;;  %v2327_v49 = vld [vmem:[#allocation3 + $0x40] sm:$0xff]  ;;  %v2345_v25 = vld [vmem:[#allocation3 + $0xd0] sm:$0xff]  ;;  %v2348_v16 = vld [vmem:[#allocation3 + $0xe8] sm:$0xff] }
 0x219   : > { %v13287_v44 = vunpack.i.h.bf16 %v13285_v24  ;;  %v13286_v2 = vunpack.i.l.bf16 %v13285_v24  ;;  %v2330_v24 = vld [vmem:[#allocation3 + $0x58] sm:$0xff] }
 0x21a   : > { %v2187_v29 = vsel %vm486_vm7, %v2155_v21, %v13321_v61  ;;  %v2188_v50 = vsel %vm486_vm7, %v2156_v18, %v13322_v5  ;;  %v2333_v5 = vld [vmem:[#allocation3 + $0x70] sm:$0xff]  ;;  %v2336_v61 = vld [vmem:[#allocation3 + $0x88] sm:$0xff]  ;;  %v2351_v18 = vld [vmem:[#allocation3 + $0x100] sm:$0xff] }
 0x21b   : > { %v13325_v57 = vpop.permute.xlu0 %13324  ;;  %v1545_v30 = vsel %vm486_vm7, %v1513_v19, %v13286_v2  ;;  %v1546_v62 = vsel %vm486_vm7, %v1514_v26, %v13287_v44  ;;  %v2339_v44 = vld [vmem:[#allocation3 + $0xa0] sm:$0xff]  ;;  %v2342_v2 = vld [vmem:[#allocation3 + $0xb8] sm:$0xff] }
 0x21c   : > { %v13305_v23 = vpop.permute.xlu1 %13304  ;;  %v13327_v17 = vunpack.i.h.bf16 %v13325_v57  ;;  %v13326_v53 = vunpack.i.l.bf16 %v13325_v57 }
 0x21d   : > { %v13307_v13 = vunpack.i.h.bf16 %v13305_v23  ;;  %v13306_v27 = vunpack.i.l.bf16 %v13305_v23 }
 0x21e   : > { %v2219_v12 = vsel %vm1549_vm8, %v2187_v29, %v13326_v53  ;;  %v2220_v20 = vsel %vm1549_vm8, %v2188_v50, %v13327_v17  ;;  %v2354_v53 = vld [vmem:[#allocation3 + $0x118] sm:$0xff] }
 0x21f   : > { %v1578_v33 = vsel %vm1549_vm8, %v1545_v30, %v13306_v27  ;;  %v1579_v35 = vsel %vm1549_vm8, %v1546_v62, %v13307_v13  ;;  %v2237_v42 = vpack.c.bf16 %v2220_v20, %v2219_v12  ;;  %v13330_v28 = vpop.permute.xlu0 %13329  ;;  %v2357_v13 = vld [vmem:[#allocation3 + $0x130] sm:$0xff]  ;;  %v2360_v20 = vld [vmem:[#allocation3 + $0x148] sm:$0xff] }
 0x220   : > { %v1596_v45 = vpack.c.bf16 %v1579_v35, %v1578_v33  ;;  %v13310_v48 = vpop.permute.xlu1 %13309  ;;  %v13332_v0 = vunpack.i.h.bf16 %v13330_v28  ;;  %v13331_v15 = vunpack.i.l.bf16 %v13330_v28  ;;  %v2363_v33 = vld [vmem:[#allocation3 + $0x160] sm:$0xff] }
 0x221   : > { %2710 = vmatprep.mubr.bf16.mxu1 %v2237_v42  ;;  %v13312_v36 = vunpack.i.h.bf16 %v13310_v48  ;;  %v13311_v38 = vunpack.i.l.bf16 %v13310_v48 }
 0x222   : > { %v2158_v40 = vsel %vm440_vm4, %v15262_v6, %v13332_v0  ;;  %v2157_v22 = vsel %vm440_vm4, %v15260_v4, %v13331_v15  ;;  %2711 = vmatmul.mubr.bf16.gmra.mrb[88].mxu1 %v1596_v45  ;;  %v2366_v15 = vld [vmem:[#allocation3 + $0x178] sm:$0xff] }
 0x223   : > { %v13335_v32 = vpop.permute.xlu0 %13334  ;;  %v2189_v59 = vsel %vm486_vm7, %v2157_v22, %v12876_v9  ;;  %v2190_v60 = vsel %vm486_vm7, %v2158_v40, %v12877_v52  ;;  %v1516_v46 = vsel %vm440_vm4, %v1004_v8, %v13312_v36  ;;  %v1515_v51 = vsel %vm440_vm4, %v1003_v3, %v13311_v38 }
 0x224   : > { %v13315_v55 = vpop.permute.xlu1 %13314  ;;  %v13337_v43 = vunpack.i.h.bf16 %v13335_v32  ;;  %v13336_v56 = vunpack.i.l.bf16 %v13335_v32 }
 0x225   : > { %v13317_v37 = vunpack.i.h.bf16 %v13315_v55  ;;  %v13316_v6 = vunpack.i.l.bf16 %v13315_v55 }
 0x226   : > { %v2221_v1 = vsel %vm1549_vm8, %v2189_v59, %v13336_v56  ;;  %v2222_v4 = vsel %vm1549_vm8, %v2190_v60, %v13337_v43 }
 0x227   : > { %v2238_v10 = vpack.c.bf16 %v2222_v4, %v2221_v1  ;;  %v1547_v7 = vsel %vm486_vm7, %v1515_v51, %v13316_v6  ;;  %v1548_v11 = vsel %vm486_vm7, %v1516_v46, %v13317_v37 }
 0x228   : > { %v13340_v58 = vpop.permute.xlu1 %13339 }
 0x229   : > { %v13342_v34 = vunpack.i.h.bf16 %v13340_v58  ;;  %v13341_v54 = vunpack.i.l.bf16 %v13340_v58  ;;  %2718 = vmatprep.mubr.bf16.mxu1 %v2238_v10 }
 0x22b   : > { %v1580_v14 = vsel %vm1549_vm8, %v1547_v7, %v13341_v54  ;;  %v1581_v63 = vsel %vm1549_vm8, %v1548_v11, %v13342_v34 }
 0x22c   : > { %v1597_v31 = vpack.c.bf16 %v1581_v63, %v1580_v14 }
 0x22e   : > { %2719 = vmatmul.mubr.bf16.gmra.mrb[92].mxu1 %v1597_v31 }
 0x22f   : > { %12650 = vmatprep.mubr.msk.bf16.mxu1 %vm440_vm4, %v2321_v41 }
 0x236   : > { %12651 = vmatmul.mubr.msk.bf16.vlgmr.msra.gmra.mrb[96].mxu1 %vm440_vm4, %v2324_v47 }
 0x237   : > { %12654 = vmatprep.mubr.msk.bf16.mxu1 %vm440_vm4, %v2327_v49 }
 0x23e   : > { %12655 = vmatmul.mubr.msk.bf16.gmra.mrb[100].mxu1 %vm440_vm4, %v2330_v24 }
 0x23f   : > { %12658 = vmatprep.mubr.msk.bf16.mxu1 %vm440_vm4, %v2333_v5 }
 0x246   : > { %12659 = vmatmul.mubr.msk.bf16.gmra.mrb[104].mxu1 %vm440_vm4, %v2336_v61 }
 0x247   : > { %12662 = vmatprep.mubr.msk.bf16.mxu1 %vm440_vm4, %v2339_v44 }
 0x24e   : > { %12663 = vmatmul.mubr.msk.bf16.gmra.mrb[108].mxu1 %vm440_vm4, %v2342_v2 }
 0x24f   : > { %12666 = vmatprep.mubr.msk.bf16.mxu1 %vm440_vm4, %v2345_v25 }
 0x256   : > { %12667 = vmatmul.mubr.msk.bf16.gmra.mrb[112].mxu1 %vm440_vm4, %v2348_v16 }
 0x257   : > { %v12366_v21 = vpop.f32.mrb[32].mxu1  ;;  %12670 = vmatprep.mubr.msk.bf16.mxu1 %vm440_vm4, %v2351_v18 }
 0x258   : > { %v12367_v26 = vpop.f32.mrb[33].mxu1 }
 0x259   : > { %v15443_v19 = vadd.f32 %v12367_v26, %v12366_v21  ;;  %v12369_v57 = vpop.f32.mrb[34].mxu1 }
 0x25a   : > { %v12370_v23 = vpop.f32.mrb[35].mxu1 }
 0x25b   : > { %v15445_v17 = vadd.f32 %v12370_v23, %v12369_v57 }
 0x25e   : > { %12671 = vmatmul.mubr.msk.bf16.gmra.mrb[116].mxu1 %vm440_vm4, %v2354_v53 }
 0x25f   : > { %v12372_v27 = vpop.f32.mrb[36].mxu1  ;;  %12674 = vmatprep.mubr.msk.bf16.mxu1 %vm440_vm4, %v2357_v13 }
 0x260   : > { %v12373_v29 = vpop.f32.mrb[37].mxu1 }
 0x261   : > { %v15449_v50 = vadd.f32 %v12373_v29, %v12372_v27  ;;  %v12375_v30 = vpop.f32.mrb[38].mxu1 }
 0x262   : > { %v12376_v62 = vpop.f32.mrb[39].mxu1 }
 0x263   : > { %v15451_v12 = vadd.f32 %v12376_v62, %v12375_v30 }
 0x266   : > { %12675 = vmatmul.mubr.msk.bf16.gmra.mrb[120].mxu1 %vm440_vm4, %v2360_v20 }
 0x267   : > { %v12378_v35 = vpop.f32.mrb[40].mxu1  ;;  %12678 = vmatprep.mubr.msk.bf16.mxu1 %vm440_vm4, %v2363_v33 }
 0x268   : > { %v12379_v42 = vpop.f32.mrb[41].mxu1 }
 0x269   : > { %v15455_v45 = vadd.f32 %v12379_v42, %v12378_v35  ;;  %v12381_v28 = vpop.f32.mrb[42].mxu1 }
 0x26a   : > { %v12382_v48 = vpop.f32.mrb[43].mxu1 }
 0x26b   : > { %v15457_v0 = vadd.f32 %v12382_v48, %v12381_v28 }
 0x26e   : > { %12679 = vmatmul.mubr.msk.bf16.gmra.mrb[124].mxu1 %vm440_vm4, %v2366_v15 }
 0x271   : > { %v12384_v40 = vpop.f32.mrb[44].mxu1 }
 0x272   : > { %v12385_v22 = vpop.f32.mrb[45].mxu1 }
 0x273   : > { %v15460_v52 = vadd.f32 %v12385_v22, %v12384_v40  ;;  %v12387_v9 = vpop.f32.mrb[46].mxu1 }
 0x274   : > { %v12388_v32 = vpop.f32.mrb[47].mxu1 }
 0x275   : > { %v15462_v55 = vadd.f32 %v12388_v32, %v12387_v9 }
 0x27d   : > { %v12390_v36 = vpop.f32.mrb[48].mxu1 }
 0x27e   : > { %v12391_v38 = vpop.f32.mrb[49].mxu1 }
 0x27f   : > { %v15464_v43 = vadd.f32 %v12391_v38, %v12390_v36  ;;  %v12393_v56 = vpop.f32.mrb[50].mxu1 }
 0x280   : > { %v12394_v59 = vpop.f32.mrb[51].mxu1 }
 0x281   : > { %v15466_v60 = vadd.f32 %v12394_v59, %v12393_v56 }
 0x289   : > { %v12396_v37 = vpop.f32.mrb[52].mxu1 }
 0x28a   : > { %v12397_v6 = vpop.f32.mrb[53].mxu1 }
 0x28b   : > { %v15468_v1 = vadd.f32 %v12397_v6, %v12396_v37  ;;  %v12399_v4 = vpop.f32.mrb[54].mxu1 }
 0x28c   : > { %v12400_v3 = vpop.f32.mrb[55].mxu1 }
 0x28d   : > { %v15470_v8 = vadd.f32 %v12400_v3, %v12399_v4 }
 0x295   : > { %v12402_v10 = vpop.f32.mrb[56].mxu1 }
 0x296   : > { %v12403_v58 = vpop.f32.mrb[57].mxu1 }
 0x297   : > { %v15472_v46 = vadd.f32 %v12403_v58, %v12402_v10  ;;  %v12405_v51 = vpop.f32.mrb[58].mxu1 }
 0x298   : > { %v12406_v34 = vpop.f32.mrb[59].mxu1 }
 0x299   : > { %v15474_v54 = vadd.f32 %v12406_v34, %v12405_v51  ;;  %v14498_v34 = vmov 1983009808  }
 0x2a1   : > { %v12408_v7 = vpop.f32.mrb[60].mxu1 }
 0x2a2   : > { %v12409_v11 = vpop.f32.mrb[61].mxu1 }
 0x2a3   : > { %v15476_v14 = vadd.f32 %v12409_v11, %v12408_v7  ;;  %v12411_v63 = vpop.f32.mrb[62].mxu1  ;;  %v2954_v7 = vunpack.c.l.s4 %v14498_v34  ;;  %v2956_v11 = vlaneseq }
 0x2a4   : > { %v12412_v31 = vpop.f32.mrb[63].mxu1 }
 0x2a5   : > { %v15478_v41 = vadd.f32 %v12412_v31, %v12411_v63  ;;  %v11403_v63 = vld [vmem:[%s18636_s4] ss:$0 sm:$0xff] }
 0x2ad   : > { %v12414_v47 = vpop.f32.mrb[64].mxu1 }
 0x2ae   : > { %v12415_v49 = vpop.f32.mrb[65].mxu1 }
 0x2af   : > { %v15480_v24 = vadd.f32 %v12415_v49, %v12414_v47  ;;  %v12417_v5 = vpop.f32.mrb[66].mxu1 }
 0x2b0   : > { %v12418_v61 = vpop.f32.mrb[67].mxu1 }
 0x2b1   : > { %v15482_v44 = vadd.f32 %v12418_v61, %v12417_v5  ;;  %v2955_v5 = vunpack.c.0.s8 %v2954_v7  ;;  %v15541_v61 = vshrl.u32 %v2956_v11, 7 }
 0x2b3   : > { %18648 = vst [vmem:[#allocation9_spill] sm:$0xff] %v15541_v61 }
 0x2b9   : > { %v12420_v2 = vpop.f32.mrb[68].mxu1 }
 0x2ba   : > { %v12421_v25 = vpop.f32.mrb[69].mxu1 }
 0x2bb   : > { %v15484_v16 = vadd.f32 %v12421_v25, %v12420_v2  ;;  %v12423_v18 = vpop.f32.mrb[70].mxu1  ;;  %v2609_v25 = vadd.f32 %v15449_v50, %v11403_v63  ;;  %v15560_v50 = vadd.f32 %v15464_v43, %v11403_v63  ;;  %v15584_v43 = vadd.f32 %v15478_v41, %v11403_v63 }
 0x2bc   : > { %v12424_v21 = vpop.f32.mrb[71].mxu1 }
 0x2bd   : > { %v15486_v26 = vadd.f32 %v12424_v21, %v12423_v18  ;;  %v2601_v18 = vadd.f32 %v15443_v19, %v11403_v63  ;;  %v2604_v21 = vadd.f32 %v15445_v17, %v11403_v63  ;;  %v15563_v19 = vadd.f32 %v15466_v60, %v11403_v63 }
 0x2be   : > { %v15566_v17 = vsub.s32 %v2955_v5, %v15541_v61  ;;  %v15587_v60 = vadd.f32 %v15474_v54, %v11403_v63 }
 0x2c5   : > { %v12426_v57 = vpop.f32.mrb[72].mxu1 }
 0x2c6   : > { %v12427_v23 = vpop.f32.mrb[73].mxu1 }
 0x2c7   : > { %v15488_v53 = vadd.f32 %v12427_v23, %v12426_v57  ;;  %v12429_v13 = vpop.f32.mrb[74].mxu1  ;;  %v2612_v23 = vadd.f32 %v15451_v12, %v11403_v63  ;;  %v15569_v12 = vsub.s32 0, %v15541_v61 }
 0x2c8   : > { %v12430_v27 = vpop.f32.mrb[75].mxu1 }
 0x2c9   : > { %v15490_v29 = vadd.f32 %v12430_v27, %v12429_v13  ;;  %v15548_v13 = vadd.f32 %v15455_v45, %v11403_v63  ;;  %v15551_v27 = vadd.f32 %v15457_v0, %v11403_v63  ;;  %v15572_v45 = vadd.f32 %v15468_v1, %v11403_v63 }
 0x2ca   : > { %v15575_v0 = vadd.f32 %v15470_v8, %v11403_v63  ;;  %v15593_v1 = vadd.f32 %v15480_v24, %v11403_v63  ;;  %v15596_v8 = vadd.f32 %v15486_v26, %v11403_v63  ;;  %v15605_v54 = vadd.f32 %v15488_v53, %v11403_v63 }
 0x2d1   : > { %v12432_v30 = vpop.f32.mrb[76].mxu1 }
 0x2d2   : > { %v12433_v62 = vpop.f32.mrb[77].mxu1 }
 0x2d3   : > { %v15492_v20 = vadd.f32 %v12433_v62, %v12432_v30  ;;  %v12435_v33 = vpop.f32.mrb[78].mxu1  ;;  %v15554_v30 = vadd.f32 %v15460_v52, %v11403_v63  ;;  %v15557_v62 = vadd.f32 %v15462_v55, %v11403_v63  ;;  %v15578_v52 = vadd.f32 %v15476_v14, %v11403_v63 }
 0x2d4   : > { %v12436_v35 = vpop.f32.mrb[79].mxu1  ;;  %v15581_v55 = vadd.f32 %v15472_v46, %v11403_v63  ;;  %v15599_v14 = vadd.f32 %v15482_v44, %v11403_v63 }
 0x2d5   : > { %v15494_v42 = vadd.f32 %v12436_v35, %v12435_v33  ;;  %v15590_v35 = vadd.f32 %v15484_v16, %v11403_v63  ;;  %v15602_v41 = vadd.f32 %v15492_v20, %v11403_v63  ;;  %v15608_v16 = vadd.f32 %v15490_v29, %v11403_v63 }
 0x2dd   : > { %v12438_v28 = vpop.f32.mrb[80].mxu1 }
 0x2de   : > { %v12439_v48 = vpop.f32.mrb[81].mxu1 }
 0x2df   : > { %v12440_v15 = vadd.f32 %v12439_v48, %v12438_v28  ;;  %v12441_v40 = vpop.f32.mrb[82].mxu1 }
 0x2e0   : > { %v12442_v22 = vpop.f32.mrb[83].mxu1 }
 0x2e1   : > { %v12443_v9 = vadd.f32 %v12442_v22, %v12441_v40  ;;  %v15611_v40 = vadd.f32 %v15494_v42, %v11403_v63  ;;  %v15613_v26 = vadd.f32 %v12440_v15, %v11403_v63 }
 0x2e3   : > { %18649 = vst [vmem:[#allocation10_spill] sm:$0xff] %v15613_v26  ;;  %v15615_v44 = vadd.f32 %v12443_v9, %v11403_v63 }
 0x2e5   : > { %18650 = vst [vmem:[#allocation11_spill] sm:$0xff] %v15615_v44 }
 0x2e9   : > { %v12444_v32 = vpop.f32.mrb[84].mxu1 }
 0x2ea   : > { %v12445_v36 = vpop.f32.mrb[85].mxu1 }
 0x2eb   : > { %v12446_v38 = vadd.f32 %v12445_v36, %v12444_v32  ;;  %v12447_v56 = vpop.f32.mrb[86].mxu1 }
 0x2ec   : > { %v12448_v59 = vpop.f32.mrb[87].mxu1 }
 0x2ed   : > { %v12449_v37 = vadd.f32 %v12448_v59, %v12447_v56  ;;  %v15617_v20 = vadd.f32 %v12446_v38, %v11403_v63 }
 0x2ef   : > { %v15619_v56 = vadd.f32 %v12449_v37, %v11403_v63 }
 0x2f1   : > { %18651 = vst [vmem:[#allocation12_spill] sm:$0xff] %v15619_v56 }
 0x2f5   : > { %v12450_v6 = vpop.f32.mrb[88].mxu1 }
 0x2f6   : > { %v12451_v4 = vpop.f32.mrb[89].mxu1 }
 0x2f7   : > { %v12452_v3 = vadd.f32 %v12451_v4, %v12450_v6  ;;  %v12453_v10 = vpop.f32.mrb[90].mxu1 }
 0x2f8   : > { %v12454_v58 = vpop.f32.mrb[91].mxu1 }
 0x2f9   : > { %v12455_v51 = vadd.f32 %v12454_v58, %v12453_v10  ;;  %v15621_v29 = vadd.f32 %v12452_v3, %v11403_v63 }
 0x2fb   : > { %18652 = vst [vmem:[#allocation13_spill] sm:$0xff] %v15621_v29  ;;  %v15623_v6 = vadd.f32 %v12455_v51, %v11403_v63 }
 0x2fd   : > { %18653 = vst [vmem:[#allocation14_spill] sm:$0xff] %v15623_v6 }
 0x301   : > { %v12456_v39 = vpop.f32.mrb[92].mxu1 }
 0x302   : > { %v12457_v31 = vpop.f32.mrb[93].mxu1 }
 0x303   : > { %v12458_v47 = vadd.f32 %v12457_v31, %v12456_v39  ;;  %v12459_v49 = vpop.f32.mrb[94].mxu1 }
 0x304   : > { %v12460_v2 = vpop.f32.mrb[95].mxu1 }
 0x305   : > { %v12461_v57 = vadd.f32 %v12460_v2, %v12459_v49  ;;  %v15626_v10 = vadd.f32 %v12458_v47, %v11403_v63 }
 0x307   : > { %18654 = vst [vmem:[#allocation15_spill] sm:$0xff] %v15626_v10  ;;  %v15629_v38 = vadd.f32 %v12461_v57, %v11403_v63 }
 0x309   : > { %v12652_v33 = vpop.f32.mrb[96].mxu1  ;;  %18655 = vst [vmem:[#allocation16_spill] sm:$0xff] %v15629_v38 }
 0x30a   : > { %v2770_v46 = vadd.f32 %v12652_v33, %v2609_v25  ;;  %v2761_v28 = vpop.f32.mrb[97].mxu1 }
 0x30b   : > { %v2762_v48 = vadd.f32 %v2761_v28, %v2601_v18  ;;  %v12653_v24 = vpop.f32.mrb[98].mxu1 }
 0x30c   : > { %v2890_v22 = vmax.f32 %v2770_v46, 0.0  ;;  %v2773_v32 = vadd.f32 %v12653_v24, %v2612_v23  ;;  %v2764_v36 = vpop.f32.mrb[99].mxu1 }
 0x30d   : > { %v2888_v53 = vmax.f32 %v2762_v48, 0.0  ;;  %v2765_v59 = vadd.f32 %v2764_v36, %v2604_v21 }
 0x30e   : > { %v2986_v4 = vcombine.high %v2890_v22, %v2890_v22  ;;  %v2993_v42 = vrot.slane %v2890_v22, %v15566_v17  ;;  %v2891_v15 = vmax.f32 %v2773_v32, 0.0 }
 0x30f   : > { %v2952_v9 = vcombine.high %v2888_v53, %v2888_v53  ;;  %v2959_v58 = vrot.slane %v2888_v53, %v15566_v17  ;;  %v2889_v34 = vmax.f32 %v2765_v59, 0.0 }
 0x310   : > { %v3000_v37 = vrot.slane %v2986_v4, %v15566_v17  ;;  %v3001_v7 = vcombine.high %v2993_v42, %v2993_v42  ;;  %v11446_v11 = vrot.slane %v2993_v42, 9  ;;  %v3003_v3 = vcombine.high %v2891_v15, %v2891_v15 }
 0x311   : > { %v2966_v51 = vrot.slane %v2952_v9, %v15566_v17  ;;  %v2967_v39 = vcombine.high %v2959_v58, %v2959_v58  ;;  %v11438_v31 = vrot.slane %v2959_v58, 9  ;;  %v3010_v47 = vrot.slane %v2891_v15, %v15566_v17  ;;  %v12656_v49 = vpop.f32.mrb[100].mxu1 }
 0x312   : > { %v3002_v5 = vcombine.high %v3000_v37, %v3000_v37  ;;  %v11447_v2 = vrot.slane %v3001_v7, 9  ;;  %v11448_v25 = vrot.slane %v3000_v37, 9  ;;  %v4016_v18 = vmax.f32 %v2993_v42, %v11446_v11  ;;  %v2777_v63 = vpop.f32.mrb[101].mxu1 }
 0x313   : > { %v2968_v21 = vcombine.high %v2966_v51, %v2966_v51  ;;  %v11439_v57 = vrot.slane %v2967_v39, 9  ;;  %v11440_v23 = vrot.slane %v2966_v51, 9  ;;  %v4008_v33 = vmax.f32 %v2959_v58, %v11438_v31  ;;  %v12657_v46 = vpop.f32.mrb[102].mxu1 }
 0x314   : > { %v11449_v28 = vrot.slane %v3002_v5, 9  ;;  %v4017_v48 = vmax.f32 %v3001_v7, %v11447_v2  ;;  %v4018_v24 = vmax.f32 %v3000_v37, %v11448_v25  ;;  %v3017_v22 = vrot.slane %v3003_v3, %v15566_v17  ;;  %v15635_v32 = vpop.f32.mrb[103].mxu1 }
 0x315   : > { %v11441_v36 = vrot.slane %v2968_v21, 9  ;;  %v4009_v53 = vmax.f32 %v2967_v39, %v11439_v57  ;;  %v4010_v59 = vmax.f32 %v2966_v51, %v11440_v23  ;;  %v4136_v4 = vmax.f32 %v4008_v33, %v4016_v18 }
 0x316   : > { %v4019_v15 = vmax.f32 %v3002_v5, %v11449_v28  ;;  %v3018_v42 = vcombine.high %v3010_v47, %v3010_v47  ;;  %v3019_v9 = vcombine.high %v3017_v22, %v3017_v22  ;;  %v11450_v11 = vrot.slane %v3010_v47, 9 }
 0x317   : > { %v4011_v61 = vmax.f32 %v2968_v21, %v11441_v36  ;;  %v4137_v6 = vmax.f32 %v4009_v53, %v4017_v48  ;;  %v4138_v38 = vmax.f32 %v4010_v59, %v4018_v24  ;;  %v4267_v58 = vrot.slane %v4136_v4, %v15569_v12 }
 0x318   : > { %v11451_v31 = vrot.slane %v3018_v42, 9  ;;  %v11452_v7 = vrot.slane %v3017_v22, 9  ;;  %v11453_v37 = vrot.slane %v3019_v9, 9  ;;  %v4020_v2 = vmax.f32 %v3010_v47, %v11450_v11 }
 0x319   : > { %v4139_v3 = vmax.f32 %v4011_v61, %v4019_v15  ;;  %v4271_v25 = vrot.slane %v4137_v6, %v15569_v12  ;;  %v4275_v39 = vrot.slane %v4138_v38, %v15569_v12  ;;  %v2969_v51 = vcombine.high %v2889_v34, %v2889_v34  ;;  %v15640_v5 = vpop.f32.mrb[104].mxu1 }
 0x31a   : > { %v4021_v18 = vmax.f32 %v3018_v42, %v11451_v31  ;;  %v4022_v57 = vmax.f32 %v3017_v22, %v11452_v7  ;;  %v4023_v21 = vmax.f32 %v3019_v9, %v11453_v37  ;;  %v2976_v23 = vrot.slane %v2889_v34, %v15566_v17  ;;  %v15643_v33 = vpop.f32.mrb[105].mxu1 }
 0x31b   : > { %v4279_v28 = vrot.slane %v4139_v3, %v15569_v12  ;;  %v4521_v47 = vsel %vm4520_vm11, %v4271_v25, %v4267_v58  ;;  %v2983_v61 = vrot.slane %v2969_v51, %v15566_v17  ;;  %v2786_v6 = vadd.f32 %v12656_v49, %v15554_v30  ;;  %v15649_v38 = vpop.f32.mrb[106].mxu1 }
 0x31c   : > { %v4523_v48 = vsel %vm4522_vm12, %v4275_v39, %v4521_v47  ;;  %v2984_v24 = vcombine.high %v2976_v23, %v2976_v23  ;;  %v11442_v22 = vrot.slane %v2976_v23, 9  ;;  %v2778_v34 = vadd.f32 %v2777_v63, %v15548_v13  ;;  %v15653_v36 = vpop.f32.mrb[107].mxu1 }
 0x31d   : > { %v2985_v53 = vcombine.high %v2983_v61, %v2983_v61  ;;  %v11444_v59 = vrot.slane %v2983_v61, 9  ;;  %v4525_v4 = vsel %vm4524_vm13, %v4279_v28, %v4523_v48  ;;  %v2894_v15 = vmax.f32 %v2786_v6, 0.0 }
 0x31e   : > { %v11443_v42 = vrot.slane %v2984_v24, 9  ;;  %v4012_v9 = vmax.f32 %v2976_v23, %v11442_v22  ;;  %v2892_v30 = vmax.f32 %v2778_v34, 0.0  ;;  %v2789_v49 = vadd.f32 %v12657_v46, %v15557_v62 }
 0x31f   : > { %v11445_v11 = vrot.slane %v2985_v53, 9  ;;  %v4014_v58 = vmax.f32 %v2983_v61, %v11444_v59  ;;  %v3054_v31 = vcombine.high %v2894_v15, %v2894_v15  ;;  %v3061_v7 = vrot.slane %v2894_v15, %v15566_v17 }
 0x320   : > { %v4013_v37 = vmax.f32 %v2984_v24, %v11443_v42  ;;  %v4140_v13 = vmax.f32 %v4012_v9, %v4020_v2  ;;  %v3020_v63 = vcombine.high %v2892_v30, %v2892_v30  ;;  %v3027_v3 = vrot.slane %v2892_v30, %v15566_v17 }
 0x321   : > { %v4015_v25 = vmax.f32 %v2985_v53, %v11445_v11  ;;  %v4142_v39 = vmax.f32 %v4014_v58, %v4022_v57  ;;  %v3068_v51 = vrot.slane %v3054_v31, %v15566_v17  ;;  %v3069_v28 = vcombine.high %v3061_v7, %v3061_v7  ;;  %v15660_v47 = vpop.f32.mrb[108].mxu1 }
 0x322   : > { %v4141_v23 = vmax.f32 %v4013_v37, %v4021_v18  ;;  %v4283_v62 = vrot.slane %v4140_v13, %v15569_v12  ;;  %v11462_v46 = vrot.slane %v3061_v7, 9  ;;  %v3034_v61 = vrot.slane %v3020_v63, %v15566_v17  ;;  %v15664_v6 = vpop.f32.mrb[109].mxu1 }
 0x323   : > { %v4143_v48 = vmax.f32 %v4015_v25, %v4023_v21  ;;  %v4291_v2 = vrot.slane %v4142_v39, %v15569_v12  ;;  %v3070_v24 = vcombine.high %v3068_v51, %v3068_v51  ;;  %v11463_v22 = vrot.slane %v3069_v28, 9  ;;  %v15667_v34 = vpop.f32.mrb[110].mxu1 }
 0x324   : > { %v4287_v57 = vrot.slane %v4141_v23, %v15569_v12  ;;  %v4527_v53 = vsel %vm4526_vm14, %v4283_v62, %v4525_v4  ;;  %v11464_v59 = vrot.slane %v3068_v51, 9  ;;  %v4032_v18 = vmax.f32 %v3061_v7, %v11462_v46  ;;  %v15671_v15 = vpop.f32.mrb[111].mxu1 }
 0x325   : > { %v4295_v42 = vrot.slane %v4143_v48, %v15569_v12  ;;  %v11465_v9 = vrot.slane %v3070_v24, 9  ;;  %v4033_v30 = vmax.f32 %v3069_v28, %v11463_v22  ;;  %v3035_v11 = vcombine.high %v3027_v3, %v3027_v3 }
 0x326   : > { %v4529_v21 = vsel %vm4528_vm15, %v4287_v57, %v4527_v53  ;;  %v4034_v58 = vmax.f32 %v3068_v51, %v11464_v59  ;;  %v3036_v31 = vcombine.high %v3034_v61, %v3034_v61  ;;  %v11454_v37 = vrot.slane %v3027_v3, 9 }
 0x327   : > { %v4531_v13 = vsel %vm4530_vm0, %v4291_v2, %v4529_v21  ;;  %v4035_v63 = vmax.f32 %v3070_v24, %v11465_v9  ;;  %v11455_v25 = vrot.slane %v3035_v11, 9  ;;  %v11456_v39 = vrot.slane %v3034_v61, 9 }
 0x328   : > { %v4533_v4 = vsel %vm4532_vm1, %v4295_v42, %v4531_v13  ;;  %v11457_v7 = vrot.slane %v3036_v31, 9  ;;  %v4024_v23 = vmax.f32 %v3027_v3, %v11454_v37  ;;  %v2895_v62 = vmax.f32 %v2789_v49, 0.0 }
 0x329   : > { %4592 = vst.msk [vmem:[#allocation4 + $0x11] sm:$0xff] %vm486_vm7, %v4533_v4  ;;  %v4025_v46 = vmax.f32 %v3035_v11, %v11455_v25  ;;  %v4026_v28 = vmax.f32 %v3034_v61, %v11456_v39  ;;  %v2781_v48 = vadd.f32 %v15635_v32, %v15551_v27  ;;  %v2802_v51 = vadd.f32 %v15640_v5, %v15572_v45  ;;  %v15682_v22 = vpop.f32.mrb[112].mxu1 }
 0x32a   : > { %v4027_v2 = vmax.f32 %v3036_v31, %v11457_v7  ;;  %v4144_v24 = vmax.f32 %v4024_v23, %v4032_v18  ;;  %v3071_v57 = vcombine.high %v2895_v62, %v2895_v62  ;;  %v3078_v53 = vrot.slane %v2895_v62, %v15566_v17  ;;  %v15685_v59 = vpop.f32.mrb[113].mxu1 }
 0x32b   : > { %v4145_v49 = vmax.f32 %v4025_v46, %v4033_v30  ;;  %v4146_v3 = vmax.f32 %v4026_v28, %v4034_v58  ;;  %v2893_v42 = vmax.f32 %v2781_v48, 0.0  ;;  %v2898_v9 = vmax.f32 %v2802_v51, 0.0  ;;  %v15687_v61 = vpop.f32.mrb[114].mxu1 }
 0x32c   : > { %v4147_v11 = vmax.f32 %v4027_v2, %v4035_v63  ;;  %v4299_v27 = vrot.slane %v4144_v24, %v15569_v12  ;;  %v3085_v45 = vrot.slane %v3071_v57, %v15566_v17  ;;  %v3086_v32 = vcombine.high %v3078_v53, %v3078_v53  ;;  %v15691_v5 = vpop.f32.mrb[115].mxu1 }
 0x32d   : > { %v4303_v18 = vrot.slane %v4145_v49, %v15569_v12  ;;  %v4307_v21 = vrot.slane %v4146_v3, %v15569_v12  ;;  %v11466_v31 = vrot.slane %v3078_v53, 9  ;;  %v3037_v37 = vcombine.high %v2893_v42, %v2893_v42 }
 0x32e   : > { %v4311_v30 = vrot.slane %v4147_v11, %v15569_v12  ;;  %v3087_v58 = vcombine.high %v3085_v45, %v3085_v45  ;;  %v11467_v13 = vrot.slane %v3086_v32, 9  ;;  %v11468_v25 = vrot.slane %v3085_v45, 9 }
 0x32f   : > { %v4534_v63 = vsel %vm4520_vm11, %v4303_v18, %v4299_v27  ;;  %v4036_v39 = vmax.f32 %v3078_v53, %v11466_v31  ;;  %v3044_v4 = vrot.slane %v2893_v42, %v15566_v17  ;;  %v3051_v7 = vrot.slane %v3037_v37, %v15566_v17 }
 0x330   : > { %v4535_v23 = vsel %vm4522_vm12, %v4307_v21, %v4534_v63  ;;  %v11469_v62 = vrot.slane %v3087_v58, 9  ;;  %v4037_v46 = vmax.f32 %v3086_v32, %v11467_v13  ;;  %v4038_v28 = vmax.f32 %v3085_v45, %v11468_v25 }
 0x331   : > { %v3052_v48 = vcombine.high %v3044_v4, %v3044_v4  ;;  %v3053_v51 = vcombine.high %v3051_v7, %v3051_v7  ;;  %v11458_v2 = vrot.slane %v3044_v4, 9  ;;  %v11460_v24 = vrot.slane %v3051_v7, 9  ;;  %v15700_v57 = vpop.f32.mrb[116].mxu1 }
 0x332   : > { %v4039_v49 = vmax.f32 %v3087_v58, %v11469_v62  ;;  %v4536_v3 = vsel %vm4524_vm13, %v4311_v30, %v4535_v23  ;;  %v3122_v11 = vcombine.high %v2898_v9, %v2898_v9  ;;  %v3129_v53 = vrot.slane %v2898_v9, %v15566_v17  ;;  %v15704_v42 = vpop.f32.mrb[117].mxu1 }
 0x333   : > { %v11459_v27 = vrot.slane %v3052_v48, 9  ;;  %v11461_v18 = vrot.slane %v3053_v51, 9  ;;  %v4028_v21 = vmax.f32 %v3044_v4, %v11458_v2  ;;  %v4030_v31 = vmax.f32 %v3051_v7, %v11460_v24  ;;  %v15706_v32 = vpop.f32.mrb[118].mxu1 }
 0x334   : > { %v3136_v45 = vrot.slane %v3122_v11, %v15566_v17  ;;  %v3137_v37 = vcombine.high %v3129_v53, %v3129_v53  ;;  %v11478_v13 = vrot.slane %v3129_v53, 9  ;;  %v2794_v58 = vadd.f32 %v15643_v33, %v15560_v50  ;;  %v15711_v25 = vpop.f32.mrb[119].mxu1 }
 0x335   : > { %v4029_v30 = vmax.f32 %v3052_v48, %v11459_v27  ;;  %v4031_v63 = vmax.f32 %v3053_v51, %v11461_v18  ;;  %v4148_v9 = vmax.f32 %v4028_v21, %v4036_v39  ;;  %v4150_v23 = vmax.f32 %v4030_v31, %v4038_v28 }
 0x336   : > { %v3138_v62 = vcombine.high %v3136_v45, %v3136_v45  ;;  %v11479_v29 = vrot.slane %v3137_v37, 9  ;;  %v11480_v10 = vrot.slane %v3136_v45, 9  ;;  %v4048_v4 = vmax.f32 %v3129_v53, %v11478_v13 }
 0x337   : > { %v4149_v7 = vmax.f32 %v4029_v30, %v4037_v46  ;;  %v4151_v2 = vmax.f32 %v4031_v63, %v4039_v49  ;;  %v4315_v24 = vrot.slane %v4148_v9, %v15569_v12  ;;  %v4323_v11 = vrot.slane %v4150_v23, %v15569_v12 }
 0x338   : > { %v11481_v44 = vrot.slane %v3138_v62, 9  ;;  %v4049_v56 = vmax.f32 %v3137_v37, %v11479_v29  ;;  %v4050_v26 = vmax.f32 %v3136_v45, %v11480_v10  ;;  %v2896_v50 = vmax.f32 %v2794_v58, 0.0 }
 0x339   : > { %v4319_v33 = vrot.slane %v4149_v7, %v15569_v12  ;;  %v4327_v48 = vrot.slane %v4151_v2, %v15569_v12  ;;  %v4537_v39 = vsel %vm4526_vm14, %v4315_v24, %v4536_v3  ;;  %v2805_v28 = vadd.f32 %v15649_v38, %v15575_v0  ;;  %v15720_v51 = vpop.f32.mrb[120].mxu1 }
 0x33a   : > { %v4051_v46 = vmax.f32 %v3138_v62, %v11481_v44  ;;  %v3088_v49 = vcombine.high %v2896_v50, %v2896_v50  ;;  %v3095_v53 = vrot.slane %v2896_v50, %v15566_v17  ;;  %v2797_v29 = vadd.f32 %v15653_v36, %v15563_v19  ;;  %v15725_v10 = vpop.f32.mrb[121].mxu1 }
 0x33b   : > { %v4538_v27 = vsel %vm4528_vm15, %v4319_v33, %v4537_v39  ;;  %v2899_v18 = vmax.f32 %v2805_v28, 0.0  ;;  %v2818_v3 = vadd.f32 %v15660_v47, %v15578_v52  ;;  %v15732_v0 = vadd.f32 %v15664_v6, %v15581_v55  ;;  %v15734_v38 = vpop.f32.mrb[122].mxu1 }
 0x33c   : > { %v4539_v44 = vsel %vm4530_vm0, %v4323_v11, %v4538_v27  ;;  %v3102_v21 = vrot.slane %v3088_v49, %v15566_v17  ;;  %v3103_v31 = vcombine.high %v3095_v53, %v3095_v53  ;;  %v11470_v19 = vrot.slane %v3095_v53, 9  ;;  %v15738_v36 = vpop.f32.mrb[123].mxu1 }
 0x33d   : > { %v4540_v45 = vsel %vm4532_vm1, %v4327_v48, %v4539_v44  ;;  %v3139_v37 = vcombine.high %v2899_v18, %v2899_v18  ;;  %v3146_v13 = vrot.slane %v2899_v18, %v15566_v17  ;;  %v2897_v52 = vmax.f32 %v2797_v29, 0.0 }
 0x33e   : > { %4593 = vst.msk [vmem:[#allocation4 + $0x21] sm:$0xff] %vm486_vm7, %v4540_v45  ;;  %v3104_v55 = vcombine.high %v3102_v21, %v3102_v21  ;;  %v11471_v47 = vrot.slane %v3103_v31, 9  ;;  %v11472_v6 = vrot.slane %v3102_v21, 9  ;;  %v4040_v58 = vmax.f32 %v3095_v53, %v11470_v19 }
 0x33f   : > { %v3153_v30 = vrot.slane %v3139_v37, %v15566_v17  ;;  %v3154_v63 = vcombine.high %v3146_v13, %v3146_v13  ;;  %v11482_v9 = vrot.slane %v3146_v13, 9  ;;  %v3105_v23 = vcombine.high %v2897_v52, %v2897_v52 }
 0x340   : > { %v11473_v62 = vrot.slane %v3104_v55, 9  ;;  %v4041_v7 = vmax.f32 %v3103_v31, %v11471_v47  ;;  %v4042_v2 = vmax.f32 %v3102_v21, %v11472_v6  ;;  %v4152_v24 = vmax.f32 %v4040_v58, %v4048_v4 }
 0x341   : > { %v3155_v11 = vcombine.high %v3153_v30, %v3153_v30  ;;  %v11483_v50 = vrot.slane %v3154_v63, 9  ;;  %v11484_v33 = vrot.slane %v3153_v30, 9  ;;  %v4052_v48 = vmax.f32 %v3146_v13, %v11482_v9  ;;  %v15744_v39 = vpop.f32.mrb[124].mxu1 }
 0x342   : > { %v4043_v28 = vmax.f32 %v3104_v55, %v11473_v62  ;;  %v4153_v49 = vmax.f32 %v4041_v7, %v4049_v56  ;;  %v4154_v29 = vmax.f32 %v4042_v2, %v4050_v26  ;;  %v4331_v53 = vrot.slane %v4152_v24, %v15569_v12  ;;  %v15747_v27 = vpop.f32.mrb[125].mxu1 }
 0x343   : > { %v11485_v18 = vrot.slane %v3155_v11, 9  ;;  %v4053_v44 = vmax.f32 %v3154_v63, %v11483_v50  ;;  %v4054_v19 = vmax.f32 %v3153_v30, %v11484_v33  ;;  %v3112_v31 = vrot.slane %v2897_v52, %v15566_v17  ;;  %v15750_v21 = vpop.f32.mrb[126].mxu1 }
 0x344   : > { %v4155_v4 = vmax.f32 %v4043_v28, %v4051_v46  ;;  %v4335_v45 = vrot.slane %v4153_v49, %v15569_v12  ;;  %v4339_v37 = vrot.slane %v4154_v29, %v15569_v12  ;;  %v3119_v13 = vrot.slane %v3105_v23, %v15566_v17  ;;  %v15755_v56 = vpop.f32.mrb[127].mxu1 }
 0x345   : > { %v4055_v26 = vmax.f32 %v3155_v11, %v11485_v18  ;;  %v3120_v55 = vcombine.high %v3112_v31, %v3112_v31  ;;  %v11474_v47 = vrot.slane %v3112_v31, 9  ;;  %v2902_v6 = vmax.f32 %v2818_v3, 0.0 }
 0x346   : > { %v4343_v58 = vrot.slane %v4155_v4, %v15569_v12  ;;  %v4541_v30 = vsel %vm4520_vm11, %v4335_v45, %v4331_v53  ;;  %v3121_v52 = vcombine.high %v3119_v13, %v3119_v13  ;;  %v11476_v63 = vrot.slane %v3119_v13, 9 }
 0x347   : > { %v4542_v46 = vsel %vm4522_vm12, %v4339_v37, %v4541_v30  ;;  %v11475_v9 = vrot.slane %v3120_v55, 9  ;;  %v4044_v62 = vmax.f32 %v3112_v31, %v11474_v47  ;;  %v3190_v7 = vcombine.high %v2902_v6, %v2902_v6 }
 0x348   : > { %v11477_v2 = vrot.slane %v3121_v52, 9  ;;  %v4046_v24 = vmax.f32 %v3119_v13, %v11476_v63  ;;  %v4543_v23 = vsel %vm4524_vm13, %v4343_v58, %v4542_v46  ;;  %v3197_v11 = vrot.slane %v2902_v6, %v15566_v17 }
 0x349   : > { %v4045_v50 = vmax.f32 %v3120_v55, %v11475_v9  ;;  %v4156_v33 = vmax.f32 %v4044_v62, %v4052_v48  ;;  %v3204_v3 = vrot.slane %v3190_v7, %v15566_v17  ;;  %v2900_v28 = vmax.f32 %v15732_v0, 0.0 }
 0x34a   : > { %v4047_v49 = vmax.f32 %v3121_v52, %v11477_v2  ;;  %v4158_v29 = vmax.f32 %v4046_v24, %v4054_v19  ;;  %v3205_v53 = vcombine.high %v3197_v11, %v3197_v11  ;;  %v11494_v18 = vrot.slane %v3197_v11, 9 }
 0x34b   : > { %v4157_v4 = vmax.f32 %v4045_v50, %v4053_v44  ;;  %v4347_v31 = vrot.slane %v4156_v33, %v15569_v12  ;;  %v3206_v45 = vcombine.high %v3204_v3, %v3204_v3  ;;  %v11496_v37 = vrot.slane %v3204_v3, 9 }
 0x34c   : > { %v4159_v13 = vmax.f32 %v4047_v49, %v4055_v26  ;;  %v4355_v47 = vrot.slane %v4158_v29, %v15569_v12  ;;  %v11495_v58 = vrot.slane %v3205_v53, 9  ;;  %v4064_v6 = vmax.f32 %v3197_v11, %v11494_v18 }
 0x34d   : > { %v4351_v48 = vrot.slane %v4157_v4, %v15569_v12  ;;  %v4544_v55 = vsel %vm4526_vm14, %v4347_v31, %v4543_v23  ;;  %v11497_v30 = vrot.slane %v3206_v45, 9  ;;  %v4066_v0 = vmax.f32 %v3204_v3, %v11496_v37 }
 0x34e   : > { %v4359_v19 = vrot.slane %v4159_v13, %v15569_v12  ;;  %v4065_v52 = vmax.f32 %v3205_v53, %v11495_v58  ;;  %v3156_v63 = vcombine.high %v2900_v28, %v2900_v28  ;;  %v3163_v44 = vrot.slane %v2900_v28, %v15566_v17  ;;  %v13442_v58 = vld [vmem:[%s18637_s5] sm:$0xff]  }
 0x34f   : > { %v4545_v46 = vsel %vm4528_vm15, %v4351_v48, %v4544_v55  ;;  %v4067_v9 = vmax.f32 %v3206_v45, %v11497_v30  ;;  %v2821_v26 = vadd.f32 %v15667_v34, %v15584_v43  ;;  %v2813_v62 = vadd.f32 %v15671_v15, %v15587_v60  ;;  %v13443_v48 = vld [vmem:[%s18637_s5 + $0x48] sm:$0xff]  }
 0x350   : > { %v4546_v7 = vsel %vm4530_vm0, %v4355_v47, %v4545_v46  ;;  %v3170_v2 = vrot.slane %v3156_v63, %v15566_v17  ;;  %v3171_v24 = vcombine.high %v3163_v44, %v3163_v44  ;;  %v11486_v23 = vrot.slane %v3163_v44, 9  ;;  %v13441_v47 = vld [vmem:[%s18637_s5 + $0x40] sm:$0xff]  }
 0x351   : > { %v4547_v11 = vsel %vm4532_vm1, %v4359_v19, %v4546_v7  ;;  %v2903_v50 = vmax.f32 %v2821_v26, 0.0  ;;  %v2901_v33 = vmax.f32 %v2813_v62, 0.0  ;;  %v2834_v3 = vadd.f32 %v15682_v22, %v15590_v35  ;;  %12480 = vmatprep.subr.bf16.mxu0 %v13441_v47 }
 0x352   : > { %4594 = vst.msk [vmem:[#allocation4 + $0x31] sm:$0xff] %vm486_vm7, %v4547_v11  ;;  %v3172_v28 = vcombine.high %v3170_v2, %v3170_v2  ;;  %v11487_v43 = vrot.slane %v3171_v24, 9  ;;  %v11488_v34 = vrot.slane %v3170_v2, 9  ;;  %v4056_v49 = vmax.f32 %v3163_v44, %v11486_v23  ;;  %12481 = vmatpush3.bf16.msra.mxu0 %v13442_v58  ;;  %v13444_v23 = vld [vmem:[%s18637_s5 + $0x8] sm:$0xff]  }
 0x353   : > { %v3207_v60 = vcombine.high %v2903_v50, %v2903_v50  ;;  %v3214_v15 = vrot.slane %v2903_v50, %v15566_v17  ;;  %v3173_v29 = vcombine.high %v2901_v33, %v2901_v33  ;;  %v3180_v53 = vrot.slane %v2901_v33, %v15566_v17  ;;  %12482 = vmatprep.subr.bf16.mxu0 %v13443_v48  ;;  %v13445_v33 = vld [vmem:[%s18637_s5 + $0x50] sm:$0xff]  }
 0x354   : > { %v11489_v18 = vrot.slane %v3172_v28, 9  ;;  %v4057_v4 = vmax.f32 %v3171_v24, %v11487_v43  ;;  %v4058_v31 = vmax.f32 %v3170_v2, %v11488_v34  ;;  %v4160_v45 = vmax.f32 %v4056_v49, %v4064_v6 }
 0x355   : > { %v3221_v37 = vrot.slane %v3207_v60, %v15566_v17  ;;  %v3222_v13 = vcombine.high %v3214_v15, %v3214_v15  ;;  %v11498_v35 = vrot.slane %v3214_v15, 9  ;;  %v3187_v22 = vrot.slane %v3173_v29, %v15566_v17 }
 0x356   : > { %v4059_v55 = vmax.f32 %v3172_v28, %v11489_v18  ;;  %v4161_v6 = vmax.f32 %v4057_v4, %v4065_v52  ;;  %v4162_v30 = vmax.f32 %v4058_v31, %v4066_v0  ;;  %v4363_v19 = vrot.slane %v4160_v45, %v15569_v12  ;;  %12483 = vmatpush3.bf16.msra.mxu0 %v13444_v23 }
 0x357   : > { %v3223_v63 = vcombine.high %v3221_v37, %v3221_v37  ;;  %v11499_v44 = vrot.slane %v3222_v13, 9  ;;  %v11500_v46 = vrot.slane %v3221_v37, 9  ;;  %v4068_v26 = vmax.f32 %v3214_v15, %v11498_v35  ;;  %12484 = vmatprep.subr.bf16.mxu0 %v13445_v33 }
 0x358   : > { %v4163_v62 = vmax.f32 %v4059_v55, %v4067_v9  ;;  %v4367_v7 = vrot.slane %v4161_v6, %v15569_v12  ;;  %v4371_v2 = vrot.slane %v4162_v30, %v15569_v12  ;;  %v3188_v24 = vcombine.high %v3180_v53, %v3180_v53 }
 0x359   : > { %v11501_v52 = vrot.slane %v3223_v63, 9  ;;  %v4069_v0 = vmax.f32 %v3222_v13, %v11499_v44  ;;  %v4070_v11 = vmax.f32 %v3221_v37, %v11500_v46  ;;  %v3189_v50 = vcombine.high %v3187_v22, %v3187_v22  ;;  %v13446_v37 = vld [vmem:[%s18637_s5 + $0x10] sm:$0xff]  }
 0x35a   : > { %v4375_v9 = vrot.slane %v4163_v62, %v15569_v12  ;;  %v4548_v28 = vsel %vm4520_vm11, %v4367_v7, %v4363_v19  ;;  %v11490_v43 = vrot.slane %v3180_v53, 9  ;;  %v11491_v34 = vrot.slane %v3188_v24, 9  ;;  %12485 = vmatpush3.bf16.msra.mxu0 %v13446_v37 }
 0x35b   : > { %v4549_v49 = vsel %vm4522_vm12, %v4371_v2, %v4548_v28  ;;  %v4071_v60 = vmax.f32 %v3223_v63, %v11501_v52  ;;  %v11492_v15 = vrot.slane %v3187_v22, 9  ;;  %v11493_v29 = vrot.slane %v3189_v50, 9 }
 0x35c   : > { %v4060_v18 = vmax.f32 %v3180_v53, %v11490_v43  ;;  %v4061_v4 = vmax.f32 %v3188_v24, %v11491_v34  ;;  %v4550_v31 = vsel %vm4524_vm13, %v4375_v9, %v4549_v49  ;;  %v2906_v45 = vmax.f32 %v2834_v3, 0.0 }
 0x35d   : > { %v4062_v13 = vmax.f32 %v3187_v22, %v11492_v15  ;;  %v4063_v35 = vmax.f32 %v3189_v50, %v11493_v29  ;;  %v2826_v47 = vadd.f32 %v15685_v59, %v15593_v1  ;;  %v2837_v58 = vadd.f32 %v15687_v61, %v15596_v8 }
 0x35e   : > { %v4164_v48 = vmax.f32 %v4060_v18, %v4068_v26  ;;  %v4165_v53 = vmax.f32 %v4061_v4, %v4069_v0  ;;  %v3258_v55 = vcombine.high %v2906_v45, %v2906_v45  ;;  %v3265_v6 = vrot.slane %v2906_v45, %v15566_v17 }
 0x35f   : > { %v4166_v3 = vmax.f32 %v4062_v13, %v4070_v11  ;;  %v4167_v30 = vmax.f32 %v4063_v35, %v4071_v60  ;;  %v2904_v19 = vmax.f32 %v2826_v47, 0.0  ;;  %v2907_v63 = vmax.f32 %v2837_v58, 0.0 }
 0x360   : > { %v4379_v44 = vrot.slane %v4164_v48, %v15569_v12  ;;  %v4383_v22 = vrot.slane %v4165_v53, %v15569_v12  ;;  %v3272_v46 = vrot.slane %v3258_v55, %v15566_v17  ;;  %v3273_v1 = vcombine.high %v3265_v6, %v3265_v6  ;;  %v13447_v53 = vld [vmem:[%s18637_s5 + $0x58] sm:$0xff]  }
 0x361   : > { %v4387_v8 = vrot.slane %v4166_v3, %v15569_v12  ;;  %v4391_v59 = vrot.slane %v4167_v30, %v15569_v12  ;;  %v11510_v61 = vrot.slane %v3265_v6, 9  ;;  %v3224_v26 = vcombine.high %v2904_v19, %v2904_v19  ;;  %v13448_v55 = vld [vmem:[%s18637_s5 + $0x18] sm:$0xff]   ;;  %12486 = vmatprep.subr.bf16.mxu0 %v13447_v53 }
 0x362   : > { %v4551_v62 = vsel %vm4526_vm14, %v4379_v44, %v4550_v31  ;;  %v3274_v7 = vcombine.high %v3272_v46, %v3272_v46  ;;  %v11511_v2 = vrot.slane %v3273_v1, 9  ;;  %v11512_v24 = vrot.slane %v3272_v46, 9  ;;  %12487 = vmatpush3.bf16.msra.mxu0 %v13448_v55 }
 0x363   : > { %v4552_v23 = vsel %vm4528_vm15, %v4383_v22, %v4551_v62  ;;  %v4080_v52 = vmax.f32 %v3265_v6, %v11510_v61  ;;  %v3231_v0 = vrot.slane %v2904_v19, %v15566_v17  ;;  %v3238_v11 = vrot.slane %v3224_v26, %v15566_v17  ;;  %v13449_v6 = vld [vmem:[%s18637_s5 + $0x60] sm:$0xff]   ;;  %v4608_v61 = vld [vmem:[#allocation4 + $0x1] sm:$0xff] }
 0x364   : > { %v4553_v50 = vsel %vm4530_vm0, %v4387_v8, %v4552_v23  ;;  %v11513_v33 = vrot.slane %v3274_v7, 9  ;;  %v4081_v9 = vmax.f32 %v3273_v1, %v11511_v2  ;;  %v4082_v28 = vmax.f32 %v3272_v46, %v11512_v24  ;;  %v4609_v26 = vld [vmem:[#allocation4 + $0x11] sm:$0xff]  ;;  %12488 = vmatprep.subr.bf16.mxu0 %v13449_v6 }
 0x365   : > { %v4554_v43 = vsel %vm4532_vm1, %v4391_v59, %v4553_v50  ;;  %v3239_v34 = vcombine.high %v3231_v0, %v3231_v0  ;;  %v3240_v49 = vcombine.high %v3238_v11, %v3238_v11  ;;  %v11502_v60 = vrot.slane %v3231_v0, 9  ;;  %v13450_v62 = vld [vmem:[%s18637_s5 + $0x20] sm:$0xff]  }
 0x366   : > { %4595 = vst.msk [vmem:[#allocation4 + $0x41] sm:$0xff] %vm486_vm7, %v4554_v43  ;;  %v4083_v15 = vmax.f32 %v3274_v7, %v11513_v33  ;;  %v11504_v29 = vrot.slane %v3238_v11, 9  ;;  %v3275_v18 = vcombine.high %v2907_v63, %v2907_v63  ;;  %v3282_v4 = vrot.slane %v2907_v63, %v15566_v17  ;;  %12489 = vmatpush3.bf16.msra.mxu0 %v13450_v62 }
 0x367   : > { %v11503_v31 = vrot.slane %v3239_v34, 9  ;;  %v11505_v45 = vrot.slane %v3240_v49, 9  ;;  %v4072_v37 = vmax.f32 %v3231_v0, %v11502_v60  ;;  %v2829_v13 = vadd.f32 %v15691_v5, %v15599_v14 }
 0x368   : > { %v4074_v35 = vmax.f32 %v3238_v11, %v11504_v29  ;;  %v3289_v47 = vrot.slane %v3275_v18, %v15566_v17  ;;  %v3290_v58 = vcombine.high %v3282_v4, %v3282_v4  ;;  %v11514_v48 = vrot.slane %v3282_v4, 9 }
 0x369   : > { %v4073_v3 = vmax.f32 %v3239_v34, %v11503_v31  ;;  %v4075_v30 = vmax.f32 %v3240_v49, %v11505_v45  ;;  %v4168_v14 = vmax.f32 %v4072_v37, %v4080_v52  ;;  %v2905_v5 = vmax.f32 %v2829_v13, 0.0 }
 0x36a   : > { %v4170_v19 = vmax.f32 %v4074_v35, %v4082_v28  ;;  %v3291_v63 = vcombine.high %v3289_v47, %v3289_v47  ;;  %v11515_v44 = vrot.slane %v3290_v58, 9  ;;  %v11516_v22 = vrot.slane %v3289_v47, 9 }
 0x36b   : > { %v4169_v46 = vmax.f32 %v4073_v3, %v4081_v9  ;;  %v4171_v1 = vmax.f32 %v4075_v30, %v4083_v15  ;;  %v4395_v8 = vrot.slane %v4168_v14, %v15569_v12  ;;  %v4084_v59 = vmax.f32 %v3282_v4, %v11514_v48 }
 0x36c   : > { %v4403_v7 = vrot.slane %v4170_v19, %v15569_v12  ;;  %v11517_v2 = vrot.slane %v3291_v63, 9  ;;  %v4085_v24 = vmax.f32 %v3290_v58, %v11515_v44  ;;  %v4086_v23 = vmax.f32 %v3289_v47, %v11516_v22 }
 0x36d   : > { %v4399_v52 = vrot.slane %v4169_v46, %v15569_v12  ;;  %v4407_v0 = vrot.slane %v4171_v1, %v15569_v12  ;;  %v3241_v11 = vcombine.high %v2905_v5, %v2905_v5  ;;  %v3248_v50 = vrot.slane %v2905_v5, %v15566_v17  ;;  %v13451_v46 = vld [vmem:[%s18637_s5 + $0x68] sm:$0xff]   ;;  %v13452_v1 = vld [vmem:[%s18637_s5 + $0xc0] sm:$0xff]  }
 0x36e   : > { %v4087_v33 = vmax.f32 %v3291_v63, %v11517_v2  ;;  %v13348_v9 = vpack.i.bf16 %v4609_v26, %v4608_v61  ;;  %v2850_v28 = vadd.f32 %v15700_v57, %v15602_v41  ;;  %v2842_v43 = vadd.f32 %v15704_v42, %v15605_v54  ;;  %v13455_v2 = vld [vmem:[%s18637_s5 + $0x70] sm:$0xff]   ;;  %12490 = vmatprep.subr.bf16.mxu0 %v13451_v46 }
 0x36f   : > { %v4555_v34 = vsel %vm4520_vm11, %v4399_v52, %v4395_v8  ;;  %v3255_v49 = vrot.slane %v3241_v11, %v15566_v17  ;;  %v3256_v60 = vcombine.high %v3248_v50, %v3248_v50  ;;  %v11506_v15 = vrot.slane %v3248_v50, 9  ;;  %v13453_v8 = vld [vmem:[%s18637_s5 + $0x28] sm:$0xff]   ;;  %12520 = vmatprep.subr.bf16.mxu1 %v13452_v1 }
 0x370   : > { %v4556_v29 = vsel %vm4522_vm12, %v4403_v7, %v4555_v34  ;;  %13349 = vrot.lane.b32.xlu1 %v13348_v9, %s14496_s24  ;;  %v2910_v18 = vmax.f32 %v2850_v28, 0.0  ;;  %v2908_v4 = vmax.f32 %v2842_v43, 0.0  ;;  %v2853_v31 = vadd.f32 %v15706_v32, %v15611_v40  ;;  %v13454_v7 = vld [vmem:[%s18637_s5 + $0x80] sm:$0xff]   ;;  %v15884_v28 = vld [vmem:[#allocation4 + $0x20] sm:$0xff]  ;;  %12491 = vmatpush3.bf16.msra.mxu0 %v13453_v8 }
 0x371   : > { %v3257_v41 = vcombine.high %v3255_v49, %v3255_v49  ;;  %v11507_v57 = vrot.slane %v3256_v60, 9  ;;  %v11508_v45 = vrot.slane %v3255_v49, 9  ;;  %v4076_v54 = vmax.f32 %v3248_v50, %v11506_v15  ;;  %12521 = vmatpush3.bf16.msra.mxu1 %v13454_v7  ;;  %v13456_v43 = vld [vmem:[%s18637_s5 + $0x30] sm:$0xff]   ;;  %12492 = vmatprep.subr.bf16.mxu0 %v13455_v2 }
 0x372   : > { %v4557_v42 = vsel %vm4524_vm13, %v4407_v0, %v4556_v29  ;;  %v3326_v37 = vcombine.high %v2910_v18, %v2910_v18  ;;  %v3333_v13 = vrot.slane %v2910_v18, %v15566_v17  ;;  %v3292_v35 = vcombine.high %v2908_v4, %v2908_v4 }
 0x373   : > { %v11509_v47 = vrot.slane %v3257_v41, 9  ;;  %v4077_v58 = vmax.f32 %v3256_v60, %v11507_v57  ;;  %v4078_v48 = vmax.f32 %v3255_v49, %v11508_v45  ;;  %v4172_v53 = vmax.f32 %v4076_v54, %v4084_v59  ;;  %v15891_v57 = vld [vmem:[#allocation4 + $0x10] sm:$0xff] }
 0x374   : > { %v3340_v55 = vrot.slane %v3326_v37, %v15566_v17  ;;  %v3341_v6 = vcombine.high %v3333_v13, %v3333_v13  ;;  %v11526_v3 = vrot.slane %v3333_v13, 9  ;;  %v3299_v40 = vrot.slane %v2908_v4, %v15566_v17  ;;  %12493 = vmatpush3.bf16.msra.mxu0 %v13456_v43 }
 0x375   : > { %v4079_v32 = vmax.f32 %v3257_v41, %v11509_v47  ;;  %v4173_v30 = vmax.f32 %v4077_v58, %v4085_v24  ;;  %v4174_v14 = vmax.f32 %v4078_v48, %v4086_v23  ;;  %v4411_v5 = vrot.slane %v4172_v53, %v15569_v12 }
 0x376   : > { %v3342_v19 = vcombine.high %v3340_v55, %v3340_v55  ;;  %v11527_v63 = vrot.slane %v3341_v6, 9  ;;  %v11528_v44 = vrot.slane %v3340_v55, 9  ;;  %v4096_v22 = vmax.f32 %v3333_v13, %v11526_v3 }
 0x377   : > { %v4175_v59 = vmax.f32 %v4079_v32, %v4087_v33  ;;  %v4415_v61 = vrot.slane %v4173_v30, %v15569_v12  ;;  %v4419_v26 = vrot.slane %v4174_v14, %v15569_v12  ;;  %v4558_v62 = vsel %vm4526_vm14, %v4411_v5, %v4557_v42 }
 0x378   : > { %v11529_v24 = vrot.slane %v3342_v19, 9  ;;  %v4097_v23 = vmax.f32 %v3341_v6, %v11527_v63  ;;  %v4098_v52 = vmax.f32 %v3340_v55, %v11528_v44  ;;  %v3306_v0 = vrot.slane %v3292_v35, %v15566_v17 }
 0x379   : > { %v4423_v11 = vrot.slane %v4175_v59, %v15569_v12  ;;  %v4559_v50 = vsel %vm4528_vm15, %v4415_v61, %v4558_v62  ;;  %v3307_v33 = vcombine.high %v3299_v40, %v3299_v40  ;;  %v11518_v9 = vrot.slane %v3299_v40, 9 }
 0x37a   : > { %v4560_v34 = vsel %vm4530_vm0, %v4419_v26, %v4559_v50  ;;  %v4099_v49 = vmax.f32 %v3342_v19, %v11529_v24  ;;  %v3308_v60 = vcombine.high %v3306_v0, %v3306_v0  ;;  %v11520_v15 = vrot.slane %v3306_v0, 9 }
 0x37b   : > { %v4561_v29 = vsel %vm4532_vm1, %v4423_v11, %v4560_v34  ;;  %v11519_v18 = vrot.slane %v3307_v33, 9  ;;  %v4088_v4 = vmax.f32 %v3299_v40, %v11518_v9  ;;  %v2911_v41 = vmax.f32 %v2853_v31, 0.0  ;;  %v18656_v9 = vld [vmem:[#allocation10_spill] sm:$0xff] }
 0x37c   : > { %4596 = vst.msk [vmem:[#allocation4 + $0x51] sm:$0xff] %vm486_vm7, %v4561_v29  ;;  %v11521_v45 = vrot.slane %v3308_v60, 9  ;;  %v4090_v54 = vmax.f32 %v3306_v0, %v11520_v15  ;;  %v2845_v42 = vadd.f32 %v15711_v25, %v15608_v16  ;;  %v13343_v37 = vpack.i.bf16 %v15884_v28, %v15891_v57  ;;  %v18657_v15 = vld [vmem:[#allocation12_spill] sm:$0xff] }
 0x37d   : > { %v4089_v13 = vmax.f32 %v3307_v33, %v11519_v18  ;;  %v4176_v35 = vmax.f32 %v4088_v4, %v4096_v22  ;;  %v3343_v47 = vcombine.high %v2911_v41, %v2911_v41  ;;  %v3350_v58 = vrot.slane %v2911_v41, %v15566_v17 }
 0x37e   : > { %v4091_v48 = vmax.f32 %v3308_v60, %v11521_v45  ;;  %v4178_v31 = vmax.f32 %v4090_v54, %v4098_v52  ;;  %v2909_v53 = vmax.f32 %v2845_v42, 0.0  ;;  %13344 = vrot.lane.b32.xlu0 %v13343_v37, %s14496_s24  ;;  %v2866_v55 = vadd.f32 %v15720_v51, %v15617_v20 }
 0x37f   : > { %v4177_v6 = vmax.f32 %v4089_v13, %v4097_v23  ;;  %v4427_v16 = vrot.slane %v4176_v35, %v15569_v12  ;;  %v3357_v25 = vrot.slane %v3343_v47, %v15566_v17  ;;  %v3358_v3 = vcombine.high %v3350_v58, %v3350_v58 }
 0x380   : > { %v4179_v40 = vmax.f32 %v4091_v48, %v4099_v49  ;;  %v4435_v32 = vrot.slane %v4178_v31, %v15569_v12  ;;  %v11530_v30 = vrot.slane %v3350_v58, 9  ;;  %v3309_v14 = vcombine.high %v2909_v53, %v2909_v53 }
 0x381   : > { %v4431_v5 = vrot.slane %v4177_v6, %v15569_v12  ;;  %v3359_v19 = vcombine.high %v3357_v25, %v3357_v25  ;;  %v11531_v63 = vrot.slane %v3358_v3, 9  ;;  %v11532_v44 = vrot.slane %v3357_v25, 9 }
 0x382   : > { %v4439_v22 = vrot.slane %v4179_v40, %v15569_v12  ;;  %v4100_v46 = vmax.f32 %v3350_v58, %v11530_v30  ;;  %v3316_v20 = vrot.slane %v2909_v53, %v15566_v17  ;;  %v3323_v51 = vrot.slane %v3309_v14, %v15566_v17  ;;  %v13458_v40 = vld [vmem:[%s18637_s5 + $0xc8] sm:$0xff]  }
 0x383   : > { %v4562_v1 = vsel %vm4520_vm11, %v4431_v5, %v4427_v16  ;;  %v11533_v8 = vrot.slane %v3359_v19, 9  ;;  %v4101_v59 = vmax.f32 %v3358_v3, %v11531_v63  ;;  %v4102_v61 = vmax.f32 %v3357_v25, %v11532_v44  ;;  %v13457_v3 = vld [vmem:[%s18637_s5 + $0x78] sm:$0xff]   ;;  %v13460_v63 = vld [vmem:[%s18637_s5 + $0x88] sm:$0xff]   ;;  %12522 = vmatprep.subr.bf16.mxu1 %v13458_v40 }
 0x384   : > { %v4563_v26 = vsel %vm4522_vm12, %v4435_v32, %v4562_v1  ;;  %v3324_v62 = vcombine.high %v3316_v20, %v3316_v20  ;;  %v3325_v7 = vcombine.high %v3323_v51, %v3323_v51  ;;  %v11522_v2 = vrot.slane %v3316_v20, 9  ;;  %v13459_v32 = vld [vmem:[%s18637_s5 + $0x38] sm:$0xff]   ;;  %12494 = vmatprep.subr.bf16.mxu0 %v13457_v3  ;;  %12523 = vmatpush3.bf16.msra.mxu1 %v13460_v63 }
 0x385   : > { %v4103_v24 = vmax.f32 %v3359_v19, %v11533_v8  ;;  %v11524_v23 = vrot.slane %v3323_v51, 9  ;;  %v4564_v52 = vsel %vm4524_vm13, %v4439_v22, %v4563_v26  ;;  %v2914_v0 = vmax.f32 %v2866_v55, 0.0  ;;  %v15941_v26 = vld [vmem:[#allocation4 + $0x31] sm:$0xff]  ;;  %12495 = vmatpush3.bf16.msra.mxu0 %v13459_v32 }
 0x386   : > { %v11523_v11 = vrot.slane %v3324_v62, 9  ;;  %v11525_v50 = vrot.slane %v3325_v7, 9  ;;  %v4092_v33 = vmax.f32 %v3316_v20, %v11522_v2  ;;  %v2858_v43 = vadd.f32 %v15725_v10, %v18656_v9  ;;  %v18658_v20 = vld [vmem:[#allocation11_spill] sm:$0xff] }
 0x387   : > { %v4094_v34 = vmax.f32 %v3323_v51, %v11524_v23  ;;  %v3394_v49 = vcombine.high %v2914_v0, %v2914_v0  ;;  %v3401_v60 = vrot.slane %v2914_v0, %v15566_v17  ;;  %v2869_v29 = vadd.f32 %v15734_v38, %v18657_v15 }
 0x388   : > { %v4093_v18 = vmax.f32 %v3324_v62, %v11523_v11  ;;  %v4095_v4 = vmax.f32 %v3325_v7, %v11525_v50  ;;  %v4180_v41 = vmax.f32 %v4092_v33, %v4100_v46  ;;  %v2912_v45 = vmax.f32 %v2858_v43, 0.0  ;;  %v15946_v11 = vld [vmem:[#allocation4 + $0x21] sm:$0xff] }
 0x389   : > { %v4182_v54 = vmax.f32 %v4094_v34, %v4102_v61  ;;  %v3408_v42 = vrot.slane %v3394_v49, %v15566_v17  ;;  %v3409_v37 = vcombine.high %v3401_v60, %v3401_v60  ;;  %v11542_v13 = vrot.slane %v3401_v60, 9 }
 0x38a   : > { %v4181_v35 = vmax.f32 %v4093_v18, %v4101_v59  ;;  %v4183_v47 = vmax.f32 %v4095_v4, %v4103_v24  ;;  %v4443_v10 = vrot.slane %v4180_v41, %v15569_v12  ;;  %v3360_v58 = vcombine.high %v2912_v45, %v2912_v45 }
 0x38b   : > { %v4451_v48 = vrot.slane %v4182_v54, %v15569_v12  ;;  %v3410_v31 = vcombine.high %v3408_v42, %v3408_v42  ;;  %v11543_v53 = vrot.slane %v3409_v37, 9  ;;  %v11544_v55 = vrot.slane %v3408_v42, 9 }
 0x38c   : > { %v4447_v38 = vrot.slane %v4181_v35, %v15569_v12  ;;  %v4455_v6 = vrot.slane %v4183_v47, %v15569_v12  ;;  %v4565_v16 = vsel %vm4526_vm14, %v4443_v10, %v4564_v52  ;;  %v4112_v25 = vmax.f32 %v3401_v60, %v11542_v13 }
 0x38d   : > { %v11545_v30 = vrot.slane %v3410_v31, 9  ;;  %v4113_v14 = vmax.f32 %v3409_v37, %v11543_v53  ;;  %v4114_v5 = vmax.f32 %v3408_v42, %v11544_v55  ;;  %v3367_v19 = vrot.slane %v2912_v45, %v15566_v17 }
 0x38e   : > { %v4566_v44 = vsel %vm4528_vm15, %v4447_v38, %v4565_v16  ;;  %v3374_v22 = vrot.slane %v3360_v58, %v15566_v17  ;;  %v2915_v46 = vmax.f32 %v2869_v29, 0.0  ;;  %v2861_v51 = vadd.f32 %v15738_v36, %v18658_v20 }
 0x38f   : > { %v4567_v1 = vsel %vm4530_vm0, %v4451_v48, %v4566_v44  ;;  %v4115_v8 = vmax.f32 %v3410_v31, %v11545_v30  ;;  %v3375_v59 = vcombine.high %v3367_v19, %v3367_v19  ;;  %v11534_v61 = vrot.slane %v3367_v19, 9  ;;  %v18661_v44 = vld [vmem:[#allocation16_spill] sm:$0xff] }
 0x390   : > { %v4568_v62 = vsel %vm4532_vm1, %v4455_v6, %v4567_v1  ;;  %v3376_v7 = vcombine.high %v3374_v22, %v3374_v22  ;;  %v11536_v2 = vrot.slane %v3374_v22, 9  ;;  %v3411_v24 = vcombine.high %v2915_v46, %v2915_v46  ;;  %v18659_v6 = vld [vmem:[#allocation15_spill] sm:$0xff] }
 0x391   : > { %4597 = vst.msk [vmem:[#allocation4 + $0x61] sm:$0xff] %vm486_vm7, %v4568_v62  ;;  %v11535_v23 = vrot.slane %v3375_v59, 9  ;;  %v4104_v36 = vmax.f32 %v3367_v19, %v11534_v61  ;;  %v3418_v52 = vrot.slane %v2915_v46, %v15566_v17  ;;  %v2913_v0 = vmax.f32 %v2861_v51, 0.0 }
 0x392   : > { %v11537_v50 = vrot.slane %v3376_v7, 9  ;;  %v4106_v33 = vmax.f32 %v3374_v22, %v11536_v2  ;;  %v3425_v9 = vrot.slane %v3411_v24, %v15566_v17  ;;  %v15951_v43 = vpack.i.bf16 %v15941_v26, %v15946_v11 }
 0x393   : > { %v4105_v34 = vmax.f32 %v3375_v59, %v11535_v23  ;;  %v4184_v49 = vmax.f32 %v4104_v36, %v4112_v25  ;;  %v3426_v60 = vcombine.high %v3418_v52, %v3418_v52  ;;  %v11546_v15 = vrot.slane %v3418_v52, 9  ;;  %v18660_v25 = vld [vmem:[#allocation13_spill] sm:$0xff] }
 0x394   : > { %v4107_v29 = vmax.f32 %v3376_v7, %v11537_v50  ;;  %v4186_v18 = vmax.f32 %v4106_v33, %v4114_v5  ;;  %v3427_v4 = vcombine.high %v3425_v9, %v3425_v9  ;;  %v11548_v41 = vrot.slane %v3425_v9, 9  ;;  %13359 = vrot.lane.b32.xlu1 %v15951_v43, %s14496_s24 }
 0x395   : > { %v4185_v45 = vmax.f32 %v4105_v34, %v4113_v14  ;;  %v4459_v54 = vrot.slane %v4184_v49, %v15569_v12  ;;  %v11547_v42 = vrot.slane %v3426_v60, 9  ;;  %v4116_v37 = vmax.f32 %v3418_v52, %v11546_v15  ;;  %v13461_v15 = vld [vmem:[%s18637_s5 + $0xd0] sm:$0xff]  }
 0x396   : > { %v4187_v13 = vmax.f32 %v4107_v29, %v4115_v8  ;;  %v4467_v35 = vrot.slane %v4186_v18, %v15569_v12  ;;  %v11549_v47 = vrot.slane %v3427_v4, 9  ;;  %v4118_v10 = vmax.f32 %v3425_v9, %v11548_v41  ;;  %v13462_v29 = vld [vmem:[%s18637_s5 + $0x90] sm:$0xff]   ;;  %12524 = vmatprep.subr.bf16.mxu1 %v13461_v15 }
 0x397   : > { %v4463_v58 = vrot.slane %v4185_v45, %v15569_v12  ;;  %v4117_v48 = vmax.f32 %v3426_v60, %v11547_v42  ;;  %v3377_v31 = vcombine.high %v2913_v0, %v2913_v0  ;;  %v3384_v53 = vrot.slane %v2913_v0, %v15566_v17  ;;  %12525 = vmatpush3.bf16.msra.mxu1 %v13462_v29 }
 0x398   : > { %v4471_v55 = vrot.slane %v4187_v13, %v15569_v12  ;;  %v4119_v38 = vmax.f32 %v3427_v4, %v11549_v47  ;;  %v2882_v16 = vadd.f32 %v15744_v39, %v18659_v6  ;;  %v2874_v3 = vadd.f32 %v15747_v27, %v18660_v25 }
 0x399   : > { %v4569_v40 = vsel %vm4520_vm11, %v4463_v58, %v4459_v54  ;;  %v3391_v32 = vrot.slane %v3377_v31, %v15566_v17  ;;  %v3392_v30 = vcombine.high %v3384_v53, %v3384_v53  ;;  %v11538_v14 = vrot.slane %v3384_v53, 9  ;;  %v15989_v31 = vld [vmem:[#allocation4 + $0x40] sm:$0xff] }
 0x39a   : > { %v4570_v5 = vsel %vm4522_vm12, %v4467_v35, %v4569_v40  ;;  %v2918_v19 = vmax.f32 %v2882_v16, 0.0  ;;  %v2916_v63 = vmax.f32 %v2874_v3, 0.0  ;;  %v2885_v22 = vadd.f32 %v15750_v21, %v18661_v44  ;;  %v13463_v35 = vld [vmem:[%s18637_s5 + $0xd8] sm:$0xff]  }
 0x39b   : > { %v3393_v46 = vcombine.high %v3391_v32, %v3391_v32  ;;  %v11539_v20 = vrot.slane %v3392_v30, 9  ;;  %v11540_v51 = vrot.slane %v3391_v32, 9  ;;  %v4108_v39 = vmax.f32 %v3384_v53, %v11538_v14  ;;  %v13464_v53 = vld [vmem:[%s18637_s5 + $0x98] sm:$0xff]   ;;  %12526 = vmatprep.subr.bf16.mxu1 %v13463_v35  ;;  %v15998_v14 = vld [vmem:[#allocation4 + $0x51] sm:$0xff] }
 0x39c   : > { %v4571_v1 = vsel %vm4524_vm13, %v4471_v55, %v4570_v5  ;;  %v3462_v27 = vcombine.high %v2918_v19, %v2918_v19  ;;  %v3469_v8 = vrot.slane %v2918_v19, %v15566_v17  ;;  %v3428_v59 = vcombine.high %v2916_v63, %v2916_v63  ;;  %12527 = vmatpush3.bf16.msra.mxu1 %v13464_v53  ;;  %v16046_v53 = vld [vmem:[#allocation4 + $0x50] sm:$0xff] }
 0x39d   : > { %v11541_v61 = vrot.slane %v3393_v46, 9  ;;  %v4109_v62 = vmax.f32 %v3392_v30, %v11539_v20  ;;  %v4110_v7 = vmax.f32 %v3391_v32, %v11540_v51  ;;  %v4188_v2 = vmax.f32 %v4108_v39, %v4116_v37  ;;  %v15996_v30 = vld [vmem:[#allocation4 + $0x30] sm:$0xff] }
 0x39e   : > { %v3476_v24 = vrot.slane %v3462_v27, %v15566_v17  ;;  %v3477_v23 = vcombine.high %v3469_v8, %v3469_v8  ;;  %v11558_v36 = vrot.slane %v3469_v8, 9  ;;  %v3435_v21 = vrot.slane %v2916_v63, %v15566_v17  ;;  %v18662_v63 = vld [vmem:[#allocation14_spill] sm:$0xff] }
 0x39f   : > { %v4111_v52 = vmax.f32 %v3393_v46, %v11541_v61  ;;  %v4189_v0 = vmax.f32 %v4109_v62, %v4117_v48  ;;  %v4190_v50 = vmax.f32 %v4110_v7, %v4118_v10  ;;  %v4475_v33 = vrot.slane %v4188_v2, %v15569_v12 }
 0x3a0   : > { %v3478_v9 = vcombine.high %v3476_v24, %v3476_v24  ;;  %v11559_v34 = vrot.slane %v3477_v23, 9  ;;  %v11560_v49 = vrot.slane %v3476_v24, 9  ;;  %v4128_v60 = vmax.f32 %v3469_v8, %v11558_v36  ;;  %v16024_v36 = vld [vmem:[%s18637_s5 + $0x100] sm:$0xff]  }
 0x3a1   : > { %v4191_v18 = vmax.f32 %v4111_v52, %v4119_v38  ;;  %v4479_v4 = vrot.slane %v4189_v0, %v15569_v12  ;;  %v4483_v41 = vrot.slane %v4190_v50, %v15569_v12  ;;  %v4572_v45 = vsel %vm4526_vm14, %v4475_v33, %v4571_v1  ;;  %v13468_v33 = vld [vmem:[%s18637_s5 + $0xe8] sm:$0xff]   ;;  %12682 = vmatprep.subr.bf16.mxu0 %v16024_v36 }
 0x3a2   : > { %v11561_v54 = vrot.slane %v3478_v9, 9  ;;  %v4129_v42 = vmax.f32 %v3477_v23, %v11559_v34  ;;  %v4130_v37 = vmax.f32 %v3476_v24, %v11560_v49  ;;  %v3442_v13 = vrot.slane %v3428_v59, %v15566_v17  ;;  %v13465_v24 = vld [vmem:[%s18637_s5 + $0xe0] sm:$0xff]  }
 0x3a3   : > { %v4487_v47 = vrot.slane %v4191_v18, %v15569_v12  ;;  %v4573_v10 = vsel %vm4528_vm15, %v4479_v4, %v4572_v45  ;;  %v3443_v58 = vcombine.high %v3435_v21, %v3435_v21  ;;  %v11550_v48 = vrot.slane %v3435_v21, 9  ;;  %v13466_v23 = vld [vmem:[%s18637_s5 + $0xa0] sm:$0xff]   ;;  %12528 = vmatprep.subr.bf16.mxu1 %v13465_v24  ;;  %v13469_v45 = vld [vmem:[%s18637_s5 + $0xa8] sm:$0xff]  }
 0x3a4   : > { %v4574_v55 = vsel %vm4530_vm0, %v4483_v41, %v4573_v10  ;;  %v4131_v38 = vmax.f32 %v3478_v9, %v11561_v54  ;;  %v3444_v6 = vcombine.high %v3442_v13, %v3442_v13  ;;  %v11552_v16 = vrot.slane %v3442_v13, 9  ;;  %v16037_v41 = vld [vmem:[#allocation4 + $0x60] sm:$0xff]  ;;  %12529 = vmatpush3.bf16.msra.mxu1 %v13466_v23 }
 0x3a5   : > { %v4575_v25 = vsel %vm4532_vm1, %v4487_v47, %v4574_v55  ;;  %v11551_v3 = vrot.slane %v3443_v58, 9  ;;  %v4120_v40 = vmax.f32 %v3435_v21, %v11550_v48  ;;  %v2919_v32 = vmax.f32 %v2885_v22, 0.0  ;;  %v16006_v22 = vld [vmem:[#allocation4 + $0x41] sm:$0xff]  ;;  %12530 = vmatprep.subr.bf16.mxu1 %v13468_v33 }
 0x3a6   : > { %4598 = vst.msk [vmem:[#allocation4 + $0x71] sm:$0xff] %vm486_vm7, %v4575_v25  ;;  %v11553_v5 = vrot.slane %v3444_v6, 9  ;;  %v4122_v19 = vmax.f32 %v3442_v13, %v11552_v16  ;;  %v2877_v44 = vadd.f32 %v15755_v56, %v18662_v63  ;;  %v13353_v46 = vpack.i.bf16 %v15989_v31, %v15996_v30  ;;  %v16051_v25 = vld [vmem:[#allocation4 + $0x61] sm:$0xff]  ;;  %v16057_v63 = vld [vmem:[#allocation4 + $0x52] sm:$0xff] }
 0x3a7   : > { %v4121_v20 = vmax.f32 %v3443_v58, %v11551_v3  ;;  %v4192_v51 = vmax.f32 %v4120_v40, %v4128_v60  ;;  %v3479_v39 = vcombine.high %v2919_v32, %v2919_v32  ;;  %v3486_v1 = vrot.slane %v2919_v32, %v15566_v17  ;;  %v16053_v3 = vld [vmem:[#allocation4 + $0x32] sm:$0xff] }
 0x3a8   : > { %v4123_v27 = vmax.f32 %v3444_v6, %v11553_v5  ;;  %v4194_v8 = vmax.f32 %v4122_v19, %v4130_v37  ;;  %v2917_v59 = vmax.f32 %v2877_v44, 0.0  ;;  %13354 = vrot.lane.b32.xlu0 %v13353_v46, %s14496_s24  ;;  %v16011_v61 = vpack.i.bf16 %v15998_v14, %v16006_v22  ;;  %12531 = vmatpush3.bf16.msra.mxu1 %v13469_v45  ;;  %v4864_v45 = vld [vmem:[#allocation4 + $0x92] sm:$0xff] }
 0x3a9   : > { %v4193_v56 = vmax.f32 %v4121_v20, %v4129_v42  ;;  %v4491_v62 = vrot.slane %v4192_v51, %v15569_v12  ;;  %v3493_v7 = vrot.slane %v3479_v39, %v15566_v17  ;;  %v3494_v2 = vcombine.high %v3486_v1, %v3486_v1  ;;  %v16062_v20 = vld [vmem:[#allocation4 + $0x22] sm:$0xff] }
 0x3aa   : > { %v4195_v21 = vmax.f32 %v4123_v27, %v4131_v38  ;;  %v4499_v52 = vrot.slane %v4194_v8, %v15569_v12  ;;  %v11562_v0 = vrot.slane %v3486_v1, 9  ;;  %v3445_v50 = vcombine.high %v2917_v59, %v2917_v59  ;;  %13369 = vrot.lane.b32.xlu1 %v16011_v61, %s14496_s24  ;;  %v16065_v27 = vld [vmem:[#allocation4 + $0x42] sm:$0xff] }
 0x3ab   : > { %v4495_v9 = vrot.slane %v4193_v56, %v15569_v12  ;;  %v3495_v34 = vcombine.high %v3493_v7, %v3493_v7  ;;  %v11563_v49 = vrot.slane %v3494_v2, 9  ;;  %v11564_v60 = vrot.slane %v3493_v7, 9  ;;  %v16067_v8 = vld [vmem:[#allocation4 + $0x62] sm:$0xff] }
 0x3ac   : > { %v4503_v15 = vrot.slane %v4195_v21, %v15569_v12  ;;  %v4132_v29 = vmax.f32 %v3486_v1, %v11562_v0  ;;  %v3452_v18 = vrot.slane %v2917_v59, %v15566_v17  ;;  %v3459_v4 = vrot.slane %v3445_v50, %v15566_v17 }
 0x3ad   : > { %v4576_v54 = vsel %vm4520_vm11, %v4495_v9, %v4491_v62  ;;  %v11565_v42 = vrot.slane %v3495_v34, 9  ;;  %v4133_v37 = vmax.f32 %v3494_v2, %v11563_v49  ;;  %v4134_v13 = vmax.f32 %v3493_v7, %v11564_v60  ;;  %v16043_v35 = vld [vmem:[#allocation4 + $0x71] sm:$0xff] }
 0x3ae   : > { %v4577_v47 = vsel %vm4522_vm12, %v4499_v52, %v4576_v54  ;;  %v3460_v10 = vcombine.high %v3452_v18, %v3452_v18  ;;  %v3461_v58 = vcombine.high %v3459_v4, %v3459_v4  ;;  %v11554_v48 = vrot.slane %v3452_v18, 9  ;;  %v16059_v44 = vld [vmem:[#allocation4 + $0x72] sm:$0xff] }
 0x3af   : > { %v4135_v55 = vmax.f32 %v3495_v34, %v11565_v42  ;;  %v11556_v38 = vrot.slane %v3459_v4, 9  ;;  %v4578_v6 = vsel %vm4524_vm13, %v4503_v15, %v4577_v47  ;;  %v13363_v16 = vpack.i.bf16 %v16037_v41, %v16046_v53  ;;  %v4736_v62 = vld [vmem:[#allocation4 + $0x12] sm:$0xff] }
 0x3b0   : > { %v11555_v40 = vrot.slane %v3460_v10, 9  ;;  %v11557_v32 = vrot.slane %v3461_v58, 9  ;;  %v4124_v5 = vmax.f32 %v3452_v18, %v11554_v48  ;;  %v13373_v19 = vpack.i.bf16 %v16043_v35, %v16051_v25  ;;  %v13471_v18 = vld [vmem:[%s18637_s5 + $0xf0] sm:$0xff]   ;;  %v16101_v54 = vld [vmem:[#allocation4 + $0x70] sm:$0xff]  ;;  %v13475_v48 = vld [vmem:[%s18637_s5 + $0xb8] sm:$0xff]  }
 0x3b1   : > { %v4126_v46 = vmax.f32 %v3459_v4, %v11556_v38  ;;  %13364 = vrot.lane.b32.xlu0 %v13363_v16, %s14496_s24  ;;  %v4865_v59 = vpack.c.bf16 %v16053_v3, %v16062_v20  ;;  %v4866_v7 = vpack.c.bf16 %v16057_v63, %v16065_v27  ;;  %v4867_v2 = vpack.c.bf16 %v16059_v44, %v16067_v8  ;;  %v13472_v4 = vld [vmem:[%s18637_s5 + $0xb0] sm:$0xff]   ;;  %v4808_v38 = vld [vmem:[#allocation4 + $0x91] sm:$0xff] }
 0x3b2   : > { %v4125_v51 = vmax.f32 %v3460_v10, %v11555_v40  ;;  %v4127_v39 = vmax.f32 %v3461_v58, %v11557_v32  ;;  %v4196_v1 = vmax.f32 %v4124_v5, %v4132_v29  ;;  %13374 = vrot.lane.b32.xlu1 %v13373_v19, %s14496_s24  ;;  %v13388_v52 = vpack.i.bf16 %v16062_v20, %v4736_v62  ;;  %v13474_v58 = vld [vmem:[%s18637_s5 + $0xf8] sm:$0xff]   ;;  %v4600_v16 = vld [vmem:[#allocation4] sm:$0xff] }
 0x3b3   : > { %v4198_v56 = vmax.f32 %v4126_v46, %v4134_v13  ;;  %4869 = vst.msk [vmem:[#allocation5 + $0x20] sm:$0xff] %vm486_vm7, %v4865_v59  ;;  %4870 = vst.msk [vmem:[#allocation5 + $0x48] sm:$0xff] %vm486_vm7, %v4866_v7  ;;  %v13398_v49 = vpack.i.bf16 %v16065_v27, %v16053_v3  ;;  %v13408_v29 = vpack.i.bf16 %v16067_v8, %v16057_v63  ;;  %12532 = vmatprep.subr.bf16.mxu1 %v13471_v18 }
 0x3b4   : > { %v4197_v24 = vmax.f32 %v4125_v51, %v4133_v37  ;;  %v4199_v23 = vmax.f32 %v4127_v39, %v4135_v55  ;;  %v4507_v21 = vrot.slane %v4196_v1, %v15569_v12  ;;  %4871 = vst.msk [vmem:[#allocation5 + $0x70] sm:$0xff] %vm486_vm7, %v4867_v2  ;;  %12533 = vmatpush3.bf16.msra.mxu1 %v13472_v4  ;;  %v13470_v2 = vld [vmem:[%s18637_s5 + $0x108] sm:$0xff]  }
 0x3b5   : > { %v4515_v33 = vrot.slane %v4198_v56, %v15569_v12  ;;  %12534 = vmatprep.subr.bf16.mxu1 %v13474_v58 }
 0x3b6   : > { %v4511_v0 = vrot.slane %v4197_v24, %v15569_v12  ;;  %v4579_v50 = vsel %vm4526_vm14, %v4507_v21, %v4578_v6  ;;  %13389 = vrot.lane.b32.xlu1 %v13388_v52, %s14496_s24  ;;  %v4519_v9 = vrot.slane %v4199_v23, %v15569_v12 }
 0x3b8   : > { %v4580_v34 = vsel %vm4528_vm15, %v4511_v0, %v4579_v50  ;;  %12535 = vmatpush3.bf16.msra.mxu1 %v13475_v48 }
 0x3b9   : > { %v4581_v60 = vsel %vm4530_vm0, %v4515_v33, %v4580_v34 }
 0x3ba   : > { %v4582_v15 = vsel %vm4532_vm1, %v4519_v9, %v4581_v60  ;;  %13399 = vrot.lane.b32.xlu1 %v13398_v49, %s14496_s24 }
 0x3bb   : > { %4599 = vst.msk [vmem:[#allocation4 + $0x81] sm:$0xff] %vm486_vm7, %v4582_v15 }
 0x3be   : > { %13409 = vrot.lane.b32.xlu1 %v13408_v29, %s14496_s24 }
 0x3c2   : > { %v16103_v42 = vld [vmem:[#allocation4 + $0x80] sm:$0xff] }
 0x3c3   : > { %v4743_v37 = vld [vmem:[#allocation4 + $0x82] sm:$0xff]  ;;  %v13378_v13 = vpack.i.bf16 %v16103_v42, %v16101_v54 }
 0x3c4   : > { %v13418_v47 = vpack.i.bf16 %v4743_v37, %v16059_v44  ;;  %v4868_v10 = vpack.c.bf16 %v4864_v45, %v4743_v37  ;;  %v16121_v55 = vld [vmem:[#allocation4 + $0x81] sm:$0xff] }
 0x3c5   : > { %13379 = vrot.lane.b32.xlu0 %v13378_v13, %s14496_s24  ;;  %v13413_v6 = vpack.i.bf16 %v4808_v38, %v16121_v55 }
 0x3c6   : > { %13419 = vrot.lane.b32.xlu1 %v13418_v47, %s14496_s24  ;;  %4872 = vst.msk [vmem:[#allocation5 + $0x98] sm:$0xff] %vm486_vm7, %v4868_v10 }
 0x3c9   : > { %13384 = vrot.lane.b32.xlu0 %v15951_v43, %s14496_s24 }
 0x3cd   : > { %13394 = vrot.lane.b32.xlu0 %v16011_v61, %s14496_s24  ;;  %v4664_v61 = vld [vmem:[#allocation4 + $0x2] sm:$0xff] }
 0x3d1   : > { %13404 = vrot.lane.b32.xlu0 %v13373_v19, %s14496_s24 }
 0x3d5   : > { %13414 = vrot.lane.b32.xlu0 %v13413_v6, %s14496_s24 }
 0x3e2   : > { %v13350_v40 = vpop.permute.xlu1 %13349 }
 0x3e3   : > { %v13352_v32 = vunpack.i.h.bf16 %v13350_v40  ;;  %v13351_v5 = vunpack.i.l.bf16 %v13350_v40 }
 0x3e5   : > { %v4648_v46 = vsel %vm486_vm7, %v4600_v16, %v13351_v5  ;;  %v4649_v43 = vsel %vm486_vm7, %v15891_v57, %v13352_v32  ;;  %v13473_v57 = vld [vmem:[%s18637_s5 + $0x110] sm:$0xff]  }
 0x3e6   : > { %v4656_v51 = vpack.c.bf16 %v4649_v43, %v4648_v46 }
 0x3f0   : > { %v13345_v39 = vpop.permute.xlu0 %13344 }
 0x3f1   : > { %v13347_v1 = vunpack.i.h.bf16 %v13345_v39  ;;  %v13346_v59 = vunpack.i.l.bf16 %v13345_v39 }
 0x3f3   : > { %v4712_v19 = vsel %vm486_vm7, %v4664_v61, %v13346_v59  ;;  %v4713_v56 = vsel %vm486_vm7, %v4736_v62, %v13347_v1  ;;  %v13476_v62 = vld [vmem:[%s18637_s5 + $0x118] sm:$0xff]  }
 0x3f4   : > { %v4720_v7 = vpack.c.bf16 %v4713_v56, %v4712_v19 }
 0x3f6   : > { %5232 = vmatprep.mubr.bf16.mxu0 %v4720_v7 }
 0x3f7   : > { %5233 = vmatmul.mubr.bf16.vlgmr.msra.gmra.mrb[0].mxu0 %v4656_v51  ;;  %v4728_v51 = vld [vmem:[#allocation4 + $0x11] sm:$0xff] }
 0x3f8   : > { %12683 = vmatpush3.bf16.msra.mxu0 %v16024_v36 }
 0x3f9   : > { %12684 = vmatprep.subr.bf16.mxu0 %v13470_v2 }
 0x3fc   : > { %12685 = vmatpush3.bf16.msra.mxu0 %v13470_v2 }
 0x3fd   : > { %12686 = vmatprep.subr.bf16.mxu0 %v13473_v57 }
 0x400   : > { %12687 = vmatpush3.bf16.msra.mxu0 %v13473_v57 }
 0x401   : > { %12688 = vmatprep.subr.bf16.mxu0 %v13476_v62 }
 0x404   : > { %12689 = vmatpush3.bf16.msra.mxu0 %v13476_v62 }
 0x406   : > { %v13360_v24 = vpop.permute.xlu1 %13359 }
 0x407   : > { %v13362_v23 = vunpack.i.h.bf16 %v13360_v24  ;;  %v13361_v21 = vunpack.i.l.bf16 %v13360_v24 }
 0x409   : > { %v4651_v36 = vsel %vm486_vm7, %v15996_v30, %v13362_v23  ;;  %v4650_v52 = vsel %vm486_vm7, %v15884_v28, %v13361_v21 }
 0x40a   : > { %v4657_v0 = vpack.c.bf16 %v4651_v36, %v4650_v52 }
 0x41a   : > { %v13355_v50 = vpop.permute.xlu0 %13354 }
 0x41b   : > { %v13357_v33 = vunpack.i.h.bf16 %v13355_v50  ;;  %v13356_v9 = vunpack.i.l.bf16 %v13355_v50 }
 0x41c   : > { %v13370_v34 = vpop.permute.xlu1 %13369 }
 0x41d   : > { %v4715_v49 = vsel %vm486_vm7, %v16053_v3, %v13357_v33  ;;  %v4714_v60 = vsel %vm486_vm7, %v16062_v20, %v13356_v9  ;;  %v13372_v15 = vunpack.i.h.bf16 %v13370_v34  ;;  %v13371_v29 = vunpack.i.l.bf16 %v13370_v34 }
 0x41e   : > { %v4721_v18 = vpack.c.bf16 %v4715_v49, %v4714_v60 }
 0x41f   : > { %v4653_v4 = vsel %vm486_vm7, %v16046_v53, %v13372_v15  ;;  %v4652_v45 = vsel %vm486_vm7, %v15989_v31, %v13371_v29 }
 0x420   : > { %v4658_v37 = vpack.c.bf16 %v4653_v4, %v4652_v45  ;;  %5240 = vmatprep.mubr.bf16.mxu0 %v4721_v18 }
 0x421   : > { %5241 = vmatmul.mubr.bf16.gmra.mrb[4].mxu0 %v4657_v0 }
 0x423   : > { %v13365_v13 = vpop.permute.xlu0 %13364 }
 0x424   : > { %v13367_v47 = vunpack.i.h.bf16 %v13365_v13  ;;  %v13366_v10 = vunpack.i.l.bf16 %v13365_v13  ;;  %v13375_v58 = vpop.permute.xlu1 %13374 }
 0x425   : > { %v13377_v3 = vunpack.i.h.bf16 %v13375_v58  ;;  %v13376_v48 = vunpack.i.l.bf16 %v13375_v58 }
 0x426   : > { %v4717_v20 = vsel %vm486_vm7, %v16057_v63, %v13367_v47  ;;  %v4716_v38 = vsel %vm486_vm7, %v16065_v27, %v13366_v10  ;;  %v4882_v10 = vld [vmem:[#allocation5 + $0x48] sm:$0xff] }
 0x427   : > { %v4722_v6 = vpack.c.bf16 %v4717_v20, %v4716_v38  ;;  %v4655_v16 = vsel %vm486_vm7, %v16101_v54, %v13377_v3  ;;  %v4654_v40 = vsel %vm486_vm7, %v16037_v41, %v13376_v48  ;;  %v4887_v48 = vld [vmem:[#allocation5 + $0x70] sm:$0xff] }
 0x428   : > { %v4659_v32 = vpack.c.bf16 %v4655_v16, %v4654_v40  ;;  %v13390_v5 = vpop.permute.xlu1 %13389  ;;  %v4800_v20 = vld [vmem:[#allocation4 + $0x90] sm:$0xff] }
 0x429   : > { %v13392_v46 = vunpack.i.h.bf16 %v13390_v5  ;;  %v13391_v43 = vunpack.i.l.bf16 %v13390_v5  ;;  %5248 = vmatprep.mubr.bf16.mxu0 %v4722_v6  ;;  %v13479_v5 = vld [vmem:[%s18639_s7 + $0x4] ss:$8 sps:$4 sm:$0xff]  }
 0x42a   : > { %5249 = vmatmul.mubr.bf16.gmra.mrb[8].mxu0 %v4658_v37  ;;  %6469 = vmatprep.subr.bf16.mxu1 %v13479_v5 }
 0x42b   : > { %v4777_v63 = vsel %vm486_vm7, %v15946_v11, %v13392_v46  ;;  %v4776_v61 = vsel %vm486_vm7, %v4728_v51, %v13391_v43  ;;  %v13482_v46 = vld [vmem:[%s18639_s7 + $0x14] ss:$8 sps:$4 sm:$0xff]   ;;  %v13483_v43 = vld [vmem:[%s18639_s7 + $0x20] ss:$8 sps:$4 sm:$0xff]   ;;  %v13485_v51 = vld [vmem:[%s18639_s7 + $0x24] ss:$8 sps:$4 sm:$0xff]  }
 0x42c   : > { %v4784_v27 = vpack.c.bf16 %v4777_v63, %v4776_v61  ;;  %v13400_v39 = vpop.permute.xlu1 %13399  ;;  %v13486_v63 = vld [vmem:[%s18639_s7 + $0x30] ss:$8 sps:$4 sm:$0xff]   ;;  %v13488_v61 = vld [vmem:[%s18639_s7 + $0x34] ss:$8 sps:$4 sm:$0xff]  }
 0x42d   : > { %v13402_v1 = vunpack.i.h.bf16 %v13400_v39  ;;  %v13401_v59 = vunpack.i.l.bf16 %v13400_v39  ;;  %v13489_v39 = vld [vmem:[%s18639_s7 + $0x40] ss:$8 sps:$4 sm:$0xff]  }
 0x42f   : > { %v4779_v19 = vsel %vm486_vm7, %v16006_v22, %v13402_v1  ;;  %v4778_v56 = vsel %vm486_vm7, %v15941_v26, %v13401_v59  ;;  %v13494_v1 = vld [vmem:[%s18639_s7 + $0x54] ss:$8 sps:$4 sm:$0xff]   ;;  %v13492_v59 = vld [vmem:[%s18639_s7 + $0x50] ss:$8 sps:$4 sm:$0xff]  }
 0x430   : > { %v4785_v7 = vpack.c.bf16 %v4779_v19, %v4778_v56  ;;  %v13410_v2 = vpop.permute.xlu1 %13409  ;;  %v13497_v19 = vld [vmem:[%s18639_s7 + $0x64] ss:$8 sps:$4 sm:$0xff]   ;;  %v13495_v56 = vld [vmem:[%s18639_s7 + $0x60] ss:$8 sps:$4 sm:$0xff]  }
 0x431   : > { %v13412_v57 = vunpack.i.h.bf16 %v13410_v2  ;;  %v13411_v62 = vunpack.i.l.bf16 %v13410_v2  ;;  %v13498_v2 = vld [vmem:[%s18639_s7 + $0x70] ss:$8 sps:$4 sm:$0xff]  }
 0x433   : > { %v4781_v24 = vsel %vm486_vm7, %v16051_v25, %v13412_v57  ;;  %v4780_v11 = vsel %vm486_vm7, %v15998_v14, %v13411_v62  ;;  %v13503_v57 = vld [vmem:[%s18639_s7 + $0x84] ss:$8 sps:$4 sm:$0xff]   ;;  %v13501_v62 = vld [vmem:[%s18639_s7 + $0x80] ss:$8 sps:$4 sm:$0xff]  }
 0x434   : > { %v4786_v23 = vpack.c.bf16 %v4781_v24, %v4780_v11  ;;  %v13506_v24 = vld [vmem:[%s18639_s7 + $0x94] ss:$8 sps:$4 sm:$0xff]   ;;  %v13504_v11 = vld [vmem:[%s18639_s7 + $0x90] ss:$8 sps:$4 sm:$0xff]  }
 0x437   : > { %v13380_v21 = vpop.permute.xlu0 %13379 }
 0x438   : > { %v13420_v36 = vpop.permute.xlu1 %13419  ;;  %v13382_v52 = vunpack.i.h.bf16 %v13380_v21  ;;  %v13381_v0 = vunpack.i.l.bf16 %v13380_v21  ;;  %v13507_v21 = vld [vmem:[%s18639_s7 + $0xa0] ss:$8 sps:$4 sm:$0xff]  }
 0x439   : > { %v13422_v50 = vunpack.i.h.bf16 %v13420_v36  ;;  %v13421_v22 = vunpack.i.l.bf16 %v13420_v36  ;;  %v13512_v36 = vld [vmem:[%s18639_s7 + $0xb4] ss:$8 sps:$4 sm:$0xff]  }
 0x43a   : > { %v4719_v26 = vsel %vm486_vm7, %v16059_v44, %v13382_v52  ;;  %v4718_v33 = vsel %vm486_vm7, %v16067_v8, %v13381_v0  ;;  %v4877_v8 = vld [vmem:[#allocation5 + $0x20] sm:$0xff]  ;;  %v13515_v0 = vld [vmem:[%s18639_s7 + $0xc4] ss:$8 sps:$4 sm:$0xff]  }
 0x43b   : > { %v4783_v9 = vsel %vm486_vm7, %v16121_v55, %v13422_v50  ;;  %v4782_v25 = vsel %vm486_vm7, %v16043_v35, %v13421_v22  ;;  %v4723_v14 = vpack.c.bf16 %v4719_v26, %v4718_v33  ;;  %v13385_v34 = vpop.permute.xlu0 %13384  ;;  %v13510_v52 = vld [vmem:[%s18639_s7 + $0xb0] ss:$8 sps:$4 sm:$0xff]   ;;  %v13513_v50 = vld [vmem:[%s18639_s7 + $0xc0] ss:$8 sps:$4 sm:$0xff]   ;;  %v13518_v26 = vld [vmem:[%s18639_s7 + $0xd4] ss:$8 sps:$4 sm:$0xff]  }
 0x43c   : > { %v4787_v49 = vpack.c.bf16 %v4783_v9, %v4782_v25  ;;  %v13387_v60 = vunpack.i.h.bf16 %v13385_v34  ;;  %v13386_v15 = vunpack.i.l.bf16 %v13385_v34  ;;  %v13516_v22 = vld [vmem:[%s18639_s7 + $0xd0] ss:$8 sps:$4 sm:$0xff]   ;;  %v13519_v33 = vld [vmem:[%s18639_s7 + $0xe0] ss:$8 sps:$4 sm:$0xff]   ;;  %v13521_v9 = vld [vmem:[%s18639_s7 + $0xe4] ss:$8 sps:$4 sm:$0xff]  }
 0x43d   : > { %5256 = vmatprep.mubr.bf16.mxu0 %v4723_v14  ;;  %v13524_v25 = vld [vmem:[%s18639_s7 + $0xf4] ss:$8 sps:$4 sm:$0xff]   ;;  %v13522_v14 = vld [vmem:[%s18639_s7 + $0xf0] ss:$8 sps:$4 sm:$0xff]   ;;  %v13527_v34 = vld [vmem:[%s18639_s7 + $0x104] ss:$8 sps:$4 sm:$0xff]  }
 0x43e   : > { %v4842_v29 = vsel %vm486_vm7, %v15996_v30, %v13387_v60  ;;  %v4841_v44 = vsel %vm486_vm7, %v15884_v28, %v13386_v15  ;;  %5257 = vmatmul.mubr.bf16.gmra.mrb[12].mxu0 %v4659_v32  ;;  %v4892_v32 = vld [vmem:[#allocation5 + $0x98] sm:$0xff] }
 0x43f   : > { %v4849_v18 = vpack.c.bf16 %v4842_v29, %v4841_v44  ;;  %v13395_v4 = vpop.permute.xlu0 %13394  ;;  %12690 = vmatprep.mubr.msk.bf16.mxu0 %vm486_vm7, %v4877_v8 }
 0x440   : > { %v13397_v55 = vunpack.i.h.bf16 %v13395_v4  ;;  %v13396_v35 = vunpack.i.l.bf16 %v13395_v4 }
 0x441   : > { %5297 = vmatprep.mubr.bf16.mxu1 %v4849_v18 }
 0x442   : > { %v4844_v45 = vsel %vm486_vm7, %v16046_v53, %v13397_v55  ;;  %v4843_v37 = vsel %vm486_vm7, %v15989_v31, %v13396_v35  ;;  %5298 = vmatmul.mubr.bf16.vlgmr.msra.gmra.mrb[128].mxu1 %v4784_v27  ;;  %v13491_v27 = vld [vmem:[%s18639_s7 + $0x44] ss:$8 sps:$4 sm:$0xff]  }
 0x443   : > { %v4850_v30 = vpack.c.bf16 %v4844_v45, %v4843_v37  ;;  %v13405_v13 = vpop.permute.xlu0 %13404 }
 0x444   : > { %v13407_v47 = vunpack.i.h.bf16 %v13405_v13  ;;  %v13406_v28 = vunpack.i.l.bf16 %v13405_v13 }
 0x445   : > { %5305 = vmatprep.mubr.bf16.mxu1 %v4850_v30 }
 0x446   : > { %v4846_v58 = vsel %vm486_vm7, %v16101_v54, %v13407_v47  ;;  %v4845_v3 = vsel %vm486_vm7, %v16037_v41, %v13406_v28  ;;  %12691 = vmatmul.mubr.msk.bf16.vlgmr.msra.gmra.mrb[16].mxu0 %vm486_vm7, %v4882_v10  ;;  %v13477_v41 = vld [vmem:[%s18639_s7] ss:$8 sps:$4 sm:$0xff]  }
 0x447   : > { %v4851_v53 = vpack.c.bf16 %v4846_v58, %v4845_v3  ;;  %v13415_v38 = vpop.permute.xlu0 %13414  ;;  %12694 = vmatprep.mubr.msk.bf16.mxu0 %vm486_vm7, %v4887_v48  ;;  %6470 = vmatpush1.bf16.msra.mxu1 %v13477_v41 }
 0x448   : > { %v13417_v31 = vunpack.i.h.bf16 %v13415_v38  ;;  %v13416_v6 = vunpack.i.l.bf16 %v13415_v38  ;;  %6471 = vmatprep.subr.bf16.mxu1 %v13482_v46  ;;  %v16305_v38 = vld [vmem:[%s18638_s6] ss:$0 sm:$0xff] }
 0x44a   : > { %v4848_v16 = vsel %vm486_vm7, %v4800_v20, %v13417_v31  ;;  %v4847_v40 = vsel %vm486_vm7, %v16103_v42, %v13416_v6  ;;  %5306 = vmatmul.mubr.bf16.gmra.mrb[132].mxu1 %v4785_v7  ;;  %v13480_v42 = vld [vmem:[%s18639_s7 + $0x10] ss:$8 sps:$4 sm:$0xff]   ;;  %v13500_v7 = vld [vmem:[%s18639_s7 + $0x74] ss:$8 sps:$4 sm:$0xff]  }
 0x44b   : > { %v4852_v54 = vpack.c.bf16 %v4848_v16, %v4847_v40  ;;  %5313 = vmatprep.mubr.bf16.mxu1 %v4851_v53  ;;  %6472 = vmatpush1.bf16.msra.mxu1 %v13480_v42 }
 0x44c   : > { %6473 = vmatprep.subr.bf16.mxu1 %v13485_v51 }
 0x44e   : > { %12695 = vmatmul.mubr.msk.bf16.gmra.mrb[20].mxu0 %vm486_vm7, %v4892_v32 }
 0x44f   : > { %6474 = vmatpush1.bf16.msra.mxu1 %v13483_v43 }
 0x450   : > { %6475 = vmatprep.subr.bf16.mxu1 %v13488_v61 }
 0x452   : > { %5314 = vmatmul.mubr.bf16.gmra.mrb[136].mxu1 %v4786_v23  ;;  %v13509_v23 = vld [vmem:[%s18639_s7 + $0xa4] ss:$8 sps:$4 sm:$0xff]  }
 0x453   : > { %5321 = vmatprep.mubr.bf16.mxu1 %v4852_v54  ;;  %6476 = vmatpush1.bf16.msra.mxu1 %v13486_v63 }
 0x454   : > { %6477 = vmatprep.subr.bf16.mxu1 %v13491_v27 }
 0x457   : > { %6478 = vmatpush1.bf16.msra.mxu1 %v13489_v39 }
 0x458   : > { %6479 = vmatprep.subr.bf16.mxu1 %v13494_v1 }
 0x45a   : > { %5322 = vmatmul.mubr.bf16.gmra.mrb[140].mxu1 %v4787_v49 }
 0x45b   : > { %6480 = vmatpush1.bf16.msra.mxu1 %v13492_v59  ;;  %v5428_v59 = vld [vmem:[#allocation6 + $0x1] sm:$0xff] }
 0x45c   : > { %6481 = vmatprep.subr.bf16.mxu1 %v13497_v19 }
 0x45f   : > { %6482 = vmatpush1.bf16.msra.mxu1 %v13495_v56 }
 0x460   : > { %6483 = vmatprep.subr.bf16.mxu1 %v13500_v7 }
 0x463   : > { %6484 = vmatpush1.bf16.msra.mxu1 %v13498_v2 }
 0x464   : > { %6485 = vmatprep.subr.bf16.mxu1 %v13503_v57 }
 0x467   : > { %6486 = vmatpush1.bf16.msra.mxu1 %v13501_v62 }
 0x468   : > { %6487 = vmatprep.subr.bf16.mxu1 %v13506_v24 }
 0x46b   : > { %6488 = vmatpush1.bf16.msra.mxu1 %v13504_v11 }
 0x46c   : > { %6489 = vmatprep.subr.bf16.mxu1 %v13509_v23 }
 0x46f   : > { %6490 = vmatpush1.bf16.msra.mxu1 %v13507_v21 }
 0x470   : > { %6491 = vmatprep.subr.bf16.mxu1 %v13512_v36 }
 0x473   : > { %6492 = vmatpush1.bf16.msra.mxu1 %v13510_v52 }
 0x474   : > { %6493 = vmatprep.subr.bf16.mxu1 %v13515_v0 }
 0x477   : > { %6494 = vmatpush1.bf16.msra.mxu1 %v13513_v50 }
 0x478   : > { %6495 = vmatprep.subr.bf16.mxu1 %v13518_v26 }
 0x47b   : > { %6496 = vmatpush1.bf16.msra.mxu1 %v13516_v22 }
 0x47c   : > { %6497 = vmatprep.subr.bf16.mxu1 %v13521_v9 }
 0x47f   : > { %6498 = vmatpush1.bf16.msra.mxu1 %v13519_v33 }
 0x480   : > { %6499 = vmatprep.subr.bf16.mxu1 %v13524_v25 }
 0x483   : > { %6500 = vmatpush1.bf16.msra.mxu1 %v13522_v14 }
 0x484   : > { %6542 = vmatprep.subr.bf16.mxu1 %v13527_v34  ;;  %v5412_v34 = vld [vmem:[#allocation6] sm:$0xff] }
 0x4ca   : > { %v12496_v49 = vpop.f32.mrb[0].mxu0 }
 0x4cb   : > { %v12497_v60 = vpop.f32.mrb[1].mxu0 }
 0x4cc   : > { %v12498_v15 = vadd.f32 %v12497_v60, %v12496_v49  ;;  %v12499_v29 = vpop.f32.mrb[2].mxu0 }
 0x4cd   : > { %v12500_v44 = vpop.f32.mrb[3].mxu0 }
 0x4ce   : > { %v12501_v8 = vadd.f32 %v12500_v44, %v12499_v29  ;;  %v5235_v54 = vadd.f32 %v12498_v15, %v16305_v38 }
 0x4d0   : > { %v5238_v46 = vadd.f32 %v12501_v8, %v16305_v38  ;;  %v13525_v8 = vld [vmem:[%s18639_s7 + $0x100] ss:$8 sps:$4 sm:$0xff]  }
 0x4f4   : > { %v12502_v18 = vpop.f32.mrb[4].mxu0 }
 0x4f5   : > { %v12503_v4 = vpop.f32.mrb[5].mxu0 }
 0x4f6   : > { %v12504_v55 = vadd.f32 %v12503_v4, %v12502_v18  ;;  %v12505_v35 = vpop.f32.mrb[6].mxu0 }
 0x4f7   : > { %v12506_v45 = vpop.f32.mrb[7].mxu0 }
 0x4f8   : > { %v12507_v37 = vadd.f32 %v12506_v45, %v12505_v35  ;;  %v5243_v57 = vadd.f32 %v12504_v55, %v16305_v38 }
 0x4fa   : > { %v5246_v36 = vadd.f32 %v12507_v37, %v16305_v38  ;;  %v13530_v37 = vld [vmem:[%s18639_s7 + $0x114] ss:$8 sps:$4 sm:$0xff]  }
 0x4fd   : > { %v12508_v30 = vpop.f32.mrb[8].mxu0 }
 0x4fe   : > { %v12509_v13 = vpop.f32.mrb[9].mxu0 }
 0x4ff   : > { %v12510_v47 = vadd.f32 %v12509_v13, %v12508_v30  ;;  %v12511_v28 = vpop.f32.mrb[10].mxu0 }
 0x500   : > { %v12512_v10 = vpop.f32.mrb[11].mxu0 }
 0x501   : > { %v16298_v58 = vadd.f32 %v12512_v10, %v12511_v28  ;;  %v5251_v29 = vadd.f32 %v12510_v47, %v16305_v38 }
 0x503   : > { %v5254_v47 = vadd.f32 %v16298_v58, %v16305_v38  ;;  %v13533_v58 = vld [vmem:[%s18639_s7 + $0x124] ss:$8 sps:$4 sm:$0xff]  }
 0x511   : > { %v12514_v3 = vpop.f32.mrb[12].mxu0 }
 0x512   : > { %v12515_v48 = vpop.f32.mrb[13].mxu0 }
 0x513   : > { %v16300_v53 = vadd.f32 %v12515_v48, %v12514_v3  ;;  %v12517_v20 = vpop.f32.mrb[14].mxu0  ;;  %v13528_v3 = vld [vmem:[%s18639_s7 + $0x110] ss:$8 sps:$4 sm:$0xff]  }
 0x514   : > { %v12518_v31 = vpop.f32.mrb[15].mxu0 }
 0x515   : > { %v16307_v6 = vadd.f32 %v12518_v31, %v12517_v20  ;;  %v12536_v16 = vpop.f32.mrb[128].mxu1 }
 0x516   : > { %v12537_v40 = vpop.f32.mrb[129].mxu1 }
 0x517   : > { %v12538_v32 = vadd.f32 %v12537_v40, %v12536_v16  ;;  %v12539_v41 = vpop.f32.mrb[130].mxu1 }
 0x518   : > { %v12540_v5 = vpop.f32.mrb[131].mxu1 }
 0x519   : > { %v12541_v42 = vadd.f32 %v12540_v5, %v12539_v41  ;;  %v12692_v43 = vpop.f32.mrb[16].mxu0  ;;  %v5300_v51 = vadd.f32 %v12538_v32, %v5235_v54  ;;  %v5259_v32 = vadd.f32 %v16300_v53, %v16305_v38  ;;  %v13531_v5 = vld [vmem:[%s18639_s7 + $0x120] ss:$8 sps:$4 sm:$0xff]   ;;  %v13536_v53 = vld [vmem:[%s18639_s7 + $0x134] ss:$8 sps:$4 sm:$0xff]  }
 0x51a   : > { %v5364_v63 = vpop.f32.mrb[17].mxu0 }
 0x51b   : > { %v5365_v61 = vadd.f32 %v5364_v63, %v5300_v51  ;;  %v12693_v27 = vpop.f32.mrb[18].mxu0  ;;  %v5303_v39 = vadd.f32 %v12541_v42, %v5238_v46 }
 0x51c   : > { %v5367_v1 = vpop.f32.mrb[19].mxu0 }
 0x51d   : > { %v16311_v19 = vmax.f32 %v5365_v61, 0.0  ;;  %v5368_v56 = vadd.f32 %v5367_v1, %v5303_v39  ;;  %v12542_v7 = vpop.f32.mrb[132].mxu1  ;;  %v5262_v1 = vadd.f32 %v16307_v6, %v16305_v38  ;;  %v13539_v38 = vld [vmem:[%s18639_s7 + $0x144] ss:$8 sps:$4 sm:$0xff]  }
 0x51e   : > { %v12543_v2 = vpop.f32.mrb[133].mxu1 }
 0x51f   : > { %5404 = vst [vmem:[#allocation6 + $0x11] sm:$0xff] %v16311_v19  ;;  %v16315_v62 = vmax.f32 %v5368_v56, 0.0  ;;  %v12544_v24 = vadd.f32 %v12543_v2, %v12542_v7  ;;  %v12545_v11 = vpop.f32.mrb[134].mxu1  ;;  %v5436_v23 = vpack.c.bf16 %v16311_v19, %v5428_v59  ;;  %v13534_v7 = vld [vmem:[%s18639_s7 + $0x130] ss:$8 sps:$4 sm:$0xff]  }
 0x520   : > { %v12546_v21 = vpop.f32.mrb[135].mxu1 }
 0x521   : > { %5405 = vst [vmem:[#allocation6 + $0x21] sm:$0xff] %v16315_v62  ;;  %v5308_v52 = vadd.f32 %v12544_v24, %v5243_v57  ;;  %v12547_v0 = vadd.f32 %v12546_v21, %v12545_v11  ;;  %v16320_v50 = vpop.f32.mrb[20].mxu0  ;;  %6501 = vmatprep.mubr.bf16.mxu1 %v5436_v23  ;;  %v5484_v22 = vpack.c.bf16 %v16315_v62, %v16311_v19  ;;  %v13537_v23 = vld [vmem:[%s18639_s7 + $0x140] ss:$8 sps:$4 sm:$0xff]   ;;  %v13722_v19 = vld [vmem:[%s18641_s9 + $0x434] ss:$8 sps:$4 sm:$0xff]  }
 0x522   : > { %v5380_v26 = vpop.f32.mrb[21].mxu0 }
 0x523   : > { %v5373_v33 = vadd.f32 %v12692_v43, %v5308_v52  ;;  %v5311_v9 = vadd.f32 %v12547_v0, %v5246_v36  ;;  %v16324_v25 = vpop.f32.mrb[22].mxu0 }
 0x524   : > { %v5383_v14 = vpop.f32.mrb[23].mxu0 }
 0x525   : > { %v16326_v49 = vmax.f32 %v5373_v33, 0.0  ;;  %v5376_v60 = vadd.f32 %v12693_v27, %v5311_v9  ;;  %v12548_v15 = vpop.f32.mrb[136].mxu1  ;;  %v13540_v9 = vld [vmem:[%s18639_s7 + $0x150] ss:$8 sps:$4 sm:$0xff]  }
 0x526   : > { %v12549_v44 = vpop.f32.mrb[137].mxu1  ;;  %v16332_v18 = vld [vmem:[#allocation6 + $0x10] sm:$0xff] }
 0x527   : > { %5406 = vst [vmem:[#allocation6 + $0x31] sm:$0xff] %v16326_v49  ;;  %v16335_v4 = vmax.f32 %v5376_v60, 0.0  ;;  %v12550_v55 = vadd.f32 %v12549_v44, %v12548_v15  ;;  %v12551_v35 = vpop.f32.mrb[138].mxu1  ;;  %v5420_v45 = vpack.c.bf16 %v16332_v18, %v5412_v34  ;;  %v16343_v30 = vpack.c.bf16 %v16326_v49, %v16315_v62  ;;  %v13627_v62 = vld [vmem:[%s18639_s7 + $0x320] ss:$8 sps:$4 sm:$0xff]  }
 0x528   : > { %v12552_v13 = vpop.f32.mrb[139].mxu1  ;;  %v5414_v46 = vld [vmem:[#allocation6 + $0x20] sm:$0xff] }
 0x529   : > { %5407 = vst [vmem:[#allocation6 + $0x41] sm:$0xff] %v16335_v4  ;;  %v5316_v28 = vadd.f32 %v12550_v55, %v5251_v29  ;;  %v12553_v10 = vadd.f32 %v12552_v13, %v12551_v35  ;;  %6502 = vmatmul.mubr.bf16.vlgmr.msra.gmra.mrb[144].mxu1 %v5420_v45  ;;  %v5485_v48 = vpack.c.bf16 %v16335_v4, %v16326_v49  ;;  %v13548_v29 = vld [vmem:[%s18639_s7 + $0x174] ss:$8 sps:$4 sm:$0xff]   ;;  %v13551_v55 = vld [vmem:[%s18639_s7 + $0x184] ss:$8 sps:$4 sm:$0xff]  }
 0x52a   : > { %6543 = vmatpush1.bf16.msra.mxu1 %v13525_v8  ;;  %6511 = vmatprep.mubr.bf16.mxu1 %v16343_v30  ;;  %v5468_v44 = vpack.c.bf16 %v5414_v46, %v16332_v18  ;;  %v13546_v8 = vld [vmem:[%s18639_s7 + $0x170] ss:$8 sps:$4 sm:$0xff]   ;;  %v13549_v35 = vld [vmem:[%s18639_s7 + $0x180] ss:$8 sps:$4 sm:$0xff]   ;;  %v13554_v18 = vld [vmem:[%s18639_s7 + $0x194] ss:$8 sps:$4 sm:$0xff]  }
 0x52b   : > { %v5381_v20 = vadd.f32 %v5380_v26, %v5316_v28  ;;  %v5319_v31 = vadd.f32 %v12553_v10, %v5254_v47  ;;  %6544 = vmatprep.subr.bf16.mxu1 %v13530_v37  ;;  %v13552_v45 = vld [vmem:[%s18639_s7 + $0x190] ss:$8 sps:$4 sm:$0xff]   ;;  %v13557_v37 = vld [vmem:[%s18639_s7 + $0x1a4] ss:$8 sps:$4 sm:$0xff]   ;;  %v13555_v13 = vld [vmem:[%s18639_s7 + $0x1a0] ss:$8 sps:$4 sm:$0xff]  }
 0x52c   : > { %v13560_v47 = vld [vmem:[%s18639_s7 + $0x1b4] ss:$8 sps:$4 sm:$0xff]   ;;  %v13558_v28 = vld [vmem:[%s18639_s7 + $0x1b0] ss:$8 sps:$4 sm:$0xff]   ;;  %v13563_v10 = vld [vmem:[%s18639_s7 + $0x1c4] ss:$8 sps:$4 sm:$0xff]  }
 0x52d   : > { %v16357_v16 = vmax.f32 %v5381_v20, 0.0  ;;  %v5384_v40 = vadd.f32 %v5383_v14, %v5319_v31  ;;  %v12554_v54 = vpop.f32.mrb[140].mxu1  ;;  %v13543_v14 = vld [vmem:[%s18639_s7 + $0x160] ss:$8 sps:$4 sm:$0xff]   ;;  %v13566_v20 = vld [vmem:[%s18639_s7 + $0x1d4] ss:$8 sps:$4 sm:$0xff]  }
 0x52e   : > { %v12555_v41 = vpop.f32.mrb[141].mxu1  ;;  %6545 = vmatpush1.bf16.msra.mxu1 %v13528_v3  ;;  %v16364_v42 = vld [vmem:[#allocation6 + $0x30] sm:$0xff]  ;;  %v13564_v31 = vld [vmem:[%s18639_s7 + $0x1d0] ss:$8 sps:$4 sm:$0xff]   ;;  %v13734_v49 = vld [vmem:[%s18641_s9 + $0x454] ss:$8 sps:$4 sm:$0xff]  }
 0x52f   : > { %5408 = vst [vmem:[#allocation6 + $0x51] sm:$0xff] %v16357_v16  ;;  %v16367_v43 = vmax.f32 %v5384_v40, 0.0  ;;  %v12556_v51 = vadd.f32 %v12555_v41, %v12554_v54  ;;  %v12557_v63 = vpop.f32.mrb[142].mxu1  ;;  %6546 = vmatprep.subr.bf16.mxu1 %v13533_v58  ;;  %v16370_v61 = vpack.c.bf16 %v16364_v42, %v5414_v46  ;;  %v16377_v27 = vpack.c.bf16 %v16357_v16, %v16335_v4  ;;  %v13561_v3 = vld [vmem:[%s18639_s7 + $0x1c0] ss:$8 sps:$4 sm:$0xff]  }
 0x530   : > { %v12558_v39 = vpop.f32.mrb[143].mxu1  ;;  %v16399_v21 = vld [vmem:[#allocation6 + $0x40] sm:$0xff]  ;;  %v13569_v58 = vld [vmem:[%s18639_s7 + $0x1e4] ss:$8 sps:$4 sm:$0xff]   ;;  %v13567_v40 = vld [vmem:[%s18639_s7 + $0x1e0] ss:$8 sps:$4 sm:$0xff]  }
 0x531   : > { %5409 = vst [vmem:[#allocation6 + $0x61] sm:$0xff] %v16367_v43  ;;  %v5324_v59 = vadd.f32 %v12556_v51, %v5259_v32  ;;  %v12559_v56 = vadd.f32 %v12558_v39, %v12557_v63  ;;  %6512 = vmatmul.mubr.bf16.gmra.mrb[148].mxu1 %v16370_v61  ;;  %v5486_v2 = vpack.c.bf16 %v16367_v43, %v16357_v16  ;;  %v13572_v54 = vld [vmem:[%s18639_s7 + $0x1f4] ss:$8 sps:$4 sm:$0xff]   ;;  %v13570_v32 = vld [vmem:[%s18639_s7 + $0x1f0] ss:$8 sps:$4 sm:$0xff]   ;;  %v5445_v46 = vld [vmem:[#allocation6 + $0x12] sm:$0xff] }
 0x532   : > { %6547 = vmatpush1.bf16.msra.mxu1 %v13531_v5  ;;  %6521 = vmatprep.mubr.bf16.mxu1 %v16377_v27  ;;  %v13575_v41 = vld [vmem:[%s18639_s7 + $0x204] ss:$8 sps:$4 sm:$0xff]   ;;  %v5444_v5 = vld [vmem:[#allocation6 + $0x2] sm:$0xff]  ;;  %v13573_v51 = vld [vmem:[%s18639_s7 + $0x200] ss:$8 sps:$4 sm:$0xff]   ;;  %v5469_v39 = vpack.c.bf16 %v16399_v21, %v16364_v42 }
 0x533   : > { %v5389_v57 = vadd.f32 %v16320_v50, %v5324_v59  ;;  %v5327_v24 = vadd.f32 %v12559_v56, %v5262_v1  ;;  %6548 = vmatprep.subr.bf16.mxu1 %v13536_v53  ;;  %v13542_v50 = vld [vmem:[%s18639_s7 + $0x154] ss:$8 sps:$4 sm:$0xff]   ;;  %v5452_v63 = vpack.c.bf16 %v5445_v46, %v5444_v5  ;;  %v13576_v1 = vld [vmem:[%s18639_s7 + $0x210] ss:$8 sps:$4 sm:$0xff]   ;;  %v13581_v59 = vld [vmem:[%s18639_s7 + $0x224] ss:$8 sps:$4 sm:$0xff]  }
 0x534   : > { %v13578_v53 = vld [vmem:[%s18639_s7 + $0x214] ss:$8 sps:$4 sm:$0xff]   ;;  %v16512_v56 = vld [vmem:[#allocation6 + $0x32] sm:$0xff] }
 0x535   : > { %v16393_v6 = vmax.f32 %v5389_v57, 0.0  ;;  %v5392_v11 = vadd.f32 %v16324_v25, %v5327_v24  ;;  %v13545_v25 = vld [vmem:[%s18639_s7 + $0x164] ss:$8 sps:$4 sm:$0xff]   ;;  %v13579_v42 = vld [vmem:[%s18639_s7 + $0x220] ss:$8 sps:$4 sm:$0xff]  }
 0x536   : > { %6549 = vmatpush1.bf16.msra.mxu1 %v13534_v7  ;;  %v16401_v36 = vld [vmem:[#allocation6 + $0x50] sm:$0xff]  ;;  %v5446_v7 = vld [vmem:[#allocation6 + $0x22] sm:$0xff] }
 0x537   : > { %5410 = vst [vmem:[#allocation6 + $0x71] sm:$0xff] %v16393_v6  ;;  %v16404_v52 = vmax.f32 %v5392_v11, 0.0  ;;  %6550 = vmatprep.subr.bf16.mxu1 %v13539_v38  ;;  %v16408_v0 = vpack.c.bf16 %v16401_v36, %v16399_v21  ;;  %v16415_v26 = vpack.c.bf16 %v16393_v6, %v16367_v43  ;;  %v16518_v57 = vpack.c.bf16 %v16512_v56, %v5446_v7  ;;  %v13584_v24 = vld [vmem:[%s18639_s7 + $0x234] ss:$8 sps:$4 sm:$0xff]   ;;  %v13582_v11 = vld [vmem:[%s18639_s7 + $0x230] ss:$8 sps:$4 sm:$0xff]  }
 0x538   : > { %v16431_v34 = vld [vmem:[#allocation6 + $0x60] sm:$0xff]  ;;  %v16532_v21 = vld [vmem:[#allocation6 + $0x52] sm:$0xff] }
 0x539   : > { %5411 = vst [vmem:[#allocation6 + $0x81] sm:$0xff] %v16404_v52  ;;  %6522 = vmatmul.mubr.bf16.gmra.mrb[152].mxu1 %v16408_v0  ;;  %v5487_v33 = vpack.c.bf16 %v16404_v52, %v16393_v6  ;;  %v5470_v38 = vpack.c.bf16 %v16431_v34, %v16401_v36  ;;  %v13585_v36 = vld [vmem:[%s18639_s7 + $0x240] ss:$8 sps:$4 sm:$0xff]   ;;  %v13617_v5 = vld [vmem:[%s18639_s7 + $0x2e4] ss:$8 sps:$4 sm:$0xff]  }
 0x53a   : > { %6551 = vmatpush1.bf16.msra.mxu1 %v13537_v23  ;;  %6531 = vmatprep.mubr.bf16.mxu1 %v16415_v26  ;;  %v13587_v23 = vld [vmem:[%s18639_s7 + $0x244] ss:$8 sps:$4 sm:$0xff]   ;;  %v13746_v16 = vld [vmem:[%s18641_s9 + $0x474] ss:$8 sps:$4 sm:$0xff]   ;;  %v13639_v43 = vld [vmem:[%s18639_s7 + $0x360] ss:$8 sps:$4 sm:$0xff]  }
 0x53b   : > { %6552 = vmatprep.subr.bf16.mxu1 %v13542_v50  ;;  %v13650_v6 = vld [vmem:[%s18639_s7 + $0x394] ss:$8 sps:$4 sm:$0xff]  }
 0x53e   : > { %6553 = vmatpush1.bf16.msra.mxu1 %v13540_v9  ;;  %v16433_v60 = vld [vmem:[#allocation6 + $0x70] sm:$0xff]  ;;  %v16536_v9 = vld [vmem:[#allocation6 + $0x42] sm:$0xff] }
 0x53f   : > { %6554 = vmatprep.subr.bf16.mxu1 %v13545_v25  ;;  %v16437_v15 = vpack.c.bf16 %v16433_v60, %v16431_v34  ;;  %v16543_v25 = vpack.c.bf16 %v16532_v21, %v16536_v9 }
 0x540   : > { %v16534_v50 = vld [vmem:[#allocation6 + $0x80] sm:$0xff] }
 0x541   : > { %6532 = vmatmul.mubr.bf16.gmra.mrb[156].mxu1 %v16437_v15  ;;  %v5471_v34 = vpack.c.bf16 %v16534_v50, %v16433_v60  ;;  %v13591_v60 = vld [vmem:[%s18639_s7 + $0x260] ss:$8 sps:$4 sm:$0xff]   ;;  %v16693_v4 = vld [vmem:[#allocation6 + $0x82] sm:$0xff] }
 0x542   : > { %6555 = vmatpush1.bf16.msra.mxu1 %v13543_v14  ;;  %6574 = vmatprep.mubr.bf16.mxu1 %v5468_v44  ;;  %v13590_v14 = vld [vmem:[%s18639_s7 + $0x254] ss:$8 sps:$4 sm:$0xff]   ;;  %v13593_v44 = vld [vmem:[%s18639_s7 + $0x264] ss:$8 sps:$4 sm:$0xff]  }
 0x543   : > { %6556 = vmatprep.subr.bf16.mxu1 %v13548_v29  ;;  %v13588_v29 = vld [vmem:[%s18639_s7 + $0x250] ss:$8 sps:$4 sm:$0xff]  }
 0x546   : > { %6557 = vmatpush1.bf16.msra.mxu1 %v13546_v8  ;;  %v16557_v8 = vld [vmem:[#allocation6 + $0x72] sm:$0xff] }
 0x547   : > { %6558 = vmatprep.subr.bf16.mxu1 %v13551_v55  ;;  %v16559_v55 = vld [vmem:[#allocation6 + $0x62] sm:$0xff] }
 0x54a   : > { %6559 = vmatpush1.bf16.msra.mxu1 %v13549_v35  ;;  %v16566_v35 = vpack.c.bf16 %v16557_v8, %v16559_v55 }
 0x54b   : > { %6560 = vmatprep.subr.bf16.mxu1 %v13554_v18  ;;  %v13596_v18 = vld [vmem:[%s18639_s7 + $0x274] ss:$8 sps:$4 sm:$0xff]  }
 0x54e   : > { %6561 = vmatpush1.bf16.msra.mxu1 %v13552_v45  ;;  %v5500_v45 = vpack.c.bf16 %v5446_v7, %v5445_v46  ;;  %v13615_v46 = vld [vmem:[%s18639_s7 + $0x2e0] ss:$8 sps:$4 sm:$0xff]  }
 0x54f   : > { %6562 = vmatprep.subr.bf16.mxu1 %v13557_v37  ;;  %v13594_v37 = vld [vmem:[%s18639_s7 + $0x270] ss:$8 sps:$4 sm:$0xff]   ;;  %v13621_v7 = vld [vmem:[%s18639_s7 + $0x300] ss:$8 sps:$4 sm:$0xff]  }
 0x552   : > { %6563 = vmatpush1.bf16.msra.mxu1 %v13555_v13  ;;  %v13599_v13 = vld [vmem:[%s18639_s7 + $0x284] ss:$8 sps:$4 sm:$0xff]  }
 0x553   : > { %6564 = vmatprep.subr.bf16.mxu1 %v13560_v47  ;;  %v13597_v47 = vld [vmem:[%s18639_s7 + $0x280] ss:$8 sps:$4 sm:$0xff]  }
 0x556   : > { %6565 = vmatpush1.bf16.msra.mxu1 %v13558_v28  ;;  %v13602_v28 = vld [vmem:[%s18639_s7 + $0x294] ss:$8 sps:$4 sm:$0xff]  }
 0x557   : > { %6566 = vmatprep.subr.bf16.mxu1 %v13563_v10  ;;  %v13600_v10 = vld [vmem:[%s18639_s7 + $0x290] ss:$8 sps:$4 sm:$0xff]  }
 0x55a   : > { %6567 = vmatpush1.bf16.msra.mxu1 %v13561_v3  ;;  %v13605_v3 = vld [vmem:[%s18639_s7 + $0x2a4] ss:$8 sps:$4 sm:$0xff]  }
 0x55b   : > { %6568 = vmatprep.subr.bf16.mxu1 %v13566_v20  ;;  %v13603_v20 = vld [vmem:[%s18639_s7 + $0x2a0] ss:$8 sps:$4 sm:$0xff]  }
 0x55e   : > { %6569 = vmatpush1.bf16.msra.mxu1 %v13564_v31  ;;  %v13608_v31 = vld [vmem:[%s18639_s7 + $0x2b4] ss:$8 sps:$4 sm:$0xff]  }
 0x55f   : > { %6570 = vmatprep.subr.bf16.mxu1 %v13569_v58  ;;  %v13606_v58 = vld [vmem:[%s18639_s7 + $0x2b0] ss:$8 sps:$4 sm:$0xff]  }
 0x562   : > { %6571 = vmatpush1.bf16.msra.mxu1 %v13567_v40  ;;  %v13611_v40 = vld [vmem:[%s18639_s7 + $0x2c4] ss:$8 sps:$4 sm:$0xff]  }
 0x563   : > { %6572 = vmatprep.subr.bf16.mxu1 %v13572_v54  ;;  %v13609_v54 = vld [vmem:[%s18639_s7 + $0x2c0] ss:$8 sps:$4 sm:$0xff]  }
 0x566   : > { %6573 = vmatpush1.bf16.msra.mxu1 %v13570_v32  ;;  %v13614_v32 = vld [vmem:[%s18639_s7 + $0x2d4] ss:$8 sps:$4 sm:$0xff]  }
 0x567   : > { %6615 = vmatprep.subr.bf16.mxu1 %v13575_v41  ;;  %v13612_v41 = vld [vmem:[%s18639_s7 + $0x2d0] ss:$8 sps:$4 sm:$0xff]  }
 0x569   : > { %6575 = vmatmul.mubr.bf16.vlgmr.msra.gmra.mrb[144].mxu1 %v5452_v63  ;;  %v13618_v63 = vld [vmem:[%s18639_s7 + $0x2f0] ss:$8 sps:$4 sm:$0xff]  }
 0x56a   : > { %6584 = vmatprep.mubr.bf16.mxu1 %v5469_v39  ;;  %6616 = vmatpush1.bf16.msra.mxu1 %v13573_v51  ;;  %v13620_v51 = vld [vmem:[%s18639_s7 + $0x2f4] ss:$8 sps:$4 sm:$0xff]   ;;  %v13702_v39 = vld [vmem:[%s18641_s9 + $0x400] ss:$8 sps:$4 sm:$0xff]  }
 0x56b   : > { %6617 = vmatprep.subr.bf16.mxu1 %v13578_v53  ;;  %v13623_v53 = vld [vmem:[%s18639_s7 + $0x304] ss:$8 sps:$4 sm:$0xff]  }
 0x56e   : > { %6618 = vmatpush1.bf16.msra.mxu1 %v13576_v1  ;;  %v13704_v1 = vld [vmem:[%s18641_s9 + $0x404] ss:$8 sps:$4 sm:$0xff]  }
 0x56f   : > { %6619 = vmatprep.subr.bf16.mxu1 %v13581_v59  ;;  %v13710_v59 = vld [vmem:[%s18641_s9 + $0x414] ss:$8 sps:$4 sm:$0xff]   ;;  %10642 = vmatprep.subr.bf16.mxu0 %v13704_v1  ;;  %v13671_v1 = vld [vmem:[%s18639_s7 + $0x404] ss:$8 sps:$4 sm:$0xff]  }
 0x570   : > { %10643 = vmatpush1.bf16.msra.mxu0 %v13702_v39  ;;  %v13666_v39 = vld [vmem:[%s18639_s7 + $0x3f0] ss:$8 sps:$4 sm:$0xff]  }
 0x571   : > { %6585 = vmatmul.mubr.bf16.gmra.mrb[148].mxu1 %v16518_v57  ;;  %10644 = vmatprep.subr.bf16.mxu0 %v13710_v59  ;;  %v13669_v59 = vld [vmem:[%s18639_s7 + $0x400] ss:$8 sps:$4 sm:$0xff]  }
 0x572   : > { %6594 = vmatprep.mubr.bf16.mxu1 %v5470_v38  ;;  %6620 = vmatpush1.bf16.msra.mxu1 %v13579_v42  ;;  %v13626_v42 = vld [vmem:[%s18639_s7 + $0x314] ss:$8 sps:$4 sm:$0xff]   ;;  %v5501_v38 = vpack.c.bf16 %v16536_v9, %v16512_v56  ;;  %v13714_v56 = vld [vmem:[%s18641_s9 + $0x420] ss:$8 sps:$4 sm:$0xff]   ;;  %v13720_v9 = vld [vmem:[%s18641_s9 + $0x430] ss:$8 sps:$4 sm:$0xff]  }
 0x573   : > { %6621 = vmatprep.subr.bf16.mxu1 %v13584_v24  ;;  %v13708_v24 = vld [vmem:[%s18641_s9 + $0x410] ss:$8 sps:$4 sm:$0xff]  }
 0x574   : > { %10645 = vmatpush1.bf16.msra.mxu0 %v13708_v24  ;;  %v13677_v24 = vld [vmem:[%s18639_s7 + $0x424] ss:$8 sps:$4 sm:$0xff]  }
 0x576   : > { %6622 = vmatpush1.bf16.msra.mxu1 %v13582_v11  ;;  %v13716_v11 = vld [vmem:[%s18641_s9 + $0x424] ss:$8 sps:$4 sm:$0xff]  }
 0x577   : > { %6623 = vmatprep.subr.bf16.mxu1 %v13587_v23  ;;  %v13624_v23 = vld [vmem:[%s18639_s7 + $0x310] ss:$8 sps:$4 sm:$0xff]   ;;  %10646 = vmatprep.subr.bf16.mxu0 %v13716_v11  ;;  %v13683_v11 = vld [vmem:[%s18639_s7 + $0x444] ss:$8 sps:$4 sm:$0xff]  }
 0x578   : > { %10647 = vmatpush1.bf16.msra.mxu0 %v13714_v56  ;;  %v13684_v56 = vld [vmem:[%s18639_s7 + $0x450] ss:$8 sps:$4 sm:$0xff]  }
 0x579   : > { %6595 = vmatmul.mubr.bf16.gmra.mrb[152].mxu1 %v16543_v25  ;;  %10648 = vmatprep.subr.bf16.mxu0 %v13722_v19  ;;  %v13689_v19 = vld [vmem:[%s18639_s7 + $0x464] ss:$8 sps:$4 sm:$0xff]  }
 0x57a   : > { %6604 = vmatprep.mubr.bf16.mxu1 %v5471_v34  ;;  %6624 = vmatpush1.bf16.msra.mxu1 %v13585_v36  ;;  %v13629_v36 = vld [vmem:[%s18639_s7 + $0x324] ss:$8 sps:$4 sm:$0xff]  }
 0x57b   : > { %6625 = vmatprep.subr.bf16.mxu1 %v13590_v14  ;;  %v5502_v14 = vpack.c.bf16 %v16559_v55, %v16532_v21  ;;  %v13728_v34 = vld [vmem:[%s18641_s9 + $0x444] ss:$8 sps:$4 sm:$0xff]   ;;  %v13638_v55 = vld [vmem:[%s18639_s7 + $0x354] ss:$8 sps:$4 sm:$0xff]  }
 0x57c   : > { %v13635_v21 = vld [vmem:[%s18639_s7 + $0x344] ss:$8 sps:$4 sm:$0xff]   ;;  %10649 = vmatpush1.bf16.msra.mxu0 %v13720_v9  ;;  %v13690_v9 = vld [vmem:[%s18639_s7 + $0x470] ss:$8 sps:$4 sm:$0xff]  }
 0x57d   : > { %10650 = vmatprep.subr.bf16.mxu0 %v13728_v34  ;;  %v13695_v34 = vld [vmem:[%s18641_s9 + $0x4] ss:$8 sps:$4 sm:$0xff]  }
 0x57e   : > { %6626 = vmatpush1.bf16.msra.mxu1 %v13588_v29  ;;  %v13630_v29 = vld [vmem:[%s18639_s7 + $0x330] ss:$8 sps:$4 sm:$0xff]  }
 0x57f   : > { %6627 = vmatprep.subr.bf16.mxu1 %v13593_v44  ;;  %v13726_v44 = vld [vmem:[%s18641_s9 + $0x440] ss:$8 sps:$4 sm:$0xff]  }
 0x580   : > { %10651 = vmatpush1.bf16.msra.mxu0 %v13726_v44  ;;  %v13701_v44 = vld [vmem:[%s18641_s9 + $0x24] ss:$8 sps:$4 sm:$0xff]  }
 0x581   : > { %6605 = vmatmul.mubr.bf16.gmra.mrb[156].mxu1 %v16566_v35  ;;  %10652 = vmatprep.subr.bf16.mxu0 %v13734_v49  ;;  %v13699_v49 = vld [vmem:[%s18641_s9 + $0x20] ss:$8 sps:$4 sm:$0xff]  }
 0x582   : > { %6628 = vmatpush1.bf16.msra.mxu1 %v13591_v60  ;;  %6647 = vmatprep.mubr.bf16.mxu1 %v5500_v45  ;;  %v13732_v60 = vld [vmem:[%s18641_s9 + $0x450] ss:$8 sps:$4 sm:$0xff]   ;;  %v13740_v45 = vld [vmem:[%s18641_s9 + $0x464] ss:$8 sps:$4 sm:$0xff]  }
 0x583   : > { %6629 = vmatprep.subr.bf16.mxu1 %v13596_v18  ;;  %v5503_v18 = vpack.c.bf16 %v16693_v4, %v16557_v8  ;;  %v13641_v8 = vld [vmem:[%s18639_s7 + $0x364] ss:$8 sps:$4 sm:$0xff]  }
 0x584   : > { %10653 = vmatpush1.bf16.msra.mxu0 %v13732_v60  ;;  %v13711_v60 = vld [vmem:[%s18641_s9 + $0x40] ss:$8 sps:$4 sm:$0xff]  }
 0x585   : > { %10654 = vmatprep.subr.bf16.mxu0 %v13740_v45  ;;  %v13725_v45 = vld [vmem:[%s18641_s9 + $0x64] ss:$8 sps:$4 sm:$0xff]  }
 0x586   : > { %6630 = vmatpush1.bf16.msra.mxu1 %v13594_v37  ;;  %v13636_v37 = vld [vmem:[%s18639_s7 + $0x350] ss:$8 sps:$4 sm:$0xff]  }
 0x587   : > { %6631 = vmatprep.subr.bf16.mxu1 %v13599_v13  ;;  %v13738_v13 = vld [vmem:[%s18641_s9 + $0x460] ss:$8 sps:$4 sm:$0xff]  }
 0x588   : > { %10655 = vmatpush1.bf16.msra.mxu0 %v13738_v13 }
 0x589   : > { %10656 = vmatprep.subr.bf16.mxu0 %v13746_v16  ;;  %v13729_v16 = vld [vmem:[%s18641_s9 + $0x70] ss:$8 sps:$4 sm:$0xff]  }
 0x58a   : > { %6632 = vmatpush1.bf16.msra.mxu1 %v13597_v47  ;;  %v13744_v47 = vld [vmem:[%s18641_s9 + $0x470] ss:$8 sps:$4 sm:$0xff]  }
 0x58b   : > { %6633 = vmatprep.subr.bf16.mxu1 %v13602_v28  ;;  %v13752_v28 = vld [vmem:[%s18641_s9 + $0x484] ss:$8 sps:$4 sm:$0xff]  }
 0x58c   : > { %10657 = vmatpush1.bf16.msra.mxu0 %v13744_v47  ;;  %v13741_v47 = vld [vmem:[%s18641_s9 + $0x90] ss:$8 sps:$4 sm:$0xff]  }
 0x58d   : > { %10658 = vmatprep.subr.bf16.mxu0 %v13752_v28  ;;  %v13749_v28 = vld [vmem:[%s18641_s9 + $0xa4] ss:$8 sps:$4 sm:$0xff]  }
 0x58e   : > { %6634 = vmatpush1.bf16.msra.mxu1 %v13600_v10  ;;  %v13642_v10 = vld [vmem:[%s18639_s7 + $0x370] ss:$8 sps:$4 sm:$0xff]  }
 0x58f   : > { %6635 = vmatprep.subr.bf16.mxu1 %v13605_v3  ;;  %v13647_v3 = vld [vmem:[%s18639_s7 + $0x384] ss:$8 sps:$4 sm:$0xff]  }
 0x592   : > { %6636 = vmatpush1.bf16.msra.mxu1 %v13603_v20  ;;  %v13750_v20 = vld [vmem:[%s18641_s9 + $0x480] ss:$8 sps:$4 sm:$0xff]  }
 0x593   : > { %6637 = vmatprep.subr.bf16.mxu1 %v13608_v31  ;;  %10659 = vmatpush1.bf16.msra.mxu0 %v13750_v20  ;;  %v13653_v31 = vld [vmem:[%s18639_s7 + $0x3a4] ss:$8 sps:$4 sm:$0xff]   ;;  %v13755_v20 = vld [vmem:[%s18641_s9 + $0xb4] ss:$8 sps:$4 sm:$0xff]  }
 0x596   : > { %6638 = vmatpush1.bf16.msra.mxu1 %v13606_v58  ;;  %v13651_v58 = vld [vmem:[%s18639_s7 + $0x3a0] ss:$8 sps:$4 sm:$0xff]  }
 0x597   : > { %6639 = vmatprep.subr.bf16.mxu1 %v13611_v40  ;;  %v13656_v40 = vld [vmem:[%s18639_s7 + $0x3b4] ss:$8 sps:$4 sm:$0xff]  }
 0x59a   : > { %6640 = vmatpush1.bf16.msra.mxu1 %v13609_v54  ;;  %v13654_v54 = vld [vmem:[%s18639_s7 + $0x3b0] ss:$8 sps:$4 sm:$0xff]  }
 0x59b   : > { %6641 = vmatprep.subr.bf16.mxu1 %v13614_v32  ;;  %v13659_v32 = vld [vmem:[%s18639_s7 + $0x3c4] ss:$8 sps:$4 sm:$0xff]  }
 0x59e   : > { %6642 = vmatpush1.bf16.msra.mxu1 %v13612_v41  ;;  %v13657_v41 = vld [vmem:[%s18639_s7 + $0x3c0] ss:$8 sps:$4 sm:$0xff]  }
 0x59f   : > { %6643 = vmatprep.subr.bf16.mxu1 %v13617_v5  ;;  %v13662_v5 = vld [vmem:[%s18639_s7 + $0x3d4] ss:$8 sps:$4 sm:$0xff]  }
 0x5a2   : > { %6644 = vmatpush1.bf16.msra.mxu1 %v13615_v46  ;;  %v13660_v46 = vld [vmem:[%s18639_s7 + $0x3d0] ss:$8 sps:$4 sm:$0xff]  }
 0x5a3   : > { %6645 = vmatprep.subr.bf16.mxu1 %v13620_v51  ;;  %v13665_v51 = vld [vmem:[%s18639_s7 + $0x3e4] ss:$8 sps:$4 sm:$0xff]  }
 0x5a6   : > { %6646 = vmatpush1.bf16.msra.mxu1 %v13618_v63  ;;  %v13663_v63 = vld [vmem:[%s18639_s7 + $0x3e0] ss:$8 sps:$4 sm:$0xff]  }
 0x5a7   : > { %6688 = vmatprep.subr.bf16.mxu1 %v13623_v53  ;;  %v13668_v53 = vld [vmem:[%s18639_s7 + $0x3f4] ss:$8 sps:$4 sm:$0xff]  }
 0x5a9   : > { %6648 = vmatmul.mubr.bf16.vlgmr.msra.gmra.mrb[144].mxu1 %v5484_v22  ;;  %v13632_v22 = vld [vmem:[%s18639_s7 + $0x334] ss:$8 sps:$4 sm:$0xff]  }
 0x5aa   : > { %6657 = vmatprep.mubr.bf16.mxu1 %v5501_v38  ;;  %6689 = vmatpush1.bf16.msra.mxu1 %v13621_v7  ;;  %v13674_v7 = vld [vmem:[%s18639_s7 + $0x414] ss:$8 sps:$4 sm:$0xff]   ;;  %v13675_v38 = vld [vmem:[%s18639_s7 + $0x420] ss:$8 sps:$4 sm:$0xff]  }
 0x5ab   : > { %6690 = vmatprep.subr.bf16.mxu1 %v13626_v42  ;;  %v13672_v42 = vld [vmem:[%s18639_s7 + $0x410] ss:$8 sps:$4 sm:$0xff]  }
 0x5ae   : > { %6691 = vmatpush1.bf16.msra.mxu1 %v13624_v23  ;;  %v5532_v23 = vld [vmem:[#allocation6 + $0x91] sm:$0xff] }
 0x5af   : > { %6692 = vmatprep.subr.bf16.mxu1 %v13629_v36  ;;  %v13681_v36 = vld [vmem:[%s18639_s7 + $0x440] ss:$8 sps:$4 sm:$0xff]  }
 0x5b1   : > { %6658 = vmatmul.mubr.bf16.gmra.mrb[148].mxu1 %v5485_v48  ;;  %v13633_v48 = vld [vmem:[%s18639_s7 + $0x340] ss:$8 sps:$4 sm:$0xff]  }
 0x5b2   : > { %6667 = vmatprep.mubr.bf16.mxu1 %v5502_v14  ;;  %6693 = vmatpush1.bf16.msra.mxu1 %v13627_v62  ;;  %v5516_v62 = vld [vmem:[#allocation6 + $0x90] sm:$0xff]  ;;  %v14499_v14 = vmov 0  }
 0x5b3   : > { %6694 = vmatprep.subr.bf16.mxu1 %v13632_v22  ;;  %v13687_v22 = vld [vmem:[%s18639_s7 + $0x460] ss:$8 sps:$4 sm:$0xff]  }
 0x5b6   : > { %6695 = vmatpush1.bf16.msra.mxu1 %v13630_v29  ;;  %v13698_v29 = vld [vmem:[%s18641_s9 + $0x14] ss:$8 sps:$4 sm:$0xff]  }
 0x5b7   : > { %6696 = vmatprep.subr.bf16.mxu1 %v13635_v21  ;;  %v13696_v21 = vld [vmem:[%s18641_s9 + $0x10] ss:$8 sps:$4 sm:$0xff]  }
 0x5b9   : > { %6668 = vmatmul.mubr.bf16.gmra.mrb[152].mxu1 %v5486_v2  ;;  %v13644_v2 = vld [vmem:[%s18639_s7 + $0x374] ss:$8 sps:$4 sm:$0xff]  }
 0x5ba   : > { %6677 = vmatprep.mubr.bf16.mxu1 %v5503_v18  ;;  %6697 = vmatpush1.bf16.msra.mxu1 %v13633_v48  ;;  %v13705_v48 = vld [vmem:[%s18641_s9 + $0x30] ss:$8 sps:$4 sm:$0xff]  }
 0x5bb   : > { %6698 = vmatprep.subr.bf16.mxu1 %v13638_v55  ;;  %v13713_v55 = vld [vmem:[%s18641_s9 + $0x44] ss:$8 sps:$4 sm:$0xff]   ;;  %v13717_v18 = vld [vmem:[%s18641_s9 + $0x50] ss:$8 sps:$4 sm:$0xff]  }
 0x5be   : > { %6699 = vmatpush1.bf16.msra.mxu1 %v13636_v37  ;;  %v5548_v37 = vld [vmem:[#allocation6 + $0x92] sm:$0xff] }
 0x5bf   : > { %6700 = vmatprep.subr.bf16.mxu1 %v13641_v8  ;;  %v13723_v8 = vld [vmem:[%s18641_s9 + $0x60] ss:$8 sps:$4 sm:$0xff]   ;;  %v5552_v13 = vpack.c.bf16 %v5548_v37, %v16693_v4 }
 0x5c0   : > { %v13735_v4 = vld [vmem:[%s18641_s9 + $0x80] ss:$8 sps:$4 sm:$0xff]  }
 0x5c1   : > { %6678 = vmatmul.mubr.bf16.gmra.mrb[156].mxu1 %v5487_v33  ;;  %v13648_v33 = vld [vmem:[%s18639_s7 + $0x390] ss:$8 sps:$4 sm:$0xff]  }
 0x5c2   : > { %6701 = vmatpush1.bf16.msra.mxu1 %v13639_v43  ;;  %6720 = vmatprep.mubr.bf16.mxu1 %v16343_v30  ;;  %v13645_v30 = vld [vmem:[%s18639_s7 + $0x380] ss:$8 sps:$4 sm:$0xff]   ;;  %v13737_v43 = vld [vmem:[%s18641_s9 + $0x84] ss:$8 sps:$4 sm:$0xff]  }
 0x5c3   : > { %6702 = vmatprep.subr.bf16.mxu1 %v13644_v2  ;;  %v13743_v2 = vld [vmem:[%s18641_s9 + $0x94] ss:$8 sps:$4 sm:$0xff]  }
 0x5c6   : > { %6703 = vmatpush1.bf16.msra.mxu1 %v13642_v10  ;;  %v13747_v10 = vld [vmem:[%s18641_s9 + $0xa0] ss:$8 sps:$4 sm:$0xff]  }
 0x5c7   : > { %6704 = vmatprep.subr.bf16.mxu1 %v13647_v3  ;;  %v13753_v3 = vld [vmem:[%s18641_s9 + $0xb0] ss:$8 sps:$4 sm:$0xff]  }
 0x5ca   : > { %6705 = vmatpush1.bf16.msra.mxu1 %v13645_v30  ;;  %v13756_v30 = vld [vmem:[%s18641_s9 + $0x490] ss:$8 sps:$4 sm:$0xff]  }
 0x5cb   : > { %6706 = vmatprep.subr.bf16.mxu1 %v13650_v6  ;;  %v13758_v6 = vld [vmem:[%s18641_s9 + $0x494] ss:$8 sps:$4 sm:$0xff]  }
 0x5cc   : > { %10660 = vmatprep.subr.bf16.mxu0 %v13758_v6 }
 0x5cd   : > { %10661 = vmatpush1.bf16.msra.mxu0 %v13756_v30 }
 0x5ce   : > { %6707 = vmatpush1.bf16.msra.mxu1 %v13648_v33  ;;  %v13759_v33 = vld [vmem:[%s18641_s9 + $0xc0] ss:$8 sps:$4 sm:$0xff]  }
 0x5cf   : > { %6708 = vmatprep.subr.bf16.mxu1 %v13653_v31  ;;  %v13761_v31 = vld [vmem:[%s18641_s9 + $0xc4] ss:$8 sps:$4 sm:$0xff]  }
 0x5d2   : > { %6709 = vmatpush1.bf16.msra.mxu1 %v13651_v58  ;;  %v13762_v58 = vld [vmem:[%s18641_s9 + $0x4a0] ss:$8 sps:$4 sm:$0xff]  }
 0x5d3   : > { %6710 = vmatprep.subr.bf16.mxu1 %v13656_v40  ;;  %v13764_v40 = vld [vmem:[%s18641_s9 + $0x4a4] ss:$8 sps:$4 sm:$0xff]  }
 0x5d4   : > { %10662 = vmatprep.subr.bf16.mxu0 %v13764_v40 }
 0x5d5   : > { %10663 = vmatpush1.bf16.msra.mxu0 %v13762_v58 }
 0x5d6   : > { %6711 = vmatpush1.bf16.msra.mxu1 %v13654_v54  ;;  %v13765_v54 = vld [vmem:[%s18641_s9 + $0xd0] ss:$8 sps:$4 sm:$0xff]  }
 0x5d7   : > { %6712 = vmatprep.subr.bf16.mxu1 %v13659_v32  ;;  %v13767_v32 = vld [vmem:[%s18641_s9 + $0xd4] ss:$8 sps:$4 sm:$0xff]  }
 0x5da   : > { %6713 = vmatpush1.bf16.msra.mxu1 %v13657_v41  ;;  %v13768_v41 = vld [vmem:[%s18641_s9 + $0x4b0] ss:$8 sps:$4 sm:$0xff]  }
 0x5db   : > { %6714 = vmatprep.subr.bf16.mxu1 %v13662_v5  ;;  %v13770_v5 = vld [vmem:[%s18641_s9 + $0x4b4] ss:$8 sps:$4 sm:$0xff]  }
 0x5dc   : > { %10664 = vmatprep.subr.bf16.mxu0 %v13770_v5 }
 0x5dd   : > { %10665 = vmatpush1.bf16.msra.mxu0 %v13768_v41 }
 0x5de   : > { %6715 = vmatpush1.bf16.msra.mxu1 %v13660_v46  ;;  %v13773_v46 = vld [vmem:[%s18641_s9 + $0xe4] ss:$8 sps:$4 sm:$0xff]  }
 0x5df   : > { %6716 = vmatprep.subr.bf16.mxu1 %v13665_v51  ;;  %v13776_v51 = vld [vmem:[%s18641_s9 + $0x4c4] ss:$8 sps:$4 sm:$0xff]  }
 0x5e0   : > { %10666 = vmatprep.subr.bf16.mxu0 %v13776_v51 }
 0x5e2   : > { %6717 = vmatpush1.bf16.msra.mxu1 %v13663_v63  ;;  %v13771_v63 = vld [vmem:[%s18641_s9 + $0xe0] ss:$8 sps:$4 sm:$0xff]  }
 0x5e3   : > { %6718 = vmatprep.subr.bf16.mxu1 %v13668_v53  ;;  %v13774_v53 = vld [vmem:[%s18641_s9 + $0x4c0] ss:$8 sps:$4 sm:$0xff]  }
 0x5e4   : > { %10667 = vmatpush1.bf16.msra.mxu0 %v13774_v53 }
 0x5e6   : > { %6719 = vmatpush1.bf16.msra.mxu1 %v13666_v39  ;;  %v13777_v39 = vld [vmem:[%s18641_s9 + $0xf0] ss:$8 sps:$4 sm:$0xff]  }
 0x5e7   : > { %6761 = vmatprep.subr.bf16.mxu1 %v13671_v1  ;;  %v13779_v1 = vld [vmem:[%s18641_s9 + $0xf4] ss:$8 sps:$4 sm:$0xff]  }
 0x5e9   : > { %6721 = vmatmul.mubr.bf16.vlgmr.msra.gmra.mrb[144].mxu1 %v16370_v61  ;;  %v13680_v61 = vld [vmem:[%s18639_s7 + $0x434] ss:$8 sps:$4 sm:$0xff]  }
 0x5ea   : > { %6730 = vmatprep.mubr.bf16.mxu1 %v16377_v27  ;;  %6762 = vmatpush1.bf16.msra.mxu1 %v13669_v59  ;;  %v13678_v27 = vld [vmem:[%s18639_s7 + $0x430] ss:$8 sps:$4 sm:$0xff]  }
 0x5eb   : > { %6763 = vmatprep.subr.bf16.mxu1 %v13674_v7  ;;  %v13780_v59 = vld [vmem:[%s18641_s9 + $0x4d0] ss:$8 sps:$4 sm:$0xff]   ;;  %v13782_v7 = vld [vmem:[%s18641_s9 + $0x4d4] ss:$8 sps:$4 sm:$0xff]  }
 0x5ec   : > { %10668 = vmatprep.subr.bf16.mxu0 %v13782_v7 }
 0x5ed   : > { %10669 = vmatpush1.bf16.msra.mxu0 %v13780_v59 }
 0x5ee   : > { %6764 = vmatpush1.bf16.msra.mxu1 %v13672_v42  ;;  %v13785_v42 = vld [vmem:[%s18641_s9 + $0x104] ss:$8 sps:$4 sm:$0xff]  }
 0x5ef   : > { %6765 = vmatprep.subr.bf16.mxu1 %v13677_v24  ;;  %v13786_v24 = vld [vmem:[%s18641_s9 + $0x4e0] ss:$8 sps:$4 sm:$0xff]  }
 0x5f1   : > { %6731 = vmatmul.mubr.bf16.gmra.mrb[148].mxu1 %v16408_v0  ;;  %v13686_v0 = vld [vmem:[%s18639_s7 + $0x454] ss:$8 sps:$4 sm:$0xff]  }
 0x5f2   : > { %6740 = vmatprep.mubr.bf16.mxu1 %v16415_v26  ;;  %6766 = vmatpush1.bf16.msra.mxu1 %v13675_v38  ;;  %v5536_v26 = vpack.c.bf16 %v5532_v23, %v16404_v52  ;;  %v5520_v52 = vpack.c.bf16 %v5516_v62, %v16534_v50  ;;  %v13693_v50 = vld [vmem:[%s18641_s9] ss:$8 sps:$4 sm:$0xff]   ;;  %v13788_v38 = vld [vmem:[%s18641_s9 + $0x4e4] ss:$8 sps:$4 sm:$0xff]  }
 0x5f3   : > { %6767 = vmatprep.subr.bf16.mxu1 %v13680_v61  ;;  %10670 = vmatprep.subr.bf16.mxu0 %v13788_v38  ;;  %v13792_v61 = vld [vmem:[%s18641_s9 + $0x4f0] ss:$8 sps:$4 sm:$0xff]   ;;  %v5737_v23 = vld [vmem:[%s18640_s8] sm:$0x3] }
 0x5f4   : > { %10671 = vmatpush1.bf16.msra.mxu0 %v13786_v24 }
 0x5f6   : > { %6768 = vmatpush1.bf16.msra.mxu1 %v13678_v27  ;;  %v13794_v27 = vld [vmem:[%s18641_s9 + $0x4f4] ss:$8 sps:$4 sm:$0xff]  }
 0x5f7   : > { %6769 = vmatprep.subr.bf16.mxu1 %v13683_v11  ;;  %10672 = vmatprep.subr.bf16.mxu0 %v13794_v27  ;;  %v13800_v11 = vld [vmem:[%s18641_s9 + $0x504] ss:$8 sps:$4 sm:$0xff]  }
 0x5f8   : > { %10673 = vmatpush1.bf16.msra.mxu0 %v13792_v61 }
 0x5f9   : > { %6741 = vmatmul.mubr.bf16.gmra.mrb[152].mxu1 %v16437_v15  ;;  %v13692_v15 = vld [vmem:[%s18639_s7 + $0x474] ss:$8 sps:$4 sm:$0xff]   ;;  %10683 = vmatprep.subr.bf16.mxu0 %v13800_v11 }
 0x5fa   : > { %6750 = vmatprep.mubr.bf16.mxu1 %v5536_v26  ;;  %6770 = vmatpush1.bf16.msra.mxu1 %v13681_v36  ;;  %v18663_v36 = vld [vmem:[#allocation9_spill] sm:$0xff]  ;;  %v17002_v26 = vrot.slane %v5737_v23, %v15569_v12 }
 0x5fb   : > { %6771 = vmatprep.subr.bf16.mxu1 %v13686_v0  ;;  %v5745_v0 = vsub.s32 1, %v18663_v36  ;;  %v17034_v11 = vsub.s32 2, %v18663_v36  ;;  %v11170_v36 = vld [vmem:[#allocation8] sm:$0x1] }
 0x5fe   : > { %6772 = vmatpush1.bf16.msra.mxu1 %v13684_v56  ;;  %v17006_v56 = vrot.slane %v5737_v23, %v5745_v0 }
 0x5ff   : > { %6773 = vmatprep.subr.bf16.mxu1 %v13689_v19 }
 0x601   : > { %6751 = vmatmul.mubr.bf16.gmra.mrb[156].mxu1 %v5520_v52 }
 0x602   : > { %6774 = vmatpush1.bf16.msra.mxu1 %v13687_v22  ;;  %6793 = vmatprep.mubr.bf16.mxu1 %v14499_v14 }
 0x603   : > { %6775 = vmatprep.subr.bf16.mxu1 %v13692_v15 }
 0x606   : > { %6776 = vmatpush1.bf16.msra.mxu1 %v13690_v9 }
 0x607   : > { %10478 = vmatprep.subr.bf16.mxu1 %v13695_v34 }
 0x609   : > { %6794 = vmatmul.mubr.bf16.vlgmr.msra.gmra.mrb[144].mxu1 %v16518_v57  ;;  %v13707_v57 = vld [vmem:[%s18641_s9 + $0x34] ss:$8 sps:$4 sm:$0xff]  }
 0x60a   : > { %6803 = vmatprep.mubr.bf16.mxu1 %v14499_v14  ;;  %10479 = vmatpush1.bf16.msra.mxu1 %v13693_v50 }
 0x60b   : > { %10480 = vmatprep.subr.bf16.mxu1 %v13698_v29 }
 0x60e   : > { %10481 = vmatpush1.bf16.msra.mxu1 %v13696_v21 }
 0x60f   : > { %10482 = vmatprep.subr.bf16.mxu1 %v13701_v44 }
 0x611   : > { %6804 = vmatmul.mubr.bf16.gmra.mrb[148].mxu1 %v16543_v25  ;;  %v13719_v25 = vld [vmem:[%s18641_s9 + $0x54] ss:$8 sps:$4 sm:$0xff]  }
 0x612   : > { %6813 = vmatprep.mubr.bf16.mxu1 %v14499_v14  ;;  %10483 = vmatpush1.bf16.msra.mxu1 %v13699_v49 }
 0x613   : > { %10484 = vmatprep.subr.bf16.mxu1 %v13707_v57 }
 0x616   : > { %10485 = vmatpush1.bf16.msra.mxu1 %v13705_v48 }
 0x617   : > { %10486 = vmatprep.subr.bf16.mxu1 %v13713_v55 }
 0x619   : > { %6814 = vmatmul.mubr.bf16.gmra.mrb[152].mxu1 %v16566_v35  ;;  %v13731_v35 = vld [vmem:[%s18641_s9 + $0x74] ss:$8 sps:$4 sm:$0xff]  }
 0x61a   : > { %6823 = vmatprep.mubr.bf16.mxu1 %v14499_v14  ;;  %10487 = vmatpush1.bf16.msra.mxu1 %v13711_v60 }
 0x61b   : > { %10488 = vmatprep.subr.bf16.mxu1 %v13719_v25 }
 0x61e   : > { %10489 = vmatpush1.bf16.msra.mxu1 %v13717_v18 }
 0x61f   : > { %10490 = vmatprep.subr.bf16.mxu1 %v13725_v45 }
 0x621   : > { %6824 = vmatmul.mubr.bf16.gmra.mrb[156].mxu1 %v5552_v13 }
 0x622   : > { %10491 = vmatpush1.bf16.msra.mxu1 %v13723_v8 }
 0x623   : > { %10492 = vmatprep.subr.bf16.mxu1 %v13731_v35 }
 0x626   : > { %10493 = vmatpush1.bf16.msra.mxu1 %v13729_v16 }
 0x627   : > { %10494 = vmatprep.subr.bf16.mxu1 %v13737_v43 }
 0x62a   : > { %10495 = vmatpush1.bf16.msra.mxu1 %v13735_v4 }
 0x62b   : > { %10496 = vmatprep.subr.bf16.mxu1 %v13743_v2 }
 0x62e   : > { %10497 = vmatpush1.bf16.msra.mxu1 %v13741_v47 }
 0x62f   : > { %10498 = vmatprep.subr.bf16.mxu1 %v13749_v28 }
 0x632   : > { %10499 = vmatpush1.bf16.msra.mxu1 %v13747_v10 }
 0x633   : > { %10500 = vmatprep.subr.bf16.mxu1 %v13755_v20 }
 0x636   : > { %10501 = vmatpush1.bf16.msra.mxu1 %v13753_v3 }
 0x637   : > { %10502 = vmatprep.subr.bf16.mxu1 %v13761_v31 }
 0x63a   : > { %10503 = vmatpush1.bf16.msra.mxu1 %v13759_v33 }
 0x63b   : > { %10504 = vmatprep.subr.bf16.mxu1 %v13767_v32 }
 0x63e   : > { %10505 = vmatpush1.bf16.msra.mxu1 %v13765_v54 }
 0x63f   : > { %10506 = vmatprep.subr.bf16.mxu1 %v13773_v46 }
 0x642   : > { %10507 = vmatpush1.bf16.msra.mxu1 %v13771_v63 }
 0x643   : > { %10508 = vmatprep.subr.bf16.mxu1 %v13779_v1 }
 0x646   : > { %10509 = vmatpush1.bf16.msra.mxu1 %v13777_v39 }
 0x647   : > { %10519 = vmatprep.subr.bf16.mxu1 %v13785_v42 }
 0x6dc   : > { %v6795_v19 = vpop.f32.mrb[144].mxu1 }
 0x6dd   : > { %v12708_v62 = vadd.f32 %v6795_v19, %v17002_v26  ;;  %v6797_v22 = vpop.f32.mrb[145].mxu1 }
 0x6de   : > { %v12709_v52 = vadd.f32 %v6797_v22, %v17006_v56  ;;  %v6799_v15 = vpop.f32.mrb[146].mxu1 }
 0x6df   : > { %v6834_v9 = vmax.f32 %v12708_v62, 0.0  ;;  %v12710_v14 = vadd.f32 %v6799_v15, %v17002_v26  ;;  %v6801_v34 = vpop.f32.mrb[147].mxu1 }
 0x6e0   : > { %v6835_v50 = vmax.f32 %v12709_v52, 0.0  ;;  %v12711_v29 = vadd.f32 %v6801_v34, %v17006_v56 }
 0x6e1   : > { %v6836_v21 = vmax.f32 %v12710_v14, 0.0 }
 0x6e2   : > { %v6866_v44 = vcombine.low %v6834_v9, %v6835_v50  ;;  %v6867_v49 = vcombine.high %v6834_v9, %v6835_v50  ;;  %v6837_v57 = vmax.f32 %v12711_v29, 0.0 }
 0x6e4   : > { %v6874_v48 = vrot.slane %v6866_v44, %v15566_v17  ;;  %v17014_v55 = vrot.slane %v6867_v49, %v15566_v17  ;;  %v6884_v60 = vcombine.low %v6836_v21, %v6837_v57  ;;  %v6885_v25 = vcombine.high %v6836_v21, %v6837_v57  ;;  %v6805_v18 = vpop.f32.mrb[148].mxu1 }
 0x6e5   : > { %v12712_v45 = vadd.f32 %v6805_v18, %v17002_v26  ;;  %v6807_v37 = vpop.f32.mrb[149].mxu1 }
 0x6e6   : > { %v11751_v8 = vrot.slane %v6874_v48, 9  ;;  %v6809_v13 = vpop.f32.mrb[150].mxu1  ;;  %v11753_v35 = vrot.slane %v17014_v55, 9  ;;  %v6892_v16 = vrot.slane %v6884_v60, %v15566_v17  ;;  %v17020_v43 = vrot.slane %v6885_v25, %v15566_v17 }
 0x6e7   : > { %v12713_v4 = vadd.f32 %v6807_v37, %v17006_v56  ;;  %v6811_v2 = vpop.f32.mrb[151].mxu1  ;;  %v6838_v47 = vmax.f32 %v12712_v45, 0.0  ;;  %v12714_v28 = vadd.f32 %v6809_v13, %v17002_v26  ;;  %v6882_v3 = vcombine.high %v6874_v48, %v6874_v48 }
 0x6e8   : > { %v12715_v10 = vadd.f32 %v6811_v2, %v17006_v56  ;;  %v6900_v20 = vcombine.high %v6892_v16, %v6892_v16  ;;  %v11755_v30 = vrot.slane %v6892_v16, 9  ;;  %v11757_v6 = vrot.slane %v17020_v43, 9 }
 0x6e9   : > { %v6839_v33 = vmax.f32 %v12713_v4, 0.0  ;;  %v6840_v31 = vmax.f32 %v12714_v28, 0.0  ;;  %v7138_v40 = vmax.f32 %v6874_v48, %v11751_v8  ;;  %v7140_v41 = vmax.f32 %v17014_v55, %v11753_v35  ;;  %v13783_v8 = vld [vmem:[%s18641_s9 + $0x100] ss:$8 sps:$4 sm:$0xff]  }
 0x6ea   : > { %v6841_v58 = vmax.f32 %v12715_v10, 0.0  ;;  %v7142_v54 = vmax.f32 %v6892_v16, %v11755_v30  ;;  %v11756_v32 = vrot.slane %v6900_v20, 9  ;;  %v7144_v5 = vmax.f32 %v17020_v43, %v11757_v6 }
 0x6eb   : > { %v6902_v46 = vcombine.low %v6838_v47, %v6839_v33  ;;  %v6903_v51 = vcombine.high %v6838_v47, %v6839_v33  ;;  %v11752_v42 = vrot.slane %v6882_v3, 9  ;;  %v13791_v47 = vld [vmem:[%s18641_s9 + $0x114] ss:$8 sps:$4 sm:$0xff]  }
 0x6ec   : > { %v6920_v63 = vcombine.low %v6840_v31, %v6841_v58  ;;  %v6921_v53 = vcombine.high %v6840_v31, %v6841_v58  ;;  %v6815_v39 = vpop.f32.mrb[152].mxu1  ;;  %v7170_v7 = vmax.f32 %v7138_v40, %v7142_v54  ;;  %v17029_v24 = vmax.f32 %v7140_v41, %v7144_v5 }
 0x6ed   : > { %v12716_v1 = vadd.f32 %v6815_v39, %v17002_v26  ;;  %v6817_v59 = vpop.f32.mrb[153].mxu1  ;;  %v6910_v38 = vrot.slane %v6902_v46, %v15566_v17  ;;  %v7143_v52 = vmax.f32 %v6900_v20, %v11756_v32  ;;  %v7139_v34 = vmax.f32 %v6882_v3, %v11752_v42  ;;  %v13789_v32 = vld [vmem:[%s18641_s9 + $0x110] ss:$8 sps:$4 sm:$0xff]  }
 0x6ee   : > { %v6928_v61 = vrot.slane %v6920_v63, %v15566_v17  ;;  %v6819_v27 = vpop.f32.mrb[154].mxu1  ;;  %v12717_v23 = vadd.f32 %v6817_v59, %v17006_v56  ;;  %v7190_v22 = vrot.slane %v7170_v7, %v15569_v12  ;;  %v7194_v44 = vrot.slane %v7170_v7, %v17034_v11  ;;  %v13797_v63 = vld [vmem:[%s18641_s9 + $0x124] ss:$8 sps:$4 sm:$0xff]  }
 0x6ef   : > { %v12718_v19 = vadd.f32 %v6819_v27, %v17002_v26  ;;  %v6821_v62 = vpop.f32.mrb[155].mxu1  ;;  %v11759_v15 = vrot.slane %v6910_v38, 9  ;;  %v6842_v9 = vmax.f32 %v12716_v1, 0.0  ;;  %v17041_v57 = vmax.f32 %v7139_v34, %v7143_v52  ;;  %v13806_v34 = vld [vmem:[%s18641_s9 + $0x514] ss:$8 sps:$4 sm:$0xff]  }
 0x6f0   : > { %v11763_v14 = vrot.slane %v6928_v61, 9  ;;  %v6843_v50 = vmax.f32 %v12717_v23, 0.0  ;;  %v12719_v21 = vadd.f32 %v6821_v62, %v17006_v56  ;;  %v7362_v49 = vpack.c.bf16 %v7190_v22, %v7190_v22  ;;  %v13803_v22 = vld [vmem:[%s18641_s9 + $0x134] ss:$8 sps:$4 sm:$0xff]  }
 0x6f1   : > { %v6844_v29 = vmax.f32 %v12718_v19, 0.0  ;;  %v7146_v48 = vmax.f32 %v6910_v38, %v11759_v15  ;;  %v7363_v37 = vpack.c.bf16 %v7194_v44, %v7194_v44  ;;  %v6918_v35 = vcombine.high %v6910_v38, %v6910_v38  ;;  %v13798_v19 = vld [vmem:[%s18641_s9 + $0x500] ss:$8 sps:$4 sm:$0xff]  }
 0x6f2   : > { %v7150_v60 = vmax.f32 %v6928_v61, %v11763_v14  ;;  %v6938_v25 = vcombine.low %v6842_v9, %v6843_v50  ;;  %v6939_v18 = vcombine.high %v6842_v9, %v6843_v50  ;;  %v6845_v45 = vmax.f32 %v12719_v21, 0.0 }
 0x6f3   : > { %v7205_v4 = vrot.slane %v17041_v57, %v17034_v11  ;;  %v6936_v10 = vcombine.high %v6928_v61, %v6928_v61  ;;  %10510 = vmatprep.mubr.bf16.mxu1 %v7363_v37  ;;  %v6917_v40 = vrot.slane %v6903_v51, %v15566_v17  ;;  %v6935_v41 = vrot.slane %v6921_v53, %v15566_v17  ;;  %v13795_v61 = vld [vmem:[%s18641_s9 + $0x120] ss:$8 sps:$4 sm:$0xff]   ;;  %v13809_v37 = vld [vmem:[%s18641_s9 + $0x144] ss:$8 sps:$4 sm:$0xff]  }
 0x6f4   : > { %v6825_v13 = vpop.f32.mrb[156].mxu1  ;;  %v7174_v28 = vmax.f32 %v7146_v48, %v7150_v60  ;;  %v6956_v3 = vcombine.low %v6844_v29, %v6845_v45  ;;  %v6957_v20 = vcombine.high %v6844_v29, %v6845_v45  ;;  %10511 = vmatmul.mubr.bf16.vlgmr.msra.gmra.mrb[160].mxu1 %v7362_v49  ;;  %v17067_v7 = vcombine.high %v17014_v55, %v17014_v55  ;;  %v13801_v60 = vld [vmem:[%s18641_s9 + $0x130] ss:$8 sps:$4 sm:$0xff]  }
 0x6f5   : > { %v12720_v16 = vadd.f32 %v6825_v13, %v17002_v26  ;;  %v6827_v2 = vpop.f32.mrb[157].mxu1  ;;  %v7365_v6 = vpack.c.bf16 %v7205_v4, %v7205_v4  ;;  %10520 = vmatpush1.bf16.msra.mxu1 %v13783_v8  ;;  %v11764_v59 = vrot.slane %v6936_v10, 9  ;;  %v11765_v52 = vrot.slane %v6935_v41, 9  ;;  %v13812_v13 = vld [vmem:[%s18641_s9 + $0x524] ss:$8 sps:$4 sm:$0xff]  }
 0x6f6   : > { %v6829_v30 = vpop.f32.mrb[158].mxu1  ;;  %v12721_v33 = vadd.f32 %v6827_v2, %v17006_v56  ;;  %10521 = vmatprep.subr.bf16.mxu1 %v13791_v47  ;;  %v7234_v51 = vrot.slane %v7174_v28, %v15569_v12  ;;  %v7238_v1 = vrot.slane %v7174_v28, %v17034_v11  ;;  %v6946_v15 = vrot.slane %v6938_v25, %v15566_v17 }
 0x6f7   : > { %v12722_v31 = vadd.f32 %v6829_v30, %v17002_v26  ;;  %v6831_v58 = vpop.f32.mrb[159].mxu1  ;;  %v6846_v54 = vmax.f32 %v12720_v16, 0.0  ;;  %10551 = vmatprep.mubr.bf16.mxu1 %v7365_v6  ;;  %v11760_v26 = vrot.slane %v6918_v35, 9  ;;  %v7151_v55 = vmax.f32 %v6936_v10, %v11764_v59  ;;  %v13807_v6 = vld [vmem:[%s18641_s9 + $0x140] ss:$8 sps:$4 sm:$0xff]  }
 0x6f8   : > { %v6847_v5 = vmax.f32 %v12721_v33, 0.0  ;;  %v12723_v39 = vadd.f32 %v6831_v58, %v17006_v56  ;;  %v7370_v27 = vpack.c.bf16 %v7234_v51, %v7234_v51  ;;  %v11761_v56 = vrot.slane %v6917_v40, 9  ;;  %v13810_v33 = vld [vmem:[%s18641_s9 + $0x520] ss:$8 sps:$4 sm:$0xff]  }
 0x6f9   : > { %v6848_v46 = vmax.f32 %v12722_v31, 0.0  ;;  %10522 = vmatpush1.bf16.msra.mxu1 %v13789_v32  ;;  %v7371_v23 = vpack.c.bf16 %v7238_v1, %v7238_v1  ;;  %v7147_v62 = vmax.f32 %v6918_v35, %v11760_v26  ;;  %v17087_v50 = vrot.slane %v6939_v18, %v15566_v17 }
 0x6fa   : > { %v6974_v53 = vcombine.low %v6846_v54, %v6847_v5  ;;  %v17069_v42 = vcombine.high %v6846_v54, %v6847_v5  ;;  %v6849_v38 = vmax.f32 %v12723_v39, 0.0  ;;  %10523 = vmatprep.subr.bf16.mxu1 %v13797_v63  ;;  %v6964_v29 = vrot.slane %v6956_v3, %v15566_v17 }
 0x6fb   : > { %10674 = vmatprep.mubr.bf16.mxu0 %v7371_v23  ;;  %v17090_v21 = vmax.f32 %v7147_v62, %v7151_v55  ;;  %v17094_v44 = vrot.slane %v17029_v24, %v17034_v11  ;;  %v6901_v49 = vcombine.high %v17020_v43, %v17020_v43  ;;  %v17099_v48 = vrot.slane %v6957_v20, %v15566_v17  ;;  %v13804_v43 = vld [vmem:[%s18641_s9 + $0x510] ss:$8 sps:$4 sm:$0xff]  }
 0x6fc   : > { %v6992_v9 = vcombine.low %v6848_v46, %v6849_v38  ;;  %v17081_v14 = vcombine.high %v6848_v46, %v6849_v38  ;;  %10675 = vmatmul.mubr.bf16.vlgmr.msra.gmra.mrb[24].mxu0 %v7370_v27  ;;  %v6919_v25 = vcombine.high %v6917_v40, %v6917_v40  ;;  %v6937_v18 = vcombine.high %v6935_v41, %v6935_v41  ;;  %v13818_v46 = vld [vmem:[%s18641_s9 + $0x534] ss:$8 sps:$4 sm:$0xff]   ;;  %v13813_v27 = vld [vmem:[%s18641_s9 + $0x150] ss:$8 sps:$4 sm:$0xff]  }
 0x6fd   : > { %10524 = vmatpush1.bf16.msra.mxu1 %v13795_v61  ;;  %10684 = vmatpush1.bf16.msra.mxu0 %v13798_v19  ;;  %v7249_v45 = vrot.slane %v17090_v21, %v17034_v11  ;;  %v11767_v8 = vrot.slane %v6946_v15, 9  ;;  %v7148_v35 = vmax.f32 %v6917_v40, %v11761_v56  ;;  %v7152_v16 = vmax.f32 %v6935_v41, %v11765_v52  ;;  %v13815_v40 = vld [vmem:[%s18641_s9 + $0x154] ss:$8 sps:$4 sm:$0xff]   ;;  %v13821_v19 = vld [vmem:[%s18641_s9 + $0x164] ss:$8 sps:$4 sm:$0xff]  }
 0x6fe   : > { %10525 = vmatprep.subr.bf16.mxu1 %v13803_v22  ;;  %10685 = vmatprep.subr.bf16.mxu0 %v13806_v34  ;;  %v11754_v4 = vrot.slane %v17067_v7, 9  ;;  %v6954_v2 = vcombine.high %v6946_v15, %v6946_v15  ;;  %v17118_v47 = vcombine.high %v17087_v50, %v17087_v50  ;;  %v11769_v28 = vrot.slane %v17087_v50, 9  ;;  %v13824_v22 = vld [vmem:[%s18641_s9 + $0x544] ss:$8 sps:$4 sm:$0xff]  }
 0x6ff   : > { %v11771_v10 = vrot.slane %v6964_v29, 9  ;;  %v6972_v3 = vcombine.high %v6964_v29, %v6964_v29  ;;  %v17123_v20 = vcombine.high %v17099_v48, %v17099_v48  ;;  %v7373_v30 = vpack.c.bf16 %v7249_v45, %v7249_v45 }
 0x700   : > { %v17131_v31 = vmax.f32 %v7148_v35, %v7152_v16  ;;  %v17134_v58 = vrot.slane %v6974_v53, %v15566_v17  ;;  %v11758_v54 = vrot.slane %v6901_v49, 9  ;;  %v11762_v32 = vrot.slane %v6919_v25, 9 }
 0x701   : > { %10526 = vmatpush1.bf16.msra.mxu1 %v13801_v60  ;;  %10686 = vmatpush1.bf16.msra.mxu0 %v13804_v43  ;;  %v11766_v41 = vrot.slane %v6937_v18, 9  ;;  %v11773_v5 = vrot.slane %v17099_v48, 9  ;;  %v7141_v26 = vmax.f32 %v17067_v7, %v11754_v4  ;;  %v7154_v39 = vmax.f32 %v6946_v15, %v11767_v8  ;;  %v13816_v7 = vld [vmem:[%s18641_s9 + $0x530] ss:$8 sps:$4 sm:$0xff]   ;;  %v13827_v43 = vld [vmem:[%s18641_s9 + $0x174] ss:$8 sps:$4 sm:$0xff]  }
 0x702   : > { %10527 = vmatprep.subr.bf16.mxu1 %v13809_v37  ;;  %10715 = vmatprep.mubr.bf16.mxu0 %v7373_v30  ;;  %v17145_v63 = vrot.slane %v17131_v31, %v17034_v11  ;;  %v7145_v51 = vmax.f32 %v6901_v49, %v11758_v54  ;;  %v7149_v1 = vmax.f32 %v6919_v25, %v11762_v32  ;;  %v11768_v56 = vrot.slane %v6954_v2, 9  ;;  %v13833_v54 = vld [vmem:[%s18641_s9 + $0x184] ss:$8 sps:$4 sm:$0xff]  }
 0x703   : > { %10687 = vmatprep.subr.bf16.mxu0 %v13812_v13  ;;  %v7153_v59 = vmax.f32 %v6937_v18, %v11766_v41  ;;  %v7158_v53 = vmax.f32 %v6964_v29, %v11771_v10  ;;  %v6989_v38 = vrot.slane %v17069_v42, %v15566_v17  ;;  %v7000_v61 = vrot.slane %v6992_v9, %v15566_v17  ;;  %v13830_v13 = vld [vmem:[%s18641_s9 + $0x554] ss:$8 sps:$4 sm:$0xff]   ;;  %v13825_v10 = vld [vmem:[%s18641_s9 + $0x170] ss:$8 sps:$4 sm:$0xff]   ;;  %v13836_v32 = vld [vmem:[%s18641_s9 + $0x564] ss:$8 sps:$4 sm:$0xff]  }
 0x704   : > { %v11772_v23 = vrot.slane %v6972_v3, 9  ;;  %v17160_v42 = vmax.f32 %v7141_v26, %v7145_v51  ;;  %v7155_v52 = vmax.f32 %v6954_v2, %v11768_v56  ;;  %v7156_v9 = vmax.f32 %v17087_v50, %v11769_v28  ;;  %v13819_v50 = vld [vmem:[%s18641_s9 + $0x160] ss:$8 sps:$4 sm:$0xff]  }
 0x705   : > { %10528 = vmatpush1.bf16.msra.mxu1 %v13807_v6  ;;  %10688 = vmatpush1.bf16.msra.mxu0 %v13810_v33  ;;  %v17162_v62 = vmax.f32 %v7149_v1, %v7153_v59  ;;  %v17164_v55 = vmax.f32 %v7154_v39, %v7158_v53  ;;  %v7160_v34 = vmax.f32 %v17099_v48, %v11773_v5  ;;  %v11775_v29 = vrot.slane %v17134_v58, 9  ;;  %v13831_v59 = vld [vmem:[%s18641_s9 + $0x180] ss:$8 sps:$4 sm:$0xff]  }
 0x706   : > { %10529 = vmatprep.subr.bf16.mxu1 %v13815_v40  ;;  %10689 = vmatprep.subr.bf16.mxu0 %v13818_v46  ;;  %v7159_v15 = vmax.f32 %v6972_v3, %v11772_v23  ;;  %v7007_v49 = vrot.slane %v17081_v14, %v15566_v17  ;;  %v17176_v60 = vrot.slane %v17160_v42, %v17034_v11  ;;  %v11779_v18 = vrot.slane %v7000_v61, 9  ;;  %v13822_v14 = vld [vmem:[%s18641_s9 + $0x540] ss:$8 sps:$4 sm:$0xff]   ;;  %v13828_v40 = vld [vmem:[%s18641_s9 + $0x550] ss:$8 sps:$4 sm:$0xff]  }
 0x707   : > { %v17180_v25 = vrot.slane %v17162_v62, %v17034_v11  ;;  %v17187_v48 = vrot.slane %v17164_v55, %v17034_v11  ;;  %v17191_v17 = vmax.f32 %v7156_v9, %v7160_v34  ;;  %v6990_v37 = vcombine.high %v17134_v58, %v17134_v58  ;;  %v13842_v23 = vld [vmem:[%s18641_s9 + $0x574] ss:$8 sps:$4 sm:$0xff]   ;;  %v13837_v9 = vld [vmem:[%s18641_s9 + $0x190] ss:$8 sps:$4 sm:$0xff]  }
 0x708   : > { %v17189_v45 = vmax.f32 %v7155_v52, %v7159_v15  ;;  %v11777_v8 = vrot.slane %v6989_v38, 9  ;;  %v7008_v16 = vcombine.high %v7000_v61, %v7000_v61  ;;  %v11781_v4 = vrot.slane %v7007_v49, 9  ;;  %v13840_v34 = vld [vmem:[%s18641_s9 + $0x570] ss:$8 sps:$4 sm:$0xff]  }
 0x709   : > { %10530 = vmatpush1.bf16.msra.mxu1 %v13813_v27  ;;  %10690 = vmatpush1.bf16.msra.mxu0 %v13816_v7  ;;  %v17210_v2 = vrot.slane %v17191_v17, %v17034_v11  ;;  %v11770_v28 = vrot.slane %v17118_v47, 9  ;;  %v11774_v3 = vrot.slane %v17123_v20, 9  ;;  %v7162_v30 = vmax.f32 %v17134_v58, %v11775_v29  ;;  %v13845_v29 = vld [vmem:[%s18641_s9 + $0x1a4] ss:$8 sps:$4 sm:$0xff]  }
 0x70a   : > { %10531 = vmatprep.subr.bf16.mxu1 %v13821_v19  ;;  %10691 = vmatprep.subr.bf16.mxu0 %v13824_v22  ;;  %v17206_v35 = vrot.slane %v17189_v45, %v17034_v11  ;;  %v7166_v6 = vmax.f32 %v7000_v61, %v11779_v18  ;;  %v6991_v33 = vcombine.high %v6989_v38, %v6989_v38  ;;  %v11776_v46 = vrot.slane %v6990_v37, 9  ;;  %v13848_v18 = vld [vmem:[%s18641_s9 + $0x584] ss:$8 sps:$4 sm:$0xff]  }
 0x70b   : > { %v7157_v41 = vmax.f32 %v17118_v47, %v11770_v28  ;;  %v7161_v58 = vmax.f32 %v17123_v20, %v11774_v3  ;;  %v7009_v26 = vcombine.high %v7007_v49, %v7007_v49  ;;  %v11780_v39 = vrot.slane %v7008_v16, 9  ;;  %v13834_v47 = vld [vmem:[%s18641_s9 + $0x560] ss:$8 sps:$4 sm:$0xff]   ;;  %v13839_v20 = vld [vmem:[%s18641_s9 + $0x194] ss:$8 sps:$4 sm:$0xff]  }
 0x70c   : > { %v17229_v5 = vmax.f32 %v7162_v30, %v7166_v6  ;;  %v7164_v51 = vmax.f32 %v6989_v38, %v11777_v8  ;;  %v7168_v1 = vmax.f32 %v7007_v49, %v11781_v4  ;;  %v7163_v38 = vmax.f32 %v6990_v37, %v11776_v46  ;;  %v13846_v8 = vld [vmem:[%s18641_s9 + $0x580] ss:$8 sps:$4 sm:$0xff]   ;;  %v13849_v28 = vld [vmem:[%s18641_s9 + $0x1b0] ss:$8 sps:$4 sm:$0xff]   ;;  %v13857_v3 = vld [vmem:[%s18641_s9 + $0x1c4] ss:$8 sps:$4 sm:$0xff]  }
 0x70d   : > { %10532 = vmatpush1.bf16.msra.mxu1 %v13819_v50  ;;  %10692 = vmatpush1.bf16.msra.mxu0 %v13822_v14  ;;  %v17234_v53 = vmax.f32 %v7157_v41, %v7161_v58  ;;  %v7167_v27 = vmax.f32 %v7008_v16, %v11780_v39  ;;  %v11778_v19 = vrot.slane %v6991_v33, 9  ;;  %v11782_v15 = vrot.slane %v7009_v26, 9  ;;  %v13854_v16 = vld [vmem:[%s18641_s9 + $0x594] ss:$8 sps:$4 sm:$0xff]   ;;  %v13855_v30 = vld [vmem:[%s18641_s9 + $0x1c0] ss:$8 sps:$4 sm:$0xff]  }
 0x70e   : > { %10533 = vmatprep.subr.bf16.mxu1 %v13827_v43  ;;  %10693 = vmatprep.subr.bf16.mxu0 %v13830_v13  ;;  %v17238_v61 = vrot.slane %v17229_v5, %v17034_v11  ;;  %v17246_v56 = vmax.f32 %v7164_v51, %v7168_v1  ;;  %v13843_v43 = vld [vmem:[%s18641_s9 + $0x1a0] ss:$8 sps:$4 sm:$0xff]   ;;  %v13851_v13 = vld [vmem:[%s18641_s9 + $0x1b4] ss:$8 sps:$4 sm:$0xff]   ;;  %v13869_v41 = vld [vmem:[%s18641_s9 + $0x1e4] ss:$8 sps:$4 sm:$0xff]  }
 0x70f   : > { %v17253_v7 = vrot.slane %v17234_v53, %v17034_v11  ;;  %v17255_v22 = vmax.f32 %v7163_v38, %v7167_v27  ;;  %v7165_v50 = vmax.f32 %v6991_v33, %v11778_v19  ;;  %v7169_v14 = vmax.f32 %v7009_v26, %v11782_v15  ;;  %v13858_v6 = vld [vmem:[%s18641_s9 + $0x5a0] ss:$8 sps:$4 sm:$0xff]   ;;  %v13863_v33 = vld [vmem:[%s18641_s9 + $0x1d4] ss:$8 sps:$4 sm:$0xff]   ;;  %v13872_v58 = vld [vmem:[%s18641_s9 + $0x5c4] ss:$8 sps:$4 sm:$0xff]  }
 0x710   : > { %v17259_v52 = vrot.slane %v17246_v56, %v17034_v11  ;;  %v13867_v46 = vld [vmem:[%s18641_s9 + $0x1e0] ss:$8 sps:$4 sm:$0xff]   ;;  %v13875_v39 = vld [vmem:[%s18641_s9 + $0x1f4] ss:$8 sps:$4 sm:$0xff]   ;;  %v13873_v1 = vld [vmem:[%s18641_s9 + $0x1f0] ss:$8 sps:$4 sm:$0xff]   ;;  %v7367_v15 = vpack.c.bf16 %v17094_v44, %v17094_v44 }
 0x711   : > { %10534 = vmatpush1.bf16.msra.mxu1 %v13825_v10  ;;  %10694 = vmatpush1.bf16.msra.mxu0 %v13828_v40  ;;  %v17272_v49 = vrot.slane %v17255_v22, %v17034_v11  ;;  %v17280_v37 = vmax.f32 %v7165_v50, %v7169_v14  ;;  %v13852_v10 = vld [vmem:[%s18641_s9 + $0x590] ss:$8 sps:$4 sm:$0xff]   ;;  %v13866_v40 = vld [vmem:[%s18641_s9 + $0x5b4] ss:$8 sps:$4 sm:$0xff]   ;;  %v13870_v26 = vld [vmem:[%s18641_s9 + $0x5c0] ss:$8 sps:$4 sm:$0xff]  }
 0x712   : > { %10535 = vmatprep.subr.bf16.mxu1 %v13833_v54  ;;  %10695 = vmatprep.subr.bf16.mxu0 %v13836_v32  ;;  %v13861_v54 = vld [vmem:[%s18641_s9 + $0x1d0] ss:$8 sps:$4 sm:$0xff]   ;;  %v13878_v51 = vld [vmem:[%s18641_s9 + $0x5d4] ss:$8 sps:$4 sm:$0xff]   ;;  %v13884_v38 = vld [vmem:[%s18641_s9 + $0x5e4] ss:$8 sps:$4 sm:$0xff]  }
 0x713   : > { %v17293_v4 = vrot.slane %v17280_v37, %v17034_v11  ;;  %v13860_v11 = vld [vmem:[%s18641_s9 + $0x5a4] ss:$8 sps:$4 sm:$0xff]   ;;  %v13864_v32 = vld [vmem:[%s18641_s9 + $0x5b0] ss:$8 sps:$4 sm:$0xff]   ;;  %v13879_v27 = vld [vmem:[%s18641_s9 + $0x200] ss:$8 sps:$4 sm:$0xff]  }
 0x714   : > { %v13887_v19 = vld [vmem:[%s18641_s9 + $0x214] ss:$8 sps:$4 sm:$0xff]   ;;  %v13893_v44 = vld [vmem:[%s18641_s9 + $0x224] ss:$8 sps:$4 sm:$0xff]   ;;  %v13891_v14 = vld [vmem:[%s18641_s9 + $0x220] ss:$8 sps:$4 sm:$0xff]  }
 0x715   : > { %10536 = vmatpush1.bf16.msra.mxu1 %v13831_v59  ;;  %10696 = vmatpush1.bf16.msra.mxu0 %v13834_v47  ;;  %v13876_v59 = vld [vmem:[%s18641_s9 + $0x5d0] ss:$8 sps:$4 sm:$0xff]   ;;  %v7201_v47 = vrot.slane %v17041_v57, %v15569_v12  ;;  %v13882_v57 = vld [vmem:[%s18641_s9 + $0x5e0] ss:$8 sps:$4 sm:$0xff]   ;;  %v13896_v50 = vld [vmem:[%s18641_s9 + $0x604] ss:$8 sps:$4 sm:$0xff]  }
 0x716   : > { %10537 = vmatprep.subr.bf16.mxu1 %v13839_v20  ;;  %10697 = vmatprep.subr.bf16.mxu0 %v13842_v23  ;;  %v13881_v20 = vld [vmem:[%s18641_s9 + $0x204] ss:$8 sps:$4 sm:$0xff]  }
 0x717   : > { %v7364_v23 = vpack.c.bf16 %v7201_v47, %v7201_v47  ;;  %v13932_v47 = vld [vmem:[%s18641_s9 + $0x664] ss:$8 sps:$4 sm:$0xff]  }
 0x719   : > { %10538 = vmatpush1.bf16.msra.mxu1 %v13837_v9  ;;  %10698 = vmatpush1.bf16.msra.mxu0 %v13840_v34  ;;  %v13890_v9 = vld [vmem:[%s18641_s9 + $0x5f4] ss:$8 sps:$4 sm:$0xff]   ;;  %v13885_v34 = vld [vmem:[%s18641_s9 + $0x210] ss:$8 sps:$4 sm:$0xff]  }
 0x71a   : > { %10539 = vmatprep.subr.bf16.mxu1 %v13845_v29  ;;  %10699 = vmatprep.subr.bf16.mxu0 %v13848_v18  ;;  %v13888_v29 = vld [vmem:[%s18641_s9 + $0x5f0] ss:$8 sps:$4 sm:$0xff]   ;;  %v7245_v18 = vrot.slane %v17090_v21, %v15569_v12  ;;  %v13899_v21 = vld [vmem:[%s18641_s9 + $0x234] ss:$8 sps:$4 sm:$0xff]  }
 0x71d   : > { %10540 = vmatpush1.bf16.msra.mxu1 %v13843_v43  ;;  %10700 = vmatpush1.bf16.msra.mxu0 %v13846_v8  ;;  %v13894_v43 = vld [vmem:[%s18641_s9 + $0x600] ss:$8 sps:$4 sm:$0xff]   ;;  %v7372_v8 = vpack.c.bf16 %v7245_v18, %v7245_v18  ;;  %v13950_v18 = vld [vmem:[%s18641_s9 + $0x694] ss:$8 sps:$4 sm:$0xff]  }
 0x71e   : > { %10541 = vmatprep.subr.bf16.mxu1 %v13851_v13  ;;  %10701 = vmatprep.subr.bf16.mxu0 %v13854_v16  ;;  %v13902_v13 = vld [vmem:[%s18641_s9 + $0x614] ss:$8 sps:$4 sm:$0xff]   ;;  %v7375_v16 = vpack.c.bf16 %v17145_v63, %v17145_v63  ;;  %v13908_v63 = vld [vmem:[%s18641_s9 + $0x624] ss:$8 sps:$4 sm:$0xff]  }
 0x721   : > { %10542 = vmatpush1.bf16.msra.mxu1 %v13849_v28  ;;  %10702 = vmatpush1.bf16.msra.mxu0 %v13852_v10  ;;  %v13897_v28 = vld [vmem:[%s18641_s9 + $0x230] ss:$8 sps:$4 sm:$0xff]  }
 0x722   : > { %10543 = vmatprep.subr.bf16.mxu1 %v13857_v3  ;;  %10703 = vmatprep.subr.bf16.mxu0 %v13860_v11  ;;  %v13900_v10 = vld [vmem:[%s18641_s9 + $0x610] ss:$8 sps:$4 sm:$0xff]   ;;  %v13905_v3 = vld [vmem:[%s18641_s9 + $0x244] ss:$8 sps:$4 sm:$0xff]   ;;  %v13903_v11 = vld [vmem:[%s18641_s9 + $0x240] ss:$8 sps:$4 sm:$0xff]  }
 0x725   : > { %10544 = vmatpush1.bf16.msra.mxu1 %v13855_v30  ;;  %10704 = vmatpush1.bf16.msra.mxu0 %v13858_v6  ;;  %v13906_v30 = vld [vmem:[%s18641_s9 + $0x620] ss:$8 sps:$4 sm:$0xff]   ;;  %v13911_v6 = vld [vmem:[%s18641_s9 + $0x254] ss:$8 sps:$4 sm:$0xff]  }
 0x726   : > { %10545 = vmatprep.subr.bf16.mxu1 %v13863_v33  ;;  %10705 = vmatprep.subr.bf16.mxu0 %v13866_v40  ;;  %v13914_v33 = vld [vmem:[%s18641_s9 + $0x634] ss:$8 sps:$4 sm:$0xff]   ;;  %v13909_v40 = vld [vmem:[%s18641_s9 + $0x250] ss:$8 sps:$4 sm:$0xff]  }
 0x729   : > { %10546 = vmatpush1.bf16.msra.mxu1 %v13861_v54  ;;  %10706 = vmatpush1.bf16.msra.mxu0 %v13864_v32  ;;  %v13912_v54 = vld [vmem:[%s18641_s9 + $0x630] ss:$8 sps:$4 sm:$0xff]   ;;  %v13917_v32 = vld [vmem:[%s18641_s9 + $0x264] ss:$8 sps:$4 sm:$0xff]  }
 0x72a   : > { %10547 = vmatprep.subr.bf16.mxu1 %v13869_v41  ;;  %10707 = vmatprep.subr.bf16.mxu0 %v13872_v58  ;;  %v13920_v41 = vld [vmem:[%s18641_s9 + $0x644] ss:$8 sps:$4 sm:$0xff]   ;;  %v13915_v58 = vld [vmem:[%s18641_s9 + $0x260] ss:$8 sps:$4 sm:$0xff]  }
 0x72d   : > { %10548 = vmatpush1.bf16.msra.mxu1 %v13867_v46  ;;  %10708 = vmatpush1.bf16.msra.mxu0 %v13870_v26  ;;  %v13918_v46 = vld [vmem:[%s18641_s9 + $0x640] ss:$8 sps:$4 sm:$0xff]   ;;  %v13923_v26 = vld [vmem:[%s18641_s9 + $0x274] ss:$8 sps:$4 sm:$0xff]  }
 0x72e   : > { %10549 = vmatprep.subr.bf16.mxu1 %v13875_v39  ;;  %10709 = vmatprep.subr.bf16.mxu0 %v13878_v51  ;;  %v13926_v39 = vld [vmem:[%s18641_s9 + $0x654] ss:$8 sps:$4 sm:$0xff]   ;;  %v13921_v51 = vld [vmem:[%s18641_s9 + $0x270] ss:$8 sps:$4 sm:$0xff]  }
 0x731   : > { %10550 = vmatpush1.bf16.msra.mxu1 %v13873_v1  ;;  %10710 = vmatpush1.bf16.msra.mxu0 %v13876_v59  ;;  %v13924_v1 = vld [vmem:[%s18641_s9 + $0x650] ss:$8 sps:$4 sm:$0xff]   ;;  %v13929_v59 = vld [vmem:[%s18641_s9 + $0x284] ss:$8 sps:$4 sm:$0xff]  }
 0x732   : > { %10560 = vmatprep.subr.bf16.mxu1 %v13881_v20  ;;  %10711 = vmatprep.subr.bf16.mxu0 %v13884_v38  ;;  %v13927_v20 = vld [vmem:[%s18641_s9 + $0x280] ss:$8 sps:$4 sm:$0xff]  }
 0x733   : > { %v13930_v38 = vld [vmem:[%s18641_s9 + $0x660] ss:$8 sps:$4 sm:$0xff]  }
 0x734   : > { %10552 = vmatmul.mubr.bf16.vlgmr.msra.gmra.mrb[160].mxu1 %v7364_v23  ;;  %v13938_v23 = vld [vmem:[%s18641_s9 + $0x674] ss:$8 sps:$4 sm:$0xff]  }
 0x735   : > { %10561 = vmatpush1.bf16.msra.mxu1 %v13879_v27  ;;  %10592 = vmatprep.mubr.bf16.mxu1 %v7367_v15  ;;  %v13935_v27 = vld [vmem:[%s18641_s9 + $0x294] ss:$8 sps:$4 sm:$0xff]   ;;  %v13941_v15 = vld [vmem:[%s18641_s9 + $0x2a4] ss:$8 sps:$4 sm:$0xff]  }
 0x736   : > { %10712 = vmatpush1.bf16.msra.mxu0 %v13882_v57  ;;  %10562 = vmatprep.subr.bf16.mxu1 %v13887_v19  ;;  %v13933_v57 = vld [vmem:[%s18641_s9 + $0x290] ss:$8 sps:$4 sm:$0xff]  }
 0x737   : > { %10713 = vmatprep.subr.bf16.mxu0 %v13890_v9  ;;  %v13936_v19 = vld [vmem:[%s18641_s9 + $0x670] ss:$8 sps:$4 sm:$0xff]   ;;  %v13944_v9 = vld [vmem:[%s18641_s9 + $0x684] ss:$8 sps:$4 sm:$0xff]  }
 0x739   : > { %10563 = vmatpush1.bf16.msra.mxu1 %v13885_v34  ;;  %v13939_v34 = vld [vmem:[%s18641_s9 + $0x2a0] ss:$8 sps:$4 sm:$0xff]  }
 0x73a   : > { %10714 = vmatpush1.bf16.msra.mxu0 %v13888_v29  ;;  %10564 = vmatprep.subr.bf16.mxu1 %v13893_v44  ;;  %v13942_v29 = vld [vmem:[%s18641_s9 + $0x680] ss:$8 sps:$4 sm:$0xff]   ;;  %v13947_v44 = vld [vmem:[%s18641_s9 + $0x2b4] ss:$8 sps:$4 sm:$0xff]  }
 0x73b   : > { %10724 = vmatprep.subr.bf16.mxu0 %v13896_v50  ;;  %v13945_v50 = vld [vmem:[%s18641_s9 + $0x2b0] ss:$8 sps:$4 sm:$0xff]  }
 0x73d   : > { %10716 = vmatmul.mubr.bf16.vlgmr.msra.gmra.mrb[24].mxu0 %v7372_v8  ;;  %10565 = vmatpush1.bf16.msra.mxu1 %v13891_v14  ;;  %v13948_v14 = vld [vmem:[%s18641_s9 + $0x690] ss:$8 sps:$4 sm:$0xff]   ;;  %v13956_v8 = vld [vmem:[%s18641_s9 + $0x6a4] ss:$8 sps:$4 sm:$0xff]  }
 0x73e   : > { %10725 = vmatpush1.bf16.msra.mxu0 %v13894_v43  ;;  %10756 = vmatprep.mubr.bf16.mxu0 %v7375_v16  ;;  %v13953_v43 = vld [vmem:[%s18641_s9 + $0x2c4] ss:$8 sps:$4 sm:$0xff]   ;;  %v13959_v16 = vld [vmem:[%s18641_s9 + $0x2d4] ss:$8 sps:$4 sm:$0xff]  }
 0x73f   : > { %10566 = vmatprep.subr.bf16.mxu1 %v13899_v21  ;;  %10726 = vmatprep.subr.bf16.mxu0 %v13902_v13  ;;  %v13951_v21 = vld [vmem:[%s18641_s9 + $0x2c0] ss:$8 sps:$4 sm:$0xff]  }
 0x740   : > { %v13954_v13 = vld [vmem:[%s18641_s9 + $0x6a0] ss:$8 sps:$4 sm:$0xff]  }
 0x741   : > { %10567 = vmatpush1.bf16.msra.mxu1 %v13897_v28  ;;  %v13962_v28 = vld [vmem:[%s18641_s9 + $0x6b4] ss:$8 sps:$4 sm:$0xff]  }
 0x742   : > { %10727 = vmatpush1.bf16.msra.mxu0 %v13900_v10  ;;  %10568 = vmatprep.subr.bf16.mxu1 %v13905_v3  ;;  %v13957_v10 = vld [vmem:[%s18641_s9 + $0x2d0] ss:$8 sps:$4 sm:$0xff]  }
 0x743   : > { %10728 = vmatprep.subr.bf16.mxu0 %v13908_v63  ;;  %v13960_v3 = vld [vmem:[%s18641_s9 + $0x6b0] ss:$8 sps:$4 sm:$0xff]   ;;  %v13965_v63 = vld [vmem:[%s18641_s9 + $0x2e4] ss:$8 sps:$4 sm:$0xff]  }
 0x745   : > { %10569 = vmatpush1.bf16.msra.mxu1 %v13903_v11  ;;  %v13968_v11 = vld [vmem:[%s18641_s9 + $0x6c4] ss:$8 sps:$4 sm:$0xff]  }
 0x746   : > { %10729 = vmatpush1.bf16.msra.mxu0 %v13906_v30  ;;  %10570 = vmatprep.subr.bf16.mxu1 %v13911_v6  ;;  %v13963_v30 = vld [vmem:[%s18641_s9 + $0x2e0] ss:$8 sps:$4 sm:$0xff]  }
 0x747   : > { %10730 = vmatprep.subr.bf16.mxu0 %v13914_v33  ;;  %v13966_v6 = vld [vmem:[%s18641_s9 + $0x6c0] ss:$8 sps:$4 sm:$0xff]   ;;  %v13971_v33 = vld [vmem:[%s18641_s9 + $0x2f4] ss:$8 sps:$4 sm:$0xff]  }
 0x749   : > { %10571 = vmatpush1.bf16.msra.mxu1 %v13909_v40  ;;  %v13974_v40 = vld [vmem:[%s18641_s9 + $0x6d4] ss:$8 sps:$4 sm:$0xff]  }
 0x74a   : > { %10731 = vmatpush1.bf16.msra.mxu0 %v13912_v54  ;;  %10572 = vmatprep.subr.bf16.mxu1 %v13917_v32  ;;  %v13969_v54 = vld [vmem:[%s18641_s9 + $0x2f0] ss:$8 sps:$4 sm:$0xff]  }
 0x74b   : > { %10732 = vmatprep.subr.bf16.mxu0 %v13920_v41  ;;  %v13972_v32 = vld [vmem:[%s18641_s9 + $0x6d0] ss:$8 sps:$4 sm:$0xff]   ;;  %v7212_v41 = vrot.slane %v17029_v24, %v15569_v12  ;;  %v13978_v24 = vld [vmem:[%s18641_s9 + $0x6e0] ss:$8 sps:$4 sm:$0xff]  }
 0x74d   : > { %10573 = vmatpush1.bf16.msra.mxu1 %v13915_v58  ;;  %v13977_v58 = vld [vmem:[%s18641_s9 + $0x304] ss:$8 sps:$4 sm:$0xff]  }
 0x74e   : > { %10733 = vmatpush1.bf16.msra.mxu0 %v13918_v46  ;;  %10574 = vmatprep.subr.bf16.mxu1 %v13923_v26  ;;  %v13980_v46 = vld [vmem:[%s18641_s9 + $0x6e4] ss:$8 sps:$4 sm:$0xff]   ;;  %v13975_v26 = vld [vmem:[%s18641_s9 + $0x300] ss:$8 sps:$4 sm:$0xff]  }
 0x74f   : > { %10734 = vmatprep.subr.bf16.mxu0 %v13926_v39  ;;  %v7366_v39 = vpack.c.bf16 %v7212_v41, %v7212_v41  ;;  %v14034_v41 = vld [vmem:[%s18641_s9 + $0x774] ss:$8 sps:$4 sm:$0xff]  }
 0x751   : > { %10575 = vmatpush1.bf16.msra.mxu1 %v13921_v51  ;;  %v13983_v51 = vld [vmem:[%s18641_s9 + $0x314] ss:$8 sps:$4 sm:$0xff]  }
 0x752   : > { %10735 = vmatpush1.bf16.msra.mxu0 %v13924_v1  ;;  %10576 = vmatprep.subr.bf16.mxu1 %v13929_v59  ;;  %v7369_v1 = vpack.c.bf16 %v17176_v60, %v17176_v60  ;;  %v13986_v59 = vld [vmem:[%s18641_s9 + $0x6f4] ss:$8 sps:$4 sm:$0xff]   ;;  %v13989_v60 = vld [vmem:[%s18641_s9 + $0x324] ss:$8 sps:$4 sm:$0xff]  }
 0x753   : > { %10736 = vmatprep.subr.bf16.mxu0 %v13932_v47  ;;  %v13981_v47 = vld [vmem:[%s18641_s9 + $0x310] ss:$8 sps:$4 sm:$0xff]  }
 0x755   : > { %10577 = vmatpush1.bf16.msra.mxu1 %v13927_v20  ;;  %v13984_v20 = vld [vmem:[%s18641_s9 + $0x6f0] ss:$8 sps:$4 sm:$0xff]  }
 0x756   : > { %10737 = vmatpush1.bf16.msra.mxu0 %v13930_v38  ;;  %10578 = vmatprep.subr.bf16.mxu1 %v13935_v27  ;;  %v7256_v38 = vrot.slane %v17131_v31, %v15569_v12  ;;  %v13992_v27 = vld [vmem:[%s18641_s9 + $0x704] ss:$8 sps:$4 sm:$0xff]   ;;  %v13995_v31 = vld [vmem:[%s18641_s9 + $0x334] ss:$8 sps:$4 sm:$0xff]  }
 0x757   : > { %10738 = vmatprep.subr.bf16.mxu0 %v13938_v23  ;;  %v13987_v23 = vld [vmem:[%s18641_s9 + $0x320] ss:$8 sps:$4 sm:$0xff]  }
 0x759   : > { %10579 = vmatpush1.bf16.msra.mxu1 %v13933_v57  ;;  %v13990_v57 = vld [vmem:[%s18641_s9 + $0x700] ss:$8 sps:$4 sm:$0xff]  }
 0x75a   : > { %10739 = vmatpush1.bf16.msra.mxu0 %v13936_v19  ;;  %10580 = vmatprep.subr.bf16.mxu1 %v13941_v15  ;;  %v7374_v19 = vpack.c.bf16 %v7256_v38, %v7256_v38  ;;  %v13998_v15 = vld [vmem:[%s18641_s9 + $0x714] ss:$8 sps:$4 sm:$0xff]   ;;  %v14052_v38 = vld [vmem:[%s18641_s9 + $0x7a4] ss:$8 sps:$4 sm:$0xff]  }
 0x75b   : > { %10740 = vmatprep.subr.bf16.mxu0 %v13944_v9  ;;  %v7377_v9 = vpack.c.bf16 %v17180_v25, %v17180_v25  ;;  %v14004_v25 = vld [vmem:[%s18641_s9 + $0x724] ss:$8 sps:$4 sm:$0xff]  }
 0x75d   : > { %10581 = vmatpush1.bf16.msra.mxu1 %v13939_v34  ;;  %v13993_v34 = vld [vmem:[%s18641_s9 + $0x330] ss:$8 sps:$4 sm:$0xff]  }
 0x75e   : > { %10741 = vmatpush1.bf16.msra.mxu0 %v13942_v29  ;;  %10582 = vmatprep.subr.bf16.mxu1 %v13947_v44  ;;  %v13996_v29 = vld [vmem:[%s18641_s9 + $0x710] ss:$8 sps:$4 sm:$0xff]   ;;  %v14001_v44 = vld [vmem:[%s18641_s9 + $0x344] ss:$8 sps:$4 sm:$0xff]  }
 0x75f   : > { %10742 = vmatprep.subr.bf16.mxu0 %v13950_v18  ;;  %v13999_v18 = vld [vmem:[%s18641_s9 + $0x340] ss:$8 sps:$4 sm:$0xff]  }
 0x761   : > { %10583 = vmatpush1.bf16.msra.mxu1 %v13945_v50  ;;  %v14002_v50 = vld [vmem:[%s18641_s9 + $0x720] ss:$8 sps:$4 sm:$0xff]  }
 0x762   : > { %10743 = vmatpush1.bf16.msra.mxu0 %v13948_v14  ;;  %10584 = vmatprep.subr.bf16.mxu1 %v13953_v43  ;;  %v14007_v14 = vld [vmem:[%s18641_s9 + $0x354] ss:$8 sps:$4 sm:$0xff]  }
 0x763   : > { %10744 = vmatprep.subr.bf16.mxu0 %v13956_v8  ;;  %v14010_v43 = vld [vmem:[%s18641_s9 + $0x734] ss:$8 sps:$4 sm:$0xff]   ;;  %v14005_v8 = vld [vmem:[%s18641_s9 + $0x350] ss:$8 sps:$4 sm:$0xff]  }
 0x765   : > { %10585 = vmatpush1.bf16.msra.mxu1 %v13951_v21  ;;  %v14008_v21 = vld [vmem:[%s18641_s9 + $0x730] ss:$8 sps:$4 sm:$0xff]  }
 0x766   : > { %10745 = vmatpush1.bf16.msra.mxu0 %v13954_v13  ;;  %10586 = vmatprep.subr.bf16.mxu1 %v13959_v16  ;;  %v14013_v13 = vld [vmem:[%s18641_s9 + $0x364] ss:$8 sps:$4 sm:$0xff]  }
 0x767   : > { %10746 = vmatprep.subr.bf16.mxu0 %v13962_v28  ;;  %v14016_v16 = vld [vmem:[%s18641_s9 + $0x744] ss:$8 sps:$4 sm:$0xff]   ;;  %v14011_v28 = vld [vmem:[%s18641_s9 + $0x360] ss:$8 sps:$4 sm:$0xff]  }
 0x769   : > { %10587 = vmatpush1.bf16.msra.mxu1 %v13957_v10  ;;  %v14014_v10 = vld [vmem:[%s18641_s9 + $0x740] ss:$8 sps:$4 sm:$0xff]  }
 0x76a   : > { %10747 = vmatpush1.bf16.msra.mxu0 %v13960_v3  ;;  %10588 = vmatprep.subr.bf16.mxu1 %v13965_v63  ;;  %v14019_v3 = vld [vmem:[%s18641_s9 + $0x374] ss:$8 sps:$4 sm:$0xff]  }
 0x76b   : > { %10748 = vmatprep.subr.bf16.mxu0 %v13968_v11  ;;  %v14022_v63 = vld [vmem:[%s18641_s9 + $0x754] ss:$8 sps:$4 sm:$0xff]   ;;  %v14017_v11 = vld [vmem:[%s18641_s9 + $0x370] ss:$8 sps:$4 sm:$0xff]  }
 0x76d   : > { %10589 = vmatpush1.bf16.msra.mxu1 %v13963_v30  ;;  %v14020_v30 = vld [vmem:[%s18641_s9 + $0x750] ss:$8 sps:$4 sm:$0xff]  }
 0x76e   : > { %10749 = vmatpush1.bf16.msra.mxu0 %v13966_v6  ;;  %10590 = vmatprep.subr.bf16.mxu1 %v13971_v33  ;;  %v14025_v6 = vld [vmem:[%s18641_s9 + $0x384] ss:$8 sps:$4 sm:$0xff]  }
 0x76f   : > { %10750 = vmatprep.subr.bf16.mxu0 %v13974_v40  ;;  %v14028_v33 = vld [vmem:[%s18641_s9 + $0x764] ss:$8 sps:$4 sm:$0xff]   ;;  %v14023_v40 = vld [vmem:[%s18641_s9 + $0x380] ss:$8 sps:$4 sm:$0xff]  }
 0x771   : > { %10591 = vmatpush1.bf16.msra.mxu1 %v13969_v54  ;;  %v14026_v54 = vld [vmem:[%s18641_s9 + $0x760] ss:$8 sps:$4 sm:$0xff]  }
 0x772   : > { %10751 = vmatpush1.bf16.msra.mxu0 %v13972_v32  ;;  %10601 = vmatprep.subr.bf16.mxu1 %v13977_v58  ;;  %v14031_v32 = vld [vmem:[%s18641_s9 + $0x394] ss:$8 sps:$4 sm:$0xff]   ;;  %v14029_v58 = vld [vmem:[%s18641_s9 + $0x390] ss:$8 sps:$4 sm:$0xff]  }
 0x773   : > { %10752 = vmatprep.subr.bf16.mxu0 %v13980_v46  ;;  %v14032_v46 = vld [vmem:[%s18641_s9 + $0x770] ss:$8 sps:$4 sm:$0xff]  }
 0x774   : > { %10593 = vmatmul.mubr.bf16.vlgmr.msra.gmra.mrb[160].mxu1 %v7366_v39  ;;  %v14040_v39 = vld [vmem:[%s18641_s9 + $0x784] ss:$8 sps:$4 sm:$0xff]  }
 0x775   : > { %10602 = vmatpush1.bf16.msra.mxu1 %v13975_v26  ;;  %10633 = vmatprep.mubr.bf16.mxu1 %v7369_v1  ;;  %v14037_v26 = vld [vmem:[%s18641_s9 + $0x3a4] ss:$8 sps:$4 sm:$0xff]   ;;  %v14043_v1 = vld [vmem:[%s18641_s9 + $0x3b4] ss:$8 sps:$4 sm:$0xff]  }
 0x776   : > { %10753 = vmatpush1.bf16.msra.mxu0 %v13978_v24  ;;  %10603 = vmatprep.subr.bf16.mxu1 %v13983_v51  ;;  %v14035_v24 = vld [vmem:[%s18641_s9 + $0x3a0] ss:$8 sps:$4 sm:$0xff]  }
 0x777   : > { %10754 = vmatprep.subr.bf16.mxu0 %v13986_v59  ;;  %v14038_v51 = vld [vmem:[%s18641_s9 + $0x780] ss:$8 sps:$4 sm:$0xff]   ;;  %v14046_v59 = vld [vmem:[%s18641_s9 + $0x794] ss:$8 sps:$4 sm:$0xff]  }
 0x779   : > { %10604 = vmatpush1.bf16.msra.mxu1 %v13981_v47  ;;  %v14041_v47 = vld [vmem:[%s18641_s9 + $0x3b0] ss:$8 sps:$4 sm:$0xff]  }
 0x77a   : > { %10755 = vmatpush1.bf16.msra.mxu0 %v13984_v20  ;;  %10605 = vmatprep.subr.bf16.mxu1 %v13989_v60  ;;  %v14044_v20 = vld [vmem:[%s18641_s9 + $0x790] ss:$8 sps:$4 sm:$0xff]   ;;  %v14049_v60 = vld [vmem:[%s18641_s9 + $0x3c4] ss:$8 sps:$4 sm:$0xff]  }
 0x77b   : > { %10765 = vmatprep.subr.bf16.mxu0 %v13992_v27  ;;  %v14047_v27 = vld [vmem:[%s18641_s9 + $0x3c0] ss:$8 sps:$4 sm:$0xff]  }
 0x77d   : > { %10757 = vmatmul.mubr.bf16.vlgmr.msra.gmra.mrb[24].mxu0 %v7374_v19  ;;  %10606 = vmatpush1.bf16.msra.mxu1 %v13987_v23  ;;  %v14050_v23 = vld [vmem:[%s18641_s9 + $0x7a0] ss:$8 sps:$4 sm:$0xff]   ;;  %v14058_v19 = vld [vmem:[%s18641_s9 + $0x7b4] ss:$8 sps:$4 sm:$0xff]  }
 0x77e   : > { %10766 = vmatpush1.bf16.msra.mxu0 %v13990_v57  ;;  %10797 = vmatprep.mubr.bf16.mxu0 %v7377_v9  ;;  %v14055_v57 = vld [vmem:[%s18641_s9 + $0x3d4] ss:$8 sps:$4 sm:$0xff]   ;;  %v14061_v9 = vld [vmem:[%s18641_s9 + $0x3e4] ss:$8 sps:$4 sm:$0xff]  }
 0x77f   : > { %10607 = vmatprep.subr.bf16.mxu1 %v13995_v31  ;;  %10767 = vmatprep.subr.bf16.mxu0 %v13998_v15  ;;  %v14053_v31 = vld [vmem:[%s18641_s9 + $0x3d0] ss:$8 sps:$4 sm:$0xff]  }
 0x780   : > { %v14056_v15 = vld [vmem:[%s18641_s9 + $0x7b0] ss:$8 sps:$4 sm:$0xff]  }
 0x781   : > { %10608 = vmatpush1.bf16.msra.mxu1 %v13993_v34  ;;  %v14064_v34 = vld [vmem:[%s18641_s9 + $0x7c4] ss:$8 sps:$4 sm:$0xff]  }
 0x782   : > { %10768 = vmatpush1.bf16.msra.mxu0 %v13996_v29  ;;  %10609 = vmatprep.subr.bf16.mxu1 %v14001_v44  ;;  %v14059_v29 = vld [vmem:[%s18641_s9 + $0x3e0] ss:$8 sps:$4 sm:$0xff]  }
 0x783   : > { %10769 = vmatprep.subr.bf16.mxu0 %v14004_v25  ;;  %v14062_v44 = vld [vmem:[%s18641_s9 + $0x7c0] ss:$8 sps:$4 sm:$0xff]   ;;  %v14067_v25 = vld [vmem:[%s18641_s9 + $0x3f4] ss:$8 sps:$4 sm:$0xff]  }
 0x785   : > { %10610 = vmatpush1.bf16.msra.mxu1 %v13999_v18  ;;  %v14070_v18 = vld [vmem:[%s18641_s9 + $0x7d4] ss:$8 sps:$4 sm:$0xff]  }
 0x786   : > { %10770 = vmatpush1.bf16.msra.mxu0 %v14002_v50  ;;  %10611 = vmatprep.subr.bf16.mxu1 %v14007_v14  ;;  %v14065_v50 = vld [vmem:[%s18641_s9 + $0x3f0] ss:$8 sps:$4 sm:$0xff]  }
 0x787   : > { %10771 = vmatprep.subr.bf16.mxu0 %v14010_v43  ;;  %v14068_v14 = vld [vmem:[%s18641_s9 + $0x7d0] ss:$8 sps:$4 sm:$0xff]   ;;  %v7223_v43 = vrot.slane %v17160_v42, %v15569_v12 }
 0x788   : > { %v14074_v42 = vld [vmem:[%s18641_s9 + $0x7f0] ss:$8 sps:$4 sm:$0xff]  }
 0x789   : > { %10612 = vmatpush1.bf16.msra.mxu1 %v14005_v8  ;;  %v14073_v8 = vld [vmem:[%s18641_s9 + $0x7e4] ss:$8 sps:$4 sm:$0xff]  }
 0x78a   : > { %10772 = vmatpush1.bf16.msra.mxu0 %v14008_v21  ;;  %10613 = vmatprep.subr.bf16.mxu1 %v14013_v13  ;;  %v7368_v21 = vpack.c.bf16 %v7223_v43, %v7223_v43  ;;  %v14071_v13 = vld [vmem:[%s18641_s9 + $0x7e0] ss:$8 sps:$4 sm:$0xff]   ;;  %v7381_v43 = vpack.c.bf16 %v17206_v35, %v17206_v35  ;;  %v14136_v35 = vld [vmem:[%s18641_s9 + $0x934] ss:$8 sps:$4 sm:$0xff]  }
 0x78b   : > { %10773 = vmatprep.subr.bf16.mxu0 %v14016_v16  ;;  %v14076_v16 = vld [vmem:[%s18641_s9 + $0x7f4] ss:$8 sps:$4 sm:$0xff]  }
 0x78d   : > { %10614 = vmatpush1.bf16.msra.mxu1 %v14011_v28  ;;  %v7267_v28 = vrot.slane %v17162_v62, %v15569_v12  ;;  %v14080_v62 = vld [vmem:[%s18641_s9 + $0x810] ss:$8 sps:$4 sm:$0xff]  }
 0x78e   : > { %10774 = vmatpush1.bf16.msra.mxu0 %v14014_v10  ;;  %10615 = vmatprep.subr.bf16.mxu1 %v14019_v3  ;;  %v14079_v10 = vld [vmem:[%s18641_s9 + $0x804] ss:$8 sps:$4 sm:$0xff]   ;;  %v14077_v3 = vld [vmem:[%s18641_s9 + $0x800] ss:$8 sps:$4 sm:$0xff]  }
 0x78f   : > { %10775 = vmatprep.subr.bf16.mxu0 %v14022_v63  ;;  %v7376_v63 = vpack.c.bf16 %v7267_v28, %v7267_v28  ;;  %v14142_v28 = vld [vmem:[%s18641_s9 + $0x954] ss:$8 sps:$4 sm:$0xff]  }
 0x791   : > { %10616 = vmatpush1.bf16.msra.mxu1 %v14017_v11  ;;  %v14082_v11 = vld [vmem:[%s18641_s9 + $0x814] ss:$8 sps:$4 sm:$0xff]  }
 0x792   : > { %10776 = vmatpush1.bf16.msra.mxu0 %v14020_v30  ;;  %10617 = vmatprep.subr.bf16.mxu1 %v14025_v6  ;;  %v7379_v30 = vpack.c.bf16 %v17187_v48, %v17187_v48  ;;  %v14085_v6 = vld [vmem:[%s18641_s9 + $0x824] ss:$8 sps:$4 sm:$0xff]   ;;  %v14088_v48 = vld [vmem:[%s18641_s9 + $0x834] ss:$8 sps:$4 sm:$0xff]  }
 0x793   : > { %10777 = vmatprep.subr.bf16.mxu0 %v14028_v33  ;;  %v14083_v33 = vld [vmem:[%s18641_s9 + $0x820] ss:$8 sps:$4 sm:$0xff]  }
 0x795   : > { %10618 = vmatpush1.bf16.msra.mxu1 %v14023_v40  ;;  %v14086_v40 = vld [vmem:[%s18641_s9 + $0x830] ss:$8 sps:$4 sm:$0xff]  }
 0x796   : > { %10778 = vmatpush1.bf16.msra.mxu0 %v14026_v54  ;;  %10619 = vmatprep.subr.bf16.mxu1 %v14031_v32  ;;  %v14091_v54 = vld [vmem:[%s18641_s9 + $0x844] ss:$8 sps:$4 sm:$0xff]   ;;  %v14089_v32 = vld [vmem:[%s18641_s9 + $0x840] ss:$8 sps:$4 sm:$0xff]  }
 0x797   : > { %10779 = vmatprep.subr.bf16.mxu0 %v14034_v41  ;;  %v14094_v41 = vld [vmem:[%s18641_s9 + $0x854] ss:$8 sps:$4 sm:$0xff]  }
 0x799   : > { %10620 = vmatpush1.bf16.msra.mxu1 %v14029_v58  ;;  %v14092_v58 = vld [vmem:[%s18641_s9 + $0x850] ss:$8 sps:$4 sm:$0xff]  }
 0x79a   : > { %10780 = vmatpush1.bf16.msra.mxu0 %v14032_v46  ;;  %10621 = vmatprep.subr.bf16.mxu1 %v14037_v26  ;;  %v14097_v46 = vld [vmem:[%s18641_s9 + $0x864] ss:$8 sps:$4 sm:$0xff]   ;;  %v14095_v26 = vld [vmem:[%s18641_s9 + $0x860] ss:$8 sps:$4 sm:$0xff]  }
 0x79b   : > { %10781 = vmatprep.subr.bf16.mxu0 %v14040_v39  ;;  %v14100_v39 = vld [vmem:[%s18641_s9 + $0x874] ss:$8 sps:$4 sm:$0xff]  }
 0x79d   : > { %10622 = vmatpush1.bf16.msra.mxu1 %v14035_v24  ;;  %v14098_v24 = vld [vmem:[%s18641_s9 + $0x870] ss:$8 sps:$4 sm:$0xff]  }
 0x79e   : > { %10782 = vmatpush1.bf16.msra.mxu0 %v14038_v51  ;;  %10623 = vmatprep.subr.bf16.mxu1 %v14043_v1  ;;  %v14103_v51 = vld [vmem:[%s18641_s9 + $0x884] ss:$8 sps:$4 sm:$0xff]   ;;  %v14101_v1 = vld [vmem:[%s18641_s9 + $0x880] ss:$8 sps:$4 sm:$0xff]  }
 0x79f   : > { %10783 = vmatprep.subr.bf16.mxu0 %v14046_v59  ;;  %v14106_v59 = vld [vmem:[%s18641_s9 + $0x894] ss:$8 sps:$4 sm:$0xff]  }
 0x7a1   : > { %10624 = vmatpush1.bf16.msra.mxu1 %v14041_v47  ;;  %v14104_v47 = vld [vmem:[%s18641_s9 + $0x890] ss:$8 sps:$4 sm:$0xff]  }
 0x7a2   : > { %10784 = vmatpush1.bf16.msra.mxu0 %v14044_v20  ;;  %10625 = vmatprep.subr.bf16.mxu1 %v14049_v60  ;;  %v14109_v20 = vld [vmem:[%s18641_s9 + $0x8a4] ss:$8 sps:$4 sm:$0xff]   ;;  %v14107_v60 = vld [vmem:[%s18641_s9 + $0x8a0] ss:$8 sps:$4 sm:$0xff]  }
 0x7a3   : > { %10785 = vmatprep.subr.bf16.mxu0 %v14052_v38  ;;  %v14112_v38 = vld [vmem:[%s18641_s9 + $0x8b4] ss:$8 sps:$4 sm:$0xff]  }
 0x7a5   : > { %10626 = vmatpush1.bf16.msra.mxu1 %v14047_v27  ;;  %v14110_v27 = vld [vmem:[%s18641_s9 + $0x8b0] ss:$8 sps:$4 sm:$0xff]  }
 0x7a6   : > { %10786 = vmatpush1.bf16.msra.mxu0 %v14050_v23  ;;  %10627 = vmatprep.subr.bf16.mxu1 %v14055_v57  ;;  %v14115_v23 = vld [vmem:[%s18641_s9 + $0x8c4] ss:$8 sps:$4 sm:$0xff]   ;;  %v14113_v57 = vld [vmem:[%s18641_s9 + $0x8c0] ss:$8 sps:$4 sm:$0xff]  }
 0x7a7   : > { %10787 = vmatprep.subr.bf16.mxu0 %v14058_v19  ;;  %v14118_v19 = vld [vmem:[%s18641_s9 + $0x8d4] ss:$8 sps:$4 sm:$0xff]  }
 0x7a9   : > { %10628 = vmatpush1.bf16.msra.mxu1 %v14053_v31  ;;  %v14116_v31 = vld [vmem:[%s18641_s9 + $0x8d0] ss:$8 sps:$4 sm:$0xff]  }
 0x7aa   : > { %10788 = vmatpush1.bf16.msra.mxu0 %v14056_v15  ;;  %10629 = vmatprep.subr.bf16.mxu1 %v14061_v9  ;;  %v14121_v15 = vld [vmem:[%s18641_s9 + $0x8e4] ss:$8 sps:$4 sm:$0xff]   ;;  %v14119_v9 = vld [vmem:[%s18641_s9 + $0x8e0] ss:$8 sps:$4 sm:$0xff]  }
 0x7ab   : > { %10789 = vmatprep.subr.bf16.mxu0 %v14064_v34  ;;  %v14124_v34 = vld [vmem:[%s18641_s9 + $0x8f4] ss:$8 sps:$4 sm:$0xff]  }
 0x7ad   : > { %10630 = vmatpush1.bf16.msra.mxu1 %v14059_v29  ;;  %v14122_v29 = vld [vmem:[%s18641_s9 + $0x8f0] ss:$8 sps:$4 sm:$0xff]  }
 0x7ae   : > { %10790 = vmatpush1.bf16.msra.mxu0 %v14062_v44  ;;  %10631 = vmatprep.subr.bf16.mxu1 %v14067_v25  ;;  %v7278_v44 = vrot.slane %v17164_v55, %v15569_v12  ;;  %v14127_v25 = vld [vmem:[%s18641_s9 + $0x904] ss:$8 sps:$4 sm:$0xff]   ;;  %v14128_v55 = vld [vmem:[%s18641_s9 + $0x910] ss:$8 sps:$4 sm:$0xff]  }
 0x7af   : > { %10791 = vmatprep.subr.bf16.mxu0 %v14070_v18  ;;  %v14125_v18 = vld [vmem:[%s18641_s9 + $0x900] ss:$8 sps:$4 sm:$0xff]  }
 0x7b1   : > { %10632 = vmatpush1.bf16.msra.mxu1 %v14065_v50  ;;  %v7378_v50 = vpack.c.bf16 %v7278_v44, %v7278_v44  ;;  %v14193_v44 = vld [vmem:[%s18641_s9 + $0xa64] ss:$8 sps:$4 sm:$0xff]  }
 0x7b2   : > { %10792 = vmatpush1.bf16.msra.mxu0 %v14068_v14  ;;  %v14130_v14 = vld [vmem:[%s18641_s9 + $0x914] ss:$8 sps:$4 sm:$0xff]  }
 0x7b3   : > { %10793 = vmatprep.subr.bf16.mxu0 %v14073_v8  ;;  %v14133_v8 = vld [vmem:[%s18641_s9 + $0x924] ss:$8 sps:$4 sm:$0xff]  }
 0x7b4   : > { %10634 = vmatmul.mubr.bf16.vlgmr.msra.gmra.mrb[160].mxu1 %v7368_v21  ;;  %v14131_v21 = vld [vmem:[%s18641_s9 + $0x920] ss:$8 sps:$4 sm:$0xff]  }
 0x7b6   : > { %10794 = vmatpush1.bf16.msra.mxu0 %v14071_v13  ;;  %v14134_v13 = vld [vmem:[%s18641_s9 + $0x930] ss:$8 sps:$4 sm:$0xff]  }
 0x7b7   : > { %10795 = vmatprep.subr.bf16.mxu0 %v14076_v16  ;;  %v14139_v16 = vld [vmem:[%s18641_s9 + $0x944] ss:$8 sps:$4 sm:$0xff]  }
 0x7ba   : > { %10796 = vmatpush1.bf16.msra.mxu0 %v14074_v42  ;;  %v14137_v42 = vld [vmem:[%s18641_s9 + $0x940] ss:$8 sps:$4 sm:$0xff]  }
 0x7bb   : > { %10806 = vmatprep.subr.bf16.mxu0 %v14079_v10  ;;  %v14140_v10 = vld [vmem:[%s18641_s9 + $0x950] ss:$8 sps:$4 sm:$0xff]  }
 0x7bd   : > { %10798 = vmatmul.mubr.bf16.vlgmr.msra.gmra.mrb[24].mxu0 %v7376_v63  ;;  %v14143_v63 = vld [vmem:[%s18641_s9 + $0x960] ss:$8 sps:$4 sm:$0xff]  }
 0x7be   : > { %10807 = vmatpush1.bf16.msra.mxu0 %v14077_v3  ;;  %10838 = vmatprep.mubr.bf16.mxu0 %v7379_v30  ;;  %v14145_v3 = vld [vmem:[%s18641_s9 + $0x964] ss:$8 sps:$4 sm:$0xff]   ;;  %v14146_v30 = vld [vmem:[%s18641_s9 + $0x970] ss:$8 sps:$4 sm:$0xff]  }
 0x7bf   : > { %10808 = vmatprep.subr.bf16.mxu0 %v14082_v11  ;;  %v14148_v11 = vld [vmem:[%s18641_s9 + $0x974] ss:$8 sps:$4 sm:$0xff]  }
 0x7c2   : > { %10809 = vmatpush1.bf16.msra.mxu0 %v14080_v62  ;;  %v14151_v62 = vld [vmem:[%s18641_s9 + $0x984] ss:$8 sps:$4 sm:$0xff]  }
 0x7c3   : > { %10810 = vmatprep.subr.bf16.mxu0 %v14085_v6  ;;  %v14149_v6 = vld [vmem:[%s18641_s9 + $0x980] ss:$8 sps:$4 sm:$0xff]  }
 0x7c6   : > { %10811 = vmatpush1.bf16.msra.mxu0 %v14083_v33  ;;  %v14154_v33 = vld [vmem:[%s18641_s9 + $0x994] ss:$8 sps:$4 sm:$0xff]  }
 0x7c7   : > { %10812 = vmatprep.subr.bf16.mxu0 %v14088_v48  ;;  %v14152_v48 = vld [vmem:[%s18641_s9 + $0x990] ss:$8 sps:$4 sm:$0xff]  }
 0x7ca   : > { %10813 = vmatpush1.bf16.msra.mxu0 %v14086_v40  ;;  %v14157_v40 = vld [vmem:[%s18641_s9 + $0x9a4] ss:$8 sps:$4 sm:$0xff]  }
 0x7cb   : > { %10814 = vmatprep.subr.bf16.mxu0 %v14091_v54  ;;  %v14155_v54 = vld [vmem:[%s18641_s9 + $0x9a0] ss:$8 sps:$4 sm:$0xff]  }
 0x7ce   : > { %10815 = vmatpush1.bf16.msra.mxu0 %v14089_v32  ;;  %v14160_v32 = vld [vmem:[%s18641_s9 + $0x9b4] ss:$8 sps:$4 sm:$0xff]  }
 0x7cf   : > { %10816 = vmatprep.subr.bf16.mxu0 %v14094_v41  ;;  %v14158_v41 = vld [vmem:[%s18641_s9 + $0x9b0] ss:$8 sps:$4 sm:$0xff]  }
 0x7d2   : > { %10817 = vmatpush1.bf16.msra.mxu0 %v14092_v58  ;;  %v14163_v58 = vld [vmem:[%s18641_s9 + $0x9c4] ss:$8 sps:$4 sm:$0xff]  }
 0x7d3   : > { %10818 = vmatprep.subr.bf16.mxu0 %v14097_v46  ;;  %v14161_v46 = vld [vmem:[%s18641_s9 + $0x9c0] ss:$8 sps:$4 sm:$0xff]  }
 0x7d6   : > { %10819 = vmatpush1.bf16.msra.mxu0 %v14095_v26  ;;  %v14166_v26 = vld [vmem:[%s18641_s9 + $0x9d4] ss:$8 sps:$4 sm:$0xff]  }
 0x7d7   : > { %10820 = vmatprep.subr.bf16.mxu0 %v14100_v39  ;;  %v14164_v39 = vld [vmem:[%s18641_s9 + $0x9d0] ss:$8 sps:$4 sm:$0xff]  }
 0x7da   : > { %10821 = vmatpush1.bf16.msra.mxu0 %v14098_v24  ;;  %v14169_v24 = vld [vmem:[%s18641_s9 + $0x9e4] ss:$8 sps:$4 sm:$0xff]  }
 0x7db   : > { %10822 = vmatprep.subr.bf16.mxu0 %v14103_v51  ;;  %v14167_v51 = vld [vmem:[%s18641_s9 + $0x9e0] ss:$8 sps:$4 sm:$0xff]  }
 0x7de   : > { %10823 = vmatpush1.bf16.msra.mxu0 %v14101_v1  ;;  %v14172_v1 = vld [vmem:[%s18641_s9 + $0x9f4] ss:$8 sps:$4 sm:$0xff]  }
 0x7df   : > { %10824 = vmatprep.subr.bf16.mxu0 %v14106_v59  ;;  %v14170_v59 = vld [vmem:[%s18641_s9 + $0x9f0] ss:$8 sps:$4 sm:$0xff]  }
 0x7e2   : > { %10825 = vmatpush1.bf16.msra.mxu0 %v14104_v47  ;;  %v7289_v47 = vrot.slane %v17189_v45, %v15569_v12  ;;  %v14176_v45 = vld [vmem:[%s18641_s9 + $0xa10] ss:$8 sps:$4 sm:$0xff]  }
 0x7e3   : > { %10826 = vmatprep.subr.bf16.mxu0 %v14109_v20  ;;  %v14175_v20 = vld [vmem:[%s18641_s9 + $0xa04] ss:$8 sps:$4 sm:$0xff]  }
 0x7e6   : > { %10827 = vmatpush1.bf16.msra.mxu0 %v14107_v60  ;;  %v14173_v60 = vld [vmem:[%s18641_s9 + $0xa00] ss:$8 sps:$4 sm:$0xff]  }
 0x7e7   : > { %10828 = vmatprep.subr.bf16.mxu0 %v14112_v38  ;;  %v7380_v38 = vpack.c.bf16 %v7289_v47, %v7289_v47  ;;  %v14238_v47 = vld [vmem:[%s18641_s9 + $0xb54] ss:$8 sps:$4 sm:$0xff]  }
 0x7ea   : > { %10829 = vmatpush1.bf16.msra.mxu0 %v14110_v27  ;;  %v14178_v27 = vld [vmem:[%s18641_s9 + $0xa14] ss:$8 sps:$4 sm:$0xff]  }
 0x7eb   : > { %10830 = vmatprep.subr.bf16.mxu0 %v14115_v23  ;;  %v7383_v23 = vpack.c.bf16 %v17210_v2, %v17210_v2  ;;  %v14184_v2 = vld [vmem:[%s18641_s9 + $0xa34] ss:$8 sps:$4 sm:$0xff]  }
 0x7ee   : > { %10831 = vmatpush1.bf16.msra.mxu0 %v14113_v57  ;;  %v14181_v57 = vld [vmem:[%s18641_s9 + $0xa24] ss:$8 sps:$4 sm:$0xff]  }
 0x7ef   : > { %10832 = vmatprep.subr.bf16.mxu0 %v14118_v19  ;;  %v14179_v19 = vld [vmem:[%s18641_s9 + $0xa20] ss:$8 sps:$4 sm:$0xff]  }
 0x7f2   : > { %10833 = vmatpush1.bf16.msra.mxu0 %v14116_v31  ;;  %v14182_v31 = vld [vmem:[%s18641_s9 + $0xa30] ss:$8 sps:$4 sm:$0xff]  }
 0x7f3   : > { %10834 = vmatprep.subr.bf16.mxu0 %v14121_v15  ;;  %v14187_v15 = vld [vmem:[%s18641_s9 + $0xa44] ss:$8 sps:$4 sm:$0xff]  }
 0x7f6   : > { %10835 = vmatpush1.bf16.msra.mxu0 %v14119_v9  ;;  %v14185_v9 = vld [vmem:[%s18641_s9 + $0xa40] ss:$8 sps:$4 sm:$0xff]  }
 0x7f7   : > { %10836 = vmatprep.subr.bf16.mxu0 %v14124_v34  ;;  %v14190_v34 = vld [vmem:[%s18641_s9 + $0xa54] ss:$8 sps:$4 sm:$0xff]  }
 0x7fa   : > { %10837 = vmatpush1.bf16.msra.mxu0 %v14122_v29  ;;  %v14188_v29 = vld [vmem:[%s18641_s9 + $0xa50] ss:$8 sps:$4 sm:$0xff]  }
 0x7fb   : > { %10847 = vmatprep.subr.bf16.mxu0 %v14127_v25  ;;  %v14191_v25 = vld [vmem:[%s18641_s9 + $0xa60] ss:$8 sps:$4 sm:$0xff]  }
 0x7fd   : > { %10839 = vmatmul.mubr.bf16.vlgmr.msra.gmra.mrb[24].mxu0 %v7378_v50  ;;  %v14194_v50 = vld [vmem:[%s18641_s9 + $0xa70] ss:$8 sps:$4 sm:$0xff]  }
 0x7fe   : > { %10848 = vmatpush1.bf16.msra.mxu0 %v14125_v18  ;;  %10879 = vmatprep.mubr.bf16.mxu0 %v7381_v43  ;;  %v14196_v18 = vld [vmem:[%s18641_s9 + $0xa74] ss:$8 sps:$4 sm:$0xff]   ;;  %v14197_v43 = vld [vmem:[%s18641_s9 + $0xa80] ss:$8 sps:$4 sm:$0xff]  }
 0x7ff   : > { %10849 = vmatprep.subr.bf16.mxu0 %v14130_v14  ;;  %v14199_v14 = vld [vmem:[%s18641_s9 + $0xa84] ss:$8 sps:$4 sm:$0xff]  }
 0x802   : > { %10850 = vmatpush1.bf16.msra.mxu0 %v14128_v55  ;;  %v14202_v55 = vld [vmem:[%s18641_s9 + $0xa94] ss:$8 sps:$4 sm:$0xff]  }
 0x803   : > { %10851 = vmatprep.subr.bf16.mxu0 %v14133_v8  ;;  %v14200_v8 = vld [vmem:[%s18641_s9 + $0xa90] ss:$8 sps:$4 sm:$0xff]  }
 0x806   : > { %10852 = vmatpush1.bf16.msra.mxu0 %v14131_v21  ;;  %v14205_v21 = vld [vmem:[%s18641_s9 + $0xaa4] ss:$8 sps:$4 sm:$0xff]  }
 0x807   : > { %10853 = vmatprep.subr.bf16.mxu0 %v14136_v35  ;;  %v14203_v35 = vld [vmem:[%s18641_s9 + $0xaa0] ss:$8 sps:$4 sm:$0xff]  }
 0x80a   : > { %10854 = vmatpush1.bf16.msra.mxu0 %v14134_v13  ;;  %v14208_v13 = vld [vmem:[%s18641_s9 + $0xab4] ss:$8 sps:$4 sm:$0xff]  }
 0x80b   : > { %10855 = vmatprep.subr.bf16.mxu0 %v14139_v16  ;;  %v14206_v16 = vld [vmem:[%s18641_s9 + $0xab0] ss:$8 sps:$4 sm:$0xff]  }
 0x80e   : > { %10856 = vmatpush1.bf16.msra.mxu0 %v14137_v42  ;;  %v14211_v42 = vld [vmem:[%s18641_s9 + $0xac4] ss:$8 sps:$4 sm:$0xff]  }
 0x80f   : > { %10857 = vmatprep.subr.bf16.mxu0 %v14142_v28  ;;  %v14209_v28 = vld [vmem:[%s18641_s9 + $0xac0] ss:$8 sps:$4 sm:$0xff]  }
 0x812   : > { %10858 = vmatpush1.bf16.msra.mxu0 %v14140_v10  ;;  %v14214_v10 = vld [vmem:[%s18641_s9 + $0xad4] ss:$8 sps:$4 sm:$0xff]  }
 0x813   : > { %10859 = vmatprep.subr.bf16.mxu0 %v14145_v3  ;;  %v14212_v3 = vld [vmem:[%s18641_s9 + $0xad0] ss:$8 sps:$4 sm:$0xff]  }
 0x816   : > { %10860 = vmatpush1.bf16.msra.mxu0 %v14143_v63  ;;  %v14217_v63 = vld [vmem:[%s18641_s9 + $0xae4] ss:$8 sps:$4 sm:$0xff]  }
 0x817   : > { %10861 = vmatprep.subr.bf16.mxu0 %v14148_v11  ;;  %v14215_v11 = vld [vmem:[%s18641_s9 + $0xae0] ss:$8 sps:$4 sm:$0xff]  }
 0x81a   : > { %10862 = vmatpush1.bf16.msra.mxu0 %v14146_v30  ;;  %v14220_v30 = vld [vmem:[%s18641_s9 + $0xaf4] ss:$8 sps:$4 sm:$0xff]  }
 0x81b   : > { %10863 = vmatprep.subr.bf16.mxu0 %v14151_v62  ;;  %v14218_v62 = vld [vmem:[%s18641_s9 + $0xaf0] ss:$8 sps:$4 sm:$0xff]  }
 0x81e   : > { %10864 = vmatpush1.bf16.msra.mxu0 %v14149_v6  ;;  %v7300_v6 = vrot.slane %v17191_v17, %v15569_v12  ;;  %v14224_v17 = vld [vmem:[%s18641_s9 + $0xb10] ss:$8 sps:$4 sm:$0xff]  }
 0x81f   : > { %10865 = vmatprep.subr.bf16.mxu0 %v14154_v33  ;;  %v14223_v33 = vld [vmem:[%s18641_s9 + $0xb04] ss:$8 sps:$4 sm:$0xff]  }
 0x822   : > { %10866 = vmatpush1.bf16.msra.mxu0 %v14152_v48  ;;  %v14221_v48 = vld [vmem:[%s18641_s9 + $0xb00] ss:$8 sps:$4 sm:$0xff]  }
 0x823   : > { %10867 = vmatprep.subr.bf16.mxu0 %v14157_v40  ;;  %v7382_v40 = vpack.c.bf16 %v7300_v6, %v7300_v6  ;;  %v14289_v6 = vld [vmem:[%s18641_s9 + $0xc64] ss:$8 sps:$4 sm:$0xff]  }
 0x826   : > { %10868 = vmatpush1.bf16.msra.mxu0 %v14155_v54  ;;  %v14226_v54 = vld [vmem:[%s18641_s9 + $0xb14] ss:$8 sps:$4 sm:$0xff]  }
 0x827   : > { %10869 = vmatprep.subr.bf16.mxu0 %v14160_v32  ;;  %v7385_v32 = vpack.c.bf16 %v17253_v7, %v17253_v7  ;;  %v14232_v7 = vld [vmem:[%s18641_s9 + $0xb34] ss:$8 sps:$4 sm:$0xff]  }
 0x82a   : > { %10870 = vmatpush1.bf16.msra.mxu0 %v14158_v41  ;;  %v14229_v41 = vld [vmem:[%s18641_s9 + $0xb24] ss:$8 sps:$4 sm:$0xff]  }
 0x82b   : > { %10871 = vmatprep.subr.bf16.mxu0 %v14163_v58  ;;  %v14227_v58 = vld [vmem:[%s18641_s9 + $0xb20] ss:$8 sps:$4 sm:$0xff]  }
 0x82e   : > { %10872 = vmatpush1.bf16.msra.mxu0 %v14161_v46  ;;  %v14230_v46 = vld [vmem:[%s18641_s9 + $0xb30] ss:$8 sps:$4 sm:$0xff]  }
 0x82f   : > { %10873 = vmatprep.subr.bf16.mxu0 %v14166_v26 }
 0x832   : > { %10874 = vmatpush1.bf16.msra.mxu0 %v14164_v39  ;;  %v14235_v39 = vld [vmem:[%s18641_s9 + $0xb44] ss:$8 sps:$4 sm:$0xff]  }
 0x833   : > { %10875 = vmatprep.subr.bf16.mxu0 %v14169_v24 }
 0x836   : > { %10876 = vmatpush1.bf16.msra.mxu0 %v14167_v51 }
 0x837   : > { %10877 = vmatprep.subr.bf16.mxu0 %v14172_v1 }
 0x83a   : > { %10878 = vmatpush1.bf16.msra.mxu0 %v14170_v59  ;;  %v14233_v59 = vld [vmem:[%s18641_s9 + $0xb40] ss:$8 sps:$4 sm:$0xff]  }
 0x83b   : > { %10888 = vmatprep.subr.bf16.mxu0 %v14175_v20  ;;  %v14236_v20 = vld [vmem:[%s18641_s9 + $0xb50] ss:$8 sps:$4 sm:$0xff]  }
 0x83d   : > { %10880 = vmatmul.mubr.bf16.vlgmr.msra.gmra.mrb[24].mxu0 %v7380_v38  ;;  %v14239_v38 = vld [vmem:[%s18641_s9 + $0xb60] ss:$8 sps:$4 sm:$0xff]  }
 0x83e   : > { %10889 = vmatpush1.bf16.msra.mxu0 %v14173_v60  ;;  %10920 = vmatprep.mubr.bf16.mxu0 %v7383_v23  ;;  %v14241_v60 = vld [vmem:[%s18641_s9 + $0xb64] ss:$8 sps:$4 sm:$0xff]   ;;  %v14242_v23 = vld [vmem:[%s18641_s9 + $0xb70] ss:$8 sps:$4 sm:$0xff]  }
 0x83f   : > { %10890 = vmatprep.subr.bf16.mxu0 %v14178_v27  ;;  %v14244_v27 = vld [vmem:[%s18641_s9 + $0xb74] ss:$8 sps:$4 sm:$0xff]  }
 0x842   : > { %10891 = vmatpush1.bf16.msra.mxu0 %v14176_v45  ;;  %v14247_v45 = vld [vmem:[%s18641_s9 + $0xb84] ss:$8 sps:$4 sm:$0xff]  }
 0x843   : > { %10892 = vmatprep.subr.bf16.mxu0 %v14181_v57  ;;  %v14245_v57 = vld [vmem:[%s18641_s9 + $0xb80] ss:$8 sps:$4 sm:$0xff]  }
 0x846   : > { %10893 = vmatpush1.bf16.msra.mxu0 %v14179_v19  ;;  %v14250_v19 = vld [vmem:[%s18641_s9 + $0xb94] ss:$8 sps:$4 sm:$0xff]  }
 0x847   : > { %10894 = vmatprep.subr.bf16.mxu0 %v14184_v2  ;;  %v14248_v2 = vld [vmem:[%s18641_s9 + $0xb90] ss:$8 sps:$4 sm:$0xff]  }
 0x84a   : > { %10895 = vmatpush1.bf16.msra.mxu0 %v14182_v31  ;;  %v14253_v31 = vld [vmem:[%s18641_s9 + $0xba4] ss:$8 sps:$4 sm:$0xff]  }
 0x84b   : > { %10896 = vmatprep.subr.bf16.mxu0 %v14187_v15  ;;  %v14251_v15 = vld [vmem:[%s18641_s9 + $0xba0] ss:$8 sps:$4 sm:$0xff]  }
 0x84e   : > { %10897 = vmatpush1.bf16.msra.mxu0 %v14185_v9  ;;  %v14256_v9 = vld [vmem:[%s18641_s9 + $0xbb4] ss:$8 sps:$4 sm:$0xff]  }
 0x84f   : > { %10898 = vmatprep.subr.bf16.mxu0 %v14190_v34  ;;  %v14254_v34 = vld [vmem:[%s18641_s9 + $0xbb0] ss:$8 sps:$4 sm:$0xff]  }
 0x852   : > { %10899 = vmatpush1.bf16.msra.mxu0 %v14188_v29  ;;  %v14259_v29 = vld [vmem:[%s18641_s9 + $0xbc4] ss:$8 sps:$4 sm:$0xff]  }
 0x853   : > { %10900 = vmatprep.subr.bf16.mxu0 %v14193_v44  ;;  %v14257_v44 = vld [vmem:[%s18641_s9 + $0xbc0] ss:$8 sps:$4 sm:$0xff]  }
 0x856   : > { %10901 = vmatpush1.bf16.msra.mxu0 %v14191_v25  ;;  %v14262_v25 = vld [vmem:[%s18641_s9 + $0xbd4] ss:$8 sps:$4 sm:$0xff]  }
 0x857   : > { %10902 = vmatprep.subr.bf16.mxu0 %v14196_v18  ;;  %v14260_v18 = vld [vmem:[%s18641_s9 + $0xbd0] ss:$8 sps:$4 sm:$0xff]  }
 0x85a   : > { %10903 = vmatpush1.bf16.msra.mxu0 %v14194_v50  ;;  %v14265_v50 = vld [vmem:[%s18641_s9 + $0xbe4] ss:$8 sps:$4 sm:$0xff]  }
 0x85b   : > { %10904 = vmatprep.subr.bf16.mxu0 %v14199_v14  ;;  %v14263_v14 = vld [vmem:[%s18641_s9 + $0xbe0] ss:$8 sps:$4 sm:$0xff]  }
 0x85e   : > { %10905 = vmatpush1.bf16.msra.mxu0 %v14197_v43  ;;  %v14268_v43 = vld [vmem:[%s18641_s9 + $0xbf4] ss:$8 sps:$4 sm:$0xff]  }
 0x85f   : > { %10906 = vmatprep.subr.bf16.mxu0 %v14202_v55  ;;  %v14266_v55 = vld [vmem:[%s18641_s9 + $0xbf0] ss:$8 sps:$4 sm:$0xff]  }
 0x862   : > { %10907 = vmatpush1.bf16.msra.mxu0 %v14200_v8  ;;  %v7311_v8 = vrot.slane %v17234_v53, %v15569_v12  ;;  %v14272_v53 = vld [vmem:[%s18641_s9 + $0xc10] ss:$8 sps:$4 sm:$0xff]  }
 0x863   : > { %10908 = vmatprep.subr.bf16.mxu0 %v14205_v21  ;;  %v14271_v21 = vld [vmem:[%s18641_s9 + $0xc04] ss:$8 sps:$4 sm:$0xff]  }
 0x866   : > { %10909 = vmatpush1.bf16.msra.mxu0 %v14203_v35  ;;  %v14269_v35 = vld [vmem:[%s18641_s9 + $0xc00] ss:$8 sps:$4 sm:$0xff]  }
 0x867   : > { %10910 = vmatprep.subr.bf16.mxu0 %v14208_v13  ;;  %v7384_v13 = vpack.c.bf16 %v7311_v8, %v7311_v8  ;;  %v14343_v8 = vld [vmem:[%s18641_s9 + $0xd84] ss:$8 sps:$4 sm:$0xff]  }
 0x86a   : > { %10911 = vmatpush1.bf16.msra.mxu0 %v14206_v16  ;;  %v14274_v16 = vld [vmem:[%s18641_s9 + $0xc14] ss:$8 sps:$4 sm:$0xff]  }
 0x86b   : > { %10912 = vmatprep.subr.bf16.mxu0 %v14211_v42  ;;  %v7387_v42 = vpack.c.bf16 %v17238_v61, %v17238_v61  ;;  %v14280_v61 = vld [vmem:[%s18641_s9 + $0xc34] ss:$8 sps:$4 sm:$0xff]  }
 0x86e   : > { %10913 = vmatpush1.bf16.msra.mxu0 %v14209_v28  ;;  %v14277_v28 = vld [vmem:[%s18641_s9 + $0xc24] ss:$8 sps:$4 sm:$0xff]  }
 0x86f   : > { %10914 = vmatprep.subr.bf16.mxu0 %v14214_v10  ;;  %v14275_v10 = vld [vmem:[%s18641_s9 + $0xc20] ss:$8 sps:$4 sm:$0xff]  }
 0x872   : > { %10915 = vmatpush1.bf16.msra.mxu0 %v14212_v3  ;;  %v14278_v3 = vld [vmem:[%s18641_s9 + $0xc30] ss:$8 sps:$4 sm:$0xff]  }
 0x873   : > { %10916 = vmatprep.subr.bf16.mxu0 %v14217_v63  ;;  %v14283_v63 = vld [vmem:[%s18641_s9 + $0xc44] ss:$8 sps:$4 sm:$0xff]  }
 0x876   : > { %10917 = vmatpush1.bf16.msra.mxu0 %v14215_v11  ;;  %v14281_v11 = vld [vmem:[%s18641_s9 + $0xc40] ss:$8 sps:$4 sm:$0xff]  }
 0x877   : > { %10918 = vmatprep.subr.bf16.mxu0 %v14220_v30  ;;  %v14286_v30 = vld [vmem:[%s18641_s9 + $0xc54] ss:$8 sps:$4 sm:$0xff]  }
 0x87a   : > { %10919 = vmatpush1.bf16.msra.mxu0 %v14218_v62  ;;  %v14284_v62 = vld [vmem:[%s18641_s9 + $0xc50] ss:$8 sps:$4 sm:$0xff]  }
 0x87b   : > { %10929 = vmatprep.subr.bf16.mxu0 %v14223_v33  ;;  %v14287_v33 = vld [vmem:[%s18641_s9 + $0xc60] ss:$8 sps:$4 sm:$0xff]  }
 0x87d   : > { %10921 = vmatmul.mubr.bf16.vlgmr.msra.gmra.mrb[24].mxu0 %v7382_v40  ;;  %v14290_v40 = vld [vmem:[%s18641_s9 + $0xc70] ss:$8 sps:$4 sm:$0xff]  }
 0x87e   : > { %10930 = vmatpush1.bf16.msra.mxu0 %v14221_v48  ;;  %10961 = vmatprep.mubr.bf16.mxu0 %v7385_v32  ;;  %v14292_v48 = vld [vmem:[%s18641_s9 + $0xc74] ss:$8 sps:$4 sm:$0xff]   ;;  %v14293_v32 = vld [vmem:[%s18641_s9 + $0xc80] ss:$8 sps:$4 sm:$0xff]  }
 0x87f   : > { %10931 = vmatprep.subr.bf16.mxu0 %v14226_v54  ;;  %v14295_v54 = vld [vmem:[%s18641_s9 + $0xc84] ss:$8 sps:$4 sm:$0xff]  }
 0x882   : > { %10932 = vmatpush1.bf16.msra.mxu0 %v14224_v17  ;;  %v14298_v17 = vld [vmem:[%s18641_s9 + $0xc94] ss:$8 sps:$4 sm:$0xff]  }
 0x883   : > { %10933 = vmatprep.subr.bf16.mxu0 %v14229_v41  ;;  %v14296_v41 = vld [vmem:[%s18641_s9 + $0xc90] ss:$8 sps:$4 sm:$0xff]  }
 0x886   : > { %10934 = vmatpush1.bf16.msra.mxu0 %v14227_v58  ;;  %v14301_v58 = vld [vmem:[%s18641_s9 + $0xca4] ss:$8 sps:$4 sm:$0xff]  }
 0x887   : > { %v18091_v26 = vpop.f32.mrb[160].mxu1  ;;  %10935 = vmatprep.subr.bf16.mxu0 %v14232_v7  ;;  %v14299_v7 = vld [vmem:[%s18641_s9 + $0xca0] ss:$8 sps:$4 sm:$0xff]  }
 0x888   : > { %v18096_v24 = vpop.f32.mrb[161].mxu1 }
 0x889   : > { %v10639_v51 = vpop.f32.mrb[162].mxu1 }
 0x88a   : > { %10936 = vmatpush1.bf16.msra.mxu0 %v14230_v46  ;;  %v10640_v1 = vpop.f32.mrb[163].mxu1  ;;  %v14304_v46 = vld [vmem:[%s18641_s9 + $0xcb4] ss:$8 sps:$4 sm:$0xff]   ;;  %v14307_v51 = vld [vmem:[%s18641_s9 + $0xcc4] ss:$8 sps:$4 sm:$0xff]  }
 0x88b   : > { %10937 = vmatprep.subr.bf16.mxu0 %v14235_v39  ;;  %v14302_v39 = vld [vmem:[%s18641_s9 + $0xcb0] ss:$8 sps:$4 sm:$0xff]   ;;  %v14305_v1 = vld [vmem:[%s18641_s9 + $0xcc0] ss:$8 sps:$4 sm:$0xff]  }
 0x88e   : > { %10938 = vmatpush1.bf16.msra.mxu0 %v14233_v59  ;;  %v14310_v59 = vld [vmem:[%s18641_s9 + $0xcd4] ss:$8 sps:$4 sm:$0xff]  }
 0x88f   : > { %10939 = vmatprep.subr.bf16.mxu0 %v14238_v47  ;;  %v14308_v47 = vld [vmem:[%s18641_s9 + $0xcd0] ss:$8 sps:$4 sm:$0xff]  }
 0x892   : > { %10940 = vmatpush1.bf16.msra.mxu0 %v14236_v20  ;;  %v14313_v20 = vld [vmem:[%s18641_s9 + $0xce4] ss:$8 sps:$4 sm:$0xff]  }
 0x893   : > { %10941 = vmatprep.subr.bf16.mxu0 %v14241_v60  ;;  %v14311_v60 = vld [vmem:[%s18641_s9 + $0xce0] ss:$8 sps:$4 sm:$0xff]  }
 0x896   : > { %10942 = vmatpush1.bf16.msra.mxu0 %v14239_v38  ;;  %v14316_v38 = vld [vmem:[%s18641_s9 + $0xcf4] ss:$8 sps:$4 sm:$0xff]  }
 0x897   : > { %10943 = vmatprep.subr.bf16.mxu0 %v14244_v27  ;;  %v14314_v27 = vld [vmem:[%s18641_s9 + $0xcf0] ss:$8 sps:$4 sm:$0xff]  }
 0x89a   : > { %10944 = vmatpush1.bf16.msra.mxu0 %v14242_v23  ;;  %v7322_v23 = vrot.slane %v17229_v5, %v15569_v12  ;;  %v14320_v5 = vld [vmem:[%s18641_s9 + $0xd10] ss:$8 sps:$4 sm:$0xff]  }
 0x89b   : > { %10945 = vmatprep.subr.bf16.mxu0 %v14247_v45  ;;  %v14319_v45 = vld [vmem:[%s18641_s9 + $0xd04] ss:$8 sps:$4 sm:$0xff]  }
 0x89e   : > { %10946 = vmatpush1.bf16.msra.mxu0 %v14245_v57  ;;  %v14317_v57 = vld [vmem:[%s18641_s9 + $0xd00] ss:$8 sps:$4 sm:$0xff]  }
 0x89f   : > { %10947 = vmatprep.subr.bf16.mxu0 %v14250_v19  ;;  %v7386_v19 = vpack.c.bf16 %v7322_v23, %v7322_v23  ;;  %v14377_v23 = vld [vmem:[%s18641_s9 + $0xe40] ss:$8 sps:$4 sm:$0xff]  }
 0x8a2   : > { %10948 = vmatpush1.bf16.msra.mxu0 %v14248_v2  ;;  %v14322_v2 = vld [vmem:[%s18641_s9 + $0xd14] ss:$8 sps:$4 sm:$0xff]  }
 0x8a3   : > { %10949 = vmatprep.subr.bf16.mxu0 %v14253_v31  ;;  %v7389_v31 = vpack.c.bf16 %v17272_v49, %v17272_v49  ;;  %v14328_v49 = vld [vmem:[%s18641_s9 + $0xd34] ss:$8 sps:$4 sm:$0xff]  }
 0x8a6   : > { %10950 = vmatpush1.bf16.msra.mxu0 %v14251_v15  ;;  %v14325_v15 = vld [vmem:[%s18641_s9 + $0xd24] ss:$8 sps:$4 sm:$0xff]  }
 0x8a7   : > { %10951 = vmatprep.subr.bf16.mxu0 %v14256_v9  ;;  %v14323_v9 = vld [vmem:[%s18641_s9 + $0xd20] ss:$8 sps:$4 sm:$0xff]  }
 0x8aa   : > { %10952 = vmatpush1.bf16.msra.mxu0 %v14254_v34  ;;  %v14326_v34 = vld [vmem:[%s18641_s9 + $0xd30] ss:$8 sps:$4 sm:$0xff]  }
 0x8ab   : > { %10953 = vmatprep.subr.bf16.mxu0 %v14259_v29  ;;  %v14331_v29 = vld [vmem:[%s18641_s9 + $0xd44] ss:$8 sps:$4 sm:$0xff]  }
 0x8ae   : > { %10954 = vmatpush1.bf16.msra.mxu0 %v14257_v44  ;;  %v14329_v44 = vld [vmem:[%s18641_s9 + $0xd40] ss:$8 sps:$4 sm:$0xff]  }
 0x8af   : > { %10955 = vmatprep.subr.bf16.mxu0 %v14262_v25  ;;  %v14334_v25 = vld [vmem:[%s18641_s9 + $0xd54] ss:$8 sps:$4 sm:$0xff]  }
 0x8b2   : > { %10956 = vmatpush1.bf16.msra.mxu0 %v14260_v18  ;;  %v14332_v18 = vld [vmem:[%s18641_s9 + $0xd50] ss:$8 sps:$4 sm:$0xff]  }
 0x8b3   : > { %10957 = vmatprep.subr.bf16.mxu0 %v14265_v50  ;;  %v14337_v50 = vld [vmem:[%s18641_s9 + $0xd64] ss:$8 sps:$4 sm:$0xff]  }
 0x8b6   : > { %10958 = vmatpush1.bf16.msra.mxu0 %v14263_v14  ;;  %v14335_v14 = vld [vmem:[%s18641_s9 + $0xd60] ss:$8 sps:$4 sm:$0xff]  }
 0x8b7   : > { %10959 = vmatprep.subr.bf16.mxu0 %v14268_v43  ;;  %v14340_v43 = vld [vmem:[%s18641_s9 + $0xd74] ss:$8 sps:$4 sm:$0xff]  }
 0x8ba   : > { %10960 = vmatpush1.bf16.msra.mxu0 %v14266_v55  ;;  %v14338_v55 = vld [vmem:[%s18641_s9 + $0xd70] ss:$8 sps:$4 sm:$0xff]  }
 0x8bb   : > { %10970 = vmatprep.subr.bf16.mxu0 %v14271_v21  ;;  %v14341_v21 = vld [vmem:[%s18641_s9 + $0xd80] ss:$8 sps:$4 sm:$0xff]  }
 0x8bd   : > { %10962 = vmatmul.mubr.bf16.vlgmr.msra.gmra.mrb[24].mxu0 %v7384_v13  ;;  %v14344_v13 = vld [vmem:[%s18641_s9 + $0xd90] ss:$8 sps:$4 sm:$0xff]  }
 0x8be   : > { %10971 = vmatpush1.bf16.msra.mxu0 %v14269_v35  ;;  %11002 = vmatprep.mubr.bf16.mxu0 %v7387_v42  ;;  %v14346_v35 = vld [vmem:[%s18641_s9 + $0xd94] ss:$8 sps:$4 sm:$0xff]   ;;  %v14347_v42 = vld [vmem:[%s18641_s9 + $0xda0] ss:$8 sps:$4 sm:$0xff]  }
 0x8bf   : > { %10972 = vmatprep.subr.bf16.mxu0 %v14274_v16  ;;  %v14349_v16 = vld [vmem:[%s18641_s9 + $0xda4] ss:$8 sps:$4 sm:$0xff]  }
 0x8c2   : > { %10973 = vmatpush1.bf16.msra.mxu0 %v14272_v53  ;;  %v14352_v53 = vld [vmem:[%s18641_s9 + $0xdb4] ss:$8 sps:$4 sm:$0xff]  }
 0x8c3   : > { %10974 = vmatprep.subr.bf16.mxu0 %v14277_v28  ;;  %v14350_v28 = vld [vmem:[%s18641_s9 + $0xdb0] ss:$8 sps:$4 sm:$0xff]  }
 0x8c6   : > { %10975 = vmatpush1.bf16.msra.mxu0 %v14275_v10  ;;  %v14355_v10 = vld [vmem:[%s18641_s9 + $0xdc4] ss:$8 sps:$4 sm:$0xff]  }
 0x8c7   : > { %10976 = vmatprep.subr.bf16.mxu0 %v14280_v61  ;;  %v14353_v61 = vld [vmem:[%s18641_s9 + $0xdc0] ss:$8 sps:$4 sm:$0xff]  }
 0x8ca   : > { %10977 = vmatpush1.bf16.msra.mxu0 %v14278_v3  ;;  %v14358_v3 = vld [vmem:[%s18641_s9 + $0xdd4] ss:$8 sps:$4 sm:$0xff]  }
 0x8cb   : > { %10978 = vmatprep.subr.bf16.mxu0 %v14283_v63  ;;  %v14356_v63 = vld [vmem:[%s18641_s9 + $0xdd0] ss:$8 sps:$4 sm:$0xff]  }
 0x8ce   : > { %10979 = vmatpush1.bf16.msra.mxu0 %v14281_v11  ;;  %v14361_v11 = vld [vmem:[%s18641_s9 + $0xde4] ss:$8 sps:$4 sm:$0xff]  }
 0x8cf   : > { %10980 = vmatprep.subr.bf16.mxu0 %v14286_v30  ;;  %v14359_v30 = vld [vmem:[%s18641_s9 + $0xde0] ss:$8 sps:$4 sm:$0xff]  }
 0x8d2   : > { %10981 = vmatpush1.bf16.msra.mxu0 %v14284_v62  ;;  %v14364_v62 = vld [vmem:[%s18641_s9 + $0xdf4] ss:$8 sps:$4 sm:$0xff]  }
 0x8d3   : > { %10982 = vmatprep.subr.bf16.mxu0 %v14289_v6  ;;  %v14362_v6 = vld [vmem:[%s18641_s9 + $0xdf0] ss:$8 sps:$4 sm:$0xff]  }
 0x8d6   : > { %10983 = vmatpush1.bf16.msra.mxu0 %v14287_v33  ;;  %v7333_v33 = vrot.slane %v17255_v22, %v15569_v12  ;;  %v14461_v22 = vld [vmem:[%s18643_s11 + $0x40] sm:$0xff]  }
 0x8d7   : > { %10984 = vmatprep.subr.bf16.mxu0 %v14292_v48  ;;  %v14367_v48 = vld [vmem:[%s18641_s9 + $0xe04] ss:$8 sps:$4 sm:$0xff]   ;;  %12568 = vmatprep.subr.bf16.mxu1 %v14461_v22  ;;  %v14436_v22 = vld [vmem:[%s18641_s9 + $0xf74] ss:$8 sps:$4 sm:$0xff]  }
 0x8da   : > { %10985 = vmatpush1.bf16.msra.mxu0 %v14290_v40  ;;  %v14365_v40 = vld [vmem:[%s18641_s9 + $0xe00] ss:$8 sps:$4 sm:$0xff]  }
 0x8db   : > { %10986 = vmatprep.subr.bf16.mxu0 %v14295_v54  ;;  %v7388_v54 = vpack.c.bf16 %v7333_v33, %v7333_v33  ;;  %v14427_v33 = vld [vmem:[%s18641_s9 + $0xf44] ss:$8 sps:$4 sm:$0xff]  }
 0x8de   : > { %10987 = vmatpush1.bf16.msra.mxu0 %v14293_v32  ;;  %v14370_v32 = vld [vmem:[%s18641_s9 + $0xe14] ss:$8 sps:$4 sm:$0xff]  }
 0x8df   : > { %10988 = vmatprep.subr.bf16.mxu0 %v14298_v17  ;;  %v7391_v17 = vpack.c.bf16 %v17259_v52, %v17259_v52  ;;  %v14373_v52 = vld [vmem:[%s18641_s9 + $0xe24] ss:$8 sps:$4 sm:$0xff]  }
 0x8e2   : > { %10989 = vmatpush1.bf16.msra.mxu0 %v14296_v41  ;;  %v14462_v41 = vld [vmem:[%s18643_s11] sm:$0xff]  }
 0x8e3   : > { %10990 = vmatprep.subr.bf16.mxu0 %v14301_v58  ;;  %v14463_v58 = vld [vmem:[%s18643_s11 + $0x48] sm:$0xff]   ;;  %12569 = vmatpush3.bf16.msra.mxu1 %v14462_v41  ;;  %v14434_v41 = vld [vmem:[%s18641_s9 + $0xf70] ss:$8 sps:$4 sm:$0xff]  }
 0x8e4   : > { %12570 = vmatprep.subr.bf16.mxu1 %v14463_v58  ;;  %v14439_v58 = vld [vmem:[%s18641_s9 + $0xf84] ss:$8 sps:$4 sm:$0xff]  }
 0x8e6   : > { %10991 = vmatpush1.bf16.msra.mxu0 %v14299_v7  ;;  %v14368_v7 = vld [vmem:[%s18641_s9 + $0xe10] ss:$8 sps:$4 sm:$0xff]  }
 0x8e7   : > { %10992 = vmatprep.subr.bf16.mxu0 %v14304_v46  ;;  %v14464_v46 = vld [vmem:[%s18643_s11 + $0x8] sm:$0xff]  }
 0x8e8   : > { %12571 = vmatpush3.bf16.msra.mxu1 %v14464_v46  ;;  %v14440_v46 = vld [vmem:[%s18641_s9 + $0xf90] ss:$8 sps:$4 sm:$0xff]  }
 0x8ea   : > { %10993 = vmatpush1.bf16.msra.mxu0 %v14302_v39  ;;  %v14465_v39 = vld [vmem:[%s18643_s11 + $0x50] sm:$0xff]  }
 0x8eb   : > { %10994 = vmatprep.subr.bf16.mxu0 %v14307_v51  ;;  %v14371_v51 = vld [vmem:[%s18641_s9 + $0xe20] ss:$8 sps:$4 sm:$0xff]   ;;  %12572 = vmatprep.subr.bf16.mxu1 %v14465_v39  ;;  %v14445_v39 = vld [vmem:[%s18641_s9 + $0xfa4] ss:$8 sps:$4 sm:$0xff]  }
 0x8ee   : > { %10995 = vmatpush1.bf16.msra.mxu0 %v14305_v1  ;;  %v14376_v1 = vld [vmem:[%s18641_s9 + $0xe34] ss:$8 sps:$4 sm:$0xff]  }
 0x8ef   : > { %10996 = vmatprep.subr.bf16.mxu0 %v14310_v59  ;;  %v14466_v59 = vld [vmem:[%s18643_s11 + $0x10] sm:$0xff]  }
 0x8f0   : > { %12573 = vmatpush3.bf16.msra.mxu1 %v14466_v59  ;;  %v14446_v59 = vld [vmem:[%s18641_s9 + $0xfb0] ss:$8 sps:$4 sm:$0xff]  }
 0x8f2   : > { %10997 = vmatpush1.bf16.msra.mxu0 %v14308_v47  ;;  %v14467_v47 = vld [vmem:[%s18643_s11 + $0x58] sm:$0xff]  }
 0x8f3   : > { %10998 = vmatprep.subr.bf16.mxu0 %v14313_v20  ;;  %v14374_v20 = vld [vmem:[%s18641_s9 + $0xe30] ss:$8 sps:$4 sm:$0xff]   ;;  %12574 = vmatprep.subr.bf16.mxu1 %v14467_v47  ;;  %v14451_v47 = vld [vmem:[%s18641_s9 + $0xfc4] ss:$8 sps:$4 sm:$0xff]  }
 0x8f6   : > { %10999 = vmatpush1.bf16.msra.mxu0 %v14311_v60  ;;  %v14379_v60 = vld [vmem:[%s18641_s9 + $0xe44] ss:$8 sps:$4 sm:$0xff]  }
 0x8f7   : > { %11000 = vmatprep.subr.bf16.mxu0 %v14316_v38  ;;  %v14468_v38 = vld [vmem:[%s18643_s11 + $0x18] sm:$0xff]  }
 0x8f8   : > { %12575 = vmatpush3.bf16.msra.mxu1 %v14468_v38  ;;  %v14452_v38 = vld [vmem:[%s18641_s9 + $0xfd0] ss:$8 sps:$4 sm:$0xff]  }
 0x8fa   : > { %11001 = vmatpush1.bf16.msra.mxu0 %v14314_v27  ;;  %v14469_v27 = vld [vmem:[%s18643_s11 + $0x60] sm:$0xff]  }
 0x8fb   : > { %11011 = vmatprep.subr.bf16.mxu0 %v14319_v45  ;;  %v14382_v45 = vld [vmem:[%s18641_s9 + $0xe54] ss:$8 sps:$4 sm:$0xff]   ;;  %12576 = vmatprep.subr.bf16.mxu1 %v14469_v27  ;;  %v14457_v27 = vld [vmem:[%s18641_s9 + $0xfe4] ss:$8 sps:$4 sm:$0xff]  }
 0x8fd   : > { %11003 = vmatmul.mubr.bf16.vlgmr.msra.gmra.mrb[24].mxu0 %v7386_v19  ;;  %v14471_v19 = vld [vmem:[%s18643_s11 + $0x68] sm:$0xff]  }
 0x8fe   : > { %11012 = vmatpush1.bf16.msra.mxu0 %v14317_v57  ;;  %11043 = vmatprep.mubr.bf16.mxu0 %v7389_v31  ;;  %v14470_v57 = vld [vmem:[%s18643_s11 + $0x20] sm:$0xff]  }
 0x8ff   : > { %11013 = vmatprep.subr.bf16.mxu0 %v14322_v2  ;;  %v14380_v2 = vld [vmem:[%s18641_s9 + $0xe50] ss:$8 sps:$4 sm:$0xff]   ;;  %v14385_v31 = vld [vmem:[%s18641_s9 + $0xe64] ss:$8 sps:$4 sm:$0xff]   ;;  %12577 = vmatpush3.bf16.msra.mxu1 %v14470_v57 }
 0x900   : > { %12578 = vmatprep.subr.bf16.mxu1 %v14471_v19  ;;  %v14458_v57 = vld [vmem:[%s18641_s9 + $0xff0] ss:$8 sps:$4 sm:$0xff]   ;;  %v7355_v19 = vrot.slane %v17280_v37, %v15569_v12 }
 0x901   : > { %v14476_v37 = vld [vmem:[%s18643_s11 + $0x38] sm:$0xff]  }
 0x902   : > { %11014 = vmatpush1.bf16.msra.mxu0 %v14320_v5  ;;  %v14472_v5 = vld [vmem:[%s18643_s11 + $0x28] sm:$0xff]  }
 0x903   : > { %11015 = vmatprep.subr.bf16.mxu0 %v14325_v15  ;;  %v14383_v15 = vld [vmem:[%s18641_s9 + $0xe60] ss:$8 sps:$4 sm:$0xff]   ;;  %12579 = vmatpush3.bf16.msra.mxu1 %v14472_v5  ;;  %v14474_v5 = vld [vmem:[%s18643_s11 + $0x30] sm:$0xff]  }
 0x906   : > { %11016 = vmatpush1.bf16.msra.mxu0 %v14323_v9  ;;  %v14388_v9 = vld [vmem:[%s18641_s9 + $0xe74] ss:$8 sps:$4 sm:$0xff]  }
 0x907   : > { %11017 = vmatprep.subr.bf16.mxu0 %v14328_v49  ;;  %v14386_v49 = vld [vmem:[%s18641_s9 + $0xe70] ss:$8 sps:$4 sm:$0xff]  }
 0x90a   : > { %11018 = vmatpush1.bf16.msra.mxu0 %v14326_v34  ;;  %v14391_v34 = vld [vmem:[%s18641_s9 + $0xe84] ss:$8 sps:$4 sm:$0xff]  }
 0x90b   : > { %11019 = vmatprep.subr.bf16.mxu0 %v14331_v29  ;;  %v14389_v29 = vld [vmem:[%s18641_s9 + $0xe80] ss:$8 sps:$4 sm:$0xff]  }
 0x90e   : > { %11020 = vmatpush1.bf16.msra.mxu0 %v14329_v44  ;;  %v14394_v44 = vld [vmem:[%s18641_s9 + $0xe94] ss:$8 sps:$4 sm:$0xff]  }
 0x90f   : > { %11021 = vmatprep.subr.bf16.mxu0 %v14334_v25  ;;  %v14392_v25 = vld [vmem:[%s18641_s9 + $0xe90] ss:$8 sps:$4 sm:$0xff]  }
 0x912   : > { %11022 = vmatpush1.bf16.msra.mxu0 %v14332_v18  ;;  %v14397_v18 = vld [vmem:[%s18641_s9 + $0xea4] ss:$8 sps:$4 sm:$0xff]  }
 0x913   : > { %11023 = vmatprep.subr.bf16.mxu0 %v14337_v50  ;;  %v14395_v50 = vld [vmem:[%s18641_s9 + $0xea0] ss:$8 sps:$4 sm:$0xff]  }
 0x916   : > { %11024 = vmatpush1.bf16.msra.mxu0 %v14335_v14  ;;  %v14400_v14 = vld [vmem:[%s18641_s9 + $0xeb4] ss:$8 sps:$4 sm:$0xff]  }
 0x917   : > { %11025 = vmatprep.subr.bf16.mxu0 %v14340_v43  ;;  %v14398_v43 = vld [vmem:[%s18641_s9 + $0xeb0] ss:$8 sps:$4 sm:$0xff]  }
 0x91a   : > { %11026 = vmatpush1.bf16.msra.mxu0 %v14338_v55  ;;  %v14403_v55 = vld [vmem:[%s18641_s9 + $0xec4] ss:$8 sps:$4 sm:$0xff]  }
 0x91b   : > { %11027 = vmatprep.subr.bf16.mxu0 %v14343_v8  ;;  %v14401_v8 = vld [vmem:[%s18641_s9 + $0xec0] ss:$8 sps:$4 sm:$0xff]  }
 0x91e   : > { %11028 = vmatpush1.bf16.msra.mxu0 %v14341_v21  ;;  %v14406_v21 = vld [vmem:[%s18641_s9 + $0xed4] ss:$8 sps:$4 sm:$0xff]  }
 0x91f   : > { %11029 = vmatprep.subr.bf16.mxu0 %v14346_v35  ;;  %v14404_v35 = vld [vmem:[%s18641_s9 + $0xed0] ss:$8 sps:$4 sm:$0xff]  }
 0x922   : > { %11030 = vmatpush1.bf16.msra.mxu0 %v14344_v13  ;;  %v14409_v13 = vld [vmem:[%s18641_s9 + $0xee4] ss:$8 sps:$4 sm:$0xff]  }
 0x923   : > { %11031 = vmatprep.subr.bf16.mxu0 %v14349_v16  ;;  %v14407_v16 = vld [vmem:[%s18641_s9 + $0xee0] ss:$8 sps:$4 sm:$0xff]  }
 0x926   : > { %11032 = vmatpush1.bf16.msra.mxu0 %v14347_v42  ;;  %v14412_v42 = vld [vmem:[%s18641_s9 + $0xef4] ss:$8 sps:$4 sm:$0xff]  }
 0x927   : > { %11033 = vmatprep.subr.bf16.mxu0 %v14352_v53  ;;  %v14410_v53 = vld [vmem:[%s18641_s9 + $0xef0] ss:$8 sps:$4 sm:$0xff]  }
 0x92a   : > { %11034 = vmatpush1.bf16.msra.mxu0 %v14350_v28  ;;  %v7344_v28 = vrot.slane %v17246_v56, %v15569_v12  ;;  %v14416_v56 = vld [vmem:[%s18641_s9 + $0xf10] ss:$8 sps:$4 sm:$0xff]  }
 0x92b   : > { %11035 = vmatprep.subr.bf16.mxu0 %v14355_v10  ;;  %v14415_v10 = vld [vmem:[%s18641_s9 + $0xf04] ss:$8 sps:$4 sm:$0xff]  }
 0x92e   : > { %11036 = vmatpush1.bf16.msra.mxu0 %v14353_v61  ;;  %v14413_v61 = vld [vmem:[%s18641_s9 + $0xf00] ss:$8 sps:$4 sm:$0xff]  }
 0x92f   : > { %11037 = vmatprep.subr.bf16.mxu0 %v14358_v3  ;;  %v7390_v3 = vpack.c.bf16 %v7344_v28, %v7344_v28 }
 0x932   : > { %11038 = vmatpush1.bf16.msra.mxu0 %v14356_v63  ;;  %v14418_v63 = vld [vmem:[%s18641_s9 + $0xf14] ss:$8 sps:$4 sm:$0xff]  }
 0x933   : > { %11039 = vmatprep.subr.bf16.mxu0 %v14361_v11  ;;  %v7393_v11 = vpack.c.bf16 %v17293_v4, %v17293_v4  ;;  %v14424_v4 = vld [vmem:[%s18641_s9 + $0xf34] ss:$8 sps:$4 sm:$0xff]  }
 0x936   : > { %11040 = vmatpush1.bf16.msra.mxu0 %v14359_v30  ;;  %v14421_v30 = vld [vmem:[%s18641_s9 + $0xf24] ss:$8 sps:$4 sm:$0xff]  }
 0x937   : > { %11041 = vmatprep.subr.bf16.mxu0 %v14364_v62  ;;  %v14419_v62 = vld [vmem:[%s18641_s9 + $0xf20] ss:$8 sps:$4 sm:$0xff]  }
 0x93a   : > { %11042 = vmatpush1.bf16.msra.mxu0 %v14362_v6  ;;  %v14422_v6 = vld [vmem:[%s18641_s9 + $0xf30] ss:$8 sps:$4 sm:$0xff]  }
 0x93b   : > { %11052 = vmatprep.subr.bf16.mxu0 %v14367_v48  ;;  %v14425_v48 = vld [vmem:[%s18641_s9 + $0xf40] ss:$8 sps:$4 sm:$0xff]  }
 0x93d   : > { %11044 = vmatmul.mubr.bf16.vlgmr.msra.gmra.mrb[24].mxu0 %v7388_v54  ;;  %v14428_v54 = vld [vmem:[%s18641_s9 + $0xf50] ss:$8 sps:$4 sm:$0xff]  }
 0x93e   : > { %11053 = vmatpush1.bf16.msra.mxu0 %v14365_v40  ;;  %11084 = vmatprep.mubr.bf16.mxu0 %v7391_v17  ;;  %v14430_v40 = vld [vmem:[%s18641_s9 + $0xf54] ss:$8 sps:$4 sm:$0xff]   ;;  %v14431_v17 = vld [vmem:[%s18641_s9 + $0xf60] ss:$8 sps:$4 sm:$0xff]  }
 0x93f   : > { %11054 = vmatprep.subr.bf16.mxu0 %v14370_v32  ;;  %v14433_v32 = vld [vmem:[%s18641_s9 + $0xf64] ss:$8 sps:$4 sm:$0xff]  }
 0x942   : > { %11055 = vmatpush1.bf16.msra.mxu0 %v14368_v7  ;;  %v14437_v7 = vld [vmem:[%s18641_s9 + $0xf80] ss:$8 sps:$4 sm:$0xff]  }
 0x943   : > { %11056 = vmatprep.subr.bf16.mxu0 %v14373_v52  ;;  %v14442_v52 = vld [vmem:[%s18641_s9 + $0xf94] ss:$8 sps:$4 sm:$0xff]  }
 0x946   : > { %11057 = vmatpush1.bf16.msra.mxu0 %v14371_v51  ;;  %v14443_v51 = vld [vmem:[%s18641_s9 + $0xfa0] ss:$8 sps:$4 sm:$0xff]  }
 0x947   : > { %11058 = vmatprep.subr.bf16.mxu0 %v14376_v1  ;;  %v14448_v1 = vld [vmem:[%s18641_s9 + $0xfb4] ss:$8 sps:$4 sm:$0xff]  }
 0x94a   : > { %11059 = vmatpush1.bf16.msra.mxu0 %v14374_v20  ;;  %v14449_v20 = vld [vmem:[%s18641_s9 + $0xfc0] ss:$8 sps:$4 sm:$0xff]  }
 0x94b   : > { %11060 = vmatprep.subr.bf16.mxu0 %v14379_v60  ;;  %v14454_v60 = vld [vmem:[%s18641_s9 + $0xfd4] ss:$8 sps:$4 sm:$0xff]  }
 0x94e   : > { %11061 = vmatpush1.bf16.msra.mxu0 %v14377_v23  ;;  %v14455_v23 = vld [vmem:[%s18641_s9 + $0xfe0] ss:$8 sps:$4 sm:$0xff]  }
 0x94f   : > { %11062 = vmatprep.subr.bf16.mxu0 %v14382_v45  ;;  %v14460_v45 = vld [vmem:[%s18641_s9 + $0xff4] ss:$8 sps:$4 sm:$0xff]  }
 0x952   : > { %11063 = vmatpush1.bf16.msra.mxu0 %v14380_v2  ;;  %v7392_v2 = vpack.c.bf16 %v7355_v19, %v7355_v19 }
 0x953   : > { %11064 = vmatprep.subr.bf16.mxu0 %v14385_v31  ;;  %v14473_v31 = vld [vmem:[%s18643_s11 + $0x70] sm:$0xff]  }
 0x954   : > { %12580 = vmatprep.subr.bf16.mxu1 %v14473_v31 }
 0x955   : > { %12581 = vmatpush3.bf16.msra.mxu1 %v14474_v5 }
 0x956   : > { %11065 = vmatpush1.bf16.msra.mxu0 %v14383_v15  ;;  %v14475_v15 = vld [vmem:[%s18643_s11 + $0x78] sm:$0xff]  }
 0x957   : > { %11066 = vmatprep.subr.bf16.mxu0 %v14388_v9  ;;  %12582 = vmatprep.subr.bf16.mxu1 %v14475_v15  ;;  %v7906_v9 = vld [vmem:[%s18642_s10] sm:$0x3] }
 0x959   : > { %12583 = vmatpush3.bf16.msra.mxu1 %v14476_v37 }
 0x95a   : > { %11067 = vmatpush1.bf16.msra.mxu0 %v14386_v49  ;;  %v10471_v49 = vrot.slane %v7906_v9, %v15569_v12 }
 0x95b   : > { %11068 = vmatprep.subr.bf16.mxu0 %v14391_v34  ;;  %v10475_v34 = vrot.slane %v7906_v9, %v5745_v0 }
 0x95e   : > { %11069 = vmatpush1.bf16.msra.mxu0 %v14389_v29  ;;  %v12724_v29 = vadd.f32 %v18091_v26, %v10471_v49 }
 0x95f   : > { %11070 = vmatprep.subr.bf16.mxu0 %v14394_v44  ;;  %v12726_v44 = vadd.f32 %v18096_v24, %v10475_v34 }
 0x962   : > { %11071 = vmatpush1.bf16.msra.mxu0 %v14392_v25 }
 0x963   : > { %11072 = vmatprep.subr.bf16.mxu0 %v14397_v18 }
 0x966   : > { %11073 = vmatpush1.bf16.msra.mxu0 %v14395_v50 }
 0x967   : > { %11074 = vmatprep.subr.bf16.mxu0 %v14400_v14 }
 0x96a   : > { %11075 = vmatpush1.bf16.msra.mxu0 %v14398_v43 }
 0x96b   : > { %11076 = vmatprep.subr.bf16.mxu0 %v14403_v55 }
 0x96e   : > { %11077 = vmatpush1.bf16.msra.mxu0 %v14401_v8 }
 0x96f   : > { %11078 = vmatprep.subr.bf16.mxu0 %v14406_v21 }
 0x972   : > { %11079 = vmatpush1.bf16.msra.mxu0 %v14404_v35 }
 0x973   : > { %11080 = vmatprep.subr.bf16.mxu0 %v14409_v13 }
 0x976   : > { %11081 = vmatpush1.bf16.msra.mxu0 %v14407_v16 }
 0x977   : > { %11082 = vmatprep.subr.bf16.mxu0 %v14412_v42 }
 0x97a   : > { %11083 = vmatpush1.bf16.msra.mxu0 %v14410_v53 }
 0x97b   : > { %11093 = vmatprep.subr.bf16.mxu0 %v14415_v10 }
 0x97d   : > { %11085 = vmatmul.mubr.bf16.vlgmr.msra.gmra.mrb[24].mxu0 %v7390_v3 }
 0x97e   : > { %11094 = vmatpush1.bf16.msra.mxu0 %v14413_v61  ;;  %11125 = vmatprep.mubr.bf16.mxu0 %v7393_v11 }
 0x97f   : > { %11095 = vmatprep.subr.bf16.mxu0 %v14418_v63 }
 0x982   : > { %11096 = vmatpush1.bf16.msra.mxu0 %v14416_v56 }
 0x983   : > { %11097 = vmatprep.subr.bf16.mxu0 %v14421_v30 }
 0x986   : > { %11098 = vmatpush1.bf16.msra.mxu0 %v14419_v62 }
 0x987   : > { %11099 = vmatprep.subr.bf16.mxu0 %v14424_v4 }
 0x98a   : > { %11100 = vmatpush1.bf16.msra.mxu0 %v14422_v6 }
 0x98b   : > { %11101 = vmatprep.subr.bf16.mxu0 %v14427_v33 }
 0x98e   : > { %11102 = vmatpush1.bf16.msra.mxu0 %v14425_v48 }
 0x98f   : > { %11103 = vmatprep.subr.bf16.mxu0 %v14430_v40 }
 0x992   : > { %11104 = vmatpush1.bf16.msra.mxu0 %v14428_v54 }
 0x993   : > { %11105 = vmatprep.subr.bf16.mxu0 %v14433_v32 }
 0x996   : > { %11106 = vmatpush1.bf16.msra.mxu0 %v14431_v17 }
 0x997   : > { %11107 = vmatprep.subr.bf16.mxu0 %v14436_v22 }
 0x99a   : > { %11108 = vmatpush1.bf16.msra.mxu0 %v14434_v41 }
 0x99b   : > { %11109 = vmatprep.subr.bf16.mxu0 %v14439_v58 }
 0x99e   : > { %11110 = vmatpush1.bf16.msra.mxu0 %v14437_v7 }
 0x99f   : > { %11111 = vmatprep.subr.bf16.mxu0 %v14442_v52 }
 0x9a2   : > { %11112 = vmatpush1.bf16.msra.mxu0 %v14440_v46 }
 0x9a3   : > { %11113 = vmatprep.subr.bf16.mxu0 %v14445_v39 }
 0x9a6   : > { %11114 = vmatpush1.bf16.msra.mxu0 %v14443_v51 }
 0x9a7   : > { %11115 = vmatprep.subr.bf16.mxu0 %v14448_v1 }
 0x9aa   : > { %11116 = vmatpush1.bf16.msra.mxu0 %v14446_v59 }
 0x9ab   : > { %11117 = vmatprep.subr.bf16.mxu0 %v14451_v47 }
 0x9ae   : > { %11118 = vmatpush1.bf16.msra.mxu0 %v14449_v20 }
 0x9af   : > { %11119 = vmatprep.subr.bf16.mxu0 %v14454_v60 }
 0x9b2   : > { %11120 = vmatpush1.bf16.msra.mxu0 %v14452_v38 }
 0x9b3   : > { %11121 = vmatprep.subr.bf16.mxu0 %v14457_v27 }
 0x9b6   : > { %11122 = vmatpush1.bf16.msra.mxu0 %v14455_v23 }
 0x9b7   : > { %11123 = vmatprep.subr.bf16.mxu0 %v14460_v45 }
 0x9ba   : > { %11124 = vmatpush1.bf16.msra.mxu0 %v14458_v57 }
 0x9bd   : > { %11126 = vmatmul.mubr.bf16.vlgmr.msra.gmra.mrb[24].mxu0 %v7392_v2 }
 0xa90   : > { %v11127_v25 = vpop.f32.mrb[24].mxu0 }
 0xa91   : > { %v12725_v18 = vadd.f32 %v12724_v29, %v11127_v25  ;;  %v11129_v50 = vpop.f32.mrb[25].mxu0 }
 0xa92   : > { %v12727_v14 = vadd.f32 %v12726_v44, %v11129_v50  ;;  %v11131_v43 = vpop.f32.mrb[26].mxu0 }
 0xa93   : > { %v11134_v55 = vmax.f32 %v12725_v18, 0.0  ;;  %v11132_v8 = vpop.f32.mrb[27].mxu0 }
 0xa94   : > { %v11135_v21 = vmax.f32 %v12727_v14, 0.0 }
 0xa95   : > { %v11136_v13 = vpack.c.bf16 %v11134_v55, %v11134_v55 }
 0xa96   : > { %v11137_v35 = vpack.c.bf16 %v11135_v21, %v11135_v21 }
 0xa98   : > { %11299 = vmatprep.mubr.bf16.mxu1 %v11137_v35 }
 0xa99   : > { %11300 = vmatmul.mubr.bf16.vlgmr.msra.gmra.mrb[164].mxu1 %v11136_v13 }
 0xb6c   : > { %v12584_v12 = vpop.f32.mrb[164].mxu1 }
 0xb6d   : > { %v12585_v0 = vpop.f32.mrb[165].mxu1 }
 0xb6e   : > { %v12586_v16 = vadd.f32 %v12585_v0, %v12584_v12  ;;  %v12587_v26 = vpop.f32.mrb[166].mxu1 }
 0xb6f   : > { %v12588_v42 = vpop.f32.mrb[167].mxu1 }
 0xb70   : > { %v11302_v24 = vadd.f32 %v12586_v16, %v11170_v36 }
 0xb72   : > { %v11307_v53 = vsub.f32 0.0, %v11302_v24 }
 0xb74   : > { %v11308_v28 = vmul.f32 1.442695, %v11307_v53 }
 0xb76   : > { %14477 = vpow2.f32 %v11308_v28 }
 0xb80   : > { %v14478_v10 = vpop.eup %14477 }
 0xb81   : > { %v11310_v61 = vadd.f32 1.0, %v14478_v10 }
 0xb83   : > { %14479 = vrcp.f32 %v11310_v61 }
 0xb8d   : > { %v14480_v3 = vpop.eup %14479 }
 0xb8e   : > { %11314 = vst.msk [vmem:[%s438_s29] sm:$0x1] %vm11313_vm2, %v14480_v3 }
 0xb8f PF: > { %s25_s27 = sadd.s32 1, %s14491_s27  }
 0xb90   : > { %p22_p4 = scmp.ge.s32.totalorder %s25_s27, 4  }
 0xb92   :  { %24 = sbr.rel (!%p22_p4) target bundleno = 3 (0x3), region = 111 }

</bundles_post_ra>
